<compile_context>
chip_gen: v6e
topology: v6e:2x2x1
jax: 0.10.0
libtpu: 0.0.40
codegen_flags: <defaults>
</compile_context>

<pallas_src>
import jax
import jax.numpy as jnp
import numpy as np
from jax.experimental import pallas as pl
from jax.experimental.pallas import tpu as pltpu


# ---------------- Pallas kernel (fully fused forward) ----------------

def aux_fused_kernel(x_ref, m_ref, scale_ref, shift_ref,
                     w1_ref, b1_ref, w2_ref, b2_ref, o_ref):
    # AvgPool2d(5,3) + 1x1 conv folded into one matmul; result already in (s*128 + o) order.
    feats = jnp.dot(x_ref[...], m_ref[...],
                    preferred_element_type=jnp.float32)           # (BN, 2048) f32
    feats = feats * scale_ref[...] + shift_ref[...]               # conv bias + eval-BN folded
    feats = jnp.clip(feats, 0.0, 6.0)                             # ReLU6
    h = jnp.dot(feats.astype(jnp.bfloat16), w1_ref[...],
                preferred_element_type=jnp.float32) + b1_ref[...]  # Linear 2048->1024
    h = jnp.clip(h, 0.0, 6.0)                                     # ReLU6
    # TODO(synk): Dropout(p=0.7) is identity in eval mode; train-mode stochastic dropout
    #             (pltpu.prng_random_bits mask) is intentionally not implemented here.
    o_ref[...] = jnp.dot(h.astype(jnp.bfloat16), w2_ref[...],
                         preferred_element_type=jnp.float32) + b2_ref[...]   # Linear 1024->out_pad


# ---------------- one-time parameter folding (input independent) ----------------

def _build_pool_matrix(H, W, k=5, s=3):
    """(Ho*Wo, H*W) matrix implementing AvgPool2d(kernel=k, stride=s), floor/VALID."""
    Ho, Wo = (H - k) // s + 1, (W - k) // s + 1
    P = np.zeros((Ho * Wo, H * W), dtype=np.float32)
    inv = 1.0 / (k * k)
    for ph in range(Ho):
        for pw in range(Wo):
            for dh in range(k):
                for dw in range(k):
                    P[ph * Wo + pw, (ph * s + dh) * W + (pw * s + dw)] = inv
    return P, Ho, Wo


def prepare_kernel_params(params, Cin, H, W):
    """Fold weights once (NOT per forward call) into kernel-ready, bf16, lane-dense tensors."""
    P, Ho, Wo = _build_pool_matrix(H, W)
    S = Ho * Wo
    assert S == 16, "InceptionAux expects a 4x4 spatial map after AvgPool2d(5, 3)"
    HW = H * W

    # Fold avgpool + 1x1 conv into a single weight:
    #   M[c*HW + hw, s*128 + o] = P[s, hw] * conv_w[o, c]
    # so feats = x_nchw.reshape(N, Cin*HW) @ M is already in the (s*128 + o) flatten order.
    # TODO(synk): for large Cin (e.g. 768) this fused weight inflates FLOPs/VMEM ~HW/S-fold;
    #             switch to a pool-then-conv split (per-channel pool matmul + channel matmul).
    wc = params["conv_w"][:, :, 0, 0]                                    # (128, Cin)
    M = jnp.einsum("sh,oc->chso", jnp.asarray(P), wc).reshape(Cin * HW, S * 128)

    # Fold conv bias + eval-mode BatchNorm into per-channel scale/shift, tiled to (s*128 + o).
    eps = 1e-5
    scale = params["bn_gamma"] / jnp.sqrt(params["bn_var"] + eps)        # (128,)
    shift = (params["conv_b"] - params["bn_mean"]) * scale + params["bn_beta"]
    scale_t = jnp.tile(scale, S).reshape(1, S * 128)
    shift_t = jnp.tile(shift, S).reshape(1, S * 128)

    # Permute Linear1: PyTorch flatten order of the conv output is (o*16 + s); ours is (s*128 + o).
    W1 = params["W1"]                                                    # (1024, 2048)
    w1p = jnp.transpose(W1.reshape(1024, 128, S), (2, 1, 0)).reshape(S * 128, 1024)
    b1 = params["b1"].reshape(1, 1024)

    # Pad Linear2 columns to a multiple of 128 for a lane-dense output tile.
    out_dim = params["W2"].shape[0]
    out_pad = max(128, ((out_dim + 127) // 128) * 128)
    w2 = jnp.zeros((1024, out_pad), jnp.float32).at[:, :out_dim].set(params["W2"].T)
    b2 = jnp.zeros((1, out_pad), jnp.float32).at[:, :out_dim].set(params["b2"].reshape(1, -1))

    return {
        "M": M.astype(jnp.bfloat16),
        "scale": scale_t.astype(jnp.float32),
        "shift": shift_t.astype(jnp.float32),
        "w1": w1p.astype(jnp.bfloat16),
        "b1": b1.astype(jnp.float32),
        "w2": w2.astype(jnp.bfloat16),
        "b2": b2.astype(jnp.float32),
        "out_dim": out_dim,
    }


# ---------------- forward wrapper ----------------

def inception_aux_forward(x_nchw, kp):
    N, Cin, H, W = x_nchw.shape
    K1 = Cin * H * W
    F = kp["M"].shape[1]                      # 16 * 128 = 2048
    out_pad = kp["w2"].shape[1]
    out_dim = kp["out_dim"]

    # Row-block the batch: multiples of 8 sublanes, up to 128 rows per grid step.
    BN = min(128, ((N + 7) // 8) * 8)
    N_pad = ((N + BN - 1) // BN) * BN
    grid = (N_pad // BN,)

    x_flat = x_nchw.reshape(N, K1).astype(jnp.bfloat16)      # natural NCHW flatten, no transpose
    if N_pad != N:
        x_flat = jnp.pad(x_flat, ((0, N_pad - N), (0, 0)))

    const = lambda i: (0, 0)                                 # weights resident across grid steps
    out = pl.pallas_call(
        aux_fused_kernel,
        out_shape=jax.ShapeDtypeStruct((N_pad, out_pad), jnp.float32),
        grid=grid,
        in_specs=[
            pl.BlockSpec((BN, K1), lambda i: (i, 0)),        # activations: streamed per block
            pl.BlockSpec((K1, F), const),                    # fused pool+conv weight (bf16)
            pl.BlockSpec((1, F), const),                     # BN scale (f32)
            pl.BlockSpec((1, F), const),                     # BN shift + conv bias (f32)
            pl.BlockSpec((F, 1024), const),                  # Linear1 weight (bf16)
            pl.BlockSpec((1, 1024), const),                  # Linear1 bias (f32)
            pl.BlockSpec((1024, out_pad), const),            # Linear2 weight, lane-padded (bf16)
            pl.BlockSpec((1, out_pad), const),               # Linear2 bias, lane-padded (f32)
        ],
        out_specs=pl.BlockSpec((BN, out_pad), lambda i: (i, 0)),
        compiler_params=pltpu.CompilerParams(
            dimension_semantics=("parallel",),
            vmem_limit_bytes=48 * 1024 * 1024,
        ),
    )(x_flat, kp["M"], kp["scale"], kp["shift"], kp["w1"], kp["b1"], kp["w2"], kp["b2"])

    return out[:N, :out_dim]


# ---------------- pure-JAX f32 reference (for correctness check) ----------------

def reference_forward(x, p):
    xs = jax.lax.reduce_window(x, 0.0, jax.lax.add,
                               (1, 1, 5, 5), (1, 1, 3, 3), "VALID") / 25.0
    y = jnp.einsum("nchw,oc->nohw", xs, p["conv_w"][:, :, 0, 0]) \
        + p["conv_b"][None, :, None, None]
    scale = p["bn_gamma"] / jnp.sqrt(p["bn_var"] + 1e-5)
    y = (y - p["bn_mean"][None, :, None, None]) * scale[None, :, None, None] \
        + p["bn_beta"][None, :, None, None]
    y = jnp.clip(y, 0.0, 6.0)
    f = y.reshape(y.shape[0], -1)                    # PyTorch (o*16 + s) flatten order
    h = jnp.clip(f @ p["W1"].T + p["b1"], 0.0, 6.0)
    return h @ p["W2"].T + p["b2"]


# ---------------- deterministic parameter init ----------------

def init_params(in_channels, out_channels, key):
    ks = jax.random.split(key, 10)
    f32 = jnp.float32
    return {
        "conv_w":  (0.1 * jax.random.normal(ks[0], (128, in_channels, 1, 1))).astype(f32),
        "conv_b":  (0.1 * jax.random.normal(ks[1], (128,))).astype(f32),
        "bn_gamma": (1.0 + 0.1 * jax.random.normal(ks[2], (128,))).astype(f32),
        "bn_beta": (0.1 * jax.random.normal(ks[3], (128,))).astype(f32),
        "bn_mean": (0.1 * jax.random.normal(ks[4], (128,))).astype(f32),
        "bn_var":  (1.0 + 0.1 * jnp.abs(jax.random.normal(ks[5], (128,)))).astype(f32),
        "W1": (0.02 * jax.random.normal(ks[6], (1024, 128 * 4 * 4))).astype(f32),
        "b1": (0.1 * jax.random.normal(ks[7], (1024,))).astype(f32),
        "W2": (0.02 * jax.random.normal(ks[8], (out_channels, 1024))).astype(f32),
        "b2": (0.1 * jax.random.normal(ks[9], (out_channels,))).astype(f32),
    }


if __name__ == "__main__":
    key = jax.random.PRNGKey(0)
    k_x, k_p = jax.random.split(key)

    # Linear1 expects 128*4*4 features -> AvgPool2d(5,3) must yield 4x4 -> 16x16 input works
    # ((16-5)//3 + 1 = 4), matching PyTorch's floor-mode pooling.
    N, Cin, H, W, OUT = 2, 4, 16, 16, 10
    x = jax.random.normal(k_x, (N, Cin, H, W), dtype=jnp.float32)
    params = init_params(Cin, OUT, k_p)

    kparams = prepare_kernel_params(params, Cin, H, W)   # one-time weight folding
    out = inception_aux_forward(x, kparams)
    out = jax.block_until_ready(out)

    ref = jax.block_until_ready(reference_forward(x, params))
    # bf16 matmul operands (f32 accumulation) -> relaxed tolerance vs the f32 reference.
    np.testing.assert_allclose(np.asarray(out), np.asarray(ref), rtol=2e-2, atol=2e-2)

    print("KERNEL_OK")
</pallas_src>

<mosaic_0001>
module attributes {stable_mosaic.version = 11 : i64} {
  func.func @aux_fused_kernel(%arg0: i32, %arg1: memref<8x1024xbf16, #tpu.memory_space<vmem>>, %arg2: memref<1024x2048xbf16, #tpu.memory_space<vmem>>, %arg3: memref<1x2048xf32, #tpu.memory_space<vmem>>, %arg4: memref<1x2048xf32, #tpu.memory_space<vmem>>, %arg5: memref<2048x1024xbf16, #tpu.memory_space<vmem>>, %arg6: memref<1x1024xf32, #tpu.memory_space<vmem>>, %arg7: memref<1024x128xbf16, #tpu.memory_space<vmem>>, %arg8: memref<1x128xf32, #tpu.memory_space<vmem>>, %arg9: memref<8x128xf32, #tpu.memory_space<vmem>>) attributes {dimension_semantics = [#tpu.dimension_semantics<parallel>], iteration_bounds = array<i64: 1>, scalar_prefetch = 0 : i64, scratch_operands = 0 : i64, tpu.core_type = #tpu.core_type<tc>, window_params = [{transform_indices = @transform_0, window_bounds = array<i64: 8, 1024>}, {pipeline_mode = #tpu.pipeline_mode<synchronous>, transform_indices = @transform_1, window_bounds = array<i64: 1024, 2048>}, {pipeline_mode = #tpu.pipeline_mode<synchronous>, transform_indices = @transform_2, window_bounds = array<i64: 1, 2048>}, {pipeline_mode = #tpu.pipeline_mode<synchronous>, transform_indices = @transform_3, window_bounds = array<i64: 1, 2048>}, {pipeline_mode = #tpu.pipeline_mode<synchronous>, transform_indices = @transform_4, window_bounds = array<i64: 2048, 1024>}, {pipeline_mode = #tpu.pipeline_mode<synchronous>, transform_indices = @transform_5, window_bounds = array<i64: 1, 1024>}, {pipeline_mode = #tpu.pipeline_mode<synchronous>, transform_indices = @transform_6, window_bounds = array<i64: 1024, 128>}, {pipeline_mode = #tpu.pipeline_mode<synchronous>, transform_indices = @transform_7, window_bounds = array<i64: 1, 128>}, {transform_indices = @transform_8, window_bounds = array<i64: 8, 128>}]} {
    %c0 = arith.constant 0 : index
    %c0_0 = arith.constant 0 : index
    %0 = vector.load %arg1[%c0, %c0_0] : memref<8x1024xbf16, #tpu.memory_space<vmem>>, vector<8x1024xbf16>
    %c0_1 = arith.constant 0 : index
    %c0_2 = arith.constant 0 : index
    %1 = vector.load %arg2[%c0_1, %c0_2] : memref<1024x2048xbf16, #tpu.memory_space<vmem>>, vector<1024x2048xbf16>
    %cst = arith.constant dense<0.000000e+00> : vector<8x2048xf32>
    %2 = tpu.matmul %0, %1, %cst {dimension_numbers = #tpu.dot_dimension_numbers<[1], [0], [0], [1], [0, 0, 1, 1], [], []>} : vector<8x1024xbf16>, vector<1024x2048xbf16>, vector<8x2048xf32> -> vector<8x2048xf32>
    %c0_3 = arith.constant 0 : index
    %c0_4 = arith.constant 0 : index
    %3 = vector.load %arg3[%c0_3, %c0_4] : memref<1x2048xf32, #tpu.memory_space<vmem>>, vector<1x2048xf32>
    %4 = vector.broadcast %3 : vector<1x2048xf32> to vector<8x2048xf32>
    %5 = arith.mulf %2, %4 : vector<8x2048xf32>
    %c0_5 = arith.constant 0 : index
    %c0_6 = arith.constant 0 : index
    %6 = vector.load %arg4[%c0_5, %c0_6] : memref<1x2048xf32, #tpu.memory_space<vmem>>, vector<1x2048xf32>
    %7 = vector.broadcast %6 : vector<1x2048xf32> to vector<8x2048xf32>
    %8 = arith.addf %5, %7 : vector<8x2048xf32>
    %cst_7 = arith.constant 0.000000e+00 : f32
    %cst_8 = arith.constant 6.000000e+00 : f32
    %9 = vector.broadcast %cst_7 : f32 to vector<8x2048xf32>
    %10 = arith.maximumf %9, %8 : vector<8x2048xf32>
    %11 = vector.broadcast %cst_8 : f32 to vector<8x2048xf32>
    %12 = arith.minimumf %11, %10 : vector<8x2048xf32>
    %13 = arith.truncf %12 : vector<8x2048xf32> to vector<8x2048xbf16>
    %c0_9 = arith.constant 0 : index
    %c0_10 = arith.constant 0 : index
    %14 = vector.load %arg5[%c0_9, %c0_10] : memref<2048x1024xbf16, #tpu.memory_space<vmem>>, vector<2048x1024xbf16>
    %cst_11 = arith.constant dense<0.000000e+00> : vector<8x1024xf32>
    %15 = tpu.matmul %13, %14, %cst_11 {dimension_numbers = #tpu.dot_dimension_numbers<[1], [0], [0], [1], [0, 0, 1, 1], [], []>} : vector<8x2048xbf16>, vector<2048x1024xbf16>, vector<8x1024xf32> -> vector<8x1024xf32>
    %c0_12 = arith.constant 0 : index
    %c0_13 = arith.constant 0 : index
    %16 = vector.load %arg6[%c0_12, %c0_13] : memref<1x1024xf32, #tpu.memory_space<vmem>>, vector<1x1024xf32>
    %17 = vector.broadcast %16 : vector<1x1024xf32> to vector<8x1024xf32>
    %18 = arith.addf %15, %17 : vector<8x1024xf32>
    %cst_14 = arith.constant 0.000000e+00 : f32
    %cst_15 = arith.constant 6.000000e+00 : f32
    %19 = vector.broadcast %cst_14 : f32 to vector<8x1024xf32>
    %20 = arith.maximumf %19, %18 : vector<8x1024xf32>
    %21 = vector.broadcast %cst_15 : f32 to vector<8x1024xf32>
    %22 = arith.minimumf %21, %20 : vector<8x1024xf32>
    %23 = arith.truncf %22 : vector<8x1024xf32> to vector<8x1024xbf16>
    %c0_16 = arith.constant 0 : index
    %c0_17 = arith.constant 0 : index
    %24 = vector.load %arg7[%c0_16, %c0_17] : memref<1024x128xbf16, #tpu.memory_space<vmem>>, vector<1024x128xbf16>
    %cst_18 = arith.constant dense<0.000000e+00> : vector<8x128xf32>
    %25 = tpu.matmul %23, %24, %cst_18 {dimension_numbers = #tpu.dot_dimension_numbers<[1], [0], [0], [1], [0, 0, 1, 1], [], []>} : vector<8x1024xbf16>, vector<1024x128xbf16>, vector<8x128xf32> -> vector<8x128xf32>
    %c0_19 = arith.constant 0 : index
    %c0_20 = arith.constant 0 : index
    %26 = vector.load %arg8[%c0_19, %c0_20] : memref<1x128xf32, #tpu.memory_space<vmem>>, vector<1x128xf32>
    %27 = vector.broadcast %26 : vector<1x128xf32> to vector<8x128xf32>
    %28 = arith.addf %25, %27 : vector<8x128xf32>
    %c0_21 = arith.constant 0 : index
    %c0_22 = arith.constant 0 : index
    %29 = vector.load %arg9[%c0_21, %c0_22] : memref<8x128xf32, #tpu.memory_space<vmem>>, vector<8x128xf32>
    tpu.vector_store %arg9[%c0_21, %c0_22], %28 {strides = array<i32>} : memref<8x128xf32, #tpu.memory_space<vmem>>, vector<8x128xf32>,
    return
  }
  func.func @transform_0(%arg0: i32) -> (i32, i32) {
    %c0_i32 = arith.constant 0 : i32
    %c0_i32_0 = arith.constant 0 : i32
    return %arg0, %c0_i32 : i32, i32
  }
  func.func @transform_1(%arg0: i32) -> (i32, i32) {
    %c0_i32 = arith.constant 0 : i32
    %c0_i32_0 = arith.constant 0 : i32
    %c0_i32_1 = arith.constant 0 : i32
    return %c0_i32, %c0_i32_0 : i32, i32
  }
  func.func @transform_2(%arg0: i32) -> (i32, i32) {
    %c0_i32 = arith.constant 0 : i32
    %c0_i32_0 = arith.constant 0 : i32
    %c0_i32_1 = arith.constant 0 : i32
    return %c0_i32, %c0_i32_0 : i32, i32
  }
  func.func @transform_3(%arg0: i32) -> (i32, i32) {
    %c0_i32 = arith.constant 0 : i32
    %c0_i32_0 = arith.constant 0 : i32
    %c0_i32_1 = arith.constant 0 : i32
    return %c0_i32, %c0_i32_0 : i32, i32
  }
  func.func @transform_4(%arg0: i32) -> (i32, i32) {
    %c0_i32 = arith.constant 0 : i32
    %c0_i32_0 = arith.constant 0 : i32
    %c0_i32_1 = arith.constant 0 : i32
    return %c0_i32, %c0_i32_0 : i32, i32
  }
  func.func @transform_5(%arg0: i32) -> (i32, i32) {
    %c0_i32 = arith.constant 0 : i32
    %c0_i32_0 = arith.constant 0 : i32
    %c0_i32_1 = arith.constant 0 : i32
    return %c0_i32, %c0_i32_0 : i32, i32
  }
  func.func @transform_6(%arg0: i32) -> (i32, i32) {
    %c0_i32 = arith.constant 0 : i32
    %c0_i32_0 = arith.constant 0 : i32
    %c0_i32_1 = arith.constant 0 : i32
    return %c0_i32, %c0_i32_0 : i32, i32
  }
  func.func @transform_7(%arg0: i32) -> (i32, i32) {
    %c0_i32 = arith.constant 0 : i32
    %c0_i32_0 = arith.constant 0 : i32
    %c0_i32_1 = arith.constant 0 : i32
    return %c0_i32, %c0_i32_0 : i32, i32
  }
  func.func @transform_8(%arg0: i32) -> (i32, i32) {
    %c0_i32 = arith.constant 0 : i32
    %c0_i32_0 = arith.constant 0 : i32
    return %arg0, %c0_i32 : i32, i32
  }
}

</mosaic_0001>

<bundles_post_ra>
// kernel: tpu_custom_call.1
= control target key start
LH: loop header
LB: loop body
LE: loop exit
PB: predicated region body
PF: predicated region fallthrough
CT: control target
= control target key end

     0   :  { %13 = vsyncpa [#allocation3], 0  ;;  %s19149_s0 = inlined_call_operand.hbm [shape: bf16[8,1024], index: 0, kind: input, shape index: {}]   ;;  %s19150_s1 = inlined_call_operand.hbm [shape: bf16[1024,2048], index: 1, kind: input, shape index: {}]   ;;  %s19151_s2 = inlined_call_operand.hbm [shape: f32[1,2048], index: 2, kind: input, shape index: {}]   ;;  %s19152_s3 = inlined_call_operand.hbm [shape: f32[1,2048], index: 3, kind: input, shape index: {}]   ;;  %s19153_s4 = inlined_call_operand.hbm [shape: bf16[2048,1024], index: 4, kind: input, shape index: {}]   ;;  %s19154_s5 = inlined_call_operand.hbm [shape: f32[1,1024], index: 5, kind: input, shape index: {}]   ;;  %s19155_s6 = inlined_call_operand.hbm [shape: bf16[1024,128], index: 6, kind: input, shape index: {}]   ;;  %s19156_s7 = inlined_call_operand.hbm [shape: f32[1,128], index: 7, kind: input, shape index: {}]   ;;  %s19157_s8 = inlined_call_operand.hbm [shape: f32[8,128], index: 8, kind: output, shape index: {}]  }
   0x1   :  { %14 = vsyncpa [#allocation6], 0 }
   0x2   :  { %15 = vsyncpa [#allocation9], 0 }
   0x3   :  { %16 = vsyncpa [#allocation12], 0 }
   0x4   :  { %17 = vsyncpa [#allocation15], 0 }
   0x5   :  { %18 = vsyncpa [#allocation4], 0  ;;  %s18577_s27 = smov [#allocation5]  }
   0x6   :  { %s34_s28 = sshll.u32 %s18577_s27, 4  ;;  %s35_s28 = int_to_ptr.vmem [resolvable:$true] %s34_s28 }
   0x7   :  { %s18393_s29 = scalar_lea.vmem %s35_s28, 131072  ;;  %p18398_p1 = scmp.lt.s32.totalorder %s35_s28, %s35_s28 }
   0x8   :  { %p18394_p0 = scmp.ne.s32.totalorder %s35_s28, %s18393_s29  ;;  %p18399_p2 = scmp.lt.s32.totalorder %s18393_s29, %s18393_s29 }
   0xa   :  { %p18400_p3 = por %p18399_p2, %p18398_p1 }
   0xc   :  { %p18401_p4 = pnand %p18400_p3, %p18394_p0 }
   0xe   :  { %18404 = shalt.err (!%p18401_p4)
}
   0xf   :  { %s18578_s30 = smov 1024   ;;  %s18579_s9 = smov 64  }
  0x10   :  { %40 = dma.hbm_to_vmem [thread:$0]  %s19150_s1, 131072, %s35_s28, [#allocation6], %s18578_s30, %s18578_s30, %s18579_s9  }
  0x11   :  { %s18580_s12 = smov [#allocation8]   ;;  %s18581_s14 = smov [#allocation11]  }
  0x12   :  { %s57_s13 = sshll.u32 %s18580_s12, 4  ;;  %s79_s15 = sshll.u32 %s18581_s14, 4  ;;  %s58_s13 = int_to_ptr.vmem [resolvable:$true] %s57_s13  ;;  %s80_s15 = int_to_ptr.vmem [resolvable:$true] %s79_s15 }
  0x13   :  { %s18413_s16 = scalar_lea.vmem %s58_s13, 256  ;;  %p18418_p6 = scmp.lt.s32.totalorder %s58_s13, %s58_s13 }
  0x14   :  { %p18414_p5 = scmp.ne.s32.totalorder %s58_s13, %s18413_s16  ;;  %p18419_p7 = scmp.lt.s32.totalorder %s18413_s16, %s18413_s16 }
  0x16   :  { %p18420_p8 = por %p18419_p7, %p18418_p6 }
  0x18   :  { %p18421_p9 = pnand %p18420_p8, %p18414_p5 }
  0x1a   :  { %18424 = shalt.err (!%p18421_p9)
}
  0x1b   :  { %60 = dma.hbm_to_vmem [thread:$0]  %s19152_s3, 256, %s58_s13, [#allocation9]  }
  0x1c   :  { %s18433_s19 = scalar_lea.vmem %s80_s15, 128  ;;  %p18438_p11 = scmp.lt.s32.totalorder %s80_s15, %s80_s15 }
  0x1d   :  { %p18434_p10 = scmp.ne.s32.totalorder %s80_s15, %s18433_s19  ;;  %p18439_p12 = scmp.lt.s32.totalorder %s18433_s19, %s18433_s19 }
  0x1f   :  { %p18440_p13 = por %p18439_p12, %p18438_p11 }
  0x21   :  { %p18441_p0 = pnand %p18440_p13, %p18434_p10 }
  0x23   :  { %18444 = shalt.err (!%p18441_p0)
}
  0x24   :  { %82 = dma.hbm_to_vmem [thread:$0]  %s19154_s5, 128, %s80_s15, [#allocation12]  }
  0x25   :  { %s18582_s21 = smov [#allocation2]   ;;  %s18583_s23 = smov [#allocation7]  }
  0x26   :  { %s25_s22 = sshll.u32 %s18582_s21, 4  ;;  %s47_s24 = sshll.u32 %s18583_s23, 4  ;;  %s26_s22 = int_to_ptr.vmem [resolvable:$true] %s25_s22  ;;  %s48_s24 = int_to_ptr.vmem [resolvable:$true] %s47_s24 }
  0x27   :  { %s18453_s25 = scalar_lea.vmem %s26_s22, 512  ;;  %p18458_p2 = scmp.lt.s32.totalorder %s26_s22, %s26_s22 }
  0x28   :  { %p18454_p1 = scmp.ne.s32.totalorder %s26_s22, %s18453_s25  ;;  %p18459_p3 = scmp.lt.s32.totalorder %s18453_s25, %s18453_s25 }
  0x2a   :  { %p18460_p4 = por %p18459_p3, %p18458_p2 }
  0x2c   :  { %p18461_p5 = pnand %p18460_p4, %p18454_p1 }
  0x2e   :  { %18464 = shalt.err (!%p18461_p5)
}
  0x2f   :  { %28 = dma.hbm_to_vmem [thread:$0]  %s19149_s0, 512, %s26_s22, [#allocation3]  }
  0x30   :  { %s18473_s27 = scalar_lea.vmem %s48_s24, 256  ;;  %p18478_p7 = scmp.lt.s32.totalorder %s48_s24, %s48_s24 }
  0x31   :  { %p18474_p6 = scmp.ne.s32.totalorder %s48_s24, %s18473_s27  ;;  %p18479_p8 = scmp.lt.s32.totalorder %s18473_s27, %s18473_s27 }
  0x33   :  { %p18480_p9 = por %p18479_p8, %p18478_p7 }
  0x35   :  { %p18481_p10 = pnand %p18480_p9, %p18474_p6 }
  0x37   :  { %18484 = shalt.err (!%p18481_p10)
}
  0x38   :  { %50 = dma.hbm_to_vmem [thread:$0]  %s19151_s2, 256, %s48_s24, [#allocation6]  }
  0x39   :  { %s18584_s29 = smov [#allocation10]  }
  0x3a   :  { %s66_s30 = sshll.u32 %s18584_s29, 4  ;;  %s67_s30 = int_to_ptr.vmem [resolvable:$true] %s66_s30 }
  0x3b   :  { %s18493_s10 = scalar_lea.vmem %s67_s30, 131072  ;;  %p18498_p12 = scmp.lt.s32.totalorder %s67_s30, %s67_s30 }
  0x3c   :  { %p18494_p11 = scmp.ne.s32.totalorder %s67_s30, %s18493_s10  ;;  %p18499_p13 = scmp.lt.s32.totalorder %s18493_s10, %s18493_s10 }
  0x3e   :  { %p18500_p0 = por %p18499_p13, %p18498_p12 }
  0x40   :  { %p18501_p1 = pnand %p18500_p0, %p18494_p11 }
  0x42   :  { %18504 = shalt.err (!%p18501_p1)
}
  0x43   :  { %s18585_s0 = smov 512   ;;  %s18586_s11 = smov 32  }
  0x44   :  { %72 = dma.hbm_to_vmem [thread:$0]  %s19153_s4, 131072, %s67_s30, [#allocation9], %s18585_s0, %s18585_s0, %s18586_s11  }
  0x45   :  { %s18587_s14 = smov [#allocation13]   ;;  %s18588_s2 = smov [#allocation14]  }
  0x46   :  { %s88_s15 = sshll.u32 %s18587_s14, 4  ;;  %s101_s16 = sshll.u32 %s18588_s2, 4  ;;  %s89_s15 = int_to_ptr.vmem [resolvable:$true] %s88_s15  ;;  %s102_s16 = int_to_ptr.vmem [resolvable:$true] %s101_s16 }
  0x47   :  { %s18513_s17 = scalar_lea.vmem %s89_s15, 8192  ;;  %p18518_p3 = scmp.lt.s32.totalorder %s89_s15, %s89_s15 }
  0x48   :  { %p18514_p2 = scmp.ne.s32.totalorder %s89_s15, %s18513_s17  ;;  %p18519_p4 = scmp.lt.s32.totalorder %s18513_s17, %s18513_s17 }
  0x4a   :  { %p18520_p5 = por %p18519_p4, %p18518_p3 }
  0x4c   :  { %p18521_p6 = pnand %p18520_p5, %p18514_p2 }
  0x4e   :  { %18524 = shalt.err (!%p18521_p6)
}
  0x4f   :  { %s18589_s18 = smov 4   ;;  %s18533_s4 = scalar_lea.vmem %s102_s16, 16 }
  0x50   :  { %94 = dma.hbm_to_vmem [thread:$0]  %s19155_s6, 8192, %s89_s15, [#allocation12], %s18579_s9, %s18579_s9, %s18589_s18  }
  0x51   :  { %p18534_p7 = scmp.ne.s32.totalorder %s102_s16, %s18533_s4  ;;  %s18537_s20 = scalar_lea.vmem %s102_s16, 32 }
  0x52   :  { %p18538_p8 = scmp.lt.s32.totalorder %s102_s16, %s102_s16  ;;  %p18539_p9 = scmp.lt.s32.totalorder %s18537_s20, %s18533_s4 }
  0x54   :  { %p18540_p10 = por %p18539_p9, %p18538_p8 }
  0x56   :  { %p18541_p11 = pnand %p18540_p10, %p18534_p7 }
  0x58   :  { %18544 = shalt.err (!%p18541_p11)
}
  0x59   :  { %104 = dma.hbm_to_vmem [thread:$0]  %s19156_s7, 16, %s102_s16, [#allocation15]  }
  0x5a   :  { %18565 = dma.done.wait [#allocation3], 512  }
  0x5b   :  { %18566 = vsyncadd [#allocation3], 4294966784 }
  0x5c   :  { %18567 = dma.done.wait [#allocation6], 131328  }
  0x5d   :  { %18568 = vsyncadd [#allocation6], 4294835968 }
  0x5e   :  { %18569 = dma.done.wait [#allocation9], 131328  }
  0x5f   :  { %18570 = vsyncadd [#allocation9], 4294835968 }
  0x60   :  { %18571 = dma.done.wait [#allocation12], 8320  }
  0x61   :  { %18572 = vsyncadd [#allocation12], 4294958976 }
  0x62   :  { %18573 = dma.done.wait [#allocation15], 16  }
  0x63   :  { %18574 = vsyncadd [#allocation15], 4294967280  ;;  %v246_v0 = vld [vmem:[#allocation5 + $0x380] sm:$0xff]  ;;  %v18665_v54 = vld [vmem:[#allocation2 + $0x8] sm:$0xff]  ;;  %s18590_s6 = smov [#allocation16]  }
  0x64   :  { %v254_v1 = vld [vmem:[#allocation5 + $0x3c0] sm:$0xff]  ;;  %v18673_v59 = vcombine.high %v18665_v54, %v18665_v54  ;;  %s16074_s7 = sshll.u32 %s18590_s6, 4  ;;  %s16075_s7 = int_to_ptr.vmem [resolvable:$true] %s16074_s7 }
  0x65   :  { %v502_v2 = vld [vmem:[#allocation5 + $0xb80] sm:$0xff]  ;;  %v16208_v3 = vcombine.high %v246_v0, %v254_v1  ;;  %v16207_v5 = vcombine.low %v246_v0, %v254_v1  ;;  %s18545_s9 = scalar_lea.vmem %s16075_s7, 128  ;;  %p18550_p13 = scmp.lt.s32.totalorder %s16075_s7, %s16075_s7 }
  0x66   :  { %v510_v4 = vld [vmem:[#allocation5 + $0xbc0] sm:$0xff]  ;;  %6379 = vmatprep.mubr.bf16.mxu1 %v18673_v59  ;;  %p18546_p12 = scmp.ne.s32.totalorder %s16075_s7, %s18545_s9  ;;  %p18551_p0 = scmp.lt.s32.totalorder %s18545_s9, %s18545_s9 }
  0x67   :  { %v230_v6 = vld [vmem:[#allocation5 + $0x300] sm:$0xff]  ;;  %v16464_v8 = vcombine.high %v502_v2, %v510_v4  ;;  %v16463_v9 = vcombine.low %v502_v2, %v510_v4  ;;  %6306 = vmatprep.subr.bf16.mxu0 %v16208_v3 }
  0x68   :  { %v238_v7 = vld [vmem:[#allocation5 + $0x340] sm:$0xff]  ;;  %6307 = vmatpush1.bf16.msra.mxu0 %v16207_v5  ;;  %p18552_p1 = por %p18551_p0, %p18550_p13 }
  0x69   :  { %v16192_v10 = vcombine.high %v230_v6, %v238_v7  ;;  %v486_v11 = vld [vmem:[#allocation5 + $0xb00] sm:$0xff]  ;;  %6347 = vmatprep.subr.bf16.mxu1 %v16464_v8  ;;  %v16191_v18 = vcombine.low %v230_v6, %v238_v7 }
  0x6a   :  { %v494_v12 = vld [vmem:[#allocation5 + $0xb40] sm:$0xff]  ;;  %6348 = vmatpush1.bf16.msra.mxu1 %v16463_v9  ;;  %p18553_p2 = pnand %p18552_p1, %p18546_p12 }
  0x6b   :  { %v214_v13 = vld [vmem:[#allocation5 + $0x280] sm:$0xff]  ;;  %v16448_v14 = vcombine.high %v486_v11, %v494_v12  ;;  %6308 = vmatprep.subr.bf16.mxu0 %v16192_v10  ;;  %v16447_v19 = vcombine.low %v486_v11, %v494_v12 }
  0x6c   :  { %v222_v15 = vld [vmem:[#allocation5 + $0x2c0] sm:$0xff]  ;;  %6309 = vmatpush1.bf16.msra.mxu0 %v16191_v18 }
  0x6d   :  { %v470_v16 = vld [vmem:[#allocation5 + $0xa80] sm:$0xff]  ;;  %v16176_v20 = vcombine.high %v214_v13, %v222_v15  ;;  %6349 = vmatprep.subr.bf16.mxu1 %v16448_v14  ;;  %v16175_v26 = vcombine.low %v214_v13, %v222_v15 }
  0x6e   :  { %v478_v17 = vld [vmem:[#allocation5 + $0xac0] sm:$0xff]  ;;  %6350 = vmatpush1.bf16.msra.mxu1 %v16447_v19 }
  0x6f   :  { %v16432_v21 = vcombine.high %v470_v16, %v478_v17  ;;  %v198_v22 = vld [vmem:[#allocation5 + $0x200] sm:$0xff]  ;;  %6310 = vmatprep.subr.bf16.mxu0 %v16176_v20  ;;  %v16431_v27 = vcombine.low %v470_v16, %v478_v17 }
  0x70   :  { %v206_v23 = vld [vmem:[#allocation5 + $0x240] sm:$0xff]  ;;  %6311 = vmatpush1.bf16.msra.mxu0 %v16175_v26 }
  0x71   :  { %v454_v24 = vld [vmem:[#allocation5 + $0xa00] sm:$0xff]  ;;  %v16160_v28 = vcombine.high %v198_v22, %v206_v23  ;;  %6351 = vmatprep.subr.bf16.mxu1 %v16432_v21  ;;  %v16159_v34 = vcombine.low %v198_v22, %v206_v23 }
  0x72   :  { %v462_v25 = vld [vmem:[#allocation5 + $0xa40] sm:$0xff]  ;;  %6352 = vmatpush1.bf16.msra.mxu1 %v16431_v27 }
  0x73   :  { %v16416_v29 = vcombine.high %v454_v24, %v462_v25  ;;  %v182_v30 = vld [vmem:[#allocation5 + $0x180] sm:$0xff]  ;;  %6312 = vmatprep.subr.bf16.mxu0 %v16160_v28  ;;  %v16415_v35 = vcombine.low %v454_v24, %v462_v25 }
  0x74   :  { %v190_v31 = vld [vmem:[#allocation5 + $0x1c0] sm:$0xff]  ;;  %6313 = vmatpush1.bf16.msra.mxu0 %v16159_v34 }
  0x75   :  { %v438_v32 = vld [vmem:[#allocation5 + $0x980] sm:$0xff]  ;;  %v16144_v36 = vcombine.high %v182_v30, %v190_v31  ;;  %6353 = vmatprep.subr.bf16.mxu1 %v16416_v29  ;;  %v16143_v42 = vcombine.low %v182_v30, %v190_v31 }
  0x76   :  { %v446_v33 = vld [vmem:[#allocation5 + $0x9c0] sm:$0xff]  ;;  %6354 = vmatpush1.bf16.msra.mxu1 %v16415_v35 }
  0x77   :  { %v16400_v37 = vcombine.high %v438_v32, %v446_v33  ;;  %v166_v38 = vld [vmem:[#allocation5 + $0x100] sm:$0xff]  ;;  %6314 = vmatprep.subr.bf16.mxu0 %v16144_v36  ;;  %v16399_v43 = vcombine.low %v438_v32, %v446_v33 }
  0x78   :  { %v174_v39 = vld [vmem:[#allocation5 + $0x140] sm:$0xff]  ;;  %6315 = vmatpush1.bf16.msra.mxu0 %v16143_v42 }
  0x79   :  { %v422_v40 = vld [vmem:[#allocation5 + $0x900] sm:$0xff]  ;;  %v16128_v44 = vcombine.high %v166_v38, %v174_v39  ;;  %6355 = vmatprep.subr.bf16.mxu1 %v16400_v37  ;;  %v16127_v50 = vcombine.low %v166_v38, %v174_v39 }
  0x7a   :  { %v430_v41 = vld [vmem:[#allocation5 + $0x940] sm:$0xff]  ;;  %6356 = vmatpush1.bf16.msra.mxu1 %v16399_v43 }
  0x7b   :  { %v16384_v45 = vcombine.high %v422_v40, %v430_v41  ;;  %v150_v46 = vld [vmem:[#allocation5 + $0x80] sm:$0xff]  ;;  %6316 = vmatprep.subr.bf16.mxu0 %v16128_v44  ;;  %v16383_v51 = vcombine.low %v422_v40, %v430_v41 }
  0x7c   :  { %v158_v47 = vld [vmem:[#allocation5 + $0xc0] sm:$0xff]  ;;  %6317 = vmatpush1.bf16.msra.mxu0 %v16127_v50 }
  0x7d   :  { %v406_v48 = vld [vmem:[#allocation5 + $0x880] sm:$0xff]  ;;  %v16112_v52 = vcombine.high %v150_v46, %v158_v47  ;;  %6357 = vmatprep.subr.bf16.mxu1 %v16384_v45  ;;  %v16111_v62 = vcombine.low %v150_v46, %v158_v47 }
  0x7e   :  { %v414_v49 = vld [vmem:[#allocation5 + $0x8c0] sm:$0xff]  ;;  %6358 = vmatpush1.bf16.msra.mxu1 %v16383_v51 }
  0x7f   :  { %v18663_v53 = vld [vmem:[#allocation2] sm:$0xff]  ;;  %v16368_v55 = vcombine.high %v406_v48, %v414_v49  ;;  %6318 = vmatprep.subr.bf16.mxu0 %v16112_v52  ;;  %v16367_v63 = vcombine.low %v406_v48, %v414_v49 }
  0x80   :  { %v134_v56 = vld [vmem:[#allocation5] sm:$0xff]  ;;  %v18669_v58 = vcombine.high %v18663_v53, %v18663_v53  ;;  %6319 = vmatpush1.bf16.msra.mxu0 %v16111_v62 }
  0x81   :  { %v142_v57 = vld [vmem:[#allocation5 + $0x40] sm:$0xff]  ;;  %6359 = vmatprep.subr.bf16.mxu1 %v16368_v55 }
  0x82   :  { %v390_v60 = vld [vmem:[#allocation5 + $0x800] sm:$0xff]  ;;  %6338 = vmatprep.mubr.bf16.mxu0 %v18669_v58  ;;  %v16096_v0 = vcombine.high %v134_v56, %v142_v57  ;;  %v16095_v6 = vcombine.low %v134_v56, %v142_v57  ;;  %6360 = vmatpush1.bf16.msra.mxu1 %v16367_v63 }
  0x83   :  { %v398_v61 = vld [vmem:[#allocation5 + $0x840] sm:$0xff] }
  0x84   :  { %v16352_v1 = vcombine.high %v390_v60, %v398_v61  ;;  %v374_v2 = vld [vmem:[#allocation5 + $0x780] sm:$0xff]  ;;  %6320 = vmatprep.subr.bf16.mxu0 %v16096_v0  ;;  %v16351_v7 = vcombine.low %v390_v60, %v398_v61 }
  0x85   :  { %v382_v3 = vld [vmem:[#allocation5 + $0x7c0] sm:$0xff]  ;;  %6321 = vmatpush1.bf16.msra.mxu0 %v16095_v6 }
  0x86   :  { %v630_v4 = vld [vmem:[#allocation5 + $0xf80] sm:$0xff]  ;;  %v16336_v8 = vcombine.high %v374_v2, %v382_v3  ;;  %6361 = vmatprep.subr.bf16.mxu1 %v16352_v1  ;;  %v16335_v14 = vcombine.low %v374_v2, %v382_v3 }
  0x87   :  { %v638_v5 = vld [vmem:[#allocation5 + $0xfc0] sm:$0xff]  ;;  %6362 = vmatpush1.bf16.msra.mxu1 %v16351_v7 }
  0x88   :  { %v16592_v9 = vcombine.high %v630_v4, %v638_v5  ;;  %v358_v10 = vld [vmem:[#allocation5 + $0x700] sm:$0xff]  ;;  %6322 = vmatprep.subr.bf16.mxu0 %v16336_v8  ;;  %v16591_v15 = vcombine.low %v630_v4, %v638_v5 }
  0x89   :  { %v366_v11 = vld [vmem:[#allocation5 + $0x740] sm:$0xff]  ;;  %6323 = vmatpush2.bf16.msra.mxu0 %v16335_v14 }
  0x8a   :  { %v614_v12 = vld [vmem:[#allocation5 + $0xf00] sm:$0xff]  ;;  %v16320_v16 = vcombine.high %v358_v10, %v366_v11  ;;  %6363 = vmatprep.subr.bf16.mxu1 %v16592_v9  ;;  %v16319_v22 = vcombine.low %v358_v10, %v366_v11 }
  0x8b   :  { %v622_v13 = vld [vmem:[#allocation5 + $0xf40] sm:$0xff]  ;;  %6364 = vmatpush2.bf16.msra.mxu1 %v16591_v15 }
  0x8c   :  { %v16576_v17 = vcombine.high %v614_v12, %v622_v13  ;;  %v342_v18 = vld [vmem:[#allocation5 + $0x680] sm:$0xff]  ;;  %6324 = vmatprep.subr.bf16.mxu0 %v16320_v16  ;;  %v16575_v23 = vcombine.low %v614_v12, %v622_v13  ;;  %v18679_v16 = vcombine.low %v18663_v53, %v18663_v53 }
  0x8d   :  { %v350_v19 = vld [vmem:[#allocation5 + $0x6c0] sm:$0xff]  ;;  %6325 = vmatpush2.bf16.msra.mxu0 %v16319_v22  ;;  %v18687_v22 = vld [vmem:[#allocation2 + $0x18] sm:$0xff] }
  0x8e   :  { %v598_v20 = vld [vmem:[#allocation5 + $0xe80] sm:$0xff]  ;;  %v16304_v24 = vcombine.high %v342_v18, %v350_v19  ;;  %6365 = vmatprep.subr.bf16.mxu1 %v16576_v17  ;;  %v16303_v30 = vcombine.low %v342_v18, %v350_v19  ;;  %v18681_v19 = vld [vmem:[#allocation2 + $0x10] sm:$0xff] }
  0x8f   :  { %v606_v21 = vld [vmem:[#allocation5 + $0xec0] sm:$0xff]  ;;  %6366 = vmatpush2.bf16.msra.mxu1 %v16575_v23 }
  0x90   :  { %v16560_v25 = vcombine.high %v598_v20, %v606_v21  ;;  %v326_v26 = vld [vmem:[#allocation5 + $0x600] sm:$0xff]  ;;  %6326 = vmatprep.subr.bf16.mxu0 %v16304_v24  ;;  %v16559_v31 = vcombine.low %v598_v20, %v606_v21  ;;  %v18685_v20 = vcombine.low %v18665_v54, %v18665_v54  ;;  %v18696_v54 = vcombine.high %v18687_v22, %v18687_v22 }
  0x91   :  { %v334_v27 = vld [vmem:[#allocation5 + $0x640] sm:$0xff]  ;;  %6327 = vmatpush2.bf16.msra.mxu0 %v16303_v30 }
  0x92   :  { %v582_v28 = vld [vmem:[#allocation5 + $0xe00] sm:$0xff]  ;;  %v16288_v32 = vcombine.high %v326_v26, %v334_v27  ;;  %6367 = vmatprep.subr.bf16.mxu1 %v16560_v25  ;;  %v16287_v38 = vcombine.low %v326_v26, %v334_v27 }
  0x93   :  { %v590_v29 = vld [vmem:[#allocation5 + $0xe40] sm:$0xff]  ;;  %6368 = vmatpush2.bf16.msra.mxu1 %v16559_v31 }
  0x94   :  { %v16544_v33 = vcombine.high %v582_v28, %v590_v29  ;;  %v310_v34 = vld [vmem:[#allocation5 + $0x580] sm:$0xff]  ;;  %6328 = vmatprep.subr.bf16.mxu0 %v16288_v32  ;;  %v16543_v39 = vcombine.low %v582_v28, %v590_v29  ;;  %v18691_v29 = vcombine.high %v18681_v19, %v18681_v19 }
  0x95   :  { %v318_v35 = vld [vmem:[#allocation5 + $0x5c0] sm:$0xff]  ;;  %6329 = vmatpush2.bf16.msra.mxu0 %v16287_v38 }
  0x96   :  { %v566_v36 = vld [vmem:[#allocation5 + $0xd80] sm:$0xff]  ;;  %v16272_v40 = vcombine.high %v310_v34, %v318_v35  ;;  %6369 = vmatprep.subr.bf16.mxu1 %v16544_v33  ;;  %v16271_v46 = vcombine.low %v310_v34, %v318_v35 }
  0x97   :  { %v574_v37 = vld [vmem:[#allocation5 + $0xdc0] sm:$0xff]  ;;  %6370 = vmatpush2.bf16.msra.mxu1 %v16543_v39 }
  0x98   :  { %v16528_v41 = vcombine.high %v566_v36, %v574_v37  ;;  %v294_v42 = vld [vmem:[#allocation5 + $0x500] sm:$0xff]  ;;  %6330 = vmatprep.subr.bf16.mxu0 %v16272_v40  ;;  %v16527_v47 = vcombine.low %v566_v36, %v574_v37 }
  0x99   :  { %v302_v43 = vld [vmem:[#allocation5 + $0x540] sm:$0xff]  ;;  %6331 = vmatpush2.bf16.msra.mxu0 %v16271_v46 }
  0x9a   :  { %v550_v44 = vld [vmem:[#allocation5 + $0xd00] sm:$0xff]  ;;  %v16256_v48 = vcombine.high %v294_v42, %v302_v43  ;;  %6371 = vmatprep.subr.bf16.mxu1 %v16528_v41  ;;  %v16255_v56 = vcombine.low %v294_v42, %v302_v43 }
  0x9b   :  { %v558_v45 = vld [vmem:[#allocation5 + $0xd40] sm:$0xff]  ;;  %6372 = vmatpush2.bf16.msra.mxu1 %v16527_v47 }
  0x9c   :  { %v16512_v49 = vcombine.high %v550_v44, %v558_v45  ;;  %v278_v50 = vld [vmem:[#allocation5 + $0x480] sm:$0xff]  ;;  %6332 = vmatprep.subr.bf16.mxu0 %v16256_v48  ;;  %v16511_v57 = vcombine.low %v550_v44, %v558_v45 }
  0x9d   :  { %v286_v51 = vld [vmem:[#allocation5 + $0x4c0] sm:$0xff]  ;;  %6333 = vmatpush2.bf16.msra.mxu0 %v16255_v56 }
  0x9e   :  { %v534_v52 = vld [vmem:[#allocation5 + $0xc80] sm:$0xff]  ;;  %v16240_v60 = vcombine.high %v278_v50, %v286_v51  ;;  %6373 = vmatprep.subr.bf16.mxu1 %v16512_v49  ;;  %v16239_v2 = vcombine.low %v278_v50, %v286_v51 }
  0x9f   :  { %v542_v55 = vld [vmem:[#allocation5 + $0xcc0] sm:$0xff]  ;;  %6374 = vmatpush2.bf16.msra.mxu1 %v16511_v57 }
  0xa0   :  { %v16496_v61 = vcombine.high %v534_v52, %v542_v55  ;;  %v262_v62 = vld [vmem:[#allocation5 + $0x400] sm:$0xff]  ;;  %6334 = vmatprep.subr.bf16.mxu0 %v16240_v60  ;;  %v16495_v3 = vcombine.low %v534_v52, %v542_v55 }
  0xa1   :  { %v270_v63 = vld [vmem:[#allocation5 + $0x440] sm:$0xff]  ;;  %6335 = vmatpush2.bf16.msra.mxu0 %v16239_v2 }
  0xa2   :  { %v518_v0 = vld [vmem:[#allocation5 + $0xc00] sm:$0xff]  ;;  %v16224_v4 = vcombine.high %v262_v62, %v270_v63  ;;  %6375 = vmatprep.subr.bf16.mxu1 %v16496_v61  ;;  %v16223_v10 = vcombine.low %v262_v62, %v270_v63 }
  0xa3   :  { %v526_v1 = vld [vmem:[#allocation5 + $0xc40] sm:$0xff]  ;;  %6376 = vmatpush2.bf16.msra.mxu1 %v16495_v3 }
  0xa4   :  { %v16480_v5 = vcombine.high %v518_v0, %v526_v1  ;;  %v758_v6 = vld [vmem:[#allocation5 + $0x1380] sm:$0xff]  ;;  %6336 = vmatprep.subr.bf16.mxu0 %v16224_v4  ;;  %v16479_v11 = vcombine.low %v518_v0, %v526_v1 }
  0xa5   :  { %v766_v7 = vld [vmem:[#allocation5 + $0x13c0] sm:$0xff]  ;;  %6337 = vmatpush2.bf16.msra.mxu0 %v16223_v10 }
  0xa6   :  { %v1014_v8 = vld [vmem:[#allocation5 + $0x1b80] sm:$0xff]  ;;  %v16720_v12 = vcombine.high %v758_v6, %v766_v7  ;;  %6377 = vmatprep.subr.bf16.mxu1 %v16480_v5  ;;  %v16719_v21 = vcombine.low %v758_v6, %v766_v7 }
  0xa7   :  { %v1022_v9 = vld [vmem:[#allocation5 + $0x1bc0] sm:$0xff]  ;;  %6378 = vmatpush2.bf16.msra.mxu1 %v16479_v11 }
  0xa8   :  { %v16976_v13 = vcombine.high %v1014_v8, %v1022_v9  ;;  %v742_v14 = vld [vmem:[#allocation5 + $0x1300] sm:$0xff]  ;;  %6388 = vmatprep.subr.bf16.mxu0 %v16720_v12  ;;  %v16975_v23 = vcombine.low %v1014_v8, %v1022_v9  ;;  %6339 = vmatmul.mubr.bf16.vlgmr.msra.gmra.mxu0 %v18679_v16 }
  0xa9   :  { %v750_v15 = vld [vmem:[#allocation5 + $0x1340] sm:$0xff]  ;;  %6389 = vmatpush1.bf16.msra.mxu0 %v16719_v21  ;;  %6420 = vmatprep.mubr.bf16.mxu0 %v18691_v29 }
  0xaa   :  { %v998_v17 = vld [vmem:[#allocation5 + $0x1b00] sm:$0xff]  ;;  %v16704_v24 = vcombine.high %v742_v14, %v750_v15  ;;  %6429 = vmatprep.subr.bf16.mxu1 %v16976_v13  ;;  %6380 = vmatmul.mubr.bf16.vlgmr.msra.gmra.mxu1 %v18685_v20  ;;  %v16703_v30 = vcombine.low %v742_v14, %v750_v15 }
  0xab   :  { %v1006_v18 = vld [vmem:[#allocation5 + $0x1b40] sm:$0xff]  ;;  %6430 = vmatpush1.bf16.msra.mxu1 %v16975_v23  ;;  %6461 = vmatprep.mubr.bf16.mxu1 %v18696_v54 }
  0xac   :  { %v726_v25 = vld [vmem:[#allocation5 + $0x1280] sm:$0xff]  ;;  %v16960_v53 = vcombine.high %v998_v17, %v1006_v18  ;;  %6390 = vmatprep.subr.bf16.mxu0 %v16704_v24  ;;  %v16959_v31 = vcombine.low %v998_v17, %v1006_v18 }
  0xad   :  { %v734_v26 = vld [vmem:[#allocation5 + $0x12c0] sm:$0xff]  ;;  %6391 = vmatpush1.bf16.msra.mxu0 %v16703_v30 }
  0xae   :  { %v982_v27 = vld [vmem:[#allocation5 + $0x1a80] sm:$0xff]  ;;  %v16688_v32 = vcombine.high %v726_v25, %v734_v26  ;;  %6431 = vmatprep.subr.bf16.mxu1 %v16960_v53  ;;  %v16687_v38 = vcombine.low %v726_v25, %v734_v26 }
  0xaf   :  { %v990_v28 = vld [vmem:[#allocation5 + $0x1ac0] sm:$0xff]  ;;  %6432 = vmatpush1.bf16.msra.mxu1 %v16959_v31 }
  0xb0   :  { %v710_v33 = vld [vmem:[#allocation5 + $0x1200] sm:$0xff]  ;;  %v16944_v36 = vcombine.high %v982_v27, %v990_v28  ;;  %6392 = vmatprep.subr.bf16.mxu0 %v16688_v32  ;;  %v16943_v39 = vcombine.low %v982_v27, %v990_v28 }
  0xb1   :  { %v718_v34 = vld [vmem:[#allocation5 + $0x1240] sm:$0xff]  ;;  %6393 = vmatpush1.bf16.msra.mxu0 %v16687_v38 }
  0xb2   :  { %v966_v35 = vld [vmem:[#allocation5 + $0x1a00] sm:$0xff]  ;;  %v16672_v40 = vcombine.high %v710_v33, %v718_v34  ;;  %6433 = vmatprep.subr.bf16.mxu1 %v16944_v36  ;;  %v16671_v46 = vcombine.low %v710_v33, %v718_v34 }
  0xb3   :  { %v974_v37 = vld [vmem:[#allocation5 + $0x1a40] sm:$0xff]  ;;  %6434 = vmatpush1.bf16.msra.mxu1 %v16943_v39 }
  0xb4   :  { %v694_v41 = vld [vmem:[#allocation5 + $0x1180] sm:$0xff]  ;;  %v16928_v44 = vcombine.high %v966_v35, %v974_v37  ;;  %6394 = vmatprep.subr.bf16.mxu0 %v16672_v40  ;;  %v16927_v47 = vcombine.low %v966_v35, %v974_v37 }
  0xb5   :  { %v702_v42 = vld [vmem:[#allocation5 + $0x11c0] sm:$0xff]  ;;  %6395 = vmatpush1.bf16.msra.mxu0 %v16671_v46 }
  0xb6   :  { %v950_v43 = vld [vmem:[#allocation5 + $0x1980] sm:$0xff]  ;;  %v16656_v48 = vcombine.high %v694_v41, %v702_v42  ;;  %6435 = vmatprep.subr.bf16.mxu1 %v16928_v44  ;;  %v16655_v56 = vcombine.low %v694_v41, %v702_v42 }
  0xb7   :  { %v958_v45 = vld [vmem:[#allocation5 + $0x19c0] sm:$0xff]  ;;  %6436 = vmatpush1.bf16.msra.mxu1 %v16927_v47 }
  0xb8   :  { %v678_v49 = vld [vmem:[#allocation5 + $0x1100] sm:$0xff]  ;;  %v16912_v52 = vcombine.high %v950_v43, %v958_v45  ;;  %6396 = vmatprep.subr.bf16.mxu0 %v16656_v48  ;;  %v16911_v57 = vcombine.low %v950_v43, %v958_v45 }
  0xb9   :  { %v686_v50 = vld [vmem:[#allocation5 + $0x1140] sm:$0xff]  ;;  %6397 = vmatpush1.bf16.msra.mxu0 %v16655_v56 }
  0xba   :  { %v934_v51 = vld [vmem:[#allocation5 + $0x1900] sm:$0xff]  ;;  %v16640_v60 = vcombine.high %v678_v49, %v686_v50  ;;  %6437 = vmatprep.subr.bf16.mxu1 %v16912_v52  ;;  %v16639_v2 = vcombine.low %v678_v49, %v686_v50 }
  0xbb   :  { %v942_v55 = vld [vmem:[#allocation5 + $0x1940] sm:$0xff]  ;;  %6438 = vmatpush1.bf16.msra.mxu1 %v16911_v57 }
  0xbc   :  { %v662_v61 = vld [vmem:[#allocation5 + $0x1080] sm:$0xff]  ;;  %v16896_v0 = vcombine.high %v934_v51, %v942_v55  ;;  %6398 = vmatprep.subr.bf16.mxu0 %v16640_v60  ;;  %v16895_v3 = vcombine.low %v934_v51, %v942_v55 }
  0xbd   :  { %v670_v62 = vld [vmem:[#allocation5 + $0x10c0] sm:$0xff]  ;;  %6399 = vmatpush1.bf16.msra.mxu0 %v16639_v2 }
  0xbe   :  { %v918_v63 = vld [vmem:[#allocation5 + $0x1880] sm:$0xff]  ;;  %v16624_v4 = vcombine.high %v662_v61, %v670_v62  ;;  %6439 = vmatprep.subr.bf16.mxu1 %v16896_v0  ;;  %v16623_v10 = vcombine.low %v662_v61, %v670_v62 }
  0xbf   :  { %v926_v1 = vld [vmem:[#allocation5 + $0x18c0] sm:$0xff]  ;;  %6440 = vmatpush1.bf16.msra.mxu1 %v16895_v3 }
  0xc0   :  { %v646_v5 = vld [vmem:[#allocation5 + $0x1000] sm:$0xff]  ;;  %v16880_v8 = vcombine.high %v918_v63, %v926_v1  ;;  %6400 = vmatprep.subr.bf16.mxu0 %v16624_v4  ;;  %v16879_v11 = vcombine.low %v918_v63, %v926_v1 }
  0xc1   :  { %v654_v6 = vld [vmem:[#allocation5 + $0x1040] sm:$0xff]  ;;  %6401 = vmatpush1.bf16.msra.mxu0 %v16623_v10 }
  0xc2   :  { %v902_v7 = vld [vmem:[#allocation5 + $0x1800] sm:$0xff]  ;;  %v16608_v12 = vcombine.high %v646_v5, %v654_v6  ;;  %6441 = vmatprep.subr.bf16.mxu1 %v16880_v8  ;;  %v16607_v21 = vcombine.low %v646_v5, %v654_v6 }
  0xc3   :  { %v910_v9 = vld [vmem:[#allocation5 + $0x1840] sm:$0xff]  ;;  %6442 = vmatpush1.bf16.msra.mxu1 %v16879_v11 }
  0xc4   :  { %v886_v13 = vld [vmem:[#allocation5 + $0x1780] sm:$0xff]  ;;  %v16864_v17 = vcombine.high %v902_v7, %v910_v9  ;;  %6402 = vmatprep.subr.bf16.mxu0 %v16608_v12  ;;  %v16863_v23 = vcombine.low %v902_v7, %v910_v9 }
  0xc5   :  { %v894_v14 = vld [vmem:[#allocation5 + $0x17c0] sm:$0xff]  ;;  %6403 = vmatpush1.bf16.msra.mxu0 %v16607_v21 }
  0xc6   :  { %v1142_v15 = vld [vmem:[#allocation5 + $0x1f80] sm:$0xff]  ;;  %v16848_v24 = vcombine.high %v886_v13, %v894_v14  ;;  %6443 = vmatprep.subr.bf16.mxu1 %v16864_v17  ;;  %v16847_v30 = vcombine.low %v886_v13, %v894_v14 }
  0xc7   :  { %v1150_v18 = vld [vmem:[#allocation5 + $0x1fc0] sm:$0xff]  ;;  %6444 = vmatpush1.bf16.msra.mxu1 %v16863_v23 }
  0xc8   :  { %v870_v25 = vld [vmem:[#allocation5 + $0x1700] sm:$0xff]  ;;  %v17104_v27 = vcombine.high %v1142_v15, %v1150_v18  ;;  %6404 = vmatprep.subr.bf16.mxu0 %v16848_v24  ;;  %v17103_v31 = vcombine.low %v1142_v15, %v1150_v18 }
  0xc9   :  { %v878_v26 = vld [vmem:[#allocation5 + $0x1740] sm:$0xff]  ;;  %6405 = vmatpush2.bf16.msra.mxu0 %v16847_v30 }
  0xca   :  { %v1126_v53 = vld [vmem:[#allocation5 + $0x1f00] sm:$0xff]  ;;  %v16832_v32 = vcombine.high %v870_v25, %v878_v26  ;;  %6445 = vmatprep.subr.bf16.mxu1 %v17104_v27  ;;  %v16831_v38 = vcombine.low %v870_v25, %v878_v26  ;;  %v247_v25 = vld [vmem:[#allocation5 + $0x388] sm:$0xff] }
  0xcb   :  { %v1134_v28 = vld [vmem:[#allocation5 + $0x1f40] sm:$0xff]  ;;  %6446 = vmatpush2.bf16.msra.mxu1 %v17103_v31  ;;  %v255_v26 = vld [vmem:[#allocation5 + $0x3c8] sm:$0xff] }
  0xcc   :  { %v854_v33 = vld [vmem:[#allocation5 + $0x1680] sm:$0xff]  ;;  %v17088_v36 = vcombine.high %v1126_v53, %v1134_v28  ;;  %6406 = vmatprep.subr.bf16.mxu0 %v16832_v32  ;;  %v17087_v39 = vcombine.low %v1126_v53, %v1134_v28  ;;  %v503_v53 = vld [vmem:[#allocation5 + $0xb88] sm:$0xff]  ;;  %v16210_v32 = vcombine.high %v247_v25, %v255_v26 }
  0xcd   :  { %v862_v34 = vld [vmem:[#allocation5 + $0x16c0] sm:$0xff]  ;;  %6407 = vmatpush2.bf16.msra.mxu0 %v16831_v38  ;;  %v511_v28 = vld [vmem:[#allocation5 + $0xbc8] sm:$0xff]  ;;  %v18703_v38 = vcombine.low %v18681_v19, %v18681_v19 }
  0xce   :  { %v1110_v35 = vld [vmem:[#allocation5 + $0x1e80] sm:$0xff]  ;;  %v16816_v40 = vcombine.high %v854_v33, %v862_v34  ;;  %6447 = vmatprep.subr.bf16.mxu1 %v17088_v36  ;;  %v16815_v46 = vcombine.low %v854_v33, %v862_v34  ;;  %v231_v33 = vld [vmem:[#allocation5 + $0x308] sm:$0xff]  ;;  %v16466_v36 = vcombine.high %v503_v53, %v511_v28 }
  0xcf   :  { %v1118_v37 = vld [vmem:[#allocation5 + $0x1ec0] sm:$0xff]  ;;  %6448 = vmatpush2.bf16.msra.mxu1 %v17087_v39  ;;  %v239_v34 = vld [vmem:[#allocation5 + $0x348] sm:$0xff]  ;;  %v18707_v39 = vcombine.low %v18687_v22, %v18687_v22 }
  0xd0   :  { %v838_v41 = vld [vmem:[#allocation5 + $0x1600] sm:$0xff]  ;;  %v17072_v44 = vcombine.high %v1110_v35, %v1118_v37  ;;  %6408 = vmatprep.subr.bf16.mxu0 %v16816_v40  ;;  %v17071_v47 = vcombine.low %v1110_v35, %v1118_v37  ;;  %v487_v35 = vld [vmem:[#allocation5 + $0xb08] sm:$0xff]  ;;  %v16209_v40 = vcombine.low %v247_v25, %v255_v26  ;;  %v16193_v19 = vcombine.low %v231_v33, %v239_v34 }
  0xd1   :  { %v846_v42 = vld [vmem:[#allocation5 + $0x1640] sm:$0xff]  ;;  %6409 = vmatpush2.bf16.msra.mxu0 %v16815_v46  ;;  %v495_v37 = vld [vmem:[#allocation5 + $0xb48] sm:$0xff] }
  0xd2   :  { %v1094_v43 = vld [vmem:[#allocation5 + $0x1e00] sm:$0xff]  ;;  %v16800_v48 = vcombine.high %v838_v41, %v846_v42  ;;  %6449 = vmatprep.subr.bf16.mxu1 %v17072_v44  ;;  %v16799_v56 = vcombine.low %v838_v41, %v846_v42  ;;  %v16465_v41 = vcombine.low %v503_v53, %v511_v28  ;;  %v16194_v42 = vcombine.high %v231_v33, %v239_v34  ;;  %v215_v44 = vld [vmem:[#allocation5 + $0x288] sm:$0xff] }
  0xd3   :  { %v1102_v45 = vld [vmem:[#allocation5 + $0x1e40] sm:$0xff]  ;;  %6450 = vmatpush2.bf16.msra.mxu1 %v17071_v47  ;;  %v471_v46 = vld [vmem:[#allocation5 + $0xa88] sm:$0xff]  ;;  %v16449_v22 = vcombine.low %v487_v35, %v495_v37 }
  0xd4   :  { %v822_v49 = vld [vmem:[#allocation5 + $0x1580] sm:$0xff]  ;;  %v17056_v52 = vcombine.high %v1094_v43, %v1102_v45  ;;  %6410 = vmatprep.subr.bf16.mxu0 %v16800_v48  ;;  %v17055_v57 = vcombine.low %v1094_v43, %v1102_v45  ;;  %v16450_v43 = vcombine.high %v487_v35, %v495_v37  ;;  %v223_v45 = vld [vmem:[#allocation5 + $0x2c8] sm:$0xff] }
  0xd5   :  { %v830_v50 = vld [vmem:[#allocation5 + $0x15c0] sm:$0xff]  ;;  %6411 = vmatpush2.bf16.msra.mxu0 %v16799_v56  ;;  %v479_v47 = vld [vmem:[#allocation5 + $0xac8] sm:$0xff]  ;;  %v16178_v48 = vcombine.high %v215_v44, %v223_v45  ;;  %v16177_v56 = vcombine.low %v215_v44, %v223_v45 }
  0xd6   :  { %v1078_v51 = vld [vmem:[#allocation5 + $0x1d80] sm:$0xff]  ;;  %v16784_v60 = vcombine.high %v822_v49, %v830_v50  ;;  %6451 = vmatprep.subr.bf16.mxu1 %v17056_v52  ;;  %v16783_v2 = vcombine.low %v822_v49, %v830_v50  ;;  %v16434_v49 = vcombine.high %v471_v46, %v479_v47  ;;  %v199_v50 = vld [vmem:[#allocation5 + $0x208] sm:$0xff] }
  0xd7   :  { %v1086_v55 = vld [vmem:[#allocation5 + $0x1dc0] sm:$0xff]  ;;  %6452 = vmatpush2.bf16.msra.mxu1 %v17055_v57  ;;  %v455_v52 = vld [vmem:[#allocation5 + $0xa08] sm:$0xff]  ;;  %v16433_v57 = vcombine.low %v471_v46, %v479_v47 }
  0xd8   :  { %v806_v61 = vld [vmem:[#allocation5 + $0x1500] sm:$0xff]  ;;  %v17040_v0 = vcombine.high %v1078_v51, %v1086_v55  ;;  %6412 = vmatprep.subr.bf16.mxu0 %v16784_v60  ;;  %v17039_v3 = vcombine.low %v1078_v51, %v1086_v55  ;;  %v207_v51 = vld [vmem:[#allocation5 + $0x248] sm:$0xff] }
  0xd9   :  { %v814_v62 = vld [vmem:[#allocation5 + $0x1540] sm:$0xff]  ;;  %6413 = vmatpush2.bf16.msra.mxu0 %v16783_v2  ;;  %v463_v55 = vld [vmem:[#allocation5 + $0xa48] sm:$0xff]  ;;  %v16162_v60 = vcombine.high %v199_v50, %v207_v51  ;;  %v16161_v2 = vcombine.low %v199_v50, %v207_v51 }
  0xda   :  { %v1062_v63 = vld [vmem:[#allocation5 + $0x1d00] sm:$0xff]  ;;  %v16768_v4 = vcombine.high %v806_v61, %v814_v62  ;;  %6453 = vmatprep.subr.bf16.mxu1 %v17040_v0  ;;  %v16767_v10 = vcombine.low %v806_v61, %v814_v62  ;;  %v16418_v61 = vcombine.high %v455_v52, %v463_v55  ;;  %v183_v62 = vld [vmem:[#allocation5 + $0x188] sm:$0xff] }
  0xdb   :  { %v1070_v1 = vld [vmem:[#allocation5 + $0x1d40] sm:$0xff]  ;;  %6454 = vmatpush2.bf16.msra.mxu1 %v17039_v3  ;;  %v439_v0 = vld [vmem:[#allocation5 + $0x988] sm:$0xff]  ;;  %v16417_v3 = vcombine.low %v455_v52, %v463_v55 }
  0xdc   :  { %v790_v5 = vld [vmem:[#allocation5 + $0x1480] sm:$0xff]  ;;  %v17024_v8 = vcombine.high %v1062_v63, %v1070_v1  ;;  %6414 = vmatprep.subr.bf16.mxu0 %v16768_v4  ;;  %v17023_v11 = vcombine.low %v1062_v63, %v1070_v1  ;;  %v191_v63 = vld [vmem:[#allocation5 + $0x1c8] sm:$0xff] }
  0xdd   :  { %v798_v6 = vld [vmem:[#allocation5 + $0x14c0] sm:$0xff]  ;;  %6415 = vmatpush2.bf16.msra.mxu0 %v16767_v10  ;;  %v447_v1 = vld [vmem:[#allocation5 + $0x9c8] sm:$0xff]  ;;  %v16146_v4 = vcombine.high %v183_v62, %v191_v63  ;;  %v16145_v10 = vcombine.low %v183_v62, %v191_v63 }
  0xde   :  { %v1046_v7 = vld [vmem:[#allocation5 + $0x1c80] sm:$0xff]  ;;  %v16752_v12 = vcombine.high %v790_v5, %v798_v6  ;;  %6455 = vmatprep.subr.bf16.mxu1 %v17024_v8  ;;  %v16751_v21 = vcombine.low %v790_v5, %v798_v6  ;;  %v16402_v5 = vcombine.high %v439_v0, %v447_v1  ;;  %v167_v6 = vld [vmem:[#allocation5 + $0x108] sm:$0xff] }
  0xdf   :  { %v1054_v9 = vld [vmem:[#allocation5 + $0x1cc0] sm:$0xff]  ;;  %6456 = vmatpush2.bf16.msra.mxu1 %v17023_v11  ;;  %v423_v8 = vld [vmem:[#allocation5 + $0x908] sm:$0xff]  ;;  %v16401_v11 = vcombine.low %v439_v0, %v447_v1 }
  0xe0   :  { %v774_v13 = vld [vmem:[#allocation5 + $0x1400] sm:$0xff]  ;;  %v17008_v17 = vcombine.high %v1046_v7, %v1054_v9  ;;  %6416 = vmatprep.subr.bf16.mxu0 %v16752_v12  ;;  %v17007_v23 = vcombine.low %v1046_v7, %v1054_v9  ;;  %v175_v7 = vld [vmem:[#allocation5 + $0x148] sm:$0xff] }
  0xe1   :  { %v782_v14 = vld [vmem:[#allocation5 + $0x1440] sm:$0xff]  ;;  %6417 = vmatpush2.bf16.msra.mxu0 %v16751_v21  ;;  %v431_v9 = vld [vmem:[#allocation5 + $0x948] sm:$0xff]  ;;  %v16130_v12 = vcombine.high %v167_v6, %v175_v7  ;;  %v16129_v21 = vcombine.low %v167_v6, %v175_v7 }
  0xe2   :  { %v1030_v15 = vld [vmem:[#allocation5 + $0x1c00] sm:$0xff]  ;;  %v16736_v24 = vcombine.high %v774_v13, %v782_v14  ;;  %6457 = vmatprep.subr.bf16.mxu1 %v17008_v17  ;;  %v16735_v30 = vcombine.low %v774_v13, %v782_v14  ;;  %v16386_v13 = vcombine.high %v423_v8, %v431_v9  ;;  %v151_v14 = vld [vmem:[#allocation5 + $0x88] sm:$0xff] }
  0xe3   :  { %v1038_v18 = vld [vmem:[#allocation5 + $0x1c40] sm:$0xff]  ;;  %6458 = vmatpush2.bf16.msra.mxu1 %v17007_v23  ;;  %v407_v17 = vld [vmem:[#allocation5 + $0x888] sm:$0xff]  ;;  %v16385_v23 = vcombine.low %v423_v8, %v431_v9 }
  0xe4   :  { %v16992_v27 = vcombine.high %v1030_v15, %v1038_v18  ;;  %6418 = vmatprep.subr.bf16.mxu0 %v16736_v24  ;;  %v16991_v31 = vcombine.low %v1030_v15, %v1038_v18  ;;  %v159_v15 = vld [vmem:[#allocation5 + $0xc8] sm:$0xff] }
  0xe5   :  { %6419 = vmatpush2.bf16.msra.mxu0 %v16735_v30  ;;  %v415_v18 = vld [vmem:[#allocation5 + $0x8c8] sm:$0xff]  ;;  %v16114_v24 = vcombine.high %v151_v14, %v159_v15  ;;  %v16113_v30 = vcombine.low %v151_v14, %v159_v15 }
  0xe6   :  { %6459 = vmatprep.subr.bf16.mxu1 %v16992_v27  ;;  %6470 = vmatprep.subr.bf16.mxu0 %v16210_v32  ;;  %v16370_v25 = vcombine.high %v407_v17, %v415_v18  ;;  %v135_v26 = vld [vmem:[#allocation5 + $0x8] sm:$0xff] }
  0xe7   :  { %6460 = vmatpush2.bf16.msra.mxu1 %v16991_v31  ;;  %v143_v53 = vld [vmem:[#allocation5 + $0x48] sm:$0xff]  ;;  %v16369_v31 = vcombine.low %v407_v17, %v415_v18 }
  0xe8   :  { %6511 = vmatprep.subr.bf16.mxu1 %v16466_v36  ;;  %6421 = vmatmul.mubr.bf16.vlgmr.msra.gmra.mxu0 %v18703_v38  ;;  %v391_v27 = vld [vmem:[#allocation5 + $0x808] sm:$0xff]  ;;  %v16098_v32 = vcombine.high %v135_v26, %v143_v53 }
  0xe9   :  { %6471 = vmatpush1.bf16.msra.mxu0 %v16209_v40  ;;  %6502 = vmatprep.mubr.bf16.mxu0 %v18669_v58  ;;  %v399_v28 = vld [vmem:[#allocation5 + $0x848] sm:$0xff]  ;;  %v16097_v40 = vcombine.low %v135_v26, %v143_v53 }
  0xea   :  { %6462 = vmatmul.mubr.bf16.vlgmr.msra.gmra.mxu1 %v18707_v39  ;;  %6472 = vmatprep.subr.bf16.mxu0 %v16194_v42  ;;  %v16354_v33 = vcombine.high %v391_v27, %v399_v28  ;;  %v375_v34 = vld [vmem:[#allocation5 + $0x788] sm:$0xff] }
  0xeb   :  { %6512 = vmatpush1.bf16.msra.mxu1 %v16465_v41  ;;  %6543 = vmatprep.mubr.bf16.mxu1 %v18673_v59  ;;  %v383_v35 = vld [vmem:[#allocation5 + $0x7c8] sm:$0xff]  ;;  %v16353_v41 = vcombine.low %v391_v27, %v399_v28 }
  0xec   :  { %6513 = vmatprep.subr.bf16.mxu1 %v16450_v43  ;;  %v631_v36 = vld [vmem:[#allocation5 + $0xf88] sm:$0xff]  ;;  %v16338_v42 = vcombine.high %v375_v34, %v383_v35 }
  0xed   :  { %6473 = vmatpush1.bf16.msra.mxu0 %v16193_v19  ;;  %v639_v37 = vld [vmem:[#allocation5 + $0xfc8] sm:$0xff]  ;;  %v16337_v19 = vcombine.low %v375_v34, %v383_v35 }
  0xee   :  { %6474 = vmatprep.subr.bf16.mxu0 %v16178_v48  ;;  %v16594_v43 = vcombine.high %v631_v36, %v639_v37  ;;  %v359_v44 = vld [vmem:[#allocation5 + $0x708] sm:$0xff] }
  0xef   :  { %6514 = vmatpush1.bf16.msra.mxu1 %v16449_v22  ;;  %v367_v45 = vld [vmem:[#allocation5 + $0x748] sm:$0xff]  ;;  %v16593_v22 = vcombine.low %v631_v36, %v639_v37 }
  0xf0   :  { %6515 = vmatprep.subr.bf16.mxu1 %v16434_v49  ;;  %v615_v46 = vld [vmem:[#allocation5 + $0xf08] sm:$0xff]  ;;  %v16322_v48 = vcombine.high %v359_v44, %v367_v45 }
  0xf1   :  { %6475 = vmatpush1.bf16.msra.mxu0 %v16177_v56  ;;  %v623_v47 = vld [vmem:[#allocation5 + $0xf48] sm:$0xff]  ;;  %v16321_v56 = vcombine.low %v359_v44, %v367_v45 }
  0xf2   :  { %6476 = vmatprep.subr.bf16.mxu0 %v16162_v60  ;;  %v16578_v49 = vcombine.high %v615_v46, %v623_v47  ;;  %v343_v50 = vld [vmem:[#allocation5 + $0x688] sm:$0xff] }
  0xf3   :  { %6516 = vmatpush1.bf16.msra.mxu1 %v16433_v57  ;;  %v351_v51 = vld [vmem:[#allocation5 + $0x6c8] sm:$0xff]  ;;  %v16577_v57 = vcombine.low %v615_v46, %v623_v47 }
  0xf4   :  { %6517 = vmatprep.subr.bf16.mxu1 %v16418_v61  ;;  %v599_v52 = vld [vmem:[#allocation5 + $0xe88] sm:$0xff]  ;;  %v16306_v60 = vcombine.high %v343_v50, %v351_v51 }
  0xf5   :  { %6477 = vmatpush1.bf16.msra.mxu0 %v16161_v2  ;;  %v607_v55 = vld [vmem:[#allocation5 + $0xec8] sm:$0xff]  ;;  %v16305_v2 = vcombine.low %v343_v50, %v351_v51 }
  0xf6   :  { %6478 = vmatprep.subr.bf16.mxu0 %v16146_v4  ;;  %v16562_v61 = vcombine.high %v599_v52, %v607_v55  ;;  %v327_v62 = vld [vmem:[#allocation5 + $0x608] sm:$0xff] }
  0xf7   :  { %6518 = vmatpush1.bf16.msra.mxu1 %v16417_v3  ;;  %v335_v63 = vld [vmem:[#allocation5 + $0x648] sm:$0xff]  ;;  %v16561_v3 = vcombine.low %v599_v52, %v607_v55 }
  0xf8   :  { %6519 = vmatprep.subr.bf16.mxu1 %v16402_v5  ;;  %v583_v0 = vld [vmem:[#allocation5 + $0xe08] sm:$0xff]  ;;  %v16290_v4 = vcombine.high %v327_v62, %v335_v63 }
  0xf9   :  { %6479 = vmatpush1.bf16.msra.mxu0 %v16145_v10  ;;  %v591_v1 = vld [vmem:[#allocation5 + $0xe48] sm:$0xff]  ;;  %v16289_v10 = vcombine.low %v327_v62, %v335_v63 }
  0xfa   :  { %6480 = vmatprep.subr.bf16.mxu0 %v16130_v12  ;;  %v16546_v5 = vcombine.high %v583_v0, %v591_v1  ;;  %v311_v6 = vld [vmem:[#allocation5 + $0x588] sm:$0xff] }
  0xfb   :  { %6520 = vmatpush1.bf16.msra.mxu1 %v16401_v11  ;;  %v319_v7 = vld [vmem:[#allocation5 + $0x5c8] sm:$0xff]  ;;  %v16545_v11 = vcombine.low %v583_v0, %v591_v1 }
  0xfc   :  { %6521 = vmatprep.subr.bf16.mxu1 %v16386_v13  ;;  %v567_v8 = vld [vmem:[#allocation5 + $0xd88] sm:$0xff]  ;;  %v16274_v12 = vcombine.high %v311_v6, %v319_v7 }
  0xfd   :  { %6481 = vmatpush1.bf16.msra.mxu0 %v16129_v21  ;;  %v575_v9 = vld [vmem:[#allocation5 + $0xdc8] sm:$0xff]  ;;  %v16273_v21 = vcombine.low %v311_v6, %v319_v7 }
  0xfe   :  { %6482 = vmatprep.subr.bf16.mxu0 %v16114_v24  ;;  %v16530_v13 = vcombine.high %v567_v8, %v575_v9  ;;  %v295_v14 = vld [vmem:[#allocation5 + $0x508] sm:$0xff] }
  0xff   :  { %6522 = vmatpush1.bf16.msra.mxu1 %v16385_v23  ;;  %v303_v15 = vld [vmem:[#allocation5 + $0x548] sm:$0xff]  ;;  %v16529_v23 = vcombine.low %v567_v8, %v575_v9 }
 0x100   :  { %6523 = vmatprep.subr.bf16.mxu1 %v16370_v25  ;;  %v551_v17 = vld [vmem:[#allocation5 + $0xd08] sm:$0xff]  ;;  %v16258_v24 = vcombine.high %v295_v14, %v303_v15 }
 0x101   :  { %6483 = vmatpush1.bf16.msra.mxu0 %v16113_v30  ;;  %v559_v18 = vld [vmem:[#allocation5 + $0xd48] sm:$0xff]  ;;  %v16257_v30 = vcombine.low %v295_v14, %v303_v15 }
 0x102   :  { %6484 = vmatprep.subr.bf16.mxu0 %v16098_v32  ;;  %v16514_v25 = vcombine.high %v551_v17, %v559_v18  ;;  %v279_v26 = vld [vmem:[#allocation5 + $0x488] sm:$0xff] }
 0x103   :  { %6524 = vmatpush1.bf16.msra.mxu1 %v16369_v31  ;;  %v287_v53 = vld [vmem:[#allocation5 + $0x4c8] sm:$0xff]  ;;  %v16513_v31 = vcombine.low %v551_v17, %v559_v18 }
 0x104   :  { %6525 = vmatprep.subr.bf16.mxu1 %v16354_v33  ;;  %v535_v27 = vld [vmem:[#allocation5 + $0xc88] sm:$0xff]  ;;  %v16242_v32 = vcombine.high %v279_v26, %v287_v53 }
 0x105   :  { %6485 = vmatpush1.bf16.msra.mxu0 %v16097_v40  ;;  %v543_v28 = vld [vmem:[#allocation5 + $0xcc8] sm:$0xff]  ;;  %v16241_v40 = vcombine.low %v279_v26, %v287_v53 }
 0x106   :  { %6486 = vmatprep.subr.bf16.mxu0 %v16338_v42  ;;  %v16498_v33 = vcombine.high %v535_v27, %v543_v28  ;;  %v263_v34 = vld [vmem:[#allocation5 + $0x408] sm:$0xff] }
 0x107   :  { %6526 = vmatpush1.bf16.msra.mxu1 %v16353_v41  ;;  %v271_v35 = vld [vmem:[#allocation5 + $0x448] sm:$0xff]  ;;  %v16497_v41 = vcombine.low %v535_v27, %v543_v28 }
 0x108   :  { %6527 = vmatprep.subr.bf16.mxu1 %v16594_v43  ;;  %v519_v36 = vld [vmem:[#allocation5 + $0xc08] sm:$0xff]  ;;  %v16226_v42 = vcombine.high %v263_v34, %v271_v35 }
 0x109   :  { %6487 = vmatpush2.bf16.msra.mxu0 %v16337_v19  ;;  %v527_v37 = vld [vmem:[#allocation5 + $0xc48] sm:$0xff]  ;;  %v16225_v19 = vcombine.low %v263_v34, %v271_v35 }
 0x10a   :  { %6488 = vmatprep.subr.bf16.mxu0 %v16322_v48  ;;  %v16482_v43 = vcombine.high %v519_v36, %v527_v37  ;;  %v759_v44 = vld [vmem:[#allocation5 + $0x1388] sm:$0xff] }
 0x10b   :  { %6528 = vmatpush2.bf16.msra.mxu1 %v16593_v22  ;;  %v767_v45 = vld [vmem:[#allocation5 + $0x13c8] sm:$0xff]  ;;  %v16481_v22 = vcombine.low %v519_v36, %v527_v37 }
 0x10c   :  { %6529 = vmatprep.subr.bf16.mxu1 %v16578_v49  ;;  %v1015_v46 = vld [vmem:[#allocation5 + $0x1b88] sm:$0xff]  ;;  %v16722_v48 = vcombine.high %v759_v44, %v767_v45 }
 0x10d   :  { %6489 = vmatpush2.bf16.msra.mxu0 %v16321_v56  ;;  %v1023_v47 = vld [vmem:[#allocation5 + $0x1bc8] sm:$0xff]  ;;  %v16721_v56 = vcombine.low %v759_v44, %v767_v45 }
 0x10e   :  { %6490 = vmatprep.subr.bf16.mxu0 %v16306_v60  ;;  %v16978_v49 = vcombine.high %v1015_v46, %v1023_v47  ;;  %v743_v50 = vld [vmem:[#allocation5 + $0x1308] sm:$0xff] }
 0x10f   :  { %6530 = vmatpush2.bf16.msra.mxu1 %v16577_v57  ;;  %v751_v51 = vld [vmem:[#allocation5 + $0x1348] sm:$0xff]  ;;  %v16977_v57 = vcombine.low %v1015_v46, %v1023_v47 }
 0x110   :  { %6531 = vmatprep.subr.bf16.mxu1 %v16562_v61  ;;  %v999_v52 = vld [vmem:[#allocation5 + $0x1b08] sm:$0xff]  ;;  %v16706_v60 = vcombine.high %v743_v50, %v751_v51 }
 0x111   :  { %6491 = vmatpush2.bf16.msra.mxu0 %v16305_v2  ;;  %v1007_v55 = vld [vmem:[#allocation5 + $0x1b48] sm:$0xff]  ;;  %v16705_v2 = vcombine.low %v743_v50, %v751_v51 }
 0x112   :  { %6492 = vmatprep.subr.bf16.mxu0 %v16290_v4  ;;  %v16962_v61 = vcombine.high %v999_v52, %v1007_v55  ;;  %v727_v62 = vld [vmem:[#allocation5 + $0x1288] sm:$0xff] }
 0x113   :  { %6532 = vmatpush2.bf16.msra.mxu1 %v16561_v3  ;;  %v735_v63 = vld [vmem:[#allocation5 + $0x12c8] sm:$0xff]  ;;  %v16961_v3 = vcombine.low %v999_v52, %v1007_v55 }
 0x114   :  { %6533 = vmatprep.subr.bf16.mxu1 %v16546_v5  ;;  %v983_v0 = vld [vmem:[#allocation5 + $0x1a88] sm:$0xff]  ;;  %v16690_v4 = vcombine.high %v727_v62, %v735_v63 }
 0x115   :  { %6493 = vmatpush2.bf16.msra.mxu0 %v16289_v10  ;;  %v991_v1 = vld [vmem:[#allocation5 + $0x1ac8] sm:$0xff]  ;;  %v16689_v10 = vcombine.low %v727_v62, %v735_v63 }
 0x116   :  { %6494 = vmatprep.subr.bf16.mxu0 %v16274_v12  ;;  %v16946_v5 = vcombine.high %v983_v0, %v991_v1  ;;  %v711_v6 = vld [vmem:[#allocation5 + $0x1208] sm:$0xff] }
 0x117   :  { %6534 = vmatpush2.bf16.msra.mxu1 %v16545_v11  ;;  %v719_v7 = vld [vmem:[#allocation5 + $0x1248] sm:$0xff]  ;;  %v16945_v11 = vcombine.low %v983_v0, %v991_v1 }
 0x118   :  { %6535 = vmatprep.subr.bf16.mxu1 %v16530_v13  ;;  %v967_v8 = vld [vmem:[#allocation5 + $0x1a08] sm:$0xff]  ;;  %v16674_v12 = vcombine.high %v711_v6, %v719_v7 }
 0x119   :  { %6495 = vmatpush2.bf16.msra.mxu0 %v16273_v21  ;;  %v975_v9 = vld [vmem:[#allocation5 + $0x1a48] sm:$0xff]  ;;  %v16673_v21 = vcombine.low %v711_v6, %v719_v7 }
 0x11a   :  { %6496 = vmatprep.subr.bf16.mxu0 %v16258_v24  ;;  %v16930_v13 = vcombine.high %v967_v8, %v975_v9  ;;  %v695_v14 = vld [vmem:[#allocation5 + $0x1188] sm:$0xff] }
 0x11b   :  { %6536 = vmatpush2.bf16.msra.mxu1 %v16529_v23  ;;  %v703_v15 = vld [vmem:[#allocation5 + $0x11c8] sm:$0xff]  ;;  %v16929_v23 = vcombine.low %v967_v8, %v975_v9 }
 0x11c   :  { %6537 = vmatprep.subr.bf16.mxu1 %v16514_v25  ;;  %v951_v17 = vld [vmem:[#allocation5 + $0x1988] sm:$0xff]  ;;  %v16658_v24 = vcombine.high %v695_v14, %v703_v15 }
 0x11d   :  { %6497 = vmatpush2.bf16.msra.mxu0 %v16257_v30  ;;  %v959_v18 = vld [vmem:[#allocation5 + $0x19c8] sm:$0xff]  ;;  %v16657_v30 = vcombine.low %v695_v14, %v703_v15 }
 0x11e   :  { %6498 = vmatprep.subr.bf16.mxu0 %v16242_v32  ;;  %v16914_v25 = vcombine.high %v951_v17, %v959_v18  ;;  %v679_v26 = vld [vmem:[#allocation5 + $0x1108] sm:$0xff] }
 0x11f   :  { %6538 = vmatpush2.bf16.msra.mxu1 %v16513_v31  ;;  %v687_v53 = vld [vmem:[#allocation5 + $0x1148] sm:$0xff]  ;;  %v16913_v31 = vcombine.low %v951_v17, %v959_v18 }
 0x120   :  { %6539 = vmatprep.subr.bf16.mxu1 %v16498_v33  ;;  %v935_v27 = vld [vmem:[#allocation5 + $0x1908] sm:$0xff]  ;;  %v16642_v32 = vcombine.high %v679_v26, %v687_v53 }
 0x121   :  { %6499 = vmatpush2.bf16.msra.mxu0 %v16241_v40  ;;  %v943_v28 = vld [vmem:[#allocation5 + $0x1948] sm:$0xff]  ;;  %v16641_v40 = vcombine.low %v679_v26, %v687_v53 }
 0x122   :  { %6500 = vmatprep.subr.bf16.mxu0 %v16226_v42  ;;  %v16898_v33 = vcombine.high %v935_v27, %v943_v28  ;;  %v663_v34 = vld [vmem:[#allocation5 + $0x1088] sm:$0xff] }
 0x123   :  { %6540 = vmatpush2.bf16.msra.mxu1 %v16497_v41  ;;  %v671_v35 = vld [vmem:[#allocation5 + $0x10c8] sm:$0xff]  ;;  %v16897_v41 = vcombine.low %v935_v27, %v943_v28 }
 0x124   :  { %6541 = vmatprep.subr.bf16.mxu1 %v16482_v43  ;;  %v919_v36 = vld [vmem:[#allocation5 + $0x1888] sm:$0xff]  ;;  %v16626_v42 = vcombine.high %v663_v34, %v671_v35 }
 0x125   :  { %6501 = vmatpush2.bf16.msra.mxu0 %v16225_v19  ;;  %v927_v37 = vld [vmem:[#allocation5 + $0x18c8] sm:$0xff]  ;;  %v16625_v19 = vcombine.low %v663_v34, %v671_v35 }
 0x126   :  { %6552 = vmatprep.subr.bf16.mxu0 %v16722_v48  ;;  %v16882_v43 = vcombine.high %v919_v36, %v927_v37  ;;  %v647_v44 = vld [vmem:[#allocation5 + $0x1008] sm:$0xff] }
 0x127   :  { %6542 = vmatpush2.bf16.msra.mxu1 %v16481_v22  ;;  %v655_v45 = vld [vmem:[#allocation5 + $0x1048] sm:$0xff]  ;;  %v16881_v22 = vcombine.low %v919_v36, %v927_v37 }
 0x128   :  { %6593 = vmatprep.subr.bf16.mxu1 %v16978_v49  ;;  %6503 = vmatmul.mubr.bf16.vlgmr.msra.gmra.mxu0 %v18679_v16  ;;  %v903_v46 = vld [vmem:[#allocation5 + $0x1808] sm:$0xff]  ;;  %v16610_v48 = vcombine.high %v647_v44, %v655_v45 }
 0x129   :  { %6553 = vmatpush1.bf16.msra.mxu0 %v16721_v56  ;;  %6584 = vmatprep.mubr.bf16.mxu0 %v18691_v29  ;;  %v911_v47 = vld [vmem:[#allocation5 + $0x1848] sm:$0xff]  ;;  %v16609_v56 = vcombine.low %v647_v44, %v655_v45 }
 0x12a   :  { %6544 = vmatmul.mubr.bf16.vlgmr.msra.gmra.mxu1 %v18685_v20  ;;  %6554 = vmatprep.subr.bf16.mxu0 %v16706_v60  ;;  %v16866_v49 = vcombine.high %v903_v46, %v911_v47  ;;  %v887_v50 = vld [vmem:[#allocation5 + $0x1788] sm:$0xff] }
 0x12b   :  { %6594 = vmatpush1.bf16.msra.mxu1 %v16977_v57  ;;  %6625 = vmatprep.mubr.bf16.mxu1 %v18696_v54  ;;  %v895_v51 = vld [vmem:[#allocation5 + $0x17c8] sm:$0xff]  ;;  %v16865_v57 = vcombine.low %v903_v46, %v911_v47 }
 0x12c   :  { %6595 = vmatprep.subr.bf16.mxu1 %v16962_v61  ;;  %v1143_v52 = vld [vmem:[#allocation5 + $0x1f88] sm:$0xff]  ;;  %v16850_v60 = vcombine.high %v887_v50, %v895_v51 }
 0x12d   :  { %6555 = vmatpush1.bf16.msra.mxu0 %v16705_v2  ;;  %v1151_v55 = vld [vmem:[#allocation5 + $0x1fc8] sm:$0xff]  ;;  %v16849_v2 = vcombine.low %v887_v50, %v895_v51 }
 0x12e   :  { %6556 = vmatprep.subr.bf16.mxu0 %v16690_v4  ;;  %v17106_v61 = vcombine.high %v1143_v52, %v1151_v55  ;;  %v871_v62 = vld [vmem:[#allocation5 + $0x1708] sm:$0xff] }
 0x12f   :  { %6596 = vmatpush1.bf16.msra.mxu1 %v16961_v3  ;;  %v879_v63 = vld [vmem:[#allocation5 + $0x1748] sm:$0xff]  ;;  %v17105_v3 = vcombine.low %v1143_v52, %v1151_v55 }
 0x130   :  { %6597 = vmatprep.subr.bf16.mxu1 %v16946_v5  ;;  %v1127_v0 = vld [vmem:[#allocation5 + $0x1f08] sm:$0xff]  ;;  %v16834_v4 = vcombine.high %v871_v62, %v879_v63 }
 0x131   :  { %6557 = vmatpush1.bf16.msra.mxu0 %v16689_v10  ;;  %v1135_v1 = vld [vmem:[#allocation5 + $0x1f48] sm:$0xff]  ;;  %v16833_v10 = vcombine.low %v871_v62, %v879_v63  ;;  %v248_v62 = vld [vmem:[#allocation5 + $0x390] sm:$0xff] }
 0x132   :  { %6558 = vmatprep.subr.bf16.mxu0 %v16674_v12  ;;  %v17090_v5 = vcombine.high %v1127_v0, %v1135_v1  ;;  %v855_v6 = vld [vmem:[#allocation5 + $0x1688] sm:$0xff]  ;;  %v256_v63 = vld [vmem:[#allocation5 + $0x3d0] sm:$0xff] }
 0x133   :  { %6598 = vmatpush1.bf16.msra.mxu1 %v16945_v11  ;;  %v863_v7 = vld [vmem:[#allocation5 + $0x16c8] sm:$0xff]  ;;  %v17089_v11 = vcombine.low %v1127_v0, %v1135_v1  ;;  %v504_v0 = vld [vmem:[#allocation5 + $0xb90] sm:$0xff] }
 0x134   :  { %6599 = vmatprep.subr.bf16.mxu1 %v16930_v13  ;;  %v1111_v8 = vld [vmem:[#allocation5 + $0x1e88] sm:$0xff]  ;;  %v16818_v12 = vcombine.high %v855_v6, %v863_v7  ;;  %v512_v1 = vld [vmem:[#allocation5 + $0xbd0] sm:$0xff] }
 0x135   :  { %6559 = vmatpush1.bf16.msra.mxu0 %v16673_v21  ;;  %v1119_v9 = vld [vmem:[#allocation5 + $0x1ec8] sm:$0xff]  ;;  %v16817_v21 = vcombine.low %v855_v6, %v863_v7  ;;  %v232_v6 = vld [vmem:[#allocation5 + $0x310] sm:$0xff] }
 0x136   :  { %6560 = vmatprep.subr.bf16.mxu0 %v16658_v24  ;;  %v17074_v13 = vcombine.high %v1111_v8, %v1119_v9  ;;  %v839_v14 = vld [vmem:[#allocation5 + $0x1608] sm:$0xff]  ;;  %v240_v7 = vld [vmem:[#allocation5 + $0x350] sm:$0xff] }
 0x137   :  { %6600 = vmatpush1.bf16.msra.mxu1 %v16929_v23  ;;  %v847_v15 = vld [vmem:[#allocation5 + $0x1648] sm:$0xff]  ;;  %v17073_v23 = vcombine.low %v1111_v8, %v1119_v9  ;;  %v488_v8 = vld [vmem:[#allocation5 + $0xb10] sm:$0xff] }
 0x138   :  { %6601 = vmatprep.subr.bf16.mxu1 %v16914_v25  ;;  %v1095_v17 = vld [vmem:[#allocation5 + $0x1e08] sm:$0xff]  ;;  %v16802_v24 = vcombine.high %v839_v14, %v847_v15  ;;  %v496_v9 = vld [vmem:[#allocation5 + $0xb50] sm:$0xff] }
 0x139   :  { %6561 = vmatpush1.bf16.msra.mxu0 %v16657_v30  ;;  %v1103_v18 = vld [vmem:[#allocation5 + $0x1e48] sm:$0xff]  ;;  %v16801_v30 = vcombine.low %v839_v14, %v847_v15  ;;  %v216_v14 = vld [vmem:[#allocation5 + $0x290] sm:$0xff] }
 0x13a   :  { %6562 = vmatprep.subr.bf16.mxu0 %v16642_v32  ;;  %v17058_v25 = vcombine.high %v1095_v17, %v1103_v18  ;;  %v823_v26 = vld [vmem:[#allocation5 + $0x1588] sm:$0xff]  ;;  %v224_v15 = vld [vmem:[#allocation5 + $0x2d0] sm:$0xff] }
 0x13b   :  { %6602 = vmatpush1.bf16.msra.mxu1 %v16913_v31  ;;  %v831_v53 = vld [vmem:[#allocation5 + $0x15c8] sm:$0xff]  ;;  %v17057_v31 = vcombine.low %v1095_v17, %v1103_v18  ;;  %v472_v18 = vld [vmem:[#allocation5 + $0xa90] sm:$0xff] }
 0x13c   :  { %6603 = vmatprep.subr.bf16.mxu1 %v16898_v33  ;;  %v1079_v27 = vld [vmem:[#allocation5 + $0x1d88] sm:$0xff]  ;;  %v16786_v32 = vcombine.high %v823_v26, %v831_v53 }
 0x13d   :  { %6563 = vmatpush1.bf16.msra.mxu0 %v16641_v40  ;;  %v1087_v28 = vld [vmem:[#allocation5 + $0x1dc8] sm:$0xff]  ;;  %v16785_v40 = vcombine.low %v823_v26, %v831_v53  ;;  %v16451_v53 = vcombine.low %v488_v8, %v496_v9 }
 0x13e   :  { %6564 = vmatprep.subr.bf16.mxu0 %v16626_v42  ;;  %v17042_v33 = vcombine.high %v1079_v27, %v1087_v28  ;;  %v807_v34 = vld [vmem:[#allocation5 + $0x1508] sm:$0xff] }
 0x13f   :  { %6604 = vmatpush1.bf16.msra.mxu1 %v16897_v41  ;;  %v815_v35 = vld [vmem:[#allocation5 + $0x1548] sm:$0xff]  ;;  %v17041_v41 = vcombine.low %v1079_v27, %v1087_v28  ;;  %v16180_v27 = vcombine.high %v216_v14, %v224_v15 }
 0x140   :  { %6605 = vmatprep.subr.bf16.mxu1 %v16882_v43  ;;  %v1063_v36 = vld [vmem:[#allocation5 + $0x1d08] sm:$0xff]  ;;  %v16770_v42 = vcombine.high %v807_v34, %v815_v35 }
 0x141   :  { %6565 = vmatpush1.bf16.msra.mxu0 %v16625_v19  ;;  %v1071_v37 = vld [vmem:[#allocation5 + $0x1d48] sm:$0xff]  ;;  %v16769_v19 = vcombine.low %v807_v34, %v815_v35  ;;  %v456_v35 = vld [vmem:[#allocation5 + $0xa10] sm:$0xff] }
 0x142   :  { %6566 = vmatprep.subr.bf16.mxu0 %v16610_v48  ;;  %v17026_v43 = vcombine.high %v1063_v36, %v1071_v37  ;;  %v791_v44 = vld [vmem:[#allocation5 + $0x1488] sm:$0xff] }
 0x143   :  { %6606 = vmatpush1.bf16.msra.mxu1 %v16881_v22  ;;  %v799_v45 = vld [vmem:[#allocation5 + $0x14c8] sm:$0xff]  ;;  %v17025_v22 = vcombine.low %v1063_v36, %v1071_v37  ;;  %v464_v36 = vld [vmem:[#allocation5 + $0xa50] sm:$0xff] }
 0x144   :  { %6607 = vmatprep.subr.bf16.mxu1 %v16866_v49  ;;  %v1047_v46 = vld [vmem:[#allocation5 + $0x1c88] sm:$0xff]  ;;  %v16754_v48 = vcombine.high %v791_v44, %v799_v45 }
 0x145   :  { %6567 = vmatpush1.bf16.msra.mxu0 %v16609_v56  ;;  %v1055_v47 = vld [vmem:[#allocation5 + $0x1cc8] sm:$0xff]  ;;  %v16753_v56 = vcombine.low %v791_v44, %v799_v45  ;;  %v16420_v45 = vcombine.high %v456_v35, %v464_v36 }
 0x146   :  { %6568 = vmatprep.subr.bf16.mxu0 %v16850_v60  ;;  %v17010_v49 = vcombine.high %v1047_v46, %v1055_v47  ;;  %v775_v50 = vld [vmem:[#allocation5 + $0x1408] sm:$0xff] }
 0x147   :  { %6608 = vmatpush1.bf16.msra.mxu1 %v16865_v57  ;;  %v783_v51 = vld [vmem:[#allocation5 + $0x1448] sm:$0xff]  ;;  %v17009_v57 = vcombine.low %v1047_v46, %v1055_v47  ;;  %v184_v46 = vld [vmem:[#allocation5 + $0x190] sm:$0xff] }
 0x148   :  { %6609 = vmatprep.subr.bf16.mxu1 %v17106_v61  ;;  %v1031_v52 = vld [vmem:[#allocation5 + $0x1c08] sm:$0xff]  ;;  %v16738_v60 = vcombine.high %v775_v50, %v783_v51  ;;  %v192_v47 = vld [vmem:[#allocation5 + $0x1d0] sm:$0xff] }
 0x149   :  { %6569 = vmatpush2.bf16.msra.mxu0 %v16849_v2  ;;  %v1039_v55 = vld [vmem:[#allocation5 + $0x1c48] sm:$0xff]  ;;  %v16737_v2 = vcombine.low %v775_v50, %v783_v51  ;;  %v16148_v50 = vcombine.high %v184_v46, %v192_v47 }
 0x14a   :  { %6570 = vmatprep.subr.bf16.mxu0 %v16834_v4  ;;  %v16994_v61 = vcombine.high %v1031_v52, %v1039_v55  ;;  %v16212_v4 = vcombine.high %v248_v62, %v256_v63 }
 0x14b   :  { %6610 = vmatpush2.bf16.msra.mxu1 %v17105_v3  ;;  %v16993_v3 = vcombine.low %v1031_v52, %v1039_v55  ;;  %v168_v52 = vld [vmem:[#allocation5 + $0x110] sm:$0xff] }
 0x14c   :  { %6611 = vmatprep.subr.bf16.mxu1 %v17090_v5  ;;  %v16468_v5 = vcombine.high %v504_v0, %v512_v1  ;;  %v176_v55 = vld [vmem:[#allocation5 + $0x150] sm:$0xff] }
 0x14d   :  { %6571 = vmatpush2.bf16.msra.mxu0 %v16833_v10  ;;  %v16211_v10 = vcombine.low %v248_v62, %v256_v63  ;;  %v16132_v62 = vcombine.high %v168_v52, %v176_v55 }
 0x14e   :  { %6572 = vmatprep.subr.bf16.mxu0 %v16818_v12  ;;  %v16196_v12 = vcombine.high %v232_v6, %v240_v7 }
 0x14f   :  { %6612 = vmatpush2.bf16.msra.mxu1 %v17089_v11  ;;  %v16467_v11 = vcombine.low %v504_v0, %v512_v1  ;;  %v152_v0 = vld [vmem:[#allocation5 + $0x90] sm:$0xff] }
 0x150   :  { %6613 = vmatprep.subr.bf16.mxu1 %v17074_v13  ;;  %v16452_v13 = vcombine.high %v488_v8, %v496_v9  ;;  %v160_v1 = vld [vmem:[#allocation5 + $0xd0] sm:$0xff] }
 0x151   :  { %6573 = vmatpush2.bf16.msra.mxu0 %v16817_v21  ;;  %v480_v21 = vld [vmem:[#allocation5 + $0xad0] sm:$0xff] }
 0x152   :  { %6574 = vmatprep.subr.bf16.mxu0 %v16802_v24  ;;  %v16195_v24 = vcombine.low %v232_v6, %v240_v7  ;;  %v16116_v6 = vcombine.high %v152_v0, %v160_v1  ;;  %v136_v8 = vld [vmem:[#allocation5 + $0x10] sm:$0xff] }
 0x153   :  { %6614 = vmatpush2.bf16.msra.mxu1 %v17073_v23  ;;  %v144_v9 = vld [vmem:[#allocation5 + $0x50] sm:$0xff] }
 0x154   :  { %6615 = vmatprep.subr.bf16.mxu1 %v17058_v25 }
 0x155   :  { %6575 = vmatpush2.bf16.msra.mxu0 %v16801_v30  ;;  %v16436_v30 = vcombine.high %v472_v18, %v480_v21 }
 0x156   :  { %6576 = vmatprep.subr.bf16.mxu0 %v16786_v32  ;;  %v208_v32 = vld [vmem:[#allocation5 + $0x250] sm:$0xff] }
 0x157   :  { %6616 = vmatpush2.bf16.msra.mxu1 %v17057_v31  ;;  %v200_v31 = vld [vmem:[#allocation5 + $0x210] sm:$0xff] }
 0x158   :  { %6617 = vmatprep.subr.bf16.mxu1 %v17042_v33 }
 0x159   :  { %6577 = vmatpush2.bf16.msra.mxu0 %v16785_v40  ;;  %v16179_v40 = vcombine.low %v216_v14, %v224_v15  ;;  %v16100_v14 = vcombine.high %v136_v8, %v144_v9 }
 0x15a   :  { %6578 = vmatprep.subr.bf16.mxu0 %v16770_v42  ;;  %v16435_v42 = vcombine.low %v472_v18, %v480_v21  ;;  %v384_v18 = vld [vmem:[#allocation5 + $0x7d0] sm:$0xff] }
 0x15b   :  { %6618 = vmatpush2.bf16.msra.mxu1 %v17041_v41  ;;  %v632_v21 = vld [vmem:[#allocation5 + $0xf90] sm:$0xff] }
 0x15c   :  { %6619 = vmatprep.subr.bf16.mxu1 %v17026_v43  ;;  %v16164_v43 = vcombine.high %v200_v31, %v208_v32 }
 0x15d   :  { %6579 = vmatpush2.bf16.msra.mxu0 %v16769_v19  ;;  %v440_v19 = vld [vmem:[#allocation5 + $0x990] sm:$0xff] }
 0x15e   :  { %6580 = vmatprep.subr.bf16.mxu0 %v16754_v48  ;;  %v16163_v48 = vcombine.low %v200_v31, %v208_v32  ;;  %v616_v31 = vld [vmem:[#allocation5 + $0xf10] sm:$0xff] }
 0x15f   :  { %6620 = vmatpush2.bf16.msra.mxu1 %v17025_v22  ;;  %v448_v22 = vld [vmem:[#allocation5 + $0x9d0] sm:$0xff] }
 0x160   :  { %6621 = vmatprep.subr.bf16.mxu1 %v17010_v49  ;;  %v16419_v49 = vcombine.low %v456_v35, %v464_v36  ;;  %v16404_v51 = vcombine.high %v440_v19, %v448_v22  ;;  %v624_v32 = vld [vmem:[#allocation5 + $0xf50] sm:$0xff] }
 0x161   :  { %6581 = vmatpush2.bf16.msra.mxu0 %v16753_v56  ;;  %v424_v56 = vld [vmem:[#allocation5 + $0x910] sm:$0xff] }
 0x162   :  { %6582 = vmatprep.subr.bf16.mxu0 %v16738_v60  ;;  %v16147_v60 = vcombine.low %v184_v46, %v192_v47 }
 0x163   :  { %6622 = vmatpush2.bf16.msra.mxu1 %v17009_v57  ;;  %v432_v57 = vld [vmem:[#allocation5 + $0x950] sm:$0xff] }
 0x164   :  { %6623 = vmatprep.subr.bf16.mxu1 %v16994_v61  ;;  %v16403_v61 = vcombine.low %v440_v19, %v448_v22  ;;  %v16388_v63 = vcombine.high %v424_v56, %v432_v57  ;;  %v328_v19 = vld [vmem:[#allocation5 + $0x610] sm:$0xff] }
 0x165   :  { %6583 = vmatpush2.bf16.msra.mxu0 %v16737_v2  ;;  %v408_v2 = vld [vmem:[#allocation5 + $0x890] sm:$0xff] }
 0x166   :  { %6634 = vmatprep.subr.bf16.mxu0 %v16212_v4  ;;  %v16131_v4 = vcombine.low %v168_v52, %v176_v55  ;;  %v336_v22 = vld [vmem:[#allocation5 + $0x650] sm:$0xff] }
 0x167   :  { %6624 = vmatpush2.bf16.msra.mxu1 %v16993_v3  ;;  %v416_v3 = vld [vmem:[#allocation5 + $0x8d0] sm:$0xff]  ;;  %v16292_v52 = vcombine.high %v328_v19, %v336_v22 }
 0x168   :  { %6675 = vmatprep.subr.bf16.mxu1 %v16468_v5  ;;  %v6340_v17 = vpop.f32.mrf.mxu0  ;;  %6585 = vmatmul.mubr.bf16.vlgmr.msra.gmra.mxu0 %v18703_v38  ;;  %v16387_v5 = vcombine.low %v424_v56, %v432_v57  ;;  %v16372_v7 = vcombine.high %v408_v2, %v416_v3  ;;  %v312_v56 = vld [vmem:[#allocation5 + $0x590] sm:$0xff] }
 0x169   :  { %6635 = vmatpush1.bf16.msra.mxu0 %v16211_v10  ;;  %6666 = vmatprep.mubr.bf16.mxu0 %v18669_v58  ;;  %v392_v10 = vld [vmem:[#allocation5 + $0x810] sm:$0xff] }
 0x16a   :  { %v6381_v23 = vpop.f32.mrf.mxu1  ;;  %6626 = vmatmul.mubr.bf16.vlgmr.msra.gmra.mxu1 %v18707_v39  ;;  %v6342_v26 = vpop.f32.mrf.mxu0  ;;  %6636 = vmatprep.subr.bf16.mxu0 %v16196_v12  ;;  %v16115_v12 = vcombine.low %v152_v0, %v160_v1  ;;  %v320_v57 = vld [vmem:[#allocation5 + $0x5d0] sm:$0xff] }
 0x16b   :  { %v18719_v25 = vadd.f32 %v6381_v23, %v6340_v17  ;;  %6676 = vmatpush1.bf16.msra.mxu1 %v16467_v11  ;;  %6707 = vmatprep.mubr.bf16.mxu1 %v18673_v59  ;;  %v400_v11 = vld [vmem:[#allocation5 + $0x850] sm:$0xff]  ;;  %v16276_v0 = vcombine.high %v312_v56, %v320_v57 }
 0x16c   :  { %v6383_v28 = vpop.f32.mrf.mxu1  ;;  %6677 = vmatprep.subr.bf16.mxu1 %v16452_v13  ;;  %v6344_v34 = vpop.f32.mrf.mxu0  ;;  %v16371_v13 = vcombine.low %v408_v2, %v416_v3  ;;  %v16356_v15 = vcombine.high %v392_v10, %v400_v11  ;;  %v376_v17 = vld [vmem:[#allocation5 + $0x790] sm:$0xff] }
 0x16d   :  { %v18722_v33 = vadd.f32 %v6383_v28, %v6342_v26  ;;  %6637 = vmatpush1.bf16.msra.mxu0 %v16195_v24  ;;  %v640_v23 = vld [vmem:[#allocation5 + $0xfd0] sm:$0xff]  ;;  %v16099_v24 = vcombine.low %v136_v8, %v144_v9  ;;  %v16355_v26 = vcombine.low %v392_v10, %v400_v11  ;;  %v16339_v34 = vcombine.low %v376_v17, %v384_v18 }
 0x16e   :  { %v6385_v37 = vpop.f32.mrf.mxu1  ;;  %v6345_v41 = vpop.f32.mrf.mxu0  ;;  %6638 = vmatprep.subr.bf16.mxu0 %v16180_v27  ;;  %v16596_v27 = vcombine.high %v632_v21, %v640_v23  ;;  %v360_v28 = vld [vmem:[#allocation5 + $0x710] sm:$0xff]  ;;  %v16595_v35 = vcombine.low %v632_v21, %v640_v23 }
 0x16f   :  { %6678 = vmatpush1.bf16.msra.mxu1 %v16451_v53  ;;  %v16340_v53 = vcombine.high %v376_v17, %v384_v18  ;;  %v16580_v37 = vcombine.high %v616_v31, %v624_v32  ;;  %v352_v41 = vld [vmem:[#allocation5 + $0x6d0] sm:$0xff] }
 0x170   :  { %v6386_v44 = vpop.f32.mrf.mxu1  ;;  %6679 = vmatprep.subr.bf16.mxu1 %v16436_v30  ;;  %v368_v30 = vld [vmem:[#allocation5 + $0x750] sm:$0xff] }
 0x171   :  { %6639 = vmatpush1.bf16.msra.mxu0 %v16179_v40  ;;  %v16324_v36 = vcombine.high %v360_v28, %v368_v30  ;;  %v344_v40 = vld [vmem:[#allocation5 + $0x690] sm:$0xff]  ;;  %v16323_v44 = vcombine.low %v360_v28, %v368_v30 }
 0x172   :  { %6640 = vmatprep.subr.bf16.mxu0 %v16164_v43  ;;  %v608_v43 = vld [vmem:[#allocation5 + $0xed0] sm:$0xff]  ;;  %v16308_v46 = vcombine.high %v344_v40, %v352_v41 }
 0x173   :  { %6680 = vmatpush1.bf16.msra.mxu1 %v16435_v42  ;;  %v600_v42 = vld [vmem:[#allocation5 + $0xe90] sm:$0xff] }
 0x174   :  { %6681 = vmatprep.subr.bf16.mxu1 %v16420_v45  ;;  %v16579_v45 = vcombine.low %v616_v31, %v624_v32  ;;  %v16564_v47 = vcombine.high %v600_v42, %v608_v43  ;;  %v296_v2 = vld [vmem:[#allocation5 + $0x510] sm:$0xff] }
 0x175   :  { %6641 = vmatpush1.bf16.msra.mxu0 %v16163_v48  ;;  %v584_v48 = vld [vmem:[#allocation5 + $0xe10] sm:$0xff] }
 0x176   :  { %6642 = vmatprep.subr.bf16.mxu0 %v16148_v50  ;;  %v16307_v50 = vcombine.low %v344_v40, %v352_v41  ;;  %v304_v3 = vld [vmem:[#allocation5 + $0x550] sm:$0xff] }
 0x177   :  { %6682 = vmatpush1.bf16.msra.mxu1 %v16419_v49  ;;  %v592_v49 = vld [vmem:[#allocation5 + $0xe50] sm:$0xff]  ;;  %v16260_v8 = vcombine.high %v296_v2, %v304_v3 }
 0x178   :  { %6683 = vmatprep.subr.bf16.mxu1 %v16404_v51  ;;  %v16563_v51 = vcombine.low %v600_v42, %v608_v43  ;;  %v16548_v55 = vcombine.high %v584_v48, %v592_v49  ;;  %v280_v10 = vld [vmem:[#allocation5 + $0x490] sm:$0xff] }
 0x179   :  { %6643 = vmatpush1.bf16.msra.mxu0 %v16147_v60  ;;  %v568_v60 = vld [vmem:[#allocation5 + $0xd90] sm:$0xff] }
 0x17a   :  { %6644 = vmatprep.subr.bf16.mxu0 %v16132_v62  ;;  %v16291_v62 = vcombine.low %v328_v19, %v336_v22  ;;  %v288_v11 = vld [vmem:[#allocation5 + $0x4d0] sm:$0xff] }
 0x17b   :  { %6684 = vmatpush1.bf16.msra.mxu1 %v16403_v61  ;;  %v576_v61 = vld [vmem:[#allocation5 + $0xdd0] sm:$0xff]  ;;  %v16244_v17 = vcombine.high %v280_v10, %v288_v11 }
 0x17c   :  { %6685 = vmatprep.subr.bf16.mxu1 %v16388_v63  ;;  %v16547_v63 = vcombine.low %v584_v48, %v592_v49  ;;  %v16532_v1 = vcombine.high %v568_v60, %v576_v61  ;;  %v264_v21 = vld [vmem:[#allocation5 + $0x410] sm:$0xff] }
 0x17d   :  { %6645 = vmatpush1.bf16.msra.mxu0 %v16131_v4  ;;  %v552_v4 = vld [vmem:[#allocation5 + $0xd10] sm:$0xff] }
 0x17e   :  { %6646 = vmatprep.subr.bf16.mxu0 %v16116_v6  ;;  %v16275_v6 = vcombine.low %v312_v56, %v320_v57  ;;  %v272_v23 = vld [vmem:[#allocation5 + $0x450] sm:$0xff] }
 0x17f   :  { %6686 = vmatpush1.bf16.msra.mxu1 %v16387_v5  ;;  %v560_v5 = vld [vmem:[#allocation5 + $0xd50] sm:$0xff]  ;;  %v16228_v28 = vcombine.high %v264_v21, %v272_v23 }
 0x180   :  { %6687 = vmatprep.subr.bf16.mxu1 %v16372_v7  ;;  %v16531_v7 = vcombine.low %v568_v60, %v576_v61  ;;  %v16516_v9 = vcombine.high %v552_v4, %v560_v5  ;;  %v760_v31 = vld [vmem:[#allocation5 + $0x1390] sm:$0xff] }
 0x181   :  { %6647 = vmatpush1.bf16.msra.mxu0 %v16115_v12  ;;  %v536_v12 = vld [vmem:[#allocation5 + $0xc90] sm:$0xff] }
 0x182   :  { %6648 = vmatprep.subr.bf16.mxu0 %v16100_v14  ;;  %v16259_v14 = vcombine.low %v296_v2, %v304_v3  ;;  %v768_v32 = vld [vmem:[#allocation5 + $0x13d0] sm:$0xff] }
 0x183   :  { %6688 = vmatpush1.bf16.msra.mxu1 %v16371_v13  ;;  %v544_v13 = vld [vmem:[#allocation5 + $0xcd0] sm:$0xff]  ;;  %v16724_v40 = vcombine.high %v760_v31, %v768_v32 }
 0x184   :  { %6689 = vmatprep.subr.bf16.mxu1 %v16356_v15  ;;  %v16515_v15 = vcombine.low %v552_v4, %v560_v5  ;;  %v16500_v18 = vcombine.high %v536_v12, %v544_v13  ;;  %v744_v42 = vld [vmem:[#allocation5 + $0x1310] sm:$0xff] }
 0x185   :  { %6649 = vmatpush1.bf16.msra.mxu0 %v16099_v24  ;;  %v520_v24 = vld [vmem:[#allocation5 + $0xc10] sm:$0xff] }
 0x186   :  { %6650 = vmatprep.subr.bf16.mxu0 %v16340_v53  ;;  %v16243_v53 = vcombine.low %v280_v10, %v288_v11  ;;  %v752_v43 = vld [vmem:[#allocation5 + $0x1350] sm:$0xff] }
 0x187   :  { %6690 = vmatpush1.bf16.msra.mxu1 %v16355_v26  ;;  %v528_v26 = vld [vmem:[#allocation5 + $0xc50] sm:$0xff]  ;;  %v16708_v19 = vcombine.high %v744_v42, %v752_v43  ;;  %v16707_v57 = vcombine.low %v744_v42, %v752_v43 }
 0x188   :  { %6691 = vmatprep.subr.bf16.mxu1 %v16596_v27  ;;  %v16499_v27 = vcombine.low %v536_v12, %v544_v13  ;;  %v16484_v30 = vcombine.high %v520_v24, %v528_v26  ;;  %v728_v48 = vld [vmem:[#allocation5 + $0x1290] sm:$0xff] }
 0x189   :  { %6651 = vmatpush2.bf16.msra.mxu0 %v16339_v34  ;;  %v1016_v34 = vld [vmem:[#allocation5 + $0x1b90] sm:$0xff] }
 0x18a   :  { %6652 = vmatprep.subr.bf16.mxu0 %v16324_v36  ;;  %v16227_v36 = vcombine.low %v264_v21, %v272_v23  ;;  %v736_v49 = vld [vmem:[#allocation5 + $0x12d0] sm:$0xff] }
 0x18b   :  { %6692 = vmatpush2.bf16.msra.mxu1 %v16595_v35  ;;  %v1024_v35 = vld [vmem:[#allocation5 + $0x1bd0] sm:$0xff] }
 0x18c   :  { %6693 = vmatprep.subr.bf16.mxu1 %v16580_v37  ;;  %v16483_v37 = vcombine.low %v520_v24, %v528_v26  ;;  %v16980_v41 = vcombine.high %v1016_v34, %v1024_v35  ;;  %v712_v3 = vld [vmem:[#allocation5 + $0x1210] sm:$0xff] }
 0x18d   :  { %6653 = vmatpush2.bf16.msra.mxu0 %v16323_v44  ;;  %v1000_v44 = vld [vmem:[#allocation5 + $0x1b10] sm:$0xff] }
 0x18e   :  { %6654 = vmatprep.subr.bf16.mxu0 %v16308_v46  ;;  %v16723_v46 = vcombine.low %v760_v31, %v768_v32  ;;  %v720_v4 = vld [vmem:[#allocation5 + $0x1250] sm:$0xff] }
 0x18f   :  { %6694 = vmatpush2.bf16.msra.mxu1 %v16579_v45  ;;  %v1008_v45 = vld [vmem:[#allocation5 + $0x1b50] sm:$0xff]  ;;  %v16676_v11 = vcombine.high %v712_v3, %v720_v4  ;;  %v16675_v21 = vcombine.low %v712_v3, %v720_v4 }
 0x190   :  { %6695 = vmatprep.subr.bf16.mxu1 %v16564_v47  ;;  %v16979_v47 = vcombine.low %v1016_v34, %v1024_v35  ;;  %v16964_v22 = vcombine.high %v1000_v44, %v1008_v45  ;;  %v16963_v61 = vcombine.low %v1000_v44, %v1008_v45  ;;  %v968_v5 = vld [vmem:[#allocation5 + $0x1a10] sm:$0xff] }
 0x191   :  { %6655 = vmatpush2.bf16.msra.mxu0 %v16307_v50  ;;  %v1128_v3 = vld [vmem:[#allocation5 + $0x1f10] sm:$0xff] }
 0x192   :  { %6656 = vmatprep.subr.bf16.mxu0 %v16292_v52  ;;  %v992_v52 = vld [vmem:[#allocation5 + $0x1ad0] sm:$0xff] }
 0x193   :  { %6696 = vmatpush2.bf16.msra.mxu1 %v16563_v51  ;;  %v984_v51 = vld [vmem:[#allocation5 + $0x1a90] sm:$0xff] }
 0x194   :  { %6697 = vmatprep.subr.bf16.mxu1 %v16548_v55  ;;  %v16948_v2 = vcombine.high %v984_v51, %v992_v52  ;;  %v1136_v4 = vld [vmem:[#allocation5 + $0x1f50] sm:$0xff] }
 0x195   :  { %6657 = vmatpush2.bf16.msra.mxu0 %v16291_v62  ;;  %v16692_v62 = vcombine.high %v728_v48, %v736_v49 }
 0x196   :  { %6658 = vmatprep.subr.bf16.mxu0 %v16276_v0 }
 0x197   :  { %6698 = vmatpush2.bf16.msra.mxu1 %v16547_v63 }
 0x198   :  { %6699 = vmatprep.subr.bf16.mxu1 %v16532_v1 }
 0x199   :  { %6659 = vmatpush2.bf16.msra.mxu0 %v16275_v6  ;;  %v976_v6 = vld [vmem:[#allocation5 + $0x1a50] sm:$0xff] }
 0x19a   :  { %6660 = vmatprep.subr.bf16.mxu0 %v16260_v8  ;;  %v16932_v13 = vcombine.high %v968_v5, %v976_v6  ;;  %v16931_v23 = vcombine.low %v968_v5, %v976_v6 }
 0x19b   :  { %6700 = vmatpush2.bf16.msra.mxu1 %v16531_v7 }
 0x19c   :  { %6701 = vmatprep.subr.bf16.mxu1 %v16516_v9  ;;  %v16691_v9 = vcombine.low %v728_v48, %v736_v49 }
 0x19d   :  { %6661 = vmatpush2.bf16.msra.mxu0 %v16259_v14  ;;  %v696_v14 = vld [vmem:[#allocation5 + $0x1190] sm:$0xff] }
 0x19e   :  { %6662 = vmatprep.subr.bf16.mxu0 %v16244_v17  ;;  %v952_v17 = vld [vmem:[#allocation5 + $0x1990] sm:$0xff] }
 0x19f   :  { %6702 = vmatpush2.bf16.msra.mxu1 %v16515_v15  ;;  %v704_v15 = vld [vmem:[#allocation5 + $0x11d0] sm:$0xff] }
 0x1a0   :  { %6703 = vmatprep.subr.bf16.mxu1 %v16500_v18  ;;  %v960_v18 = vld [vmem:[#allocation5 + $0x19d0] sm:$0xff]  ;;  %v16660_v24 = vcombine.high %v696_v14, %v704_v15  ;;  %v16659_v31 = vcombine.low %v696_v14, %v704_v15 }
 0x1a1   :  { %6663 = vmatpush2.bf16.msra.mxu0 %v16243_v53  ;;  %v16916_v26 = vcombine.high %v952_v17, %v960_v18  ;;  %v680_v53 = vld [vmem:[#allocation5 + $0x1110] sm:$0xff]  ;;  %v16915_v32 = vcombine.low %v952_v17, %v960_v18 }
 0x1a2   :  { %6664 = vmatprep.subr.bf16.mxu0 %v16228_v28  ;;  %v936_v28 = vld [vmem:[#allocation5 + $0x1910] sm:$0xff] }
 0x1a3   :  { %6704 = vmatpush2.bf16.msra.mxu1 %v16499_v27  ;;  %v688_v27 = vld [vmem:[#allocation5 + $0x1150] sm:$0xff] }
 0x1a4   :  { %6705 = vmatprep.subr.bf16.mxu1 %v16484_v30  ;;  %v944_v30 = vld [vmem:[#allocation5 + $0x1950] sm:$0xff]  ;;  %v16644_v34 = vcombine.high %v680_v53, %v688_v27  ;;  %v16643_v42 = vcombine.low %v680_v53, %v688_v27 }
 0x1a5   :  { %6665 = vmatpush2.bf16.msra.mxu0 %v16227_v36  ;;  %v16900_v35 = vcombine.high %v936_v28, %v944_v30  ;;  %v664_v36 = vld [vmem:[#allocation5 + $0x1090] sm:$0xff]  ;;  %v16899_v43 = vcombine.low %v936_v28, %v944_v30 }
 0x1a6   :  { %6716 = vmatprep.subr.bf16.mxu0 %v16724_v40  ;;  %v920_v40 = vld [vmem:[#allocation5 + $0x1890] sm:$0xff] }
 0x1a7   :  { %6706 = vmatpush2.bf16.msra.mxu1 %v16483_v37  ;;  %v672_v37 = vld [vmem:[#allocation5 + $0x10d0] sm:$0xff] }
 0x1a8   :  { %6757 = vmatprep.subr.bf16.mxu1 %v16980_v41  ;;  %v6422_v50 = vpop.f32.mrf.mxu0  ;;  %6667 = vmatmul.mubr.bf16.vlgmr.msra.gmra.mxu0 %v18679_v16  ;;  %v928_v41 = vld [vmem:[#allocation5 + $0x18d0] sm:$0xff]  ;;  %v16628_v44 = vcombine.high %v664_v36, %v672_v37  ;;  %v16627_v48 = vcombine.low %v664_v36, %v672_v37 }
 0x1a9   :  { %v6423_v55 = vadd.f32 %v6422_v50, %v18719_v25  ;;  %6717 = vmatpush1.bf16.msra.mxu0 %v16723_v46  ;;  %6748 = vmatprep.mubr.bf16.mxu0 %v18691_v29  ;;  %v16884_v45 = vcombine.high %v920_v40, %v928_v41  ;;  %v648_v46 = vld [vmem:[#allocation5 + $0x1010] sm:$0xff]  ;;  %v16883_v49 = vcombine.low %v920_v40, %v928_v41 }
 0x1aa   :  { %v6463_v56 = vpop.f32.mrf.mxu1  ;;  %6708 = vmatmul.mubr.bf16.vlgmr.msra.gmra.mxu1 %v18685_v20  ;;  %v6424_v60 = vpop.f32.mrf.mxu0  ;;  %6718 = vmatprep.subr.bf16.mxu0 %v16708_v19  ;;  %v904_v19 = vld [vmem:[#allocation5 + $0x1810] sm:$0xff] }
 0x1ab   :  { %6758 = vmatpush1.bf16.msra.mxu1 %v16979_v47  ;;  %v18728_v63 = vadd.f32 %v6463_v56, %v6423_v55  ;;  %v6425_v0 = vadd.f32 %v6424_v60, %v18722_v33  ;;  %6789 = vmatprep.mubr.bf16.mxu1 %v18696_v54  ;;  %v16947_v33 = vcombine.low %v984_v51, %v992_v52  ;;  %v656_v47 = vld [vmem:[#allocation5 + $0x1050] sm:$0xff] }
 0x1ac   :  { %v6465_v1 = vpop.f32.mrf.mxu1  ;;  %6759 = vmatprep.subr.bf16.mxu1 %v16964_v22  ;;  %v6426_v25 = vpop.f32.mrf.mxu0  ;;  %v912_v22 = vld [vmem:[#allocation5 + $0x1850] sm:$0xff]  ;;  %v16612_v50 = vcombine.high %v648_v46, %v656_v47  ;;  %v16611_v60 = vcombine.low %v648_v46, %v656_v47 }
 0x1ad   :  { %v18733_v7 = vadd.f32 %v6465_v1, %v6425_v0  ;;  %6719 = vmatpush1.bf16.msra.mxu0 %v16707_v57  ;;  %v16868_v51 = vcombine.high %v904_v19, %v912_v22  ;;  %v888_v52 = vld [vmem:[#allocation5 + $0x1790] sm:$0xff] }
 0x1ae   :  { %v6467_v8 = vpop.f32.mrf.mxu1  ;;  %v6427_v10 = vpop.f32.mrf.mxu0  ;;  %6720 = vmatprep.subr.bf16.mxu0 %v16692_v62  ;;  %v896_v55 = vld [vmem:[#allocation5 + $0x17d0] sm:$0xff] }
 0x1af   :  { %6760 = vmatpush1.bf16.msra.mxu1 %v16963_v61  ;;  %v1144_v56 = vld [vmem:[#allocation5 + $0x1f90] sm:$0xff]  ;;  %v16867_v61 = vcombine.low %v904_v19, %v912_v22  ;;  %v16852_v62 = vcombine.high %v888_v52, %v896_v55  ;;  %v16851_v25 = vcombine.low %v888_v52, %v896_v55  ;;  %v17092_v8 = vcombine.high %v1128_v3, %v1136_v4 }
 0x1b0   :  { %v6468_v12 = vpop.f32.mrf.mxu1  ;;  %6761 = vmatprep.subr.bf16.mxu1 %v16948_v2  ;;  %v1152_v57 = vld [vmem:[#allocation5 + $0x1fd0] sm:$0xff] }
 0x1b1   :  { %6721 = vmatpush1.bf16.msra.mxu0 %v16691_v9  ;;  %v17108_v0 = vcombine.high %v1144_v56, %v1152_v57  ;;  %v872_v1 = vld [vmem:[#allocation5 + $0x1710] sm:$0xff]  ;;  %v17107_v5 = vcombine.low %v1144_v56, %v1152_v57 }
 0x1b2   :  { %6722 = vmatprep.subr.bf16.mxu0 %v16676_v11  ;;  %v880_v2 = vld [vmem:[#allocation5 + $0x1750] sm:$0xff] }
 0x1b3   :  { %6762 = vmatpush1.bf16.msra.mxu1 %v16947_v33  ;;  %v16836_v6 = vcombine.high %v872_v1, %v880_v2  ;;  %v856_v9 = vld [vmem:[#allocation5 + $0x1690] sm:$0xff]  ;;  %v16835_v12 = vcombine.low %v872_v1, %v880_v2 }
 0x1b4   :  { %6763 = vmatprep.subr.bf16.mxu1 %v16932_v13  ;;  %v864_v10 = vld [vmem:[#allocation5 + $0x16d0] sm:$0xff]  ;;  %v17091_v13 = vcombine.low %v1128_v3, %v1136_v4  ;;  %v249_v3 = vld [vmem:[#allocation5 + $0x398] sm:$0xff] }
 0x1b5   :  { %6723 = vmatpush1.bf16.msra.mxu0 %v16675_v21  ;;  %v1112_v33 = vld [vmem:[#allocation5 + $0x1e90] sm:$0xff]  ;;  %v16820_v14 = vcombine.high %v856_v9, %v864_v10  ;;  %v257_v4 = vld [vmem:[#allocation5 + $0x3d8] sm:$0xff] }
 0x1b6   :  { %6724 = vmatprep.subr.bf16.mxu0 %v16660_v24  ;;  %v1120_v11 = vld [vmem:[#allocation5 + $0x1ed0] sm:$0xff]  ;;  %v16819_v24 = vcombine.low %v856_v9, %v864_v10  ;;  %v16214_v9 = vcombine.high %v249_v3, %v257_v4 }
 0x1b7   :  { %6764 = vmatpush1.bf16.msra.mxu1 %v16931_v23  ;;  %v17076_v15 = vcombine.high %v1112_v33, %v1120_v11  ;;  %v840_v17 = vld [vmem:[#allocation5 + $0x1610] sm:$0xff] }
 0x1b8   :  { %6765 = vmatprep.subr.bf16.mxu1 %v16916_v26  ;;  %v848_v18 = vld [vmem:[#allocation5 + $0x1650] sm:$0xff]  ;;  %v17075_v26 = vcombine.low %v1112_v33, %v1120_v11  ;;  %v233_v33 = vld [vmem:[#allocation5 + $0x318] sm:$0xff] }
 0x1b9   :  { %6725 = vmatpush1.bf16.msra.mxu0 %v16659_v31  ;;  %v1096_v21 = vld [vmem:[#allocation5 + $0x1e10] sm:$0xff]  ;;  %v16804_v53 = vcombine.high %v840_v17, %v848_v18  ;;  %v241_v11 = vld [vmem:[#allocation5 + $0x358] sm:$0xff] }
 0x1ba   :  { %6726 = vmatprep.subr.bf16.mxu0 %v16644_v34  ;;  %v1104_v23 = vld [vmem:[#allocation5 + $0x1e50] sm:$0xff]  ;;  %v16803_v34 = vcombine.low %v840_v17, %v848_v18  ;;  %v16198_v17 = vcombine.high %v233_v33, %v241_v11 }
 0x1bb   :  { %6766 = vmatpush1.bf16.msra.mxu1 %v16915_v32  ;;  %v17060_v27 = vcombine.high %v1096_v21, %v1104_v23  ;;  %v824_v28 = vld [vmem:[#allocation5 + $0x1590] sm:$0xff] }
 0x1bc   :  { %6767 = vmatprep.subr.bf16.mxu1 %v16900_v35  ;;  %v832_v30 = vld [vmem:[#allocation5 + $0x15d0] sm:$0xff]  ;;  %v17059_v35 = vcombine.low %v1096_v21, %v1104_v23  ;;  %v217_v21 = vld [vmem:[#allocation5 + $0x298] sm:$0xff] }
 0x1bd   :  { %6727 = vmatpush1.bf16.msra.mxu0 %v16643_v42  ;;  %v1080_v31 = vld [vmem:[#allocation5 + $0x1d90] sm:$0xff]  ;;  %v16788_v36 = vcombine.high %v824_v28, %v832_v30  ;;  %v225_v23 = vld [vmem:[#allocation5 + $0x2d8] sm:$0xff] }
 0x1be   :  { %6728 = vmatprep.subr.bf16.mxu0 %v16628_v44  ;;  %v1088_v32 = vld [vmem:[#allocation5 + $0x1dd0] sm:$0xff]  ;;  %v16787_v44 = vcombine.low %v824_v28, %v832_v30  ;;  %v16197_v28 = vcombine.low %v233_v33, %v241_v11 }
 0x1bf   :  { %6768 = vmatpush1.bf16.msra.mxu1 %v16899_v43  ;;  %v17044_v37 = vcombine.high %v1080_v31, %v1088_v32  ;;  %v808_v40 = vld [vmem:[#allocation5 + $0x1510] sm:$0xff] }
 0x1c0   :  { %6769 = vmatprep.subr.bf16.mxu1 %v16884_v45  ;;  %v816_v41 = vld [vmem:[#allocation5 + $0x1550] sm:$0xff]  ;;  %v17043_v45 = vcombine.low %v1080_v31, %v1088_v32 }
 0x1c1   :  { %6729 = vmatpush1.bf16.msra.mxu0 %v16627_v48  ;;  %v1064_v42 = vld [vmem:[#allocation5 + $0x1d10] sm:$0xff]  ;;  %v16772_v46 = vcombine.high %v808_v40, %v816_v41 }
 0x1c2   :  { %6730 = vmatprep.subr.bf16.mxu0 %v16612_v50  ;;  %v1072_v43 = vld [vmem:[#allocation5 + $0x1d50] sm:$0xff]  ;;  %v16771_v50 = vcombine.low %v808_v40, %v816_v41  ;;  %v209_v40 = vld [vmem:[#allocation5 + $0x258] sm:$0xff] }
 0x1c3   :  { %6770 = vmatpush1.bf16.msra.mxu1 %v16883_v49  ;;  %v17028_v47 = vcombine.high %v1064_v42, %v1072_v43  ;;  %v792_v19 = vld [vmem:[#allocation5 + $0x1490] sm:$0xff] }
 0x1c4   :  { %6771 = vmatprep.subr.bf16.mxu1 %v16868_v51  ;;  %v800_v22 = vld [vmem:[#allocation5 + $0x14d0] sm:$0xff]  ;;  %v17027_v51 = vcombine.low %v1064_v42, %v1072_v43  ;;  %v457_v43 = vld [vmem:[#allocation5 + $0xa18] sm:$0xff] }
 0x1c5   :  { %6731 = vmatpush1.bf16.msra.mxu0 %v16611_v60  ;;  %v1048_v48 = vld [vmem:[#allocation5 + $0x1c90] sm:$0xff]  ;;  %v16756_v52 = vcombine.high %v792_v19, %v800_v22 }
 0x1c6   :  { %6732 = vmatprep.subr.bf16.mxu0 %v16852_v62  ;;  %v1056_v49 = vld [vmem:[#allocation5 + $0x1cd0] sm:$0xff]  ;;  %v16755_v62 = vcombine.low %v792_v19, %v800_v22 }
 0x1c7   :  { %6772 = vmatpush1.bf16.msra.mxu1 %v16867_v61  ;;  %v17012_v55 = vcombine.high %v1048_v48, %v1056_v49  ;;  %v776_v56 = vld [vmem:[#allocation5 + $0x1410] sm:$0xff] }
 0x1c8   :  { %6773 = vmatprep.subr.bf16.mxu1 %v17108_v0  ;;  %v784_v57 = vld [vmem:[#allocation5 + $0x1450] sm:$0xff]  ;;  %v17011_v0 = vcombine.low %v1048_v48, %v1056_v49 }
 0x1c9   :  { %6733 = vmatpush2.bf16.msra.mxu0 %v16851_v25  ;;  %v1032_v60 = vld [vmem:[#allocation5 + $0x1c10] sm:$0xff]  ;;  %v16740_v1 = vcombine.high %v776_v56, %v784_v57  ;;  %v505_v25 = vld [vmem:[#allocation5 + $0xb98] sm:$0xff] }
 0x1ca   :  { %6734 = vmatprep.subr.bf16.mxu0 %v16836_v6  ;;  %v1040_v61 = vld [vmem:[#allocation5 + $0x1c50] sm:$0xff]  ;;  %v16739_v6 = vcombine.low %v776_v56, %v784_v57 }
 0x1cb   :  { %6774 = vmatpush2.bf16.msra.mxu1 %v17107_v5  ;;  %v16996_v2 = vcombine.high %v1032_v60, %v1040_v61  ;;  %v513_v5 = vld [vmem:[#allocation5 + $0xbd8] sm:$0xff] }
 0x1cc   :  { %6775 = vmatprep.subr.bf16.mxu1 %v17092_v8  ;;  %v16995_v8 = vcombine.low %v1032_v60, %v1040_v61  ;;  %v16470_v10 = vcombine.high %v505_v25, %v513_v5 }
 0x1cd   :  { %6735 = vmatpush2.bf16.msra.mxu0 %v16835_v12  ;;  %v489_v12 = vld [vmem:[#allocation5 + $0xb18] sm:$0xff] }
 0x1ce   :  { %6736 = vmatprep.subr.bf16.mxu0 %v16820_v14  ;;  %v16213_v14 = vcombine.low %v249_v3, %v257_v4 }
 0x1cf   :  { %6776 = vmatpush2.bf16.msra.mxu1 %v17091_v13  ;;  %v497_v13 = vld [vmem:[#allocation5 + $0xb58] sm:$0xff] }
 0x1d0   :  { %6777 = vmatprep.subr.bf16.mxu1 %v17076_v15  ;;  %v16469_v15 = vcombine.low %v505_v25, %v513_v5  ;;  %v16454_v18 = vcombine.high %v489_v12, %v497_v13  ;;  %v16453_v32 = vcombine.low %v489_v12, %v497_v13 }
 0x1d1   :  { %6737 = vmatpush2.bf16.msra.mxu0 %v16819_v24 }
 0x1d2   :  { %6738 = vmatprep.subr.bf16.mxu0 %v16804_v53  ;;  %v481_v53 = vld [vmem:[#allocation5 + $0xad8] sm:$0xff] }
 0x1d3   :  { %6778 = vmatpush2.bf16.msra.mxu1 %v17075_v26  ;;  %v473_v26 = vld [vmem:[#allocation5 + $0xa98] sm:$0xff] }
 0x1d4   :  { %6779 = vmatprep.subr.bf16.mxu1 %v17060_v27  ;;  %v16437_v19 = vcombine.low %v473_v26, %v481_v53 }
 0x1d5   :  { %6739 = vmatpush2.bf16.msra.mxu0 %v16803_v34  ;;  %v16182_v34 = vcombine.high %v217_v21, %v225_v23 }
 0x1d6   :  { %6740 = vmatprep.subr.bf16.mxu0 %v16788_v36  ;;  %v16438_v36 = vcombine.high %v473_v26, %v481_v53  ;;  %v377_v53 = vld [vmem:[#allocation5 + $0x798] sm:$0xff] }
 0x1d7   :  { %6780 = vmatpush2.bf16.msra.mxu1 %v17059_v35 }
 0x1d8   :  { %6781 = vmatprep.subr.bf16.mxu1 %v17044_v37  ;;  %v201_v37 = vld [vmem:[#allocation5 + $0x218] sm:$0xff] }
 0x1d9   :  { %6741 = vmatpush2.bf16.msra.mxu0 %v16787_v44  ;;  %v465_v44 = vld [vmem:[#allocation5 + $0xa58] sm:$0xff]  ;;  %v16166_v22 = vcombine.high %v201_v37, %v209_v40  ;;  %v16165_v56 = vcombine.low %v201_v37, %v209_v40 }
 0x1da   :  { %6742 = vmatprep.subr.bf16.mxu0 %v16772_v46  ;;  %v16181_v46 = vcombine.low %v217_v21, %v225_v23  ;;  %v16422_v49 = vcombine.high %v457_v43, %v465_v44  ;;  %v16421_v57 = vcombine.low %v457_v43, %v465_v44  ;;  %v361_v37 = vld [vmem:[#allocation5 + $0x718] sm:$0xff] }
 0x1db   :  { %6782 = vmatpush2.bf16.msra.mxu1 %v17043_v45  ;;  %v369_v40 = vld [vmem:[#allocation5 + $0x758] sm:$0xff] }
 0x1dc   :  { %6783 = vmatprep.subr.bf16.mxu1 %v17028_v47  ;;  %v625_v43 = vld [vmem:[#allocation5 + $0xf58] sm:$0xff] }
 0x1dd   :  { %6743 = vmatpush2.bf16.msra.mxu0 %v16771_v50  ;;  %v185_v50 = vld [vmem:[#allocation5 + $0x198] sm:$0xff] }
 0x1de   :  { %6744 = vmatprep.subr.bf16.mxu0 %v16756_v52  ;;  %v441_v52 = vld [vmem:[#allocation5 + $0x998] sm:$0xff] }
 0x1df   :  { %6784 = vmatpush2.bf16.msra.mxu1 %v17027_v51  ;;  %v193_v51 = vld [vmem:[#allocation5 + $0x1d8] sm:$0xff] }
 0x1e0   :  { %6785 = vmatprep.subr.bf16.mxu1 %v17012_v55  ;;  %v449_v55 = vld [vmem:[#allocation5 + $0x9d8] sm:$0xff]  ;;  %v16150_v60 = vcombine.high %v185_v50, %v193_v51  ;;  %v16149_v3 = vcombine.low %v185_v50, %v193_v51  ;;  %v16325_v50 = vcombine.low %v361_v37, %v369_v40 }
 0x1e1   :  { %6745 = vmatpush2.bf16.msra.mxu0 %v16755_v62  ;;  %v16406_v61 = vcombine.high %v441_v52, %v449_v55  ;;  %v169_v62 = vld [vmem:[#allocation5 + $0x118] sm:$0xff]  ;;  %v16405_v4 = vcombine.low %v441_v52, %v449_v55 }
 0x1e2   :  { %6746 = vmatprep.subr.bf16.mxu0 %v16740_v1  ;;  %v425_v1 = vld [vmem:[#allocation5 + $0x918] sm:$0xff] }
 0x1e3   :  { %6786 = vmatpush2.bf16.msra.mxu1 %v17011_v0  ;;  %v177_v0 = vld [vmem:[#allocation5 + $0x158] sm:$0xff] }
 0x1e4   :  { %6787 = vmatprep.subr.bf16.mxu1 %v16996_v2  ;;  %v433_v2 = vld [vmem:[#allocation5 + $0x958] sm:$0xff]  ;;  %v16134_v25 = vcombine.high %v169_v62, %v177_v0  ;;  %v16133_v33 = vcombine.low %v169_v62, %v177_v0 }
 0x1e5   :  { %6747 = vmatpush2.bf16.msra.mxu0 %v16739_v6  ;;  %v16390_v5 = vcombine.high %v425_v1, %v433_v2  ;;  %v153_v6 = vld [vmem:[#allocation5 + $0x98] sm:$0xff]  ;;  %v16389_v11 = vcombine.low %v425_v1, %v433_v2 }
 0x1e6   :  { %6798 = vmatprep.subr.bf16.mxu0 %v16214_v9  ;;  %v409_v9 = vld [vmem:[#allocation5 + $0x898] sm:$0xff] }
 0x1e7   :  { %6788 = vmatpush2.bf16.msra.mxu1 %v16995_v8  ;;  %v161_v8 = vld [vmem:[#allocation5 + $0xd8] sm:$0xff] }
 0x1e8   :  { %6839 = vmatprep.subr.bf16.mxu1 %v16470_v10  ;;  %v6504_v24 = vpop.f32.mrf.mxu0  ;;  %6749 = vmatmul.mubr.bf16.vlgmr.msra.gmra.mxu0 %v18703_v38  ;;  %v417_v10 = vld [vmem:[#allocation5 + $0x8d8] sm:$0xff]  ;;  %v16118_v12 = vcombine.high %v153_v6, %v161_v8  ;;  %v16117_v21 = vcombine.low %v153_v6, %v161_v8 }
 0x1e9   :  { %6799 = vmatpush1.bf16.msra.mxu0 %v16213_v14  ;;  %6830 = vmatprep.mubr.bf16.mxu0 %v18669_v58  ;;  %v16374_v13 = vcombine.high %v409_v9, %v417_v10  ;;  %v137_v14 = vld [vmem:[#allocation5 + $0x18] sm:$0xff]  ;;  %v16373_v23 = vcombine.low %v409_v9, %v417_v10 }
 0x1ea   :  { %v6545_v27 = vpop.f32.mrf.mxu1  ;;  %6790 = vmatmul.mubr.bf16.vlgmr.msra.gmra.mxu1 %v18707_v39  ;;  %v6506_v31 = vpop.f32.mrf.mxu0  ;;  %6800 = vmatprep.subr.bf16.mxu0 %v16198_v17  ;;  %v393_v17 = vld [vmem:[#allocation5 + $0x818] sm:$0xff] }
 0x1eb   :  { %v18737_v30 = vadd.f32 %v6545_v27, %v6504_v24  ;;  %6840 = vmatpush1.bf16.msra.mxu1 %v16469_v15  ;;  %6871 = vmatprep.mubr.bf16.mxu1 %v18673_v59  ;;  %v145_v15 = vld [vmem:[#allocation5 + $0x58] sm:$0xff] }
 0x1ec   :  { %v6547_v35 = vpop.f32.mrf.mxu1  ;;  %6841 = vmatprep.subr.bf16.mxu1 %v16454_v18  ;;  %v6508_v42 = vpop.f32.mrf.mxu0  ;;  %v401_v18 = vld [vmem:[#allocation5 + $0x858] sm:$0xff]  ;;  %v16102_v24 = vcombine.high %v137_v14, %v145_v15 }
 0x1ed   :  { %v18740_v41 = vadd.f32 %v6547_v35, %v6506_v31  ;;  %6801 = vmatpush1.bf16.msra.mxu0 %v16197_v28  ;;  %v16358_v26 = vcombine.high %v393_v17, %v401_v18  ;;  %v385_v27 = vld [vmem:[#allocation5 + $0x7d8] sm:$0xff] }
 0x1ee   :  { %v6549_v45 = vpop.f32.mrf.mxu1  ;;  %v6509_v47 = vpop.f32.mrf.mxu0  ;;  %6802 = vmatprep.subr.bf16.mxu0 %v16182_v34  ;;  %v633_v28 = vld [vmem:[#allocation5 + $0xf98] sm:$0xff]  ;;  %v16357_v34 = vcombine.low %v393_v17, %v401_v18  ;;  %v16342_v35 = vcombine.high %v377_v53, %v385_v27  ;;  %v16341_v44 = vcombine.low %v377_v53, %v385_v27 }
 0x1ef   :  { %6842 = vmatpush1.bf16.msra.mxu1 %v16453_v32  ;;  %v641_v31 = vld [vmem:[#allocation5 + $0xfd8] sm:$0xff]  ;;  %v16101_v32 = vcombine.low %v137_v14, %v145_v15 }
 0x1f0   :  { %v6550_v48 = vpop.f32.mrf.mxu1  ;;  %6843 = vmatprep.subr.bf16.mxu1 %v16438_v36  ;;  %v16598_v36 = vcombine.high %v633_v28, %v641_v31  ;;  %v617_v42 = vld [vmem:[#allocation5 + $0xf18] sm:$0xff]  ;;  %v16597_v45 = vcombine.low %v633_v28, %v641_v31 }
 0x1f1   :  { %6803 = vmatpush1.bf16.msra.mxu0 %v16181_v46  ;;  %v16326_v46 = vcombine.high %v361_v37, %v369_v40  ;;  %v16582_v47 = vcombine.high %v617_v42, %v625_v43  ;;  %v601_v48 = vld [vmem:[#allocation5 + $0xe98] sm:$0xff]  ;;  %v16581_v51 = vcombine.low %v617_v42, %v625_v43 }
 0x1f2   :  { %6804 = vmatprep.subr.bf16.mxu0 %v16166_v22  ;;  %v353_v22 = vld [vmem:[#allocation5 + $0x6d8] sm:$0xff] }
 0x1f3   :  { %6844 = vmatpush1.bf16.msra.mxu1 %v16437_v19  ;;  %v345_v19 = vld [vmem:[#allocation5 + $0x698] sm:$0xff] }
 0x1f4   :  { %6845 = vmatprep.subr.bf16.mxu1 %v16422_v49  ;;  %v609_v49 = vld [vmem:[#allocation5 + $0xed8] sm:$0xff]  ;;  %v16310_v52 = vcombine.high %v345_v19, %v353_v22  ;;  %v16309_v62 = vcombine.low %v345_v19, %v353_v22 }
 0x1f5   :  { %6805 = vmatpush1.bf16.msra.mxu0 %v16165_v56  ;;  %v16566_v55 = vcombine.high %v601_v48, %v609_v49  ;;  %v329_v56 = vld [vmem:[#allocation5 + $0x618] sm:$0xff]  ;;  %v16565_v0 = vcombine.low %v601_v48, %v609_v49 }
 0x1f6   :  { %6806 = vmatprep.subr.bf16.mxu0 %v16150_v60  ;;  %v585_v60 = vld [vmem:[#allocation5 + $0xe18] sm:$0xff] }
 0x1f7   :  { %6846 = vmatpush1.bf16.msra.mxu1 %v16421_v57  ;;  %v337_v57 = vld [vmem:[#allocation5 + $0x658] sm:$0xff] }
 0x1f8   :  { %6847 = vmatprep.subr.bf16.mxu1 %v16406_v61  ;;  %v593_v61 = vld [vmem:[#allocation5 + $0xe58] sm:$0xff]  ;;  %v16294_v1 = vcombine.high %v329_v56, %v337_v57  ;;  %v16293_v6 = vcombine.low %v329_v56, %v337_v57 }
 0x1f9   :  { %6807 = vmatpush1.bf16.msra.mxu0 %v16149_v3  ;;  %v16550_v2 = vcombine.high %v585_v60, %v593_v61  ;;  %v313_v3 = vld [vmem:[#allocation5 + $0x598] sm:$0xff]  ;;  %v16549_v8 = vcombine.low %v585_v60, %v593_v61 }
 0x1fa   :  { %6808 = vmatprep.subr.bf16.mxu0 %v16134_v25  ;;  %v569_v25 = vld [vmem:[#allocation5 + $0xd98] sm:$0xff] }
 0x1fb   :  { %6848 = vmatpush1.bf16.msra.mxu1 %v16405_v4  ;;  %v321_v4 = vld [vmem:[#allocation5 + $0x5d8] sm:$0xff] }
 0x1fc   :  { %6849 = vmatprep.subr.bf16.mxu1 %v16390_v5  ;;  %v577_v5 = vld [vmem:[#allocation5 + $0xdd8] sm:$0xff]  ;;  %v16278_v9 = vcombine.high %v313_v3, %v321_v4  ;;  %v16277_v14 = vcombine.low %v313_v3, %v321_v4 }
 0x1fd   :  { %6809 = vmatpush1.bf16.msra.mxu0 %v16133_v33  ;;  %v16534_v10 = vcombine.high %v569_v25, %v577_v5  ;;  %v297_v33 = vld [vmem:[#allocation5 + $0x518] sm:$0xff]  ;;  %v16533_v15 = vcombine.low %v569_v25, %v577_v5 }
 0x1fe   :  { %6810 = vmatprep.subr.bf16.mxu0 %v16118_v12  ;;  %v553_v12 = vld [vmem:[#allocation5 + $0xd18] sm:$0xff] }
 0x1ff   :  { %6850 = vmatpush1.bf16.msra.mxu1 %v16389_v11  ;;  %v305_v11 = vld [vmem:[#allocation5 + $0x558] sm:$0xff] }
 0x200   :  { %6851 = vmatprep.subr.bf16.mxu1 %v16374_v13  ;;  %v561_v13 = vld [vmem:[#allocation5 + $0xd58] sm:$0xff]  ;;  %v16262_v17 = vcombine.high %v297_v33, %v305_v11  ;;  %v16261_v53 = vcombine.low %v297_v33, %v305_v11 }
 0x201   :  { %6811 = vmatpush1.bf16.msra.mxu0 %v16117_v21  ;;  %v16518_v18 = vcombine.high %v553_v12, %v561_v13  ;;  %v281_v21 = vld [vmem:[#allocation5 + $0x498] sm:$0xff]  ;;  %v16517_v27 = vcombine.low %v553_v12, %v561_v13 }
 0x202   :  { %6812 = vmatprep.subr.bf16.mxu0 %v16102_v24  ;;  %v537_v24 = vld [vmem:[#allocation5 + $0xc98] sm:$0xff] }
 0x203   :  { %6852 = vmatpush1.bf16.msra.mxu1 %v16373_v23  ;;  %v289_v23 = vld [vmem:[#allocation5 + $0x4d8] sm:$0xff] }
 0x204   :  { %6853 = vmatprep.subr.bf16.mxu1 %v16358_v26  ;;  %v545_v26 = vld [vmem:[#allocation5 + $0xcd8] sm:$0xff]  ;;  %v16246_v28 = vcombine.high %v281_v21, %v289_v23  ;;  %v16245_v37 = vcombine.low %v281_v21, %v289_v23 }
 0x205   :  { %6813 = vmatpush1.bf16.msra.mxu0 %v16101_v32  ;;  %v16502_v31 = vcombine.high %v537_v24, %v545_v26  ;;  %v265_v32 = vld [vmem:[#allocation5 + $0x418] sm:$0xff]  ;;  %v16501_v40 = vcombine.low %v537_v24, %v545_v26 }
 0x206   :  { %6814 = vmatprep.subr.bf16.mxu0 %v16342_v35  ;;  %v521_v35 = vld [vmem:[#allocation5 + $0xc18] sm:$0xff] }
 0x207   :  { %6854 = vmatpush1.bf16.msra.mxu1 %v16357_v34  ;;  %v273_v34 = vld [vmem:[#allocation5 + $0x458] sm:$0xff] }
 0x208   :  { %6855 = vmatprep.subr.bf16.mxu1 %v16598_v36  ;;  %v529_v36 = vld [vmem:[#allocation5 + $0xc58] sm:$0xff]  ;;  %v16230_v42 = vcombine.high %v265_v32, %v273_v34  ;;  %v16229_v19 = vcombine.low %v265_v32, %v273_v34 }
 0x209   :  { %6815 = vmatpush2.bf16.msra.mxu0 %v16341_v44  ;;  %v16486_v43 = vcombine.high %v521_v35, %v529_v36  ;;  %v761_v44 = vld [vmem:[#allocation5 + $0x1398] sm:$0xff]  ;;  %v16485_v22 = vcombine.low %v521_v35, %v529_v36 }
 0x20a   :  { %6816 = vmatprep.subr.bf16.mxu0 %v16326_v46  ;;  %v1017_v46 = vld [vmem:[#allocation5 + $0x1b98] sm:$0xff] }
 0x20b   :  { %6856 = vmatpush2.bf16.msra.mxu1 %v16597_v45  ;;  %v769_v45 = vld [vmem:[#allocation5 + $0x13d8] sm:$0xff] }
 0x20c   :  { %6857 = vmatprep.subr.bf16.mxu1 %v16582_v47  ;;  %v1025_v47 = vld [vmem:[#allocation5 + $0x1bd8] sm:$0xff]  ;;  %v16726_v48 = vcombine.high %v761_v44, %v769_v45  ;;  %v16725_v56 = vcombine.low %v761_v44, %v769_v45 }
 0x20d   :  { %6817 = vmatpush2.bf16.msra.mxu0 %v16325_v50  ;;  %v16982_v49 = vcombine.high %v1017_v46, %v1025_v47  ;;  %v745_v50 = vld [vmem:[#allocation5 + $0x1318] sm:$0xff]  ;;  %v16981_v57 = vcombine.low %v1017_v46, %v1025_v47 }
 0x20e   :  { %6818 = vmatprep.subr.bf16.mxu0 %v16310_v52  ;;  %v1001_v52 = vld [vmem:[#allocation5 + $0x1b18] sm:$0xff] }
 0x20f   :  { %6858 = vmatpush2.bf16.msra.mxu1 %v16581_v51  ;;  %v753_v51 = vld [vmem:[#allocation5 + $0x1358] sm:$0xff] }
 0x210   :  { %6859 = vmatprep.subr.bf16.mxu1 %v16566_v55  ;;  %v1009_v55 = vld [vmem:[#allocation5 + $0x1b58] sm:$0xff]  ;;  %v16710_v60 = vcombine.high %v745_v50, %v753_v51  ;;  %v16709_v5 = vcombine.low %v745_v50, %v753_v51 }
 0x211   :  { %6819 = vmatpush2.bf16.msra.mxu0 %v16309_v62  ;;  %v16966_v61 = vcombine.high %v1001_v52, %v1009_v55  ;;  %v729_v62 = vld [vmem:[#allocation5 + $0x1298] sm:$0xff] }
 0x212   :  { %6820 = vmatprep.subr.bf16.mxu0 %v16294_v1  ;;  %v993_v3 = vld [vmem:[#allocation5 + $0x1ad8] sm:$0xff] }
 0x213   :  { %6860 = vmatpush2.bf16.msra.mxu1 %v16565_v0  ;;  %v737_v0 = vld [vmem:[#allocation5 + $0x12d8] sm:$0xff] }
 0x214   :  { %6861 = vmatprep.subr.bf16.mxu1 %v16550_v2  ;;  %v985_v2 = vld [vmem:[#allocation5 + $0x1a98] sm:$0xff]  ;;  %v16693_v23 = vcombine.low %v729_v62, %v737_v0 }
 0x215   :  { %6821 = vmatpush2.bf16.msra.mxu0 %v16293_v6  ;;  %v16950_v12 = vcombine.high %v985_v2, %v993_v3  ;;  %v713_v13 = vld [vmem:[#allocation5 + $0x1218] sm:$0xff] }
 0x216   :  { %6822 = vmatprep.subr.bf16.mxu0 %v16278_v9  ;;  %v16694_v9 = vcombine.high %v729_v62, %v737_v0  ;;  %v953_v32 = vld [vmem:[#allocation5 + $0x1998] sm:$0xff] }
 0x217   :  { %6862 = vmatpush2.bf16.msra.mxu1 %v16549_v8  ;;  %v16965_v8 = vcombine.low %v1001_v52, %v1009_v55  ;;  %v961_v34 = vld [vmem:[#allocation5 + $0x19d8] sm:$0xff] }
 0x218   :  { %6863 = vmatprep.subr.bf16.mxu1 %v16534_v10  ;;  %v937_v44 = vld [vmem:[#allocation5 + $0x1918] sm:$0xff]  ;;  %v16917_v47 = vcombine.low %v953_v32, %v961_v34 }
 0x219   :  { %6823 = vmatpush2.bf16.msra.mxu0 %v16277_v14  ;;  %v721_v14 = vld [vmem:[#allocation5 + $0x1258] sm:$0xff] }
 0x21a   :  { %6824 = vmatprep.subr.bf16.mxu0 %v16262_v17  ;;  %v977_v17 = vld [vmem:[#allocation5 + $0x1a58] sm:$0xff]  ;;  %v16678_v26 = vcombine.high %v713_v13, %v721_v14  ;;  %v16677_v35 = vcombine.low %v713_v13, %v721_v14 }
 0x21b   :  { %6864 = vmatpush2.bf16.msra.mxu1 %v16533_v15  ;;  %v969_v15 = vld [vmem:[#allocation5 + $0x1a18] sm:$0xff] }
 0x21c   :  { %6865 = vmatprep.subr.bf16.mxu1 %v16518_v18  ;;  %v16933_v36 = vcombine.low %v969_v15, %v977_v17  ;;  %v945_v45 = vld [vmem:[#allocation5 + $0x1958] sm:$0xff] }
 0x21d   :  { %6825 = vmatpush2.bf16.msra.mxu0 %v16261_v53  ;;  %v921_v50 = vld [vmem:[#allocation5 + $0x1898] sm:$0xff]  ;;  %v16901_v55 = vcombine.low %v937_v44, %v945_v45 }
 0x21e   :  { %6826 = vmatprep.subr.bf16.mxu0 %v16246_v28  ;;  %v697_v28 = vld [vmem:[#allocation5 + $0x1198] sm:$0xff] }
 0x21f   :  { %6866 = vmatpush2.bf16.msra.mxu1 %v16517_v27  ;;  %v16934_v27 = vcombine.high %v969_v15, %v977_v17  ;;  %v929_v51 = vld [vmem:[#allocation5 + $0x18d8] sm:$0xff] }
 0x220   :  { %6867 = vmatprep.subr.bf16.mxu1 %v16502_v31  ;;  %v705_v31 = vld [vmem:[#allocation5 + $0x11d8] sm:$0xff] }
 0x221   :  { %6827 = vmatpush2.bf16.msra.mxu0 %v16245_v37  ;;  %v16662_v37 = vcombine.high %v697_v28, %v705_v31  ;;  %v16661_v46 = vcombine.low %v697_v28, %v705_v31  ;;  %v905_v62 = vld [vmem:[#allocation5 + $0x1818] sm:$0xff] }
 0x222   :  { %6828 = vmatprep.subr.bf16.mxu0 %v16230_v42  ;;  %v681_v42 = vld [vmem:[#allocation5 + $0x1118] sm:$0xff] }
 0x223   :  { %6868 = vmatpush2.bf16.msra.mxu1 %v16501_v40  ;;  %v16918_v40 = vcombine.high %v953_v32, %v961_v34  ;;  %v913_v0 = vld [vmem:[#allocation5 + $0x1858] sm:$0xff] }
 0x224   :  { %6869 = vmatprep.subr.bf16.mxu1 %v16486_v43  ;;  %v689_v43 = vld [vmem:[#allocation5 + $0x1158] sm:$0xff] }
 0x225   :  { %6829 = vmatpush2.bf16.msra.mxu0 %v16229_v19  ;;  %v16646_v19 = vcombine.high %v681_v42, %v689_v43  ;;  %v16645_v52 = vcombine.low %v681_v42, %v689_v43  ;;  %v873_v13 = vld [vmem:[#allocation5 + $0x1718] sm:$0xff] }
 0x226   :  { %6880 = vmatprep.subr.bf16.mxu0 %v16726_v48  ;;  %v665_v48 = vld [vmem:[#allocation5 + $0x1098] sm:$0xff] }
 0x227   :  { %6870 = vmatpush2.bf16.msra.mxu1 %v16485_v22  ;;  %v16902_v22 = vcombine.high %v937_v44, %v945_v45  ;;  %v881_v14 = vld [vmem:[#allocation5 + $0x1758] sm:$0xff] }
 0x228   :  { %6921 = vmatprep.subr.bf16.mxu1 %v16982_v49  ;;  %v6586_v1 = vpop.f32.mrf.mxu0  ;;  %6831 = vmatmul.mubr.bf16.vlgmr.msra.gmra.mxu0 %v18679_v16  ;;  %v673_v49 = vld [vmem:[#allocation5 + $0x10d8] sm:$0xff]  ;;  %v16837_v28 = vcombine.low %v873_v13, %v881_v14 }
 0x229   :  { %v6587_v4 = vadd.f32 %v6586_v1, %v18737_v30  ;;  %6881 = vmatpush1.bf16.msra.mxu0 %v16725_v56  ;;  %6912 = vmatprep.mubr.bf16.mxu0 %v18691_v29  ;;  %v16630_v56 = vcombine.high %v665_v48, %v673_v49  ;;  %v16629_v1 = vcombine.low %v665_v48, %v673_v49  ;;  %v1137_v15 = vld [vmem:[#allocation5 + $0x1f58] sm:$0xff] }
 0x22a   :  { %v6627_v25 = vpop.f32.mrf.mxu1  ;;  %6872 = vmatmul.mubr.bf16.vlgmr.msra.gmra.mxu1 %v18685_v20  ;;  %v6588_v6 = vpop.f32.mrf.mxu0  ;;  %6882 = vmatprep.subr.bf16.mxu0 %v16710_v60  ;;  %v649_v60 = vld [vmem:[#allocation5 + $0x1018] sm:$0xff] }
 0x22b   :  { %6922 = vmatpush1.bf16.msra.mxu1 %v16981_v57  ;;  %v18746_v10 = vadd.f32 %v6627_v25, %v6587_v4  ;;  %v6589_v33 = vadd.f32 %v6588_v6, %v18740_v41  ;;  %6953 = vmatprep.mubr.bf16.mxu1 %v18696_v54  ;;  %v16949_v41 = vcombine.low %v985_v2, %v993_v3  ;;  %v889_v25 = vld [vmem:[#allocation5 + $0x1798] sm:$0xff] }
 0x22c   :  { %v6629_v11 = vpop.f32.mrf.mxu1  ;;  %6923 = vmatprep.subr.bf16.mxu1 %v16966_v61  ;;  %v6590_v30 = vpop.f32.mrf.mxu0  ;;  %v16886_v57 = vcombine.high %v921_v50, %v929_v51  ;;  %v657_v61 = vld [vmem:[#allocation5 + $0x1058] sm:$0xff]  ;;  %v16885_v2 = vcombine.low %v921_v50, %v929_v51  ;;  %v16870_v4 = vcombine.high %v905_v62, %v913_v0 }
 0x22d   :  { %v18751_v18 = vadd.f32 %v6629_v11, %v6589_v33  ;;  %6883 = vmatpush1.bf16.msra.mxu0 %v16709_v5  ;;  %v16614_v3 = vcombine.high %v649_v60, %v657_v61  ;;  %v897_v5 = vld [vmem:[#allocation5 + $0x17d8] sm:$0xff]  ;;  %v16869_v33 = vcombine.low %v905_v62, %v913_v0 }
 0x22e   :  { %v6631_v21 = vpop.f32.mrf.mxu1  ;;  %v6591_v24 = vpop.f32.mrf.mxu0  ;;  %6884 = vmatprep.subr.bf16.mxu0 %v16694_v9  ;;  %v1145_v6 = vld [vmem:[#allocation5 + $0x1f98] sm:$0xff]  ;;  %v16613_v9 = vcombine.low %v649_v60, %v657_v61  ;;  %v16854_v11 = vcombine.high %v889_v25, %v897_v5  ;;  %v16853_v17 = vcombine.low %v889_v25, %v897_v5 }
 0x22f   :  { %6924 = vmatpush1.bf16.msra.mxu1 %v16965_v8  ;;  %v1153_v8 = vld [vmem:[#allocation5 + $0x1fd8] sm:$0xff] }
 0x230   :  { %v6632_v53 = vpop.f32.mrf.mxu1  ;;  %6925 = vmatprep.subr.bf16.mxu1 %v16950_v12  ;;  %v17110_v12 = vcombine.high %v1145_v6, %v1153_v8  ;;  %v1129_v30 = vld [vmem:[#allocation5 + $0x1f18] sm:$0xff]  ;;  %v17109_v21 = vcombine.low %v1145_v6, %v1153_v8 }
 0x231   :  { %6885 = vmatpush1.bf16.msra.mxu0 %v16693_v23  ;;  %v16838_v23 = vcombine.high %v873_v13, %v881_v14  ;;  %v17094_v24 = vcombine.high %v1129_v30, %v1137_v15  ;;  %v1113_v53 = vld [vmem:[#allocation5 + $0x1e98] sm:$0xff]  ;;  %v17093_v31 = vcombine.low %v1129_v30, %v1137_v15 }
 0x232   :  { %6886 = vmatprep.subr.bf16.mxu0 %v16678_v26  ;;  %v865_v26 = vld [vmem:[#allocation5 + $0x16d8] sm:$0xff] }
 0x233   :  { %6926 = vmatpush1.bf16.msra.mxu1 %v16949_v41  ;;  %v857_v41 = vld [vmem:[#allocation5 + $0x1698] sm:$0xff] }
 0x234   :  { %6927 = vmatprep.subr.bf16.mxu1 %v16934_v27  ;;  %v1121_v27 = vld [vmem:[#allocation5 + $0x1ed8] sm:$0xff]  ;;  %v16822_v32 = vcombine.high %v857_v41, %v865_v26  ;;  %v16821_v42 = vcombine.low %v857_v41, %v865_v26 }
 0x235   :  { %6887 = vmatpush1.bf16.msra.mxu0 %v16677_v35  ;;  %v17078_v34 = vcombine.high %v1113_v53, %v1121_v27  ;;  %v841_v35 = vld [vmem:[#allocation5 + $0x1618] sm:$0xff]  ;;  %v17077_v43 = vcombine.low %v1113_v53, %v1121_v27 }
 0x236   :  { %6888 = vmatprep.subr.bf16.mxu0 %v16662_v37  ;;  %v1097_v37 = vld [vmem:[#allocation5 + $0x1e18] sm:$0xff] }
 0x237   :  { %6928 = vmatpush1.bf16.msra.mxu1 %v16933_v36  ;;  %v849_v36 = vld [vmem:[#allocation5 + $0x1658] sm:$0xff] }
 0x238   :  { %6929 = vmatprep.subr.bf16.mxu1 %v16918_v40  ;;  %v1105_v40 = vld [vmem:[#allocation5 + $0x1e58] sm:$0xff]  ;;  %v16806_v44 = vcombine.high %v841_v35, %v849_v36  ;;  %v16805_v48 = vcombine.low %v841_v35, %v849_v36 }
 0x239   :  { %6889 = vmatpush1.bf16.msra.mxu0 %v16661_v46  ;;  %v17062_v45 = vcombine.high %v1097_v37, %v1105_v40  ;;  %v825_v46 = vld [vmem:[#allocation5 + $0x1598] sm:$0xff]  ;;  %v17061_v49 = vcombine.low %v1097_v37, %v1105_v40 }
 0x23a   :  { %6890 = vmatprep.subr.bf16.mxu0 %v16646_v19  ;;  %v1081_v19 = vld [vmem:[#allocation5 + $0x1d98] sm:$0xff] }
 0x23b   :  { %6930 = vmatpush1.bf16.msra.mxu1 %v16917_v47  ;;  %v833_v47 = vld [vmem:[#allocation5 + $0x15d8] sm:$0xff] }
 0x23c   :  { %6931 = vmatprep.subr.bf16.mxu1 %v16902_v22  ;;  %v1089_v22 = vld [vmem:[#allocation5 + $0x1dd8] sm:$0xff]  ;;  %v16790_v50 = vcombine.high %v825_v46, %v833_v47  ;;  %v16789_v60 = vcombine.low %v825_v46, %v833_v47  ;;  %v482_v46 = vld [vmem:[#allocation5 + $0xae0] sm:$0xff] }
 0x23d   :  { %6891 = vmatpush1.bf16.msra.mxu0 %v16645_v52  ;;  %v17046_v51 = vcombine.high %v1081_v19, %v1089_v22  ;;  %v809_v52 = vld [vmem:[#allocation5 + $0x1518] sm:$0xff]  ;;  %v17045_v61 = vcombine.low %v1081_v19, %v1089_v22 }
 0x23e   :  { %6892 = vmatprep.subr.bf16.mxu0 %v16630_v56  ;;  %v1065_v56 = vld [vmem:[#allocation5 + $0x1d18] sm:$0xff] }
 0x23f   :  { %6932 = vmatpush1.bf16.msra.mxu1 %v16901_v55  ;;  %v817_v55 = vld [vmem:[#allocation5 + $0x1558] sm:$0xff] }
 0x240   :  { %6933 = vmatprep.subr.bf16.mxu1 %v16886_v57  ;;  %v1073_v57 = vld [vmem:[#allocation5 + $0x1d58] sm:$0xff]  ;;  %v16774_v62 = vcombine.high %v809_v52, %v817_v55  ;;  %v16773_v25 = vcombine.low %v809_v52, %v817_v55  ;;  %v202_v55 = vld [vmem:[#allocation5 + $0x220] sm:$0xff] }
 0x241   :  { %6893 = vmatpush1.bf16.msra.mxu0 %v16629_v1  ;;  %v17030_v0 = vcombine.high %v1065_v56, %v1073_v57  ;;  %v793_v1 = vld [vmem:[#allocation5 + $0x1498] sm:$0xff]  ;;  %v17029_v5 = vcombine.low %v1065_v56, %v1073_v57  ;;  %v210_v56 = vld [vmem:[#allocation5 + $0x260] sm:$0xff] }
 0x242   :  { %6894 = vmatprep.subr.bf16.mxu0 %v16614_v3  ;;  %v1049_v3 = vld [vmem:[#allocation5 + $0x1c98] sm:$0xff] }
 0x243   :  { %6934 = vmatpush1.bf16.msra.mxu1 %v16885_v2  ;;  %v801_v2 = vld [vmem:[#allocation5 + $0x14d8] sm:$0xff] }
 0x244   :  { %6935 = vmatprep.subr.bf16.mxu1 %v16870_v4  ;;  %v1057_v4 = vld [vmem:[#allocation5 + $0x1cd8] sm:$0xff]  ;;  %v16758_v6 = vcombine.high %v793_v1, %v801_v2  ;;  %v16757_v13 = vcombine.low %v793_v1, %v801_v2 }
 0x245   :  { %6895 = vmatpush1.bf16.msra.mxu0 %v16613_v9  ;;  %v17014_v8 = vcombine.high %v1049_v3, %v1057_v4  ;;  %v777_v9 = vld [vmem:[#allocation5 + $0x1418] sm:$0xff]  ;;  %v17013_v14 = vcombine.low %v1049_v3, %v1057_v4  ;;  %v16168_v4 = vcombine.high %v202_v55, %v210_v56 }
 0x246   :  { %6896 = vmatprep.subr.bf16.mxu0 %v16854_v11  ;;  %v1033_v11 = vld [vmem:[#allocation5 + $0x1c18] sm:$0xff] }
 0x247   :  { %6936 = vmatpush1.bf16.msra.mxu1 %v16869_v33  ;;  %v785_v33 = vld [vmem:[#allocation5 + $0x1458] sm:$0xff] }
 0x248   :  { %6937 = vmatprep.subr.bf16.mxu1 %v17110_v12  ;;  %v1041_v12 = vld [vmem:[#allocation5 + $0x1c58] sm:$0xff]  ;;  %v16742_v30 = vcombine.high %v777_v9, %v785_v33  ;;  %v16741_v41 = vcombine.low %v777_v9, %v785_v33  ;;  %v442_v9 = vld [vmem:[#allocation5 + $0x9a0] sm:$0xff] }
 0x249   :  { %6897 = vmatpush2.bf16.msra.mxu0 %v16853_v17  ;;  %v16998_v15 = vcombine.high %v1033_v11, %v1041_v12  ;;  %v250_v17 = vld [vmem:[#allocation5 + $0x3a0] sm:$0xff]  ;;  %v16997_v26 = vcombine.low %v1033_v11, %v1041_v12  ;;  %v16167_v11 = vcombine.low %v202_v55, %v210_v56 }
 0x24a   :  { %6898 = vmatprep.subr.bf16.mxu0 %v16838_v23  ;;  %v506_v23 = vld [vmem:[#allocation5 + $0xba0] sm:$0xff] }
 0x24b   :  { %6938 = vmatpush2.bf16.msra.mxu1 %v17109_v21  ;;  %v258_v21 = vld [vmem:[#allocation5 + $0x3e0] sm:$0xff] }
 0x24c   :  { %6939 = vmatprep.subr.bf16.mxu1 %v17094_v24  ;;  %v514_v24 = vld [vmem:[#allocation5 + $0xbe0] sm:$0xff]  ;;  %v16216_v53 = vcombine.high %v250_v17, %v258_v21  ;;  %v16215_v35 = vcombine.low %v250_v17, %v258_v21 }
 0x24d   :  { %6899 = vmatpush2.bf16.msra.mxu0 %v16837_v28  ;;  %v16472_v27 = vcombine.high %v506_v23, %v514_v24  ;;  %v234_v28 = vld [vmem:[#allocation5 + $0x320] sm:$0xff]  ;;  %v16471_v36 = vcombine.low %v506_v23, %v514_v24 }
 0x24e   :  { %6900 = vmatprep.subr.bf16.mxu0 %v16822_v32  ;;  %v490_v32 = vld [vmem:[#allocation5 + $0xb20] sm:$0xff] }
 0x24f   :  { %6940 = vmatpush2.bf16.msra.mxu1 %v17093_v31  ;;  %v242_v31 = vld [vmem:[#allocation5 + $0x360] sm:$0xff] }
 0x250   :  { %6941 = vmatprep.subr.bf16.mxu1 %v17078_v34  ;;  %v498_v34 = vld [vmem:[#allocation5 + $0xb60] sm:$0xff]  ;;  %v16200_v37 = vcombine.high %v234_v28, %v242_v31  ;;  %v16199_v19 = vcombine.low %v234_v28, %v242_v31 }
 0x251   :  { %6901 = vmatpush2.bf16.msra.mxu0 %v16821_v42  ;;  %v16456_v40 = vcombine.high %v490_v32, %v498_v34  ;;  %v218_v42 = vld [vmem:[#allocation5 + $0x2a0] sm:$0xff] }
 0x252   :  { %6902 = vmatprep.subr.bf16.mxu0 %v16806_v44  ;;  %v450_v33 = vld [vmem:[#allocation5 + $0x9e0] sm:$0xff] }
 0x253   :  { %6942 = vmatpush2.bf16.msra.mxu1 %v17077_v43  ;;  %v226_v43 = vld [vmem:[#allocation5 + $0x2e0] sm:$0xff]  ;;  %v16407_v24 = vcombine.low %v442_v9, %v450_v33 }
 0x254   :  { %6943 = vmatprep.subr.bf16.mxu1 %v17062_v45  ;;  %v474_v45 = vld [vmem:[#allocation5 + $0xaa0] sm:$0xff]  ;;  %v16183_v1 = vcombine.low %v218_v42, %v226_v43 }
 0x255   :  { %6903 = vmatpush2.bf16.msra.mxu0 %v16805_v48  ;;  %v16440_v52 = vcombine.high %v474_v45, %v482_v46  ;;  %v16439_v3 = vcombine.low %v474_v45, %v482_v46  ;;  %v426_v17 = vld [vmem:[#allocation5 + $0x920] sm:$0xff] }
 0x256   :  { %6904 = vmatprep.subr.bf16.mxu0 %v16790_v50  ;;  %v16184_v50 = vcombine.high %v218_v42, %v226_v43  ;;  %v434_v21 = vld [vmem:[#allocation5 + $0x960] sm:$0xff] }
 0x257   :  { %6944 = vmatpush2.bf16.msra.mxu1 %v17061_v49  ;;  %v16455_v49 = vcombine.low %v490_v32, %v498_v34  ;;  %v410_v28 = vld [vmem:[#allocation5 + $0x8a0] sm:$0xff]  ;;  %v16391_v34 = vcombine.low %v426_v17, %v434_v21 }
 0x258   :  { %6945 = vmatprep.subr.bf16.mxu1 %v17046_v51  ;;  %v418_v31 = vld [vmem:[#allocation5 + $0x8e0] sm:$0xff] }
 0x259   :  { %6905 = vmatpush2.bf16.msra.mxu0 %v16789_v60  ;;  %v394_v42 = vld [vmem:[#allocation5 + $0x820] sm:$0xff]  ;;  %v16375_v45 = vcombine.low %v410_v28, %v418_v31 }
 0x25a   :  { %6906 = vmatprep.subr.bf16.mxu0 %v16774_v62  ;;  %v466_v62 = vld [vmem:[#allocation5 + $0xa60] sm:$0xff] }
 0x25b   :  { %6946 = vmatpush2.bf16.msra.mxu1 %v17045_v61  ;;  %v458_v61 = vld [vmem:[#allocation5 + $0xa20] sm:$0xff] }
 0x25c   :  { %6947 = vmatprep.subr.bf16.mxu1 %v17030_v0  ;;  %v16423_v12 = vcombine.low %v458_v61, %v466_v62  ;;  %v402_v43 = vld [vmem:[#allocation5 + $0x860] sm:$0xff] }
 0x25d   :  { %6907 = vmatpush2.bf16.msra.mxu0 %v16773_v25 }
 0x25e   :  { %6908 = vmatprep.subr.bf16.mxu0 %v16758_v6  ;;  %v186_v6 = vld [vmem:[#allocation5 + $0x1a0] sm:$0xff] }
 0x25f   :  { %6948 = vmatpush2.bf16.msra.mxu1 %v17029_v5  ;;  %v16424_v5 = vcombine.high %v458_v61, %v466_v62  ;;  %v370_v61 = vld [vmem:[#allocation5 + $0x760] sm:$0xff] }
 0x260   :  { %6949 = vmatprep.subr.bf16.mxu1 %v17014_v8  ;;  %v194_v8 = vld [vmem:[#allocation5 + $0x1e0] sm:$0xff] }
 0x261   :  { %6909 = vmatpush2.bf16.msra.mxu0 %v16757_v13  ;;  %v16152_v13 = vcombine.high %v186_v6, %v194_v8  ;;  %v16151_v23 = vcombine.low %v186_v6, %v194_v8  ;;  %v618_v62 = vld [vmem:[#allocation5 + $0xf20] sm:$0xff] }
 0x262   :  { %6910 = vmatprep.subr.bf16.mxu0 %v16742_v30  ;;  %v170_v30 = vld [vmem:[#allocation5 + $0x120] sm:$0xff] }
 0x263   :  { %6950 = vmatpush2.bf16.msra.mxu1 %v17013_v14  ;;  %v16408_v14 = vcombine.high %v442_v9, %v450_v33  ;;  %v602_v6 = vld [vmem:[#allocation5 + $0xea0] sm:$0xff] }
 0x264   :  { %6951 = vmatprep.subr.bf16.mxu1 %v16998_v15  ;;  %v178_v15 = vld [vmem:[#allocation5 + $0x160] sm:$0xff] }
 0x265   :  { %6911 = vmatpush2.bf16.msra.mxu0 %v16741_v41  ;;  %v16136_v41 = vcombine.high %v170_v30, %v178_v15  ;;  %v16135_v32 = vcombine.low %v170_v30, %v178_v15  ;;  %v610_v8 = vld [vmem:[#allocation5 + $0xee0] sm:$0xff] }
 0x266   :  { %6962 = vmatprep.subr.bf16.mxu0 %v16216_v53  ;;  %v154_v53 = vld [vmem:[#allocation5 + $0xa0] sm:$0xff] }
 0x267   :  { %6952 = vmatpush2.bf16.msra.mxu1 %v16997_v26  ;;  %v16392_v26 = vcombine.high %v426_v17, %v434_v21  ;;  %v586_v30 = vld [vmem:[#allocation5 + $0xe20] sm:$0xff]  ;;  %v16567_v21 = vcombine.low %v602_v6, %v610_v8 }
 0x268   :  { %7003 = vmatprep.subr.bf16.mxu1 %v16472_v27  ;;  %v6668_v44 = vpop.f32.mrf.mxu0  ;;  %6913 = vmatmul.mubr.bf16.vlgmr.msra.gmra.mxu0 %v18703_v38  ;;  %v162_v27 = vld [vmem:[#allocation5 + $0xe0] sm:$0xff] }
 0x269   :  { %6963 = vmatpush1.bf16.msra.mxu0 %v16215_v35  ;;  %6994 = vmatprep.mubr.bf16.mxu0 %v18669_v58  ;;  %v16120_v35 = vcombine.high %v154_v53, %v162_v27  ;;  %v594_v15 = vld [vmem:[#allocation5 + $0xe60] sm:$0xff] }
 0x26a   :  { %v6709_v47 = vpop.f32.mrf.mxu1  ;;  %6954 = vmatmul.mubr.bf16.vlgmr.msra.gmra.mxu1 %v18707_v39  ;;  %v6670_v48 = vpop.f32.mrf.mxu0  ;;  %6964 = vmatprep.subr.bf16.mxu0 %v16200_v37  ;;  %v138_v37 = vld [vmem:[#allocation5 + $0x20] sm:$0xff] }
 0x26b   :  { %v18755_v22 = vadd.f32 %v6709_v47, %v6668_v44  ;;  %7004 = vmatpush1.bf16.msra.mxu1 %v16471_v36  ;;  %7035 = vmatprep.mubr.bf16.mxu1 %v18673_v59  ;;  %v16376_v36 = vcombine.high %v410_v28, %v418_v31  ;;  %v16119_v44 = vcombine.low %v154_v53, %v162_v27  ;;  %v570_v53 = vld [vmem:[#allocation5 + $0xda0] sm:$0xff] }
 0x26c   :  { %v6711_v51 = vpop.f32.mrf.mxu1  ;;  %7005 = vmatprep.subr.bf16.mxu1 %v16456_v40  ;;  %v6672_v60 = vpop.f32.mrf.mxu0  ;;  %v146_v40 = vld [vmem:[#allocation5 + $0x60] sm:$0xff]  ;;  %v16360_v47 = vcombine.high %v394_v42, %v402_v43  ;;  %v16551_v31 = vcombine.low %v586_v30, %v594_v15 }
 0x26d   :  { %v18758_v57 = vadd.f32 %v6711_v51, %v6670_v48  ;;  %6965 = vmatpush1.bf16.msra.mxu0 %v16199_v19  ;;  %v16104_v46 = vcombine.high %v138_v37, %v146_v40  ;;  %v378_v19 = vld [vmem:[#allocation5 + $0x7a0] sm:$0xff]  ;;  %v16103_v51 = vcombine.low %v138_v37, %v146_v40 }
 0x26e   :  { %v6713_v0 = vpop.f32.mrf.mxu1  ;;  %v6673_v2 = vpop.f32.mrf.mxu0  ;;  %6966 = vmatprep.subr.bf16.mxu0 %v16184_v50  ;;  %v386_v48 = vld [vmem:[#allocation5 + $0x7e0] sm:$0xff] }
 0x26f   :  { %7006 = vmatpush1.bf16.msra.mxu1 %v16455_v49  ;;  %v634_v49 = vld [vmem:[#allocation5 + $0xfa0] sm:$0xff]  ;;  %v16344_v55 = vcombine.high %v378_v19, %v386_v48 }
 0x270   :  { %v6714_v25 = vpop.f32.mrf.mxu1  ;;  %7007 = vmatprep.subr.bf16.mxu1 %v16440_v52  ;;  %v642_v50 = vld [vmem:[#allocation5 + $0xfe0] sm:$0xff]  ;;  %v16359_v52 = vcombine.low %v394_v42, %v402_v43 }
 0x271   :  { %6967 = vmatpush1.bf16.msra.mxu0 %v16183_v1  ;;  %v16600_v56 = vcombine.high %v634_v49, %v642_v50  ;;  %v362_v60 = vld [vmem:[#allocation5 + $0x720] sm:$0xff]  ;;  %v16343_v1 = vcombine.low %v378_v19, %v386_v48  ;;  %v16599_v2 = vcombine.low %v634_v49, %v642_v50 }
 0x272   :  { %6968 = vmatprep.subr.bf16.mxu0 %v16168_v4  ;;  %v626_v0 = vld [vmem:[#allocation5 + $0xf60] sm:$0xff]  ;;  %v16327_v9 = vcombine.low %v362_v60, %v370_v61 }
 0x273   :  { %7008 = vmatpush1.bf16.msra.mxu1 %v16439_v3  ;;  %v16328_v3 = vcombine.high %v362_v60, %v370_v61  ;;  %v16584_v4 = vcombine.high %v618_v62, %v626_v0  ;;  %v346_v25 = vld [vmem:[#allocation5 + $0x6a0] sm:$0xff]  ;;  %v16583_v33 = vcombine.low %v618_v62, %v626_v0 }
 0x274   :  { %7009 = vmatprep.subr.bf16.mxu1 %v16424_v5  ;;  %v354_v5 = vld [vmem:[#allocation5 + $0x6e0] sm:$0xff] }
 0x275   :  { %6969 = vmatpush1.bf16.msra.mxu0 %v16167_v11  ;;  %v16312_v11 = vcombine.high %v346_v25, %v354_v5  ;;  %v16311_v17 = vcombine.low %v346_v25, %v354_v5  ;;  %v578_v27 = vld [vmem:[#allocation5 + $0xde0] sm:$0xff] }
 0x276   :  { %6970 = vmatprep.subr.bf16.mxu0 %v16152_v13  ;;  %v330_v13 = vld [vmem:[#allocation5 + $0x620] sm:$0xff]  ;;  %v16535_v43 = vcombine.low %v570_v53, %v578_v27 }
 0x277   :  { %7010 = vmatpush1.bf16.msra.mxu1 %v16423_v12  ;;  %v16568_v12 = vcombine.high %v602_v6, %v610_v8  ;;  %v554_v37 = vld [vmem:[#allocation5 + $0xd20] sm:$0xff] }
 0x278   :  { %7011 = vmatprep.subr.bf16.mxu1 %v16408_v14  ;;  %v338_v14 = vld [vmem:[#allocation5 + $0x660] sm:$0xff] }
 0x279   :  { %6971 = vmatpush1.bf16.msra.mxu0 %v16151_v23  ;;  %v16296_v23 = vcombine.high %v330_v13, %v338_v14  ;;  %v16295_v28 = vcombine.low %v330_v13, %v338_v14  ;;  %v562_v40 = vld [vmem:[#allocation5 + $0xd60] sm:$0xff] }
 0x27a   :  { %6972 = vmatprep.subr.bf16.mxu0 %v16136_v41  ;;  %v314_v41 = vld [vmem:[#allocation5 + $0x5a0] sm:$0xff]  ;;  %v16519_v50 = vcombine.low %v554_v37, %v562_v40 }
 0x27b   :  { %7012 = vmatpush1.bf16.msra.mxu1 %v16407_v24  ;;  %v16552_v24 = vcombine.high %v586_v30, %v594_v15  ;;  %v538_v19 = vld [vmem:[#allocation5 + $0xca0] sm:$0xff] }
 0x27c   :  { %7013 = vmatprep.subr.bf16.mxu1 %v16392_v26  ;;  %v322_v26 = vld [vmem:[#allocation5 + $0x5e0] sm:$0xff] }
 0x27d   :  { %6973 = vmatpush1.bf16.msra.mxu0 %v16135_v32  ;;  %v16280_v32 = vcombine.high %v314_v41, %v322_v26  ;;  %v16279_v42 = vcombine.low %v314_v41, %v322_v26  ;;  %v546_v48 = vld [vmem:[#allocation5 + $0xce0] sm:$0xff] }
 0x27e   :  { %6974 = vmatprep.subr.bf16.mxu0 %v16120_v35  ;;  %v298_v35 = vld [vmem:[#allocation5 + $0x520] sm:$0xff]  ;;  %v16503_v0 = vcombine.low %v538_v19, %v546_v48 }
 0x27f   :  { %7014 = vmatpush1.bf16.msra.mxu1 %v16391_v34  ;;  %v16536_v34 = vcombine.high %v570_v53, %v578_v27  ;;  %v522_v60 = vld [vmem:[#allocation5 + $0xc20] sm:$0xff] }
 0x280   :  { %7015 = vmatprep.subr.bf16.mxu1 %v16376_v36  ;;  %v306_v36 = vld [vmem:[#allocation5 + $0x560] sm:$0xff] }
 0x281   :  { %6975 = vmatpush1.bf16.msra.mxu0 %v16119_v44  ;;  %v16264_v44 = vcombine.high %v298_v35, %v306_v36  ;;  %v16263_v49 = vcombine.low %v298_v35, %v306_v36  ;;  %v530_v61 = vld [vmem:[#allocation5 + $0xc60] sm:$0xff] }
 0x282   :  { %6976 = vmatprep.subr.bf16.mxu0 %v16104_v46  ;;  %v282_v46 = vld [vmem:[#allocation5 + $0x4a0] sm:$0xff]  ;;  %v16487_v8 = vcombine.low %v522_v60, %v530_v61 }
 0x283   :  { %7016 = vmatpush1.bf16.msra.mxu1 %v16375_v45  ;;  %v16520_v45 = vcombine.high %v554_v37, %v562_v40  ;;  %v1018_v25 = vld [vmem:[#allocation5 + $0x1ba0] sm:$0xff] }
 0x284   :  { %7017 = vmatprep.subr.bf16.mxu1 %v16360_v47  ;;  %v290_v47 = vld [vmem:[#allocation5 + $0x4e0] sm:$0xff] }
 0x285   :  { %6977 = vmatpush1.bf16.msra.mxu0 %v16103_v51  ;;  %v16248_v51 = vcombine.high %v282_v46, %v290_v47  ;;  %v16247_v62 = vcombine.low %v282_v46, %v290_v47  ;;  %v1026_v5 = vld [vmem:[#allocation5 + $0x1be0] sm:$0xff] }
 0x286   :  { %6978 = vmatprep.subr.bf16.mxu0 %v16344_v55  ;;  %v266_v55 = vld [vmem:[#allocation5 + $0x420] sm:$0xff]  ;;  %v16983_v15 = vcombine.low %v1018_v25, %v1026_v5 }
 0x287   :  { %7018 = vmatpush1.bf16.msra.mxu1 %v16359_v52  ;;  %v16504_v52 = vcombine.high %v538_v19, %v546_v48  ;;  %v1002_v13 = vld [vmem:[#allocation5 + $0x1b20] sm:$0xff] }
 0x288   :  { %7019 = vmatprep.subr.bf16.mxu1 %v16600_v56  ;;  %v274_v56 = vld [vmem:[#allocation5 + $0x460] sm:$0xff] }
 0x289   :  { %6979 = vmatpush2.bf16.msra.mxu0 %v16343_v1  ;;  %v16232_v1 = vcombine.high %v266_v55, %v274_v56  ;;  %v16231_v6 = vcombine.low %v266_v55, %v274_v56  ;;  %v1010_v14 = vld [vmem:[#allocation5 + $0x1b60] sm:$0xff] }
 0x28a   :  { %6980 = vmatprep.subr.bf16.mxu0 %v16328_v3  ;;  %v762_v3 = vld [vmem:[#allocation5 + $0x13a0] sm:$0xff] }
 0x28b   :  { %7020 = vmatpush2.bf16.msra.mxu1 %v16599_v2  ;;  %v16488_v2 = vcombine.high %v522_v60, %v530_v61  ;;  %v986_v26 = vld [vmem:[#allocation5 + $0x1aa0] sm:$0xff] }
 0x28c   :  { %7021 = vmatprep.subr.bf16.mxu1 %v16584_v4  ;;  %v770_v4 = vld [vmem:[#allocation5 + $0x13e0] sm:$0xff] }
 0x28d   :  { %6981 = vmatpush2.bf16.msra.mxu0 %v16327_v9  ;;  %v16728_v9 = vcombine.high %v762_v3, %v770_v4  ;;  %v16727_v30 = vcombine.low %v762_v3, %v770_v4  ;;  %v994_v53 = vld [vmem:[#allocation5 + $0x1ae0] sm:$0xff] }
 0x28e   :  { %6982 = vmatprep.subr.bf16.mxu0 %v16312_v11  ;;  %v746_v11 = vld [vmem:[#allocation5 + $0x1320] sm:$0xff] }
 0x28f   :  { %7022 = vmatpush2.bf16.msra.mxu1 %v16583_v33  ;;  %v16984_v33 = vcombine.high %v1018_v25, %v1026_v5  ;;  %v978_v46 = vld [vmem:[#allocation5 + $0x1a60] sm:$0xff] }
 0x290   :  { %7023 = vmatprep.subr.bf16.mxu1 %v16568_v12  ;;  %v754_v12 = vld [vmem:[#allocation5 + $0x1360] sm:$0xff] }
 0x291   :  { %6983 = vmatpush2.bf16.msra.mxu0 %v16311_v17  ;;  %v16712_v17 = vcombine.high %v746_v11, %v754_v12  ;;  %v698_v55 = vld [vmem:[#allocation5 + $0x11a0] sm:$0xff] }
 0x292   :  { %6984 = vmatprep.subr.bf16.mxu0 %v16296_v23  ;;  %v730_v23 = vld [vmem:[#allocation5 + $0x12a0] sm:$0xff] }
 0x293   :  { %7024 = vmatpush2.bf16.msra.mxu1 %v16567_v21  ;;  %v16968_v21 = vcombine.high %v1002_v13, %v1010_v14  ;;  %v706_v56 = vld [vmem:[#allocation5 + $0x11e0] sm:$0xff] }
 0x294   :  { %7025 = vmatprep.subr.bf16.mxu1 %v16552_v24  ;;  %v738_v24 = vld [vmem:[#allocation5 + $0x12e0] sm:$0xff] }
 0x295   :  { %6985 = vmatpush2.bf16.msra.mxu0 %v16295_v28  ;;  %v16696_v35 = vcombine.high %v730_v23, %v738_v24  ;;  %v16695_v48 = vcombine.low %v730_v23, %v738_v24  ;;  %v954_v60 = vld [vmem:[#allocation5 + $0x19a0] sm:$0xff] }
 0x296   :  { %6986 = vmatprep.subr.bf16.mxu0 %v16280_v32  ;;  %v962_v61 = vld [vmem:[#allocation5 + $0x19e0] sm:$0xff] }
 0x297   :  { %7026 = vmatpush2.bf16.msra.mxu1 %v16551_v31  ;;  %v16711_v31 = vcombine.low %v746_v11, %v754_v12  ;;  %v682_v3 = vld [vmem:[#allocation5 + $0x1120] sm:$0xff] }
 0x298   :  { %7027 = vmatprep.subr.bf16.mxu1 %v16536_v34  ;;  %v16967_v34 = vcombine.low %v1002_v13, %v1010_v14  ;;  %v690_v4 = vld [vmem:[#allocation5 + $0x1160] sm:$0xff] }
 0x299   :  { %6987 = vmatpush2.bf16.msra.mxu0 %v16279_v42  ;;  %v16952_v42 = vcombine.high %v986_v26, %v994_v53  ;;  %v938_v25 = vld [vmem:[#allocation5 + $0x1920] sm:$0xff] }
 0x29a   :  { %6988 = vmatprep.subr.bf16.mxu0 %v16264_v44  ;;  %v722_v44 = vld [vmem:[#allocation5 + $0x1260] sm:$0xff] }
 0x29b   :  { %7028 = vmatpush2.bf16.msra.mxu1 %v16535_v43  ;;  %v714_v43 = vld [vmem:[#allocation5 + $0x1220] sm:$0xff] }
 0x29c   :  { %7029 = vmatprep.subr.bf16.mxu1 %v16520_v45  ;;  %v970_v45 = vld [vmem:[#allocation5 + $0x1a20] sm:$0xff] }
 0x29d   :  { %6989 = vmatpush2.bf16.msra.mxu0 %v16263_v49  ;;  %v946_v5 = vld [vmem:[#allocation5 + $0x1960] sm:$0xff] }
 0x29e   :  { %6990 = vmatprep.subr.bf16.mxu0 %v16248_v51  ;;  %v666_v11 = vld [vmem:[#allocation5 + $0x10a0] sm:$0xff] }
 0x29f   :  { %7030 = vmatpush2.bf16.msra.mxu1 %v16519_v50  ;;  %v16680_v50 = vcombine.high %v714_v43, %v722_v44  ;;  %v674_v12 = vld [vmem:[#allocation5 + $0x10e0] sm:$0xff] }
 0x2a0   :  { %7031 = vmatprep.subr.bf16.mxu1 %v16504_v52  ;;  %v16936_v52 = vcombine.high %v970_v45, %v978_v46  ;;  %v922_v13 = vld [vmem:[#allocation5 + $0x18a0] sm:$0xff] }
 0x2a1   :  { %6991 = vmatpush2.bf16.msra.mxu0 %v16247_v62  ;;  %v16679_v62 = vcombine.low %v714_v43, %v722_v44  ;;  %v930_v14 = vld [vmem:[#allocation5 + $0x18e0] sm:$0xff] }
 0x2a2   :  { %6992 = vmatprep.subr.bf16.mxu0 %v16232_v1  ;;  %v16664_v1 = vcombine.high %v698_v55, %v706_v56  ;;  %v650_v23 = vld [vmem:[#allocation5 + $0x1020] sm:$0xff] }
 0x2a3   :  { %7032 = vmatpush2.bf16.msra.mxu1 %v16503_v0  ;;  %v16935_v0 = vcombine.low %v970_v45, %v978_v46  ;;  %v658_v24 = vld [vmem:[#allocation5 + $0x1060] sm:$0xff] }
 0x2a4   :  { %7033 = vmatprep.subr.bf16.mxu1 %v16488_v2  ;;  %v16920_v2 = vcombine.high %v954_v60, %v962_v61  ;;  %v882_v45 = vld [vmem:[#allocation5 + $0x1760] sm:$0xff] }
 0x2a5   :  { %6993 = vmatpush2.bf16.msra.mxu0 %v16231_v6  ;;  %v16663_v6 = vcombine.low %v698_v55, %v706_v56  ;;  %v1130_v46 = vld [vmem:[#allocation5 + $0x1f20] sm:$0xff] }
 0x2a6   :  { %7044 = vmatprep.subr.bf16.mxu0 %v16728_v9  ;;  %v16648_v9 = vcombine.high %v682_v3, %v690_v4  ;;  %v1114_v55 = vld [vmem:[#allocation5 + $0x1ea0] sm:$0xff] }
 0x2a7   :  { %7034 = vmatpush2.bf16.msra.mxu1 %v16487_v8  ;;  %v16919_v8 = vcombine.low %v954_v60, %v962_v61  ;;  %v1122_v56 = vld [vmem:[#allocation5 + $0x1ee0] sm:$0xff] }
 0x2a8   :  { %7085 = vmatprep.subr.bf16.mxu1 %v16984_v33  ;;  %v6750_v41 = vpop.f32.mrf.mxu0  ;;  %6995 = vmatmul.mubr.bf16.vlgmr.msra.gmra.mxu0 %v18679_v16  ;;  %v16904_v33 = vcombine.high %v938_v25, %v946_v5 }
 0x2a9   :  { %v6751_v27 = vadd.f32 %v6750_v41, %v18755_v22  ;;  %7045 = vmatpush1.bf16.msra.mxu0 %v16727_v30  ;;  %7076 = vmatprep.mubr.bf16.mxu0 %v18691_v29  ;;  %v16647_v30 = vcombine.low %v682_v3, %v690_v4  ;;  %v906_v41 = vld [vmem:[#allocation5 + $0x1820] sm:$0xff] }
 0x2aa   :  { %v6791_v28 = vpop.f32.mrf.mxu1  ;;  %7036 = vmatmul.mubr.bf16.vlgmr.msra.gmra.mxu1 %v18685_v20  ;;  %v6752_v32 = vpop.f32.mrf.mxu0  ;;  %7046 = vmatprep.subr.bf16.mxu0 %v16712_v17  ;;  %v16632_v17 = vcombine.high %v666_v11, %v674_v12  ;;  %v1098_v3 = vld [vmem:[#allocation5 + $0x1e20] sm:$0xff] }
 0x2ab   :  { %7086 = vmatpush1.bf16.msra.mxu1 %v16983_v15  ;;  %v18764_v36 = vadd.f32 %v6791_v28, %v6751_v27  ;;  %v6753_v37 = vadd.f32 %v6752_v32, %v18758_v57  ;;  %7117 = vmatprep.mubr.bf16.mxu1 %v18696_v54  ;;  %v16951_v57 = vcombine.low %v986_v26, %v994_v53  ;;  %v914_v26 = vld [vmem:[#allocation5 + $0x1860] sm:$0xff] }
 0x2ac   :  { %v6793_v40 = vpop.f32.mrf.mxu1  ;;  %7087 = vmatprep.subr.bf16.mxu1 %v16968_v21  ;;  %v6754_v22 = vpop.f32.mrf.mxu0  ;;  %v16903_v15 = vcombine.low %v938_v25, %v946_v5  ;;  %v16888_v21 = vcombine.high %v922_v13, %v930_v14  ;;  %v16631_v53 = vcombine.low %v666_v11, %v674_v12  ;;  %v16887_v27 = vcombine.low %v922_v13, %v930_v14  ;;  %v890_v32 = vld [vmem:[#allocation5 + $0x17a0] sm:$0xff] }
 0x2ad   :  { %v18769_v47 = vadd.f32 %v6793_v40, %v6753_v37  ;;  %7047 = vmatpush1.bf16.msra.mxu0 %v16711_v31  ;;  %v16616_v28 = vcombine.high %v650_v23, %v658_v24  ;;  %v16872_v31 = vcombine.high %v906_v41, %v914_v26  ;;  %v1154_v37 = vld [vmem:[#allocation5 + $0x1fe0] sm:$0xff]  ;;  %v16615_v40 = vcombine.low %v650_v23, %v658_v24 }
 0x2ae   :  { %v6795_v19 = vpop.f32.mrf.mxu1  ;;  %v6755_v49 = vpop.f32.mrf.mxu0  ;;  %7048 = vmatprep.subr.bf16.mxu0 %v16696_v35  ;;  %v1146_v35 = vld [vmem:[#allocation5 + $0x1fa0] sm:$0xff]  ;;  %v17079_v5 = vcombine.low %v1114_v55, %v1122_v56 }
 0x2af   :  { %7088 = vmatpush1.bf16.msra.mxu1 %v16967_v34  ;;  %v898_v34 = vld [vmem:[#allocation5 + $0x17e0] sm:$0xff]  ;;  %v17112_v44 = vcombine.high %v1146_v35, %v1154_v37  ;;  %v17111_v49 = vcombine.low %v1146_v35, %v1154_v37 }
 0x2b0   :  { %v6796_v51 = vpop.f32.mrf.mxu1  ;;  %7089 = vmatprep.subr.bf16.mxu1 %v16952_v42  ;;  %v16871_v42 = vcombine.low %v906_v41, %v914_v26  ;;  %v16856_v43 = vcombine.high %v890_v32, %v898_v34  ;;  %v874_v22 = vld [vmem:[#allocation5 + $0x1720] sm:$0xff] }
 0x2b1   :  { %7049 = vmatpush1.bf16.msra.mxu0 %v16695_v48  ;;  %v1138_v19 = vld [vmem:[#allocation5 + $0x1f60] sm:$0xff]  ;;  %v16855_v48 = vcombine.low %v890_v32, %v898_v34  ;;  %v16839_v60 = vcombine.low %v874_v22, %v882_v45 }
 0x2b2   :  { %7050 = vmatprep.subr.bf16.mxu0 %v16680_v50  ;;  %v17096_v50 = vcombine.high %v1130_v46, %v1138_v19  ;;  %v858_v51 = vld [vmem:[#allocation5 + $0x16a0] sm:$0xff]  ;;  %v17095_v61 = vcombine.low %v1130_v46, %v1138_v19 }
 0x2b3   :  { %7090 = vmatpush1.bf16.msra.mxu1 %v16951_v57  ;;  %v16840_v57 = vcombine.high %v874_v22, %v882_v45  ;;  %v1106_v4 = vld [vmem:[#allocation5 + $0x1e60] sm:$0xff] }
 0x2b4   :  { %7091 = vmatprep.subr.bf16.mxu1 %v16936_v52  ;;  %v866_v52 = vld [vmem:[#allocation5 + $0x16e0] sm:$0xff]  ;;  %v17063_v14 = vcombine.low %v1098_v3, %v1106_v4 }
 0x2b5   :  { %7051 = vmatpush1.bf16.msra.mxu0 %v16679_v62  ;;  %v16824_v62 = vcombine.high %v858_v51, %v866_v52  ;;  %v16823_v25 = vcombine.low %v858_v51, %v866_v52  ;;  %v1082_v11 = vld [vmem:[#allocation5 + $0x1da0] sm:$0xff]  ;;  %v507_v51 = vld [vmem:[#allocation5 + $0xba8] sm:$0xff] }
 0x2b6   :  { %7052 = vmatprep.subr.bf16.mxu0 %v16664_v1  ;;  %v842_v1 = vld [vmem:[#allocation5 + $0x1620] sm:$0xff]  ;;  %v515_v52 = vld [vmem:[#allocation5 + $0xbe8] sm:$0xff] }
 0x2b7   :  { %7092 = vmatpush1.bf16.msra.mxu1 %v16935_v0  ;;  %v17080_v0 = vcombine.high %v1114_v55, %v1122_v56  ;;  %v1090_v12 = vld [vmem:[#allocation5 + $0x1de0] sm:$0xff] }
 0x2b8   :  { %7093 = vmatprep.subr.bf16.mxu1 %v16920_v2  ;;  %v850_v2 = vld [vmem:[#allocation5 + $0x1660] sm:$0xff]  ;;  %v17047_v26 = vcombine.low %v1082_v11, %v1090_v12 }
 0x2b9   :  { %7053 = vmatpush1.bf16.msra.mxu0 %v16663_v6  ;;  %v16808_v6 = vcombine.high %v842_v1, %v850_v2  ;;  %v16807_v13 = vcombine.low %v842_v1, %v850_v2  ;;  %v1066_v23 = vld [vmem:[#allocation5 + $0x1d20] sm:$0xff]  ;;  %v491_v1 = vld [vmem:[#allocation5 + $0xb28] sm:$0xff] }
 0x2ba   :  { %7054 = vmatprep.subr.bf16.mxu0 %v16648_v9  ;;  %v826_v9 = vld [vmem:[#allocation5 + $0x15a0] sm:$0xff]  ;;  %v499_v2 = vld [vmem:[#allocation5 + $0xb68] sm:$0xff] }
 0x2bb   :  { %7094 = vmatpush1.bf16.msra.mxu1 %v16919_v8  ;;  %v17064_v8 = vcombine.high %v1098_v3, %v1106_v4  ;;  %v1074_v24 = vld [vmem:[#allocation5 + $0x1d60] sm:$0xff]  ;;  %v16473_v4 = vcombine.low %v507_v51, %v515_v52 }
 0x2bc   :  { %7095 = vmatprep.subr.bf16.mxu1 %v16904_v33  ;;  %v834_v33 = vld [vmem:[#allocation5 + $0x15e0] sm:$0xff]  ;;  %v17031_v37 = vcombine.low %v1066_v23, %v1074_v24 }
 0x2bd   :  { %7055 = vmatpush1.bf16.msra.mxu0 %v16647_v30  ;;  %v16792_v30 = vcombine.high %v826_v9, %v834_v33  ;;  %v16791_v41 = vcombine.low %v826_v9, %v834_v33  ;;  %v1050_v32 = vld [vmem:[#allocation5 + $0x1ca0] sm:$0xff]  ;;  %v475_v33 = vld [vmem:[#allocation5 + $0xaa8] sm:$0xff] }
 0x2be   :  { %7056 = vmatprep.subr.bf16.mxu0 %v16632_v17  ;;  %v810_v17 = vld [vmem:[#allocation5 + $0x1520] sm:$0xff] }
 0x2bf   :  { %7096 = vmatpush1.bf16.msra.mxu1 %v16903_v15  ;;  %v17048_v15 = vcombine.high %v1082_v11, %v1090_v12  ;;  %v1058_v34 = vld [vmem:[#allocation5 + $0x1ce0] sm:$0xff]  ;;  %v483_v11 = vld [vmem:[#allocation5 + $0xae8] sm:$0xff] }
 0x2c0   :  { %7097 = vmatprep.subr.bf16.mxu1 %v16888_v21  ;;  %v818_v21 = vld [vmem:[#allocation5 + $0x1560] sm:$0xff]  ;;  %v17015_v19 = vcombine.low %v1050_v32, %v1058_v34 }
 0x2c1   :  { %7057 = vmatpush1.bf16.msra.mxu0 %v16631_v53  ;;  %v16776_v53 = vcombine.high %v810_v17, %v818_v21  ;;  %v16775_v35 = vcombine.low %v810_v17, %v818_v21  ;;  %v1034_v22 = vld [vmem:[#allocation5 + $0x1c20] sm:$0xff] }
 0x2c2   :  { %7058 = vmatprep.subr.bf16.mxu0 %v16616_v28  ;;  %v794_v28 = vld [vmem:[#allocation5 + $0x14a0] sm:$0xff] }
 0x2c3   :  { %7098 = vmatpush1.bf16.msra.mxu1 %v16887_v27  ;;  %v17032_v27 = vcombine.high %v1066_v23, %v1074_v24  ;;  %v1042_v45 = vld [vmem:[#allocation5 + $0x1c60] sm:$0xff]  ;;  %v16442_v23 = vcombine.high %v475_v33, %v483_v11  ;;  %v203_v24 = vld [vmem:[#allocation5 + $0x228] sm:$0xff] }
 0x2c4   :  { %7099 = vmatprep.subr.bf16.mxu1 %v16872_v31  ;;  %v802_v31 = vld [vmem:[#allocation5 + $0x14e0] sm:$0xff]  ;;  %v16999_v56 = vcombine.low %v1034_v22, %v1042_v45 }
 0x2c5   :  { %7059 = vmatpush1.bf16.msra.mxu0 %v16615_v40  ;;  %v16760_v40 = vcombine.high %v794_v28, %v802_v31  ;;  %v16759_v46 = vcombine.low %v794_v28, %v802_v31  ;;  %v467_v28 = vld [vmem:[#allocation5 + $0xa68] sm:$0xff] }
 0x2c6   :  { %7060 = vmatprep.subr.bf16.mxu0 %v16856_v43  ;;  %v778_v43 = vld [vmem:[#allocation5 + $0x1420] sm:$0xff] }
 0x2c7   :  { %7100 = vmatpush1.bf16.msra.mxu1 %v16871_v42  ;;  %v17016_v42 = vcombine.high %v1050_v32, %v1058_v34 }
 0x2c8   :  { %7101 = vmatprep.subr.bf16.mxu1 %v17112_v44  ;;  %v786_v44 = vld [vmem:[#allocation5 + $0x1460] sm:$0xff] }
 0x2c9   :  { %7061 = vmatpush2.bf16.msra.mxu0 %v16855_v48  ;;  %v16744_v48 = vcombine.high %v778_v43, %v786_v44  ;;  %v16743_v55 = vcombine.low %v778_v43, %v786_v44  ;;  %v187_v43 = vld [vmem:[#allocation5 + $0x1a8] sm:$0xff] }
 0x2ca   :  { %7062 = vmatprep.subr.bf16.mxu0 %v16840_v57  ;;  %v251_v57 = vld [vmem:[#allocation5 + $0x3a8] sm:$0xff] }
 0x2cb   :  { %7102 = vmatpush2.bf16.msra.mxu1 %v17111_v49  ;;  %v17000_v49 = vcombine.high %v1034_v22, %v1042_v45  ;;  %v195_v44 = vld [vmem:[#allocation5 + $0x1e8] sm:$0xff] }
 0x2cc   :  { %7103 = vmatprep.subr.bf16.mxu1 %v17096_v50  ;;  %v259_v50 = vld [vmem:[#allocation5 + $0x3e8] sm:$0xff] }
 0x2cd   :  { %7063 = vmatpush2.bf16.msra.mxu0 %v16839_v60  ;;  %v16218_v60 = vcombine.high %v251_v57, %v259_v50  ;;  %v16217_v3 = vcombine.low %v251_v57, %v259_v50  ;;  %v443_v22 = vld [vmem:[#allocation5 + $0x9a8] sm:$0xff] }
 0x2ce   :  { %7064 = vmatprep.subr.bf16.mxu0 %v16824_v62  ;;  %v235_v62 = vld [vmem:[#allocation5 + $0x328] sm:$0xff] }
 0x2cf   :  { %7104 = vmatpush2.bf16.msra.mxu1 %v17095_v61  ;;  %v16474_v61 = vcombine.high %v507_v51, %v515_v52  ;;  %v451_v45 = vld [vmem:[#allocation5 + $0x9e8] sm:$0xff] }
 0x2d0   :  { %7105 = vmatprep.subr.bf16.mxu1 %v17080_v0  ;;  %v243_v0 = vld [vmem:[#allocation5 + $0x368] sm:$0xff] }
 0x2d1   :  { %7065 = vmatpush2.bf16.msra.mxu0 %v16823_v25  ;;  %v16202_v25 = vcombine.high %v235_v62, %v243_v0  ;;  %v171_v57 = vld [vmem:[#allocation5 + $0x128] sm:$0xff] }
 0x2d2   :  { %7066 = vmatprep.subr.bf16.mxu0 %v16808_v6  ;;  %v219_v6 = vld [vmem:[#allocation5 + $0x2a8] sm:$0xff] }
 0x2d3   :  { %7106 = vmatpush2.bf16.msra.mxu1 %v17079_v5  ;;  %v16458_v5 = vcombine.high %v491_v1, %v499_v2  ;;  %v179_v50 = vld [vmem:[#allocation5 + $0x168] sm:$0xff] }
 0x2d4   :  { %7107 = vmatprep.subr.bf16.mxu1 %v17064_v8  ;;  %v227_v8 = vld [vmem:[#allocation5 + $0x2e8] sm:$0xff] }
 0x2d5   :  { %7067 = vmatpush2.bf16.msra.mxu0 %v16807_v13  ;;  %v16201_v13 = vcombine.low %v235_v62, %v243_v0  ;;  %v16186_v17 = vcombine.high %v219_v6, %v227_v8  ;;  %v16185_v32 = vcombine.low %v219_v6, %v227_v8  ;;  %v427_v51 = vld [vmem:[#allocation5 + $0x928] sm:$0xff] }
 0x2d6   :  { %7068 = vmatprep.subr.bf16.mxu0 %v16792_v30  ;;  %v435_v52 = vld [vmem:[#allocation5 + $0x968] sm:$0xff] }
 0x2d7   :  { %7108 = vmatpush2.bf16.msra.mxu1 %v17063_v14  ;;  %v155_v62 = vld [vmem:[#allocation5 + $0xa8] sm:$0xff] }
 0x2d8   :  { %7109 = vmatprep.subr.bf16.mxu1 %v17048_v15  ;;  %v16457_v15 = vcombine.low %v491_v1, %v499_v2  ;;  %v163_v0 = vld [vmem:[#allocation5 + $0xe8] sm:$0xff] }
 0x2d9   :  { %7069 = vmatpush2.bf16.msra.mxu0 %v16791_v41  ;;  %v211_v41 = vld [vmem:[#allocation5 + $0x268] sm:$0xff] }
 0x2da   :  { %7070 = vmatprep.subr.bf16.mxu0 %v16776_v53  ;;  %v411_v1 = vld [vmem:[#allocation5 + $0x8a8] sm:$0xff] }
 0x2db   :  { %7110 = vmatpush2.bf16.msra.mxu1 %v17047_v26  ;;  %v419_v2 = vld [vmem:[#allocation5 + $0x8e8] sm:$0xff] }
 0x2dc   :  { %7111 = vmatprep.subr.bf16.mxu1 %v17032_v27  ;;  %v459_v27 = vld [vmem:[#allocation5 + $0xa28] sm:$0xff] }
 0x2dd   :  { %7071 = vmatpush2.bf16.msra.mxu0 %v16775_v35  ;;  %v16441_v35 = vcombine.low %v475_v33, %v483_v11  ;;  %v139_v6 = vld [vmem:[#allocation5 + $0x28] sm:$0xff]  ;;  %v16121_v11 = vcombine.low %v155_v62, %v163_v0 }
 0x2de   :  { %7072 = vmatprep.subr.bf16.mxu0 %v16760_v40  ;;  %v147_v8 = vld [vmem:[#allocation5 + $0x68] sm:$0xff] }
 0x2df   :  { %7112 = vmatpush2.bf16.msra.mxu1 %v17031_v37  ;;  %v16170_v37 = vcombine.high %v203_v24, %v211_v41  ;;  %v403_v33 = vld [vmem:[#allocation5 + $0x868] sm:$0xff] }
 0x2e0   :  { %7113 = vmatprep.subr.bf16.mxu1 %v17016_v42  ;;  %v16426_v42 = vcombine.high %v459_v27, %v467_v28 }
 0x2e1   :  { %7073 = vmatpush2.bf16.msra.mxu0 %v16759_v46  ;;  %v16169_v46 = vcombine.low %v203_v24, %v211_v41  ;;  %v16105_v24 = vcombine.low %v139_v6, %v147_v8 }
 0x2e2   :  { %7074 = vmatprep.subr.bf16.mxu0 %v16744_v48  ;;  %v16154_v48 = vcombine.high %v187_v43, %v195_v44 }
 0x2e3   :  { %7114 = vmatpush2.bf16.msra.mxu1 %v17015_v19  ;;  %v16425_v19 = vcombine.low %v459_v27, %v467_v28  ;;  %v363_v28 = vld [vmem:[#allocation5 + $0x728] sm:$0xff] }
 0x2e4   :  { %7115 = vmatprep.subr.bf16.mxu1 %v17000_v49  ;;  %v16410_v49 = vcombine.high %v443_v22, %v451_v45 }
 0x2e5   :  { %7075 = vmatpush2.bf16.msra.mxu0 %v16743_v55  ;;  %v16153_v55 = vcombine.low %v187_v43, %v195_v44  ;;  %v347_v43 = vld [vmem:[#allocation5 + $0x6a8] sm:$0xff] }
 0x2e6   :  { %7126 = vmatprep.subr.bf16.mxu0 %v16218_v60  ;;  %v16138_v60 = vcombine.high %v171_v57, %v179_v50  ;;  %v355_v44 = vld [vmem:[#allocation5 + $0x6e8] sm:$0xff] }
 0x2e7   :  { %7116 = vmatpush2.bf16.msra.mxu1 %v16999_v56  ;;  %v16409_v56 = vcombine.low %v443_v22, %v451_v45  ;;  %v603_v22 = vld [vmem:[#allocation5 + $0xea8] sm:$0xff] }
 0x2e8   :  { %7167 = vmatprep.subr.bf16.mxu1 %v16474_v61  ;;  %v6832_v9 = vpop.f32.mrf.mxu0  ;;  %7077 = vmatmul.mubr.bf16.vlgmr.msra.gmra.mxu0 %v18703_v38  ;;  %v16394_v61 = vcombine.high %v427_v51, %v435_v52  ;;  %v611_v45 = vld [vmem:[#allocation5 + $0xee8] sm:$0xff] }
 0x2e9   :  { %7127 = vmatpush1.bf16.msra.mxu0 %v16217_v3  ;;  %7158 = vmatprep.mubr.bf16.mxu0 %v18669_v58  ;;  %v16137_v3 = vcombine.low %v171_v57, %v179_v50  ;;  %v331_v57 = vld [vmem:[#allocation5 + $0x628] sm:$0xff] }
 0x2ea   :  { %v6873_v12 = vpop.f32.mrf.mxu1  ;;  %7118 = vmatmul.mubr.bf16.vlgmr.msra.gmra.mxu1 %v18707_v39  ;;  %v6834_v30 = vpop.f32.mrf.mxu0  ;;  %7128 = vmatprep.subr.bf16.mxu0 %v16202_v25  ;;  %v16122_v25 = vcombine.high %v155_v62, %v163_v0  ;;  %v339_v50 = vld [vmem:[#allocation5 + $0x668] sm:$0xff] }
 0x2eb   :  { %v18773_v14 = vadd.f32 %v6873_v12, %v6832_v9  ;;  %7168 = vmatpush1.bf16.msra.mxu1 %v16473_v4  ;;  %7199 = vmatprep.mubr.bf16.mxu1 %v18673_v59  ;;  %v16393_v4 = vcombine.low %v427_v51, %v435_v52  ;;  %v395_v9 = vld [vmem:[#allocation5 + $0x828] sm:$0xff]  ;;  %v16377_v12 = vcombine.low %v411_v1, %v419_v2 }
 0x2ec   :  { %v6875_v21 = vpop.f32.mrf.mxu1  ;;  %7169 = vmatprep.subr.bf16.mxu1 %v16458_v5  ;;  %v6836_v53 = vpop.f32.mrf.mxu0  ;;  %v16378_v5 = vcombine.high %v411_v1, %v419_v2  ;;  %v16361_v41 = vcombine.low %v395_v9, %v403_v33  ;;  %v587_v51 = vld [vmem:[#allocation5 + $0xe28] sm:$0xff] }
 0x2ed   :  { %v18776_v26 = vadd.f32 %v6875_v21, %v6834_v30  ;;  %7129 = vmatpush1.bf16.msra.mxu0 %v16201_v13  ;;  %v16106_v13 = vcombine.high %v139_v6, %v147_v8  ;;  %v16362_v30 = vcombine.high %v395_v9, %v403_v33  ;;  %v635_v21 = vld [vmem:[#allocation5 + $0xfa8] sm:$0xff] }
 0x2ee   :  { %v6877_v31 = vpop.f32.mrf.mxu1  ;;  %v6837_v34 = vpop.f32.mrf.mxu0  ;;  %7130 = vmatprep.subr.bf16.mxu0 %v16186_v17  ;;  %v387_v17 = vld [vmem:[#allocation5 + $0x7e8] sm:$0xff] }
 0x2ef   :  { %7170 = vmatpush1.bf16.msra.mxu1 %v16457_v15  ;;  %v379_v15 = vld [vmem:[#allocation5 + $0x7a8] sm:$0xff] }
 0x2f0   :  { %v6878_v40 = vpop.f32.mrf.mxu1  ;;  %7171 = vmatprep.subr.bf16.mxu1 %v16442_v23  ;;  %v643_v23 = vld [vmem:[#allocation5 + $0xfe8] sm:$0xff]  ;;  %v16346_v53 = vcombine.high %v379_v15, %v387_v17 }
 0x2f1   :  { %7131 = vmatpush1.bf16.msra.mxu0 %v16185_v32  ;;  %v16602_v27 = vcombine.high %v635_v21, %v643_v23  ;;  %v371_v31 = vld [vmem:[#allocation5 + $0x768] sm:$0xff] }
 0x2f2   :  { %7132 = vmatprep.subr.bf16.mxu0 %v16170_v37  ;;  %v619_v32 = vld [vmem:[#allocation5 + $0xf28] sm:$0xff]  ;;  %v16601_v37 = vcombine.low %v635_v21, %v643_v23  ;;  %v16330_v40 = vcombine.high %v363_v28, %v371_v31 }
 0x2f3   :  { %7172 = vmatpush1.bf16.msra.mxu1 %v16441_v35  ;;  %v627_v34 = vld [vmem:[#allocation5 + $0xf68] sm:$0xff]  ;;  %v16345_v35 = vcombine.low %v379_v15, %v387_v17 }
 0x2f4   :  { %7173 = vmatprep.subr.bf16.mxu1 %v16426_v42  ;;  %v16586_v42 = vcombine.high %v619_v32, %v627_v34  ;;  %v595_v52 = vld [vmem:[#allocation5 + $0xe68] sm:$0xff] }
 0x2f5   :  { %7133 = vmatpush1.bf16.msra.mxu0 %v16169_v46  ;;  %v16329_v46 = vcombine.low %v363_v28, %v371_v31  ;;  %v315_v62 = vld [vmem:[#allocation5 + $0x5a8] sm:$0xff] }
 0x2f6   :  { %7134 = vmatprep.subr.bf16.mxu0 %v16154_v48  ;;  %v16314_v48 = vcombine.high %v347_v43, %v355_v44  ;;  %v323_v0 = vld [vmem:[#allocation5 + $0x5e8] sm:$0xff] }
 0x2f7   :  { %7174 = vmatpush1.bf16.msra.mxu1 %v16425_v19  ;;  %v16585_v19 = vcombine.low %v619_v32, %v627_v34  ;;  %v571_v1 = vld [vmem:[#allocation5 + $0xda8] sm:$0xff] }
 0x2f8   :  { %7175 = vmatprep.subr.bf16.mxu1 %v16410_v49  ;;  %v16570_v49 = vcombine.high %v603_v22, %v611_v45  ;;  %v579_v2 = vld [vmem:[#allocation5 + $0xde8] sm:$0xff] }
 0x2f9   :  { %7135 = vmatpush1.bf16.msra.mxu0 %v16153_v55  ;;  %v16313_v55 = vcombine.low %v347_v43, %v355_v44  ;;  %v299_v6 = vld [vmem:[#allocation5 + $0x528] sm:$0xff] }
 0x2fa   :  { %7136 = vmatprep.subr.bf16.mxu0 %v16138_v60  ;;  %v16298_v60 = vcombine.high %v331_v57, %v339_v50  ;;  %v307_v8 = vld [vmem:[#allocation5 + $0x568] sm:$0xff] }
 0x2fb   :  { %7176 = vmatpush1.bf16.msra.mxu1 %v16409_v56  ;;  %v16569_v56 = vcombine.low %v603_v22, %v611_v45  ;;  %v555_v9 = vld [vmem:[#allocation5 + $0xd28] sm:$0xff] }
 0x2fc   :  { %7177 = vmatprep.subr.bf16.mxu1 %v16394_v61  ;;  %v16554_v61 = vcombine.high %v587_v51, %v595_v52  ;;  %v563_v33 = vld [vmem:[#allocation5 + $0xd68] sm:$0xff] }
 0x2fd   :  { %7137 = vmatpush1.bf16.msra.mxu0 %v16137_v3  ;;  %v16297_v3 = vcombine.low %v331_v57, %v339_v50  ;;  %v283_v15 = vld [vmem:[#allocation5 + $0x4a8] sm:$0xff] }
 0x2fe   :  { %7138 = vmatprep.subr.bf16.mxu0 %v16122_v25  ;;  %v16282_v25 = vcombine.high %v315_v62, %v323_v0  ;;  %v291_v17 = vld [vmem:[#allocation5 + $0x4e8] sm:$0xff] }
 0x2ff   :  { %7178 = vmatpush1.bf16.msra.mxu1 %v16393_v4  ;;  %v16553_v4 = vcombine.low %v587_v51, %v595_v52  ;;  %v539_v21 = vld [vmem:[#allocation5 + $0xca8] sm:$0xff] }
 0x300   :  { %7179 = vmatprep.subr.bf16.mxu1 %v16378_v5  ;;  %v16538_v5 = vcombine.high %v571_v1, %v579_v2  ;;  %v547_v23 = vld [vmem:[#allocation5 + $0xce8] sm:$0xff] }
 0x301   :  { %7139 = vmatpush1.bf16.msra.mxu0 %v16121_v11  ;;  %v16281_v11 = vcombine.low %v315_v62, %v323_v0  ;;  %v267_v28 = vld [vmem:[#allocation5 + $0x428] sm:$0xff] }
 0x302   :  { %7140 = vmatprep.subr.bf16.mxu0 %v16106_v13  ;;  %v16266_v13 = vcombine.high %v299_v6, %v307_v8  ;;  %v275_v31 = vld [vmem:[#allocation5 + $0x468] sm:$0xff] }
 0x303   :  { %7180 = vmatpush1.bf16.msra.mxu1 %v16377_v12  ;;  %v16537_v12 = vcombine.low %v571_v1, %v579_v2  ;;  %v523_v32 = vld [vmem:[#allocation5 + $0xc28] sm:$0xff] }
 0x304   :  { %7181 = vmatprep.subr.bf16.mxu1 %v16362_v30  ;;  %v16522_v30 = vcombine.high %v555_v9, %v563_v33  ;;  %v531_v34 = vld [vmem:[#allocation5 + $0xc68] sm:$0xff] }
 0x305   :  { %7141 = vmatpush1.bf16.msra.mxu0 %v16105_v24  ;;  %v16265_v24 = vcombine.low %v299_v6, %v307_v8  ;;  %v763_v43 = vld [vmem:[#allocation5 + $0x13a8] sm:$0xff] }
 0x306   :  { %7142 = vmatprep.subr.bf16.mxu0 %v16346_v53  ;;  %v16250_v53 = vcombine.high %v283_v15, %v291_v17  ;;  %v771_v44 = vld [vmem:[#allocation5 + $0x13e8] sm:$0xff] }
 0x307   :  { %7182 = vmatpush1.bf16.msra.mxu1 %v16361_v41  ;;  %v16521_v41 = vcombine.low %v555_v9, %v563_v33  ;;  %v1019_v22 = vld [vmem:[#allocation5 + $0x1ba8] sm:$0xff] }
 0x308   :  { %7183 = vmatprep.subr.bf16.mxu1 %v16602_v27  ;;  %v16506_v27 = vcombine.high %v539_v21, %v547_v23  ;;  %v1027_v45 = vld [vmem:[#allocation5 + $0x1be8] sm:$0xff] }
 0x309   :  { %7143 = vmatpush2.bf16.msra.mxu0 %v16345_v35  ;;  %v16249_v35 = vcombine.low %v283_v15, %v291_v17  ;;  %v747_v57 = vld [vmem:[#allocation5 + $0x1328] sm:$0xff] }
 0x30a   :  { %7144 = vmatprep.subr.bf16.mxu0 %v16330_v40  ;;  %v16234_v40 = vcombine.high %v267_v28, %v275_v31  ;;  %v755_v50 = vld [vmem:[#allocation5 + $0x1368] sm:$0xff] }
 0x30b   :  { %7184 = vmatpush2.bf16.msra.mxu1 %v16601_v37  ;;  %v16505_v37 = vcombine.low %v539_v21, %v547_v23  ;;  %v1003_v51 = vld [vmem:[#allocation5 + $0x1b28] sm:$0xff] }
 0x30c   :  { %7185 = vmatprep.subr.bf16.mxu1 %v16586_v42  ;;  %v16490_v42 = vcombine.high %v523_v32, %v531_v34  ;;  %v1011_v52 = vld [vmem:[#allocation5 + $0x1b68] sm:$0xff] }
 0x30d   :  { %7145 = vmatpush2.bf16.msra.mxu0 %v16329_v46  ;;  %v16233_v46 = vcombine.low %v267_v28, %v275_v31  ;;  %v731_v62 = vld [vmem:[#allocation5 + $0x12a8] sm:$0xff]  ;;  %v16969_v8 = vcombine.low %v1003_v51, %v1011_v52 }
 0x30e   :  { %7146 = vmatprep.subr.bf16.mxu0 %v16314_v48  ;;  %v16730_v48 = vcombine.high %v763_v43, %v771_v44  ;;  %v739_v0 = vld [vmem:[#allocation5 + $0x12e8] sm:$0xff] }
 0x30f   :  { %7186 = vmatpush2.bf16.msra.mxu1 %v16585_v19  ;;  %v16489_v19 = vcombine.low %v523_v32, %v531_v34  ;;  %v987_v2 = vld [vmem:[#allocation5 + $0x1aa8] sm:$0xff]  ;;  %v16698_v9 = vcombine.high %v731_v62, %v739_v0 }
 0x310   :  { %7187 = vmatprep.subr.bf16.mxu1 %v16570_v49  ;;  %v16986_v49 = vcombine.high %v1019_v22, %v1027_v45  ;;  %v723_v15 = vld [vmem:[#allocation5 + $0x1268] sm:$0xff] }
 0x311   :  { %7147 = vmatpush2.bf16.msra.mxu0 %v16313_v55  ;;  %v16729_v55 = vcombine.low %v763_v43, %v771_v44  ;;  %v971_v17 = vld [vmem:[#allocation5 + $0x1a28] sm:$0xff] }
 0x312   :  { %7148 = vmatprep.subr.bf16.mxu0 %v16298_v60  ;;  %v16714_v60 = vcombine.high %v747_v57, %v755_v50  ;;  %v979_v21 = vld [vmem:[#allocation5 + $0x1a68] sm:$0xff] }
 0x313   :  { %7188 = vmatpush2.bf16.msra.mxu1 %v16569_v56  ;;  %v16985_v56 = vcombine.low %v1019_v22, %v1027_v45  ;;  %v16938_v31 = vcombine.high %v971_v17, %v979_v21  ;;  %v699_v32 = vld [vmem:[#allocation5 + $0x11a8] sm:$0xff] }
 0x314   :  { %7189 = vmatprep.subr.bf16.mxu1 %v16554_v61  ;;  %v16970_v61 = vcombine.high %v1003_v51, %v1011_v52  ;;  %v707_v34 = vld [vmem:[#allocation5 + $0x11e8] sm:$0xff] }
 0x315   :  { %7149 = vmatpush2.bf16.msra.mxu0 %v16297_v3  ;;  %v995_v3 = vld [vmem:[#allocation5 + $0x1ae8] sm:$0xff]  ;;  %v16666_v43 = vcombine.high %v699_v32, %v707_v34 }
 0x316   :  { %7150 = vmatprep.subr.bf16.mxu0 %v16282_v25  ;;  %v683_v22 = vld [vmem:[#allocation5 + $0x1128] sm:$0xff] }
 0x317   :  { %7190 = vmatpush2.bf16.msra.mxu1 %v16553_v4  ;;  %v691_v45 = vld [vmem:[#allocation5 + $0x1168] sm:$0xff] }
 0x318   :  { %7191 = vmatprep.subr.bf16.mxu1 %v16538_v5  ;;  %v16713_v5 = vcombine.low %v747_v57, %v755_v50  ;;  %v16650_v57 = vcombine.high %v683_v22, %v691_v45  ;;  %v667_v51 = vld [vmem:[#allocation5 + $0x10a8] sm:$0xff] }
 0x319   :  { %7151 = vmatpush2.bf16.msra.mxu0 %v16281_v11  ;;  %v675_v52 = vld [vmem:[#allocation5 + $0x10e8] sm:$0xff] }
 0x31a   :  { %7152 = vmatprep.subr.bf16.mxu0 %v16266_v13  ;;  %v16954_v13 = vcombine.high %v987_v2, %v995_v3 }
 0x31b   :  { %7192 = vmatpush2.bf16.msra.mxu1 %v16537_v12 }
 0x31c   :  { %7193 = vmatprep.subr.bf16.mxu1 %v16522_v30  ;;  %v715_v30 = vld [vmem:[#allocation5 + $0x1228] sm:$0xff] }
 0x31d   :  { %7153 = vmatpush2.bf16.msra.mxu0 %v16265_v24 }
 0x31e   :  { %7154 = vmatprep.subr.bf16.mxu0 %v16250_v53 }
 0x31f   :  { %7194 = vmatpush2.bf16.msra.mxu1 %v16521_v41  ;;  %v16697_v41 = vcombine.low %v731_v62, %v739_v0  ;;  %v16634_v62 = vcombine.high %v667_v51, %v675_v52 }
 0x320   :  { %7195 = vmatprep.subr.bf16.mxu1 %v16506_v27  ;;  %v16682_v27 = vcombine.high %v715_v30, %v723_v15 }
 0x321   :  { %7155 = vmatpush2.bf16.msra.mxu0 %v16249_v35  ;;  %v955_v35 = vld [vmem:[#allocation5 + $0x19a8] sm:$0xff] }
 0x322   :  { %7156 = vmatprep.subr.bf16.mxu0 %v16234_v40  ;;  %v16681_v40 = vcombine.low %v715_v30, %v723_v15 }
 0x323   :  { %7196 = vmatpush2.bf16.msra.mxu1 %v16505_v37  ;;  %v963_v37 = vld [vmem:[#allocation5 + $0x19e8] sm:$0xff] }
 0x324   :  { %7197 = vmatprep.subr.bf16.mxu1 %v16490_v42  ;;  %v16937_v42 = vcombine.low %v971_v17, %v979_v21  ;;  %v16922_v44 = vcombine.high %v955_v35, %v963_v37  ;;  %v875_v21 = vld [vmem:[#allocation5 + $0x1728] sm:$0xff] }
 0x325   :  { %7157 = vmatpush2.bf16.msra.mxu0 %v16233_v46  ;;  %v939_v46 = vld [vmem:[#allocation5 + $0x1928] sm:$0xff] }
 0x326   :  { %7208 = vmatprep.subr.bf16.mxu0 %v16730_v48  ;;  %v16665_v48 = vcombine.low %v699_v32, %v707_v34  ;;  %v859_v32 = vld [vmem:[#allocation5 + $0x16a8] sm:$0xff] }
 0x327   :  { %7198 = vmatpush2.bf16.msra.mxu1 %v16489_v19  ;;  %v947_v19 = vld [vmem:[#allocation5 + $0x1968] sm:$0xff] }
 0x328   :  { %7249 = vmatprep.subr.bf16.mxu1 %v16986_v49  ;;  %v6914_v1 = vpop.f32.mrf.mxu0  ;;  %7159 = vmatmul.mubr.bf16.vlgmr.msra.gmra.mxu0 %v18679_v16  ;;  %v16921_v49 = vcombine.low %v955_v35, %v963_v37  ;;  %v16906_v50 = vcombine.high %v939_v46, %v947_v19  ;;  %v867_v34 = vld [vmem:[#allocation5 + $0x16e8] sm:$0xff] }
 0x329   :  { %v6915_v4 = vadd.f32 %v6914_v1, %v18773_v14  ;;  %7209 = vmatpush1.bf16.msra.mxu0 %v16729_v55  ;;  %7240 = vmatprep.mubr.bf16.mxu0 %v18691_v29  ;;  %v923_v55 = vld [vmem:[#allocation5 + $0x18a8] sm:$0xff] }
 0x32a   :  { %v6955_v25 = vpop.f32.mrf.mxu1  ;;  %7200 = vmatmul.mubr.bf16.vlgmr.msra.gmra.mxu1 %v18685_v20  ;;  %v6916_v6 = vpop.f32.mrf.mxu0  ;;  %7210 = vmatprep.subr.bf16.mxu0 %v16714_v60  ;;  %v16649_v60 = vcombine.low %v683_v22, %v691_v45  ;;  %v651_v1 = vld [vmem:[#allocation5 + $0x1028] sm:$0xff] }
 0x32b   :  { %7250 = vmatpush1.bf16.msra.mxu1 %v16985_v56  ;;  %v18782_v33 = vadd.f32 %v6955_v25, %v6915_v4  ;;  %v6917_v11 = vadd.f32 %v6916_v6, %v18776_v26  ;;  %7281 = vmatprep.mubr.bf16.mxu1 %v18696_v54  ;;  %v16953_v26 = vcombine.low %v987_v2, %v995_v3  ;;  %v931_v56 = vld [vmem:[#allocation5 + $0x18e8] sm:$0xff] }
 0x32c   :  { %v6957_v12 = vpop.f32.mrf.mxu1  ;;  %7251 = vmatprep.subr.bf16.mxu1 %v16970_v61  ;;  %v6918_v14 = vpop.f32.mrf.mxu0  ;;  %v16905_v61 = vcombine.low %v939_v46, %v947_v19  ;;  %v16890_v0 = vcombine.high %v923_v55, %v931_v56  ;;  %v659_v2 = vld [vmem:[#allocation5 + $0x1068] sm:$0xff]  ;;  %v16633_v25 = vcombine.low %v667_v51, %v675_v52 }
 0x32d   :  { %v18787_v23 = vadd.f32 %v6957_v12, %v6917_v11  ;;  %7211 = vmatpush1.bf16.msra.mxu0 %v16713_v5  ;;  %v907_v3 = vld [vmem:[#allocation5 + $0x1828] sm:$0xff]  ;;  %v16889_v5 = vcombine.low %v923_v55, %v931_v56  ;;  %v16618_v6 = vcombine.high %v651_v1, %v659_v2  ;;  %v16617_v30 = vcombine.low %v651_v1, %v659_v2 }
 0x32e   :  { %v6959_v24 = vpop.f32.mrf.mxu1  ;;  %v6919_v53 = vpop.f32.mrf.mxu0  ;;  %7212 = vmatprep.subr.bf16.mxu0 %v16698_v9  ;;  %v915_v4 = vld [vmem:[#allocation5 + $0x1868] sm:$0xff] }
 0x32f   :  { %7252 = vmatpush1.bf16.msra.mxu1 %v16969_v8  ;;  %v16874_v8 = vcombine.high %v907_v3, %v915_v4  ;;  %v891_v9 = vld [vmem:[#allocation5 + $0x17a8] sm:$0xff]  ;;  %v16873_v15 = vcombine.low %v907_v3, %v915_v4 }
 0x330   :  { %v6960_v28 = vpop.f32.mrf.mxu1  ;;  %7253 = vmatprep.subr.bf16.mxu1 %v16954_v13  ;;  %v899_v11 = vld [vmem:[#allocation5 + $0x17e8] sm:$0xff] }
 0x331   :  { %7213 = vmatpush1.bf16.msra.mxu0 %v16697_v41  ;;  %v1147_v12 = vld [vmem:[#allocation5 + $0x1fa8] sm:$0xff]  ;;  %v16858_v14 = vcombine.high %v891_v9, %v899_v11 }
 0x332   :  { %7214 = vmatprep.subr.bf16.mxu0 %v16682_v27  ;;  %v1155_v13 = vld [vmem:[#allocation5 + $0x1fe8] sm:$0xff] }
 0x333   :  { %7254 = vmatpush1.bf16.msra.mxu1 %v16953_v26  ;;  %v17114_v17 = vcombine.high %v1147_v12, %v1155_v13  ;;  %v883_v24 = vld [vmem:[#allocation5 + $0x1768] sm:$0xff]  ;;  %v16857_v26 = vcombine.low %v891_v9, %v899_v11  ;;  %v17113_v27 = vcombine.low %v1147_v12, %v1155_v13 }
 0x334   :  { %7255 = vmatprep.subr.bf16.mxu1 %v16938_v31  ;;  %v1131_v41 = vld [vmem:[#allocation5 + $0x1f28] sm:$0xff]  ;;  %v16842_v28 = vcombine.high %v875_v21, %v883_v24 }
 0x335   :  { %7215 = vmatpush1.bf16.msra.mxu0 %v16681_v40  ;;  %v1139_v53 = vld [vmem:[#allocation5 + $0x1f68] sm:$0xff]  ;;  %v16841_v40 = vcombine.low %v875_v21, %v883_v24 }
 0x336   :  { %7216 = vmatprep.subr.bf16.mxu0 %v16666_v43  ;;  %v17098_v31 = vcombine.high %v1131_v41, %v1139_v53  ;;  %v1115_v35 = vld [vmem:[#allocation5 + $0x1ea8] sm:$0xff]  ;;  %v16826_v43 = vcombine.high %v859_v32, %v867_v34 }
 0x337   :  { %7256 = vmatpush1.bf16.msra.mxu1 %v16937_v42  ;;  %v1123_v37 = vld [vmem:[#allocation5 + $0x1ee8] sm:$0xff]  ;;  %v17097_v42 = vcombine.low %v1131_v41, %v1139_v53 }
 0x338   :  { %7257 = vmatprep.subr.bf16.mxu1 %v16922_v44  ;;  %v17082_v44 = vcombine.high %v1115_v35, %v1123_v37  ;;  %v843_v22 = vld [vmem:[#allocation5 + $0x1628] sm:$0xff] }
 0x339   :  { %7217 = vmatpush1.bf16.msra.mxu0 %v16665_v48  ;;  %v851_v45 = vld [vmem:[#allocation5 + $0x1668] sm:$0xff]  ;;  %v16825_v48 = vcombine.low %v859_v32, %v867_v34  ;;  %v252_v32 = vld [vmem:[#allocation5 + $0x3b0] sm:$0xff] }
 0x33a   :  { %7218 = vmatprep.subr.bf16.mxu0 %v16650_v57  ;;  %v1099_v46 = vld [vmem:[#allocation5 + $0x1e28] sm:$0xff]  ;;  %v16810_v57 = vcombine.high %v843_v22, %v851_v45  ;;  %v260_v34 = vld [vmem:[#allocation5 + $0x3f0] sm:$0xff] }
 0x33b   :  { %7258 = vmatpush1.bf16.msra.mxu1 %v16921_v49  ;;  %v1107_v19 = vld [vmem:[#allocation5 + $0x1e68] sm:$0xff]  ;;  %v17081_v49 = vcombine.low %v1115_v35, %v1123_v37  ;;  %v508_v35 = vld [vmem:[#allocation5 + $0xbb0] sm:$0xff] }
 0x33c   :  { %7259 = vmatprep.subr.bf16.mxu1 %v16906_v50  ;;  %v17066_v50 = vcombine.high %v1099_v46, %v1107_v19  ;;  %v827_v51 = vld [vmem:[#allocation5 + $0x15a8] sm:$0xff]  ;;  %v516_v37 = vld [vmem:[#allocation5 + $0xbf0] sm:$0xff] }
 0x33d   :  { %7219 = vmatpush1.bf16.msra.mxu0 %v16649_v60  ;;  %v835_v52 = vld [vmem:[#allocation5 + $0x15e8] sm:$0xff]  ;;  %v16809_v60 = vcombine.low %v843_v22, %v851_v45  ;;  %v236_v22 = vld [vmem:[#allocation5 + $0x330] sm:$0xff] }
 0x33e   :  { %7220 = vmatprep.subr.bf16.mxu0 %v16634_v62  ;;  %v1083_v55 = vld [vmem:[#allocation5 + $0x1da8] sm:$0xff]  ;;  %v16794_v62 = vcombine.high %v827_v51, %v835_v52  ;;  %v244_v45 = vld [vmem:[#allocation5 + $0x370] sm:$0xff] }
 0x33f   :  { %7260 = vmatpush1.bf16.msra.mxu1 %v16905_v61  ;;  %v1091_v56 = vld [vmem:[#allocation5 + $0x1de8] sm:$0xff]  ;;  %v17065_v61 = vcombine.low %v1099_v46, %v1107_v19  ;;  %v492_v46 = vld [vmem:[#allocation5 + $0xb30] sm:$0xff] }
 0x340   :  { %7261 = vmatprep.subr.bf16.mxu1 %v16890_v0  ;;  %v17050_v0 = vcombine.high %v1083_v55, %v1091_v56  ;;  %v811_v1 = vld [vmem:[#allocation5 + $0x1528] sm:$0xff]  ;;  %v500_v19 = vld [vmem:[#allocation5 + $0xb70] sm:$0xff] }
 0x341   :  { %7221 = vmatpush1.bf16.msra.mxu0 %v16633_v25  ;;  %v819_v2 = vld [vmem:[#allocation5 + $0x1568] sm:$0xff]  ;;  %v16793_v25 = vcombine.low %v827_v51, %v835_v52  ;;  %v220_v51 = vld [vmem:[#allocation5 + $0x2b0] sm:$0xff] }
 0x342   :  { %7222 = vmatprep.subr.bf16.mxu0 %v16618_v6  ;;  %v1067_v3 = vld [vmem:[#allocation5 + $0x1d28] sm:$0xff]  ;;  %v16778_v6 = vcombine.high %v811_v1, %v819_v2  ;;  %v228_v52 = vld [vmem:[#allocation5 + $0x2f0] sm:$0xff] }
 0x343   :  { %7262 = vmatpush1.bf16.msra.mxu1 %v16889_v5  ;;  %v1075_v4 = vld [vmem:[#allocation5 + $0x1d68] sm:$0xff]  ;;  %v17049_v5 = vcombine.low %v1083_v55, %v1091_v56  ;;  %v476_v56 = vld [vmem:[#allocation5 + $0xab0] sm:$0xff] }
 0x344   :  { %7263 = vmatprep.subr.bf16.mxu1 %v16874_v8  ;;  %v17034_v8 = vcombine.high %v1067_v3, %v1075_v4  ;;  %v795_v9 = vld [vmem:[#allocation5 + $0x14a8] sm:$0xff] }
 0x345   :  { %7223 = vmatpush1.bf16.msra.mxu0 %v16617_v30  ;;  %v803_v11 = vld [vmem:[#allocation5 + $0x14e8] sm:$0xff]  ;;  %v16777_v30 = vcombine.low %v811_v1, %v819_v2  ;;  %v16459_v2 = vcombine.low %v492_v46, %v500_v19 }
 0x346   :  { %7224 = vmatprep.subr.bf16.mxu0 %v16858_v14  ;;  %v1051_v12 = vld [vmem:[#allocation5 + $0x1ca8] sm:$0xff]  ;;  %v16762_v14 = vcombine.high %v795_v9, %v803_v11 }
 0x347   :  { %7264 = vmatpush1.bf16.msra.mxu1 %v16873_v15  ;;  %v1059_v13 = vld [vmem:[#allocation5 + $0x1ce8] sm:$0xff]  ;;  %v17033_v15 = vcombine.low %v1067_v3, %v1075_v4  ;;  %v16188_v3 = vcombine.high %v220_v51, %v228_v52 }
 0x348   :  { %7265 = vmatprep.subr.bf16.mxu1 %v17114_v17  ;;  %v17018_v17 = vcombine.high %v1051_v12, %v1059_v13  ;;  %v779_v21 = vld [vmem:[#allocation5 + $0x1428] sm:$0xff] }
 0x349   :  { %7225 = vmatpush2.bf16.msra.mxu0 %v16857_v26  ;;  %v787_v24 = vld [vmem:[#allocation5 + $0x1468] sm:$0xff]  ;;  %v16761_v26 = vcombine.low %v795_v9, %v803_v11  ;;  %v460_v11 = vld [vmem:[#allocation5 + $0xa30] sm:$0xff] }
 0x34a   :  { %7226 = vmatprep.subr.bf16.mxu0 %v16842_v28  ;;  %v1035_v41 = vld [vmem:[#allocation5 + $0x1c28] sm:$0xff]  ;;  %v16746_v28 = vcombine.high %v779_v21, %v787_v24 }
 0x34b   :  { %7266 = vmatpush2.bf16.msra.mxu1 %v17113_v27  ;;  %v1043_v53 = vld [vmem:[#allocation5 + $0x1c68] sm:$0xff]  ;;  %v17017_v27 = vcombine.low %v1051_v12, %v1059_v13  ;;  %v468_v12 = vld [vmem:[#allocation5 + $0xa70] sm:$0xff] }
 0x34c   :  { %7267 = vmatprep.subr.bf16.mxu1 %v17098_v31  ;;  %v17002_v31 = vcombine.high %v1035_v41, %v1043_v53 }
 0x34d   :  { %7227 = vmatpush2.bf16.msra.mxu0 %v16841_v40  ;;  %v16745_v40 = vcombine.low %v779_v21, %v787_v24  ;;  %v16428_v24 = vcombine.high %v460_v11, %v468_v12 }
 0x34e   :  { %7228 = vmatprep.subr.bf16.mxu0 %v16826_v43  ;;  %v16220_v43 = vcombine.high %v252_v32, %v260_v34 }
 0x34f   :  { %7268 = vmatpush2.bf16.msra.mxu1 %v17097_v42  ;;  %v17001_v42 = vcombine.low %v1035_v41, %v1043_v53  ;;  %v188_v41 = vld [vmem:[#allocation5 + $0x1b0] sm:$0xff] }
 0x350   :  { %7269 = vmatprep.subr.bf16.mxu1 %v17082_v44  ;;  %v16476_v44 = vcombine.high %v508_v35, %v516_v37  ;;  %v196_v53 = vld [vmem:[#allocation5 + $0x1f0] sm:$0xff] }
 0x351   :  { %7229 = vmatpush2.bf16.msra.mxu0 %v16825_v48  ;;  %v16219_v48 = vcombine.low %v252_v32, %v260_v34  ;;  %v16156_v32 = vcombine.high %v188_v41, %v196_v53 }
 0x352   :  { %7230 = vmatprep.subr.bf16.mxu0 %v16810_v57  ;;  %v16204_v57 = vcombine.high %v236_v22, %v244_v45 }
 0x353   :  { %7270 = vmatpush2.bf16.msra.mxu1 %v17081_v49  ;;  %v16475_v49 = vcombine.low %v508_v35, %v516_v37  ;;  %v172_v35 = vld [vmem:[#allocation5 + $0x130] sm:$0xff] }
 0x354   :  { %7271 = vmatprep.subr.bf16.mxu1 %v17066_v50  ;;  %v16460_v50 = vcombine.high %v492_v46, %v500_v19  ;;  %v180_v37 = vld [vmem:[#allocation5 + $0x170] sm:$0xff] }
 0x355   :  { %7231 = vmatpush2.bf16.msra.mxu0 %v16809_v60  ;;  %v484_v60 = vld [vmem:[#allocation5 + $0xaf0] sm:$0xff] }
 0x356   :  { %7232 = vmatprep.subr.bf16.mxu0 %v16794_v62  ;;  %v16203_v62 = vcombine.low %v236_v22, %v244_v45  ;;  %v16140_v22 = vcombine.high %v172_v35, %v180_v37  ;;  %v156_v46 = vld [vmem:[#allocation5 + $0xb0] sm:$0xff] }
 0x357   :  { %7272 = vmatpush2.bf16.msra.mxu1 %v17065_v61  ;;  %v164_v19 = vld [vmem:[#allocation5 + $0xf0] sm:$0xff] }
 0x358   :  { %7273 = vmatprep.subr.bf16.mxu1 %v17050_v0 }
 0x359   :  { %7233 = vmatpush2.bf16.msra.mxu0 %v16793_v25  ;;  %v16444_v25 = vcombine.high %v476_v56, %v484_v60 }
 0x35a   :  { %7234 = vmatprep.subr.bf16.mxu0 %v16778_v6  ;;  %v212_v6 = vld [vmem:[#allocation5 + $0x270] sm:$0xff] }
 0x35b   :  { %7274 = vmatpush2.bf16.msra.mxu1 %v17049_v5  ;;  %v204_v5 = vld [vmem:[#allocation5 + $0x230] sm:$0xff] }
 0x35c   :  { %7275 = vmatprep.subr.bf16.mxu1 %v17034_v8 }
 0x35d   :  { %7235 = vmatpush2.bf16.msra.mxu0 %v16777_v30  ;;  %v16187_v30 = vcombine.low %v220_v51, %v228_v52  ;;  %v16124_v51 = vcombine.high %v156_v46, %v164_v19 }
 0x35e   :  { %7236 = vmatprep.subr.bf16.mxu0 %v16762_v14  ;;  %v16443_v14 = vcombine.low %v476_v56, %v484_v60  ;;  %v148_v56 = vld [vmem:[#allocation5 + $0x70] sm:$0xff] }
 0x35f   :  { %7276 = vmatpush2.bf16.msra.mxu1 %v17033_v15  ;;  %v396_v60 = vld [vmem:[#allocation5 + $0x830] sm:$0xff] }
 0x360   :  { %7277 = vmatprep.subr.bf16.mxu1 %v17018_v17  ;;  %v16172_v17 = vcombine.high %v204_v5, %v212_v6 }
 0x361   :  { %7237 = vmatpush2.bf16.msra.mxu0 %v16761_v26  ;;  %v444_v26 = vld [vmem:[#allocation5 + $0x9b0] sm:$0xff] }
 0x362   :  { %7238 = vmatprep.subr.bf16.mxu0 %v16746_v28  ;;  %v16171_v28 = vcombine.low %v204_v5, %v212_v6  ;;  %v636_v5 = vld [vmem:[#allocation5 + $0xfb0] sm:$0xff] }
 0x363   :  { %7278 = vmatpush2.bf16.msra.mxu1 %v17017_v27  ;;  %v452_v27 = vld [vmem:[#allocation5 + $0x9f0] sm:$0xff] }
 0x364   :  { %7279 = vmatprep.subr.bf16.mxu1 %v17002_v31  ;;  %v16427_v31 = vcombine.low %v460_v11, %v468_v12  ;;  %v16412_v34 = vcombine.high %v444_v26, %v452_v27  ;;  %v644_v6 = vld [vmem:[#allocation5 + $0xff0] sm:$0xff] }
 0x365   :  { %7239 = vmatpush2.bf16.msra.mxu0 %v16745_v40  ;;  %v428_v40 = vld [vmem:[#allocation5 + $0x930] sm:$0xff] }
 0x366   :  { %7290 = vmatprep.subr.bf16.mxu0 %v16220_v43  ;;  %v16155_v43 = vcombine.low %v188_v41, %v196_v53 }
 0x367   :  { %7280 = vmatpush2.bf16.msra.mxu1 %v17001_v42  ;;  %v436_v42 = vld [vmem:[#allocation5 + $0x970] sm:$0xff] }
 0x368   :  { %7331 = vmatprep.subr.bf16.mxu1 %v16476_v44  ;;  %v6996_v55 = vpop.f32.mrf.mxu0  ;;  %7241 = vmatmul.mubr.bf16.vlgmr.msra.gmra.mxu0 %v18703_v38  ;;  %v16411_v44 = vcombine.low %v444_v26, %v452_v27  ;;  %v16396_v45 = vcombine.high %v428_v40, %v436_v42  ;;  %v348_v26 = vld [vmem:[#allocation5 + $0x6b0] sm:$0xff] }
 0x369   :  { %7291 = vmatpush1.bf16.msra.mxu0 %v16219_v48  ;;  %7322 = vmatprep.mubr.bf16.mxu0 %v18669_v58  ;;  %v412_v48 = vld [vmem:[#allocation5 + $0x8b0] sm:$0xff] }
 0x36a   :  { %v7037_v61 = vpop.f32.mrf.mxu1  ;;  %7282 = vmatmul.mubr.bf16.vlgmr.msra.gmra.mxu1 %v18707_v39  ;;  %v6998_v1 = vpop.f32.mrf.mxu0  ;;  %7292 = vmatprep.subr.bf16.mxu0 %v16204_v57  ;;  %v16139_v57 = vcombine.low %v172_v35, %v180_v37  ;;  %v356_v27 = vld [vmem:[#allocation5 + $0x6f0] sm:$0xff] }
 0x36b   :  { %v18791_v0 = vadd.f32 %v7037_v61, %v6996_v55  ;;  %7332 = vmatpush1.bf16.msra.mxu1 %v16475_v49  ;;  %7363 = vmatprep.mubr.bf16.mxu1 %v18673_v59  ;;  %v420_v49 = vld [vmem:[#allocation5 + $0x8f0] sm:$0xff]  ;;  %v16316_v35 = vcombine.high %v348_v26, %v356_v27 }
 0x36c   :  { %v7039_v4 = vpop.f32.mrf.mxu1  ;;  %7333 = vmatprep.subr.bf16.mxu1 %v16460_v50  ;;  %v7000_v9 = vpop.f32.mrf.mxu0  ;;  %v16395_v50 = vcombine.low %v428_v40, %v436_v42  ;;  %v16380_v52 = vcombine.high %v412_v48, %v420_v49  ;;  %v140_v55 = vld [vmem:[#allocation5 + $0x30] sm:$0xff] }
 0x36d   :  { %v18794_v8 = vadd.f32 %v7039_v4, %v6998_v1  ;;  %7293 = vmatpush1.bf16.msra.mxu0 %v16203_v62  ;;  %v404_v61 = vld [vmem:[#allocation5 + $0x870] sm:$0xff]  ;;  %v16123_v62 = vcombine.low %v156_v46, %v164_v19  ;;  %v16379_v1 = vcombine.low %v412_v48, %v420_v49  ;;  %v16107_v9 = vcombine.low %v140_v55, %v148_v56 }
 0x36e   :  { %v7041_v13 = vpop.f32.mrf.mxu1  ;;  %v7001_v15 = vpop.f32.mrf.mxu0  ;;  %7294 = vmatprep.subr.bf16.mxu0 %v16188_v3  ;;  %v16364_v3 = vcombine.high %v396_v60, %v404_v61  ;;  %v380_v4 = vld [vmem:[#allocation5 + $0x7b0] sm:$0xff]  ;;  %v16363_v11 = vcombine.low %v396_v60, %v404_v61 }
 0x36f   :  { %7334 = vmatpush1.bf16.msra.mxu1 %v16459_v2  ;;  %v16108_v2 = vcombine.high %v140_v55, %v148_v56  ;;  %v16604_v13 = vcombine.high %v636_v5, %v644_v6  ;;  %v372_v15 = vld [vmem:[#allocation5 + $0x770] sm:$0xff] }
 0x370   :  { %v7042_v21 = vpop.f32.mrf.mxu1  ;;  %7335 = vmatprep.subr.bf16.mxu1 %v16444_v25  ;;  %v388_v25 = vld [vmem:[#allocation5 + $0x7f0] sm:$0xff] }
 0x371   :  { %7295 = vmatpush1.bf16.msra.mxu0 %v16187_v30  ;;  %v16348_v12 = vcombine.high %v380_v4, %v388_v25  ;;  %v364_v30 = vld [vmem:[#allocation5 + $0x730] sm:$0xff]  ;;  %v16347_v21 = vcombine.low %v380_v4, %v388_v25 }
 0x372   :  { %7296 = vmatprep.subr.bf16.mxu0 %v16172_v17  ;;  %v628_v17 = vld [vmem:[#allocation5 + $0xf70] sm:$0xff]  ;;  %v16332_v41 = vcombine.high %v364_v30, %v372_v15 }
 0x373   :  { %7336 = vmatpush1.bf16.msra.mxu1 %v16443_v14  ;;  %v620_v14 = vld [vmem:[#allocation5 + $0xf30] sm:$0xff] }
 0x374   :  { %7337 = vmatprep.subr.bf16.mxu1 %v16428_v24  ;;  %v16603_v24 = vcombine.low %v636_v5, %v644_v6  ;;  %v16588_v53 = vcombine.high %v620_v14, %v628_v17  ;;  %v332_v40 = vld [vmem:[#allocation5 + $0x630] sm:$0xff] }
 0x375   :  { %7297 = vmatpush1.bf16.msra.mxu0 %v16171_v28  ;;  %v604_v28 = vld [vmem:[#allocation5 + $0xeb0] sm:$0xff] }
 0x376   :  { %7298 = vmatprep.subr.bf16.mxu0 %v16156_v32  ;;  %v16331_v32 = vcombine.low %v364_v30, %v372_v15  ;;  %v340_v42 = vld [vmem:[#allocation5 + $0x670] sm:$0xff] }
 0x377   :  { %7338 = vmatpush1.bf16.msra.mxu1 %v16427_v31  ;;  %v612_v31 = vld [vmem:[#allocation5 + $0xef0] sm:$0xff]  ;;  %v16300_v46 = vcombine.high %v332_v40, %v340_v42 }
 0x378   :  { %7339 = vmatprep.subr.bf16.mxu1 %v16412_v34  ;;  %v16587_v34 = vcombine.low %v620_v14, %v628_v17  ;;  %v16572_v37 = vcombine.high %v604_v28, %v612_v31  ;;  %v316_v48 = vld [vmem:[#allocation5 + $0x5b0] sm:$0xff] }
 0x379   :  { %7299 = vmatpush1.bf16.msra.mxu0 %v16155_v43  ;;  %v588_v43 = vld [vmem:[#allocation5 + $0xe30] sm:$0xff] }
 0x37a   :  { %7300 = vmatprep.subr.bf16.mxu0 %v16140_v22  ;;  %v16315_v22 = vcombine.low %v348_v26, %v356_v27  ;;  %v324_v49 = vld [vmem:[#allocation5 + $0x5f0] sm:$0xff] }
 0x37b   :  { %7340 = vmatpush1.bf16.msra.mxu1 %v16411_v44  ;;  %v596_v44 = vld [vmem:[#allocation5 + $0xe70] sm:$0xff]  ;;  %v16284_v55 = vcombine.high %v316_v48, %v324_v49 }
 0x37c   :  { %7341 = vmatprep.subr.bf16.mxu1 %v16396_v45  ;;  %v16571_v45 = vcombine.low %v604_v28, %v612_v31  ;;  %v16556_v19 = vcombine.high %v588_v43, %v596_v44  ;;  %v300_v60 = vld [vmem:[#allocation5 + $0x530] sm:$0xff] }
 0x37d   :  { %7301 = vmatpush1.bf16.msra.mxu0 %v16139_v57  ;;  %v572_v57 = vld [vmem:[#allocation5 + $0xdb0] sm:$0xff] }
 0x37e   :  { %7302 = vmatprep.subr.bf16.mxu0 %v16124_v51  ;;  %v16299_v51 = vcombine.low %v332_v40, %v340_v42  ;;  %v308_v61 = vld [vmem:[#allocation5 + $0x570] sm:$0xff] }
 0x37f   :  { %7342 = vmatpush1.bf16.msra.mxu1 %v16395_v50  ;;  %v580_v50 = vld [vmem:[#allocation5 + $0xdf0] sm:$0xff]  ;;  %v16268_v4 = vcombine.high %v300_v60, %v308_v61 }
 0x380   :  { %7343 = vmatprep.subr.bf16.mxu1 %v16380_v52  ;;  %v16555_v52 = vcombine.low %v588_v43, %v596_v44  ;;  %v16540_v56 = vcombine.high %v572_v57, %v580_v50  ;;  %v284_v5 = vld [vmem:[#allocation5 + $0x4b0] sm:$0xff] }
 0x381   :  { %7303 = vmatpush1.bf16.msra.mxu0 %v16123_v62  ;;  %v556_v62 = vld [vmem:[#allocation5 + $0xd30] sm:$0xff] }
 0x382   :  { %7304 = vmatprep.subr.bf16.mxu0 %v16108_v2  ;;  %v16283_v2 = vcombine.low %v316_v48, %v324_v49  ;;  %v292_v6 = vld [vmem:[#allocation5 + $0x4f0] sm:$0xff] }
 0x383   :  { %7344 = vmatpush1.bf16.msra.mxu1 %v16379_v1  ;;  %v564_v1 = vld [vmem:[#allocation5 + $0xd70] sm:$0xff]  ;;  %v16252_v30 = vcombine.high %v284_v5, %v292_v6 }
 0x384   :  { %7345 = vmatprep.subr.bf16.mxu1 %v16364_v3  ;;  %v16539_v3 = vcombine.low %v572_v57, %v580_v50  ;;  %v16524_v25 = vcombine.high %v556_v62, %v564_v1  ;;  %v268_v14 = vld [vmem:[#allocation5 + $0x430] sm:$0xff] }
 0x385   :  { %7305 = vmatpush1.bf16.msra.mxu0 %v16107_v9  ;;  %v540_v9 = vld [vmem:[#allocation5 + $0xcb0] sm:$0xff] }
 0x386   :  { %7306 = vmatprep.subr.bf16.mxu0 %v16348_v12  ;;  %v16267_v12 = vcombine.low %v300_v60, %v308_v61  ;;  %v276_v17 = vld [vmem:[#allocation5 + $0x470] sm:$0xff] }
 0x387   :  { %7346 = vmatpush1.bf16.msra.mxu1 %v16363_v11  ;;  %v548_v11 = vld [vmem:[#allocation5 + $0xcf0] sm:$0xff]  ;;  %v16236_v26 = vcombine.high %v268_v14, %v276_v17 }
 0x388   :  { %7347 = vmatprep.subr.bf16.mxu1 %v16604_v13  ;;  %v16523_v13 = vcombine.low %v556_v62, %v564_v1  ;;  %v16508_v15 = vcombine.high %v540_v9, %v548_v11  ;;  %v764_v28 = vld [vmem:[#allocation5 + $0x13b0] sm:$0xff] }
 0x389   :  { %7307 = vmatpush2.bf16.msra.mxu0 %v16347_v21  ;;  %v524_v21 = vld [vmem:[#allocation5 + $0xc30] sm:$0xff] }
 0x38a   :  { %7308 = vmatprep.subr.bf16.mxu0 %v16332_v41  ;;  %v16251_v41 = vcombine.low %v284_v5, %v292_v6  ;;  %v772_v31 = vld [vmem:[#allocation5 + $0x13f0] sm:$0xff] }
 0x38b   :  { %7348 = vmatpush2.bf16.msra.mxu1 %v16603_v24  ;;  %v532_v24 = vld [vmem:[#allocation5 + $0xc70] sm:$0xff]  ;;  %v16732_v40 = vcombine.high %v764_v28, %v772_v31 }
 0x38c   :  { %7349 = vmatprep.subr.bf16.mxu1 %v16588_v53  ;;  %v16507_v53 = vcombine.low %v540_v9, %v548_v11  ;;  %v16492_v27 = vcombine.high %v524_v21, %v532_v24  ;;  %v748_v43 = vld [vmem:[#allocation5 + $0x1330] sm:$0xff] }
 0x38d   :  { %7309 = vmatpush2.bf16.msra.mxu0 %v16331_v32  ;;  %v1020_v32 = vld [vmem:[#allocation5 + $0x1bb0] sm:$0xff] }
 0x38e   :  { %7310 = vmatprep.subr.bf16.mxu0 %v16316_v35  ;;  %v16235_v35 = vcombine.low %v268_v14, %v276_v17  ;;  %v756_v44 = vld [vmem:[#allocation5 + $0x1370] sm:$0xff] }
 0x38f   :  { %7350 = vmatpush2.bf16.msra.mxu1 %v16587_v34  ;;  %v1028_v34 = vld [vmem:[#allocation5 + $0x1bf0] sm:$0xff]  ;;  %v16716_v48 = vcombine.high %v748_v43, %v756_v44  ;;  %v16715_v61 = vcombine.low %v748_v43, %v756_v44 }
 0x390   :  { %7351 = vmatprep.subr.bf16.mxu1 %v16572_v37  ;;  %v16491_v37 = vcombine.low %v524_v21, %v532_v24  ;;  %v16988_v42 = vcombine.high %v1020_v32, %v1028_v34  ;;  %v732_v57 = vld [vmem:[#allocation5 + $0x12b0] sm:$0xff] }
 0x391   :  { %7311 = vmatpush2.bf16.msra.mxu0 %v16315_v22  ;;  %v1004_v22 = vld [vmem:[#allocation5 + $0x1b30] sm:$0xff] }
 0x392   :  { %7312 = vmatprep.subr.bf16.mxu0 %v16300_v46  ;;  %v16731_v46 = vcombine.low %v764_v28, %v772_v31  ;;  %v740_v50 = vld [vmem:[#allocation5 + $0x12f0] sm:$0xff] }
 0x393   :  { %7352 = vmatpush2.bf16.msra.mxu1 %v16571_v45  ;;  %v1012_v45 = vld [vmem:[#allocation5 + $0x1b70] sm:$0xff] }
 0x394   :  { %7353 = vmatprep.subr.bf16.mxu1 %v16556_v19  ;;  %v16987_v19 = vcombine.low %v1020_v32, %v1028_v34  ;;  %v16972_v49 = vcombine.high %v1004_v22, %v1012_v45  ;;  %v16971_v1 = vcombine.low %v1004_v22, %v1012_v45  ;;  %v716_v6 = vld [vmem:[#allocation5 + $0x1230] sm:$0xff] }
 0x395   :  { %7313 = vmatpush2.bf16.msra.mxu0 %v16299_v51  ;;  %v724_v9 = vld [vmem:[#allocation5 + $0x1270] sm:$0xff] }
 0x396   :  { %7314 = vmatprep.subr.bf16.mxu0 %v16284_v55  ;;  %v996_v55 = vld [vmem:[#allocation5 + $0x1af0] sm:$0xff]  ;;  %v16684_v17 = vcombine.high %v716_v6, %v724_v9  ;;  %v16683_v28 = vcombine.low %v716_v6, %v724_v9 }
 0x397   :  { %7354 = vmatpush2.bf16.msra.mxu1 %v16555_v52  ;;  %v988_v52 = vld [vmem:[#allocation5 + $0x1ab0] sm:$0xff] }
 0x398   :  { %7355 = vmatprep.subr.bf16.mxu1 %v16540_v56  ;;  %v16956_v5 = vcombine.high %v988_v52, %v996_v55  ;;  %v972_v11 = vld [vmem:[#allocation5 + $0x1a30] sm:$0xff] }
 0x399   :  { %7315 = vmatpush2.bf16.msra.mxu0 %v16283_v2  ;;  %v16700_v2 = vcombine.high %v732_v57, %v740_v50  ;;  %v1148_v6 = vld [vmem:[#allocation5 + $0x1fb0] sm:$0xff] }
 0x39a   :  { %7316 = vmatprep.subr.bf16.mxu0 %v16268_v4  ;;  %v1156_v9 = vld [vmem:[#allocation5 + $0x1ff0] sm:$0xff] }
 0x39b   :  { %7356 = vmatpush2.bf16.msra.mxu1 %v16539_v3 }
 0x39c   :  { %7357 = vmatprep.subr.bf16.mxu1 %v16524_v25 }
 0x39d   :  { %7317 = vmatpush2.bf16.msra.mxu0 %v16267_v12  ;;  %v980_v12 = vld [vmem:[#allocation5 + $0x1a70] sm:$0xff] }
 0x39e   :  { %7318 = vmatprep.subr.bf16.mxu0 %v16252_v30  ;;  %v16940_v24 = vcombine.high %v972_v11, %v980_v12  ;;  %v16939_v31 = vcombine.low %v972_v11, %v980_v12 }
 0x39f   :  { %7358 = vmatpush2.bf16.msra.mxu1 %v16523_v13 }
 0x3a0   :  { %7359 = vmatprep.subr.bf16.mxu1 %v16508_v15  ;;  %v16699_v15 = vcombine.low %v732_v57, %v740_v50 }
 0x3a1   :  { %7319 = vmatpush2.bf16.msra.mxu0 %v16251_v41  ;;  %v700_v41 = vld [vmem:[#allocation5 + $0x11b0] sm:$0xff] }
 0x3a2   :  { %7320 = vmatprep.subr.bf16.mxu0 %v16236_v26  ;;  %v956_v26 = vld [vmem:[#allocation5 + $0x19b0] sm:$0xff] }
 0x3a3   :  { %7360 = vmatpush2.bf16.msra.mxu1 %v16507_v53  ;;  %v708_v53 = vld [vmem:[#allocation5 + $0x11f0] sm:$0xff] }
 0x3a4   :  { %7361 = vmatprep.subr.bf16.mxu1 %v16492_v27  ;;  %v964_v27 = vld [vmem:[#allocation5 + $0x19f0] sm:$0xff]  ;;  %v16668_v32 = vcombine.high %v700_v41, %v708_v53  ;;  %v16667_v43 = vcombine.low %v700_v41, %v708_v53 }
 0x3a5   :  { %7321 = vmatpush2.bf16.msra.mxu0 %v16235_v35  ;;  %v16924_v34 = vcombine.high %v956_v26, %v964_v27  ;;  %v684_v35 = vld [vmem:[#allocation5 + $0x1130] sm:$0xff]  ;;  %v16923_v44 = vcombine.low %v956_v26, %v964_v27 }
 0x3a6   :  { %7372 = vmatprep.subr.bf16.mxu0 %v16732_v40  ;;  %v940_v40 = vld [vmem:[#allocation5 + $0x1930] sm:$0xff] }
 0x3a7   :  { %7362 = vmatpush2.bf16.msra.mxu1 %v16491_v37  ;;  %v692_v37 = vld [vmem:[#allocation5 + $0x1170] sm:$0xff] }
 0x3a8   :  { %7413 = vmatprep.subr.bf16.mxu1 %v16988_v42  ;;  %v7078_v51 = vpop.f32.mrf.mxu0  ;;  %7323 = vmatmul.mubr.bf16.vlgmr.msra.gmra.mxu0 %v18679_v16  ;;  %v948_v42 = vld [vmem:[#allocation5 + $0x1970] sm:$0xff]  ;;  %v16652_v22 = vcombine.high %v684_v35, %v692_v37  ;;  %v16651_v57 = vcombine.low %v684_v35, %v692_v37 }
 0x3a9   :  { %v7079_v56 = vadd.f32 %v7078_v51, %v18791_v0  ;;  %7373 = vmatpush1.bf16.msra.mxu0 %v16731_v46  ;;  %7404 = vmatprep.mubr.bf16.mxu0 %v18691_v29  ;;  %v16908_v45 = vcombine.high %v940_v40, %v948_v42  ;;  %v668_v46 = vld [vmem:[#allocation5 + $0x10b0] sm:$0xff]  ;;  %v16907_v50 = vcombine.low %v940_v40, %v948_v42 }
 0x3aa   :  { %v7119_v60 = vpop.f32.mrf.mxu1  ;;  %7364 = vmatmul.mubr.bf16.vlgmr.msra.gmra.mxu1 %v18685_v20  ;;  %v7080_v62 = vpop.f32.mrf.mxu0  ;;  %7374 = vmatprep.subr.bf16.mxu0 %v16716_v48  ;;  %v924_v48 = vld [vmem:[#allocation5 + $0x18b0] sm:$0xff] }
 0x3ab   :  { %7414 = vmatpush1.bf16.msra.mxu1 %v16987_v19  ;;  %v18800_v3 = vadd.f32 %v7119_v60, %v7079_v56  ;;  %v7081_v4 = vadd.f32 %v7080_v62, %v18794_v8  ;;  %7445 = vmatprep.mubr.bf16.mxu1 %v18696_v54  ;;  %v16955_v8 = vcombine.low %v988_v52, %v996_v55  ;;  %v676_v19 = vld [vmem:[#allocation5 + $0x10f0] sm:$0xff] }
 0x3ac   :  { %v7121_v25 = vpop.f32.mrf.mxu1  ;;  %7415 = vmatprep.subr.bf16.mxu1 %v16972_v49  ;;  %v7082_v0 = vpop.f32.mrf.mxu0  ;;  %v932_v49 = vld [vmem:[#allocation5 + $0x18f0] sm:$0xff]  ;;  %v16636_v51 = vcombine.high %v668_v46, %v676_v19  ;;  %v16635_v62 = vcombine.low %v668_v46, %v676_v19 }
 0x3ad   :  { %v18805_v13 = vadd.f32 %v7121_v25, %v7081_v4  ;;  %7375 = vmatpush1.bf16.msra.mxu0 %v16715_v61  ;;  %v16892_v52 = vcombine.high %v924_v48, %v932_v49  ;;  %v652_v55 = vld [vmem:[#allocation5 + $0x1030] sm:$0xff] }
 0x3ae   :  { %v7123_v30 = vpop.f32.mrf.mxu1  ;;  %v7083_v14 = vpop.f32.mrf.mxu0  ;;  %7376 = vmatprep.subr.bf16.mxu0 %v16700_v2  ;;  %v660_v56 = vld [vmem:[#allocation5 + $0x1070] sm:$0xff] }
 0x3af   :  { %7416 = vmatpush1.bf16.msra.mxu1 %v16971_v1  ;;  %v908_v60 = vld [vmem:[#allocation5 + $0x1830] sm:$0xff]  ;;  %v16891_v1 = vcombine.low %v924_v48, %v932_v49  ;;  %v16620_v2 = vcombine.high %v652_v55, %v660_v56  ;;  %v16619_v0 = vcombine.low %v652_v55, %v660_v56  ;;  %v17116_v30 = vcombine.high %v1148_v6, %v1156_v9 }
 0x3b0   :  { %v7124_v21 = vpop.f32.mrf.mxu1  ;;  %7417 = vmatprep.subr.bf16.mxu1 %v16956_v5  ;;  %v916_v61 = vld [vmem:[#allocation5 + $0x1870] sm:$0xff] }
 0x3b1   :  { %7377 = vmatpush1.bf16.msra.mxu0 %v16699_v15  ;;  %v16876_v4 = vcombine.high %v908_v60, %v916_v61  ;;  %v892_v25 = vld [vmem:[#allocation5 + $0x17b0] sm:$0xff]  ;;  %v16875_v11 = vcombine.low %v908_v60, %v916_v61 }
 0x3b2   :  { %7378 = vmatprep.subr.bf16.mxu0 %v16684_v17  ;;  %v900_v5 = vld [vmem:[#allocation5 + $0x17f0] sm:$0xff] }
 0x3b3   :  { %7418 = vmatpush1.bf16.msra.mxu1 %v16955_v8  ;;  %v16860_v12 = vcombine.high %v892_v25, %v900_v5  ;;  %v876_v15 = vld [vmem:[#allocation5 + $0x1730] sm:$0xff]  ;;  %v16859_v21 = vcombine.low %v892_v25, %v900_v5 }
 0x3b4   :  { %7419 = vmatprep.subr.bf16.mxu1 %v16940_v24  ;;  %v884_v14 = vld [vmem:[#allocation5 + $0x1770] sm:$0xff]  ;;  %v17115_v24 = vcombine.low %v1148_v6, %v1156_v9 }
 0x3b5   :  { %7379 = vmatpush1.bf16.msra.mxu0 %v16683_v28  ;;  %v1132_v8 = vld [vmem:[#allocation5 + $0x1f30] sm:$0xff]  ;;  %v16844_v41 = vcombine.high %v876_v15, %v884_v14 }
 0x3b6   :  { %7380 = vmatprep.subr.bf16.mxu0 %v16668_v32  ;;  %v1140_v17 = vld [vmem:[#allocation5 + $0x1f70] sm:$0xff]  ;;  %v16843_v32 = vcombine.low %v876_v15, %v884_v14 }
 0x3b7   :  { %7420 = vmatpush1.bf16.msra.mxu1 %v16939_v31  ;;  %v17100_v53 = vcombine.high %v1132_v8, %v1140_v17  ;;  %v860_v26 = vld [vmem:[#allocation5 + $0x16b0] sm:$0xff] }
 0x3b8   :  { %7421 = vmatprep.subr.bf16.mxu1 %v16924_v34  ;;  %v868_v27 = vld [vmem:[#allocation5 + $0x16f0] sm:$0xff]  ;;  %v17099_v34 = vcombine.low %v1132_v8, %v1140_v17 }
 0x3b9   :  { %7381 = vmatpush1.bf16.msra.mxu0 %v16667_v43  ;;  %v1116_v28 = vld [vmem:[#allocation5 + $0x1eb0] sm:$0xff]  ;;  %v16828_v35 = vcombine.high %v860_v26, %v868_v27 }
 0x3ba   :  { %7382 = vmatprep.subr.bf16.mxu0 %v16652_v22  ;;  %v1124_v31 = vld [vmem:[#allocation5 + $0x1ef0] sm:$0xff]  ;;  %v16827_v22 = vcombine.low %v860_v26, %v868_v27 }
 0x3bb   :  { %7422 = vmatpush1.bf16.msra.mxu1 %v16923_v44  ;;  %v17084_v37 = vcombine.high %v1116_v28, %v1124_v31  ;;  %v844_v40 = vld [vmem:[#allocation5 + $0x1630] sm:$0xff] }
 0x3bc   :  { %7423 = vmatprep.subr.bf16.mxu1 %v16908_v45  ;;  %v852_v42 = vld [vmem:[#allocation5 + $0x1670] sm:$0xff]  ;;  %v17083_v45 = vcombine.low %v1116_v28, %v1124_v31  ;;  %v253_v28 = vld [vmem:[#allocation5 + $0x3b8] sm:$0xff] }
 0x3bd   :  { %7383 = vmatpush1.bf16.msra.mxu0 %v16651_v57  ;;  %v1100_v43 = vld [vmem:[#allocation5 + $0x1e30] sm:$0xff]  ;;  %v16812_v46 = vcombine.high %v844_v40, %v852_v42  ;;  %v261_v31 = vld [vmem:[#allocation5 + $0x3f8] sm:$0xff] }
 0x3be   :  { %7384 = vmatprep.subr.bf16.mxu0 %v16636_v51  ;;  %v1108_v44 = vld [vmem:[#allocation5 + $0x1e70] sm:$0xff]  ;;  %v16811_v51 = vcombine.low %v844_v40, %v852_v42  ;;  %v16222_v40 = vcombine.high %v253_v28, %v261_v31 }
 0x3bf   :  { %7424 = vmatpush1.bf16.msra.mxu1 %v16907_v50  ;;  %v17068_v19 = vcombine.high %v1100_v43, %v1108_v44  ;;  %v828_v48 = vld [vmem:[#allocation5 + $0x15b0] sm:$0xff] }
 0x3c0   :  { %7425 = vmatprep.subr.bf16.mxu1 %v16892_v52  ;;  %v836_v49 = vld [vmem:[#allocation5 + $0x15f0] sm:$0xff]  ;;  %v17067_v52 = vcombine.low %v1100_v43, %v1108_v44  ;;  %v237_v43 = vld [vmem:[#allocation5 + $0x338] sm:$0xff] }
 0x3c1   :  { %7385 = vmatpush1.bf16.msra.mxu0 %v16635_v62  ;;  %v1084_v57 = vld [vmem:[#allocation5 + $0x1db0] sm:$0xff]  ;;  %v16796_v55 = vcombine.high %v828_v48, %v836_v49  ;;  %v245_v44 = vld [vmem:[#allocation5 + $0x378] sm:$0xff] }
 0x3c2   :  { %7386 = vmatprep.subr.bf16.mxu0 %v16620_v2  ;;  %v1092_v50 = vld [vmem:[#allocation5 + $0x1df0] sm:$0xff]  ;;  %v16795_v2 = vcombine.low %v828_v48, %v836_v49  ;;  %v16206_v48 = vcombine.high %v237_v43, %v245_v44 }
 0x3c3   :  { %7426 = vmatpush1.bf16.msra.mxu1 %v16891_v1  ;;  %v17052_v56 = vcombine.high %v1084_v57, %v1092_v50  ;;  %v812_v60 = vld [vmem:[#allocation5 + $0x1530] sm:$0xff] }
 0x3c4   :  { %7427 = vmatprep.subr.bf16.mxu1 %v16876_v4  ;;  %v820_v61 = vld [vmem:[#allocation5 + $0x1570] sm:$0xff]  ;;  %v17051_v4 = vcombine.low %v1084_v57, %v1092_v50  ;;  %v221_v57 = vld [vmem:[#allocation5 + $0x2b8] sm:$0xff] }
 0x3c5   :  { %7387 = vmatpush1.bf16.msra.mxu0 %v16619_v0  ;;  %v1068_v62 = vld [vmem:[#allocation5 + $0x1d30] sm:$0xff]  ;;  %v16780_v25 = vcombine.high %v812_v60, %v820_v61  ;;  %v229_v50 = vld [vmem:[#allocation5 + $0x2f8] sm:$0xff] }
 0x3c6   :  { %7388 = vmatprep.subr.bf16.mxu0 %v16860_v12  ;;  %v1076_v1 = vld [vmem:[#allocation5 + $0x1d70] sm:$0xff]  ;;  %v16779_v12 = vcombine.low %v812_v60, %v820_v61  ;;  %v16205_v60 = vcombine.low %v237_v43, %v245_v44 }
 0x3c7   :  { %7428 = vmatpush1.bf16.msra.mxu1 %v16875_v11  ;;  %v17036_v5 = vcombine.high %v1068_v62, %v1076_v1  ;;  %v796_v6 = vld [vmem:[#allocation5 + $0x14b0] sm:$0xff] }
 0x3c8   :  { %7429 = vmatprep.subr.bf16.mxu1 %v17116_v30  ;;  %v804_v9 = vld [vmem:[#allocation5 + $0x14f0] sm:$0xff]  ;;  %v17035_v30 = vcombine.low %v1068_v62, %v1076_v1 }
 0x3c9   :  { %7389 = vmatpush2.bf16.msra.mxu0 %v16859_v21  ;;  %v1052_v0 = vld [vmem:[#allocation5 + $0x1cb0] sm:$0xff]  ;;  %v16764_v15 = vcombine.high %v796_v6, %v804_v9 }
 0x3ca   :  { %7390 = vmatprep.subr.bf16.mxu0 %v16844_v41  ;;  %v1060_v11 = vld [vmem:[#allocation5 + $0x1cf0] sm:$0xff]  ;;  %v16763_v41 = vcombine.low %v796_v6, %v804_v9  ;;  %v213_v6 = vld [vmem:[#allocation5 + $0x278] sm:$0xff] }
 0x3cb   :  { %7430 = vmatpush2.bf16.msra.mxu1 %v17115_v24  ;;  %v17020_v14 = vcombine.high %v1052_v0, %v1060_v11  ;;  %v780_v8 = vld [vmem:[#allocation5 + $0x1430] sm:$0xff] }
 0x3cc   :  { %7431 = vmatprep.subr.bf16.mxu1 %v17100_v53  ;;  %v788_v17 = vld [vmem:[#allocation5 + $0x1470] sm:$0xff]  ;;  %v17019_v53 = vcombine.low %v1052_v0, %v1060_v11  ;;  %v461_v11 = vld [vmem:[#allocation5 + $0xa38] sm:$0xff] }
 0x3cd   :  { %7391 = vmatpush2.bf16.msra.mxu0 %v16843_v32  ;;  %v1036_v21 = vld [vmem:[#allocation5 + $0x1c30] sm:$0xff]  ;;  %v16748_v26 = vcombine.high %v780_v8, %v788_v17  ;;  %v509_v32 = vld [vmem:[#allocation5 + $0xbb8] sm:$0xff] }
 0x3ce   :  { %7392 = vmatprep.subr.bf16.mxu0 %v16828_v35  ;;  %v1044_v24 = vld [vmem:[#allocation5 + $0x1c70] sm:$0xff]  ;;  %v16747_v35 = vcombine.low %v780_v8, %v788_v17 }
 0x3cf   :  { %7432 = vmatpush2.bf16.msra.mxu1 %v17099_v34  ;;  %v17004_v27 = vcombine.high %v1036_v21, %v1044_v24  ;;  %v517_v34 = vld [vmem:[#allocation5 + $0xbf8] sm:$0xff] }
 0x3d0   :  { %7433 = vmatprep.subr.bf16.mxu1 %v17084_v37  ;;  %v17003_v37 = vcombine.low %v1036_v21, %v1044_v24  ;;  %v16478_v42 = vcombine.high %v509_v32, %v517_v34 }
 0x3d1   :  { %7393 = vmatpush2.bf16.msra.mxu0 %v16827_v22  ;;  %v493_v22 = vld [vmem:[#allocation5 + $0xb38] sm:$0xff] }
 0x3d2   :  { %7394 = vmatprep.subr.bf16.mxu0 %v16812_v46  ;;  %v16221_v46 = vcombine.low %v253_v28, %v261_v31 }
 0x3d3   :  { %7434 = vmatpush2.bf16.msra.mxu1 %v17083_v45  ;;  %v501_v45 = vld [vmem:[#allocation5 + $0xb78] sm:$0xff] }
 0x3d4   :  { %7435 = vmatprep.subr.bf16.mxu1 %v17068_v19  ;;  %v16477_v19 = vcombine.low %v509_v32, %v517_v34  ;;  %v16462_v49 = vcombine.high %v493_v22, %v501_v45  ;;  %v16461_v1 = vcombine.low %v493_v22, %v501_v45  ;;  %v173_v32 = vld [vmem:[#allocation5 + $0x138] sm:$0xff] }
 0x3d5   :  { %7395 = vmatpush2.bf16.msra.mxu0 %v16811_v51  ;;  %v181_v34 = vld [vmem:[#allocation5 + $0x178] sm:$0xff] }
 0x3d6   :  { %7396 = vmatprep.subr.bf16.mxu0 %v16796_v55  ;;  %v485_v55 = vld [vmem:[#allocation5 + $0xaf8] sm:$0xff]  ;;  %v16142_v43 = vcombine.high %v173_v32, %v181_v34 }
 0x3d7   :  { %7436 = vmatpush2.bf16.msra.mxu1 %v17067_v52  ;;  %v477_v52 = vld [vmem:[#allocation5 + $0xab8] sm:$0xff] }
 0x3d8   :  { %7437 = vmatprep.subr.bf16.mxu1 %v17052_v56  ;;  %v16445_v8 = vcombine.low %v477_v52, %v485_v55  ;;  %v157_v22 = vld [vmem:[#allocation5 + $0xb8] sm:$0xff] }
 0x3d9   :  { %7397 = vmatpush2.bf16.msra.mxu0 %v16795_v2  ;;  %v16190_v2 = vcombine.high %v221_v57, %v229_v50  ;;  %v165_v45 = vld [vmem:[#allocation5 + $0xf8] sm:$0xff] }
 0x3da   :  { %7398 = vmatprep.subr.bf16.mxu0 %v16780_v25  ;;  %v16446_v25 = vcombine.high %v477_v52, %v485_v55  ;;  %v149_v52 = vld [vmem:[#allocation5 + $0x78] sm:$0xff] }
 0x3db   :  { %7438 = vmatpush2.bf16.msra.mxu1 %v17051_v4  ;;  %v397_v55 = vld [vmem:[#allocation5 + $0x838] sm:$0xff] }
 0x3dc   :  { %7439 = vmatprep.subr.bf16.mxu1 %v17036_v5  ;;  %v205_v5 = vld [vmem:[#allocation5 + $0x238] sm:$0xff] }
 0x3dd   :  { %7399 = vmatpush2.bf16.msra.mxu0 %v16779_v12  ;;  %v469_v12 = vld [vmem:[#allocation5 + $0xa78] sm:$0xff]  ;;  %v16174_v17 = vcombine.high %v205_v5, %v213_v6 }
 0x3de   :  { %7400 = vmatprep.subr.bf16.mxu0 %v16764_v15  ;;  %v16189_v15 = vcombine.low %v221_v57, %v229_v50  ;;  %v16430_v24 = vcombine.high %v461_v11, %v469_v12  ;;  %v16126_v57 = vcombine.high %v157_v22, %v165_v45 }
 0x3df   :  { %7440 = vmatpush2.bf16.msra.mxu1 %v17035_v30 }
 0x3e0   :  { %7441 = vmatprep.subr.bf16.mxu1 %v17020_v14 }
 0x3e1   :  { %7401 = vmatpush2.bf16.msra.mxu0 %v16763_v41  ;;  %v189_v41 = vld [vmem:[#allocation5 + $0x1b8] sm:$0xff] }
 0x3e2   :  { %7402 = vmatprep.subr.bf16.mxu0 %v16748_v26  ;;  %v453_v26 = vld [vmem:[#allocation5 + $0x9f8] sm:$0xff] }
 0x3e3   :  { %7442 = vmatpush2.bf16.msra.mxu1 %v17019_v53  ;;  %v445_v53 = vld [vmem:[#allocation5 + $0x9b8] sm:$0xff] }
 0x3e4   :  { %7443 = vmatprep.subr.bf16.mxu1 %v17004_v27  ;;  %v16173_v27 = vcombine.low %v205_v5, %v213_v6  ;;  %v16414_v31 = vcombine.high %v445_v53, %v453_v26  ;;  %v637_v5 = vld [vmem:[#allocation5 + $0xfb8] sm:$0xff] }
 0x3e5   :  { %7403 = vmatpush2.bf16.msra.mxu0 %v16747_v35  ;;  %v429_v35 = vld [vmem:[#allocation5 + $0x938] sm:$0xff] }
 0x3e6   :  { %7454 = vmatprep.subr.bf16.mxu0 %v16222_v40  ;;  %v645_v6 = vld [vmem:[#allocation5 + $0xff8] sm:$0xff] }
 0x3e7   :  { %7444 = vmatpush2.bf16.msra.mxu1 %v17003_v37  ;;  %v437_v37 = vld [vmem:[#allocation5 + $0x978] sm:$0xff] }
 0x3e8   :  { %7495 = vmatprep.subr.bf16.mxu1 %v16478_v42  ;;  %v7160_v51 = vpop.f32.mrf.mxu0  ;;  %7405 = vmatmul.mubr.bf16.vlgmr.msra.gmra.mxu0 %v18703_v38  ;;  %v16413_v42 = vcombine.low %v445_v53, %v453_v26  ;;  %v16398_v44 = vcombine.high %v429_v35, %v437_v37  ;;  %v349_v53 = vld [vmem:[#allocation5 + $0x6b8] sm:$0xff] }
 0x3e9   :  { %7455 = vmatpush1.bf16.msra.mxu0 %v16221_v46  ;;  %7486 = vmatprep.mubr.bf16.mxu0 %v18669_v58  ;;  %v197_v58 = vld [vmem:[#allocation5 + $0x1f8] sm:$0xff] }
 0x3ea   :  { %v7201_v56 = vpop.f32.mrf.mxu1  ;;  %7446 = vmatmul.mubr.bf16.vlgmr.msra.gmra.mxu1 %v18707_v39  ;;  %v7162_v62 = vpop.f32.mrf.mxu0  ;;  %7456 = vmatprep.subr.bf16.mxu0 %v16206_v48  ;;  %v16158_v28 = vcombine.high %v189_v41, %v197_v58  ;;  %v16157_v40 = vcombine.low %v189_v41, %v197_v58  ;;  %v413_v46 = vld [vmem:[#allocation5 + $0x8b8] sm:$0xff]  ;;  %v16141_v48 = vcombine.low %v173_v32, %v181_v34 }
 0x3eb   :  { %v18809_v61 = vadd.f32 %v7201_v56, %v7160_v51  ;;  %7496 = vmatpush1.bf16.msra.mxu1 %v16477_v19  ;;  %7527 = vmatprep.mubr.bf16.mxu1 %v18673_v59  ;;  %v16429_v59 = vcombine.low %v461_v11, %v469_v12  ;;  %v421_v19 = vld [vmem:[#allocation5 + $0x8f8] sm:$0xff] }
 0x3ec   :  { %v7203_v4 = vpop.f32.mrf.mxu1  ;;  %7497 = vmatprep.subr.bf16.mxu1 %v16462_v49  ;;  %v7164_v0 = vpop.f32.mrf.mxu0  ;;  %v16397_v49 = vcombine.low %v429_v35, %v437_v37  ;;  %v16382_v50 = vcombine.high %v413_v46, %v421_v19  ;;  %v141_v51 = vld [vmem:[#allocation5 + $0x38] sm:$0xff] }
 0x3ed   :  { %v18812_v9 = vadd.f32 %v7203_v4, %v7162_v62  ;;  %7457 = vmatpush1.bf16.msra.mxu0 %v16205_v60  ;;  %v405_v56 = vld [vmem:[#allocation5 + $0x878] sm:$0xff]  ;;  %v16125_v60 = vcombine.low %v157_v22, %v165_v45  ;;  %v16381_v62 = vcombine.low %v413_v46, %v421_v19  ;;  %v16109_v0 = vcombine.low %v141_v51, %v149_v52 }
 0x3ee   :  { %v7205_v30 = vpop.f32.mrf.mxu1  ;;  %v7165_v14 = vpop.f32.mrf.mxu0  ;;  %7458 = vmatprep.subr.bf16.mxu0 %v16190_v2  ;;  %v16366_v2 = vcombine.high %v397_v55, %v405_v56  ;;  %v381_v4 = vld [vmem:[#allocation5 + $0x7b8] sm:$0xff]  ;;  %v16365_v11 = vcombine.low %v397_v55, %v405_v56 }
 0x3ef   :  { %7498 = vmatpush1.bf16.msra.mxu1 %v16461_v1  ;;  %v16110_v1 = vcombine.high %v141_v51, %v149_v52  ;;  %v16606_v30 = vcombine.high %v637_v5, %v645_v6  ;;  %v373_v14 = vld [vmem:[#allocation5 + $0x778] sm:$0xff] }
 0x3f0   :  { %v7206_v21 = vpop.f32.mrf.mxu1  ;;  %7499 = vmatprep.subr.bf16.mxu1 %v16446_v25  ;;  %v389_v25 = vld [vmem:[#allocation5 + $0x7f8] sm:$0xff] }
 0x3f1   :  { %7459 = vmatpush1.bf16.msra.mxu0 %v16189_v15  ;;  %v16350_v12 = vcombine.high %v381_v4, %v389_v25  ;;  %v365_v15 = vld [vmem:[#allocation5 + $0x738] sm:$0xff]  ;;  %v16349_v21 = vcombine.low %v381_v4, %v389_v25 }
 0x3f2   :  { %7460 = vmatprep.subr.bf16.mxu0 %v16174_v17  ;;  %v629_v17 = vld [vmem:[#allocation5 + $0xf78] sm:$0xff]  ;;  %v16334_v41 = vcombine.high %v365_v15, %v373_v14 }
 0x3f3   :  { %7500 = vmatpush1.bf16.msra.mxu1 %v16445_v8  ;;  %v621_v8 = vld [vmem:[#allocation5 + $0xf38] sm:$0xff] }
 0x3f4   :  { %7501 = vmatprep.subr.bf16.mxu1 %v16430_v24  ;;  %v16605_v24 = vcombine.low %v637_v5, %v645_v6  ;;  %v16590_v58 = vcombine.high %v621_v8, %v629_v17  ;;  %v357_v26 = vld [vmem:[#allocation5 + $0x6f8] sm:$0xff] }
 0x3f5   :  { %7461 = vmatpush1.bf16.msra.mxu0 %v16173_v27  ;;  %v605_v27 = vld [vmem:[#allocation5 + $0xeb8] sm:$0xff]  ;;  %v16318_v32 = vcombine.high %v349_v53, %v357_v26 }
 0x3f6   :  { %7462 = vmatprep.subr.bf16.mxu0 %v16158_v28  ;;  %v16333_v28 = vcombine.low %v365_v15, %v373_v14  ;;  %v333_v35 = vld [vmem:[#allocation5 + $0x638] sm:$0xff] }
 0x3f7   :  { %7502 = vmatpush1.bf16.msra.mxu1 %v16429_v59  ;;  %v613_v59 = vld [vmem:[#allocation5 + $0xef8] sm:$0xff] }
 0x3f8   :  { %7503 = vmatprep.subr.bf16.mxu1 %v16414_v31  ;;  %v16589_v31 = vcombine.low %v621_v8, %v629_v17  ;;  %v16574_v34 = vcombine.high %v605_v27, %v613_v59  ;;  %v341_v37 = vld [vmem:[#allocation5 + $0x678] sm:$0xff] }
 0x3f9   :  { %7463 = vmatpush1.bf16.msra.mxu0 %v16157_v40  ;;  %v589_v40 = vld [vmem:[#allocation5 + $0xe38] sm:$0xff]  ;;  %v16302_v22 = vcombine.high %v333_v35, %v341_v37 }
 0x3fa   :  { %7464 = vmatprep.subr.bf16.mxu0 %v16142_v43  ;;  %v16317_v43 = vcombine.low %v349_v53, %v357_v26  ;;  %v317_v46 = vld [vmem:[#allocation5 + $0x5b8] sm:$0xff] }
 0x3fb   :  { %7504 = vmatpush1.bf16.msra.mxu1 %v16413_v42  ;;  %v597_v42 = vld [vmem:[#allocation5 + $0xe78] sm:$0xff] }
 0x3fc   :  { %7505 = vmatprep.subr.bf16.mxu1 %v16398_v44  ;;  %v16573_v44 = vcombine.low %v605_v27, %v613_v59  ;;  %v16558_v45 = vcombine.high %v589_v40, %v597_v42  ;;  %v325_v19 = vld [vmem:[#allocation5 + $0x5f8] sm:$0xff] }
 0x3fd   :  { %7465 = vmatpush1.bf16.msra.mxu0 %v16141_v48  ;;  %v573_v48 = vld [vmem:[#allocation5 + $0xdb8] sm:$0xff]  ;;  %v16286_v51 = vcombine.high %v317_v46, %v325_v19 }
 0x3fe   :  { %7466 = vmatprep.subr.bf16.mxu0 %v16126_v57  ;;  %v16301_v57 = vcombine.low %v333_v35, %v341_v37  ;;  %v301_v55 = vld [vmem:[#allocation5 + $0x538] sm:$0xff] }
 0x3ff   :  { %7506 = vmatpush1.bf16.msra.mxu1 %v16397_v49  ;;  %v581_v49 = vld [vmem:[#allocation5 + $0xdf8] sm:$0xff] }
 0x400   :  { %7507 = vmatprep.subr.bf16.mxu1 %v16382_v50  ;;  %v16557_v50 = vcombine.low %v589_v40, %v597_v42  ;;  %v16542_v52 = vcombine.high %v573_v48, %v581_v49  ;;  %v309_v56 = vld [vmem:[#allocation5 + $0x578] sm:$0xff] }
 0x401   :  { %7467 = vmatpush1.bf16.msra.mxu0 %v16125_v60  ;;  %v557_v60 = vld [vmem:[#allocation5 + $0xd38] sm:$0xff]  ;;  %v16270_v4 = vcombine.high %v301_v55, %v309_v56 }
 0x402   :  { %7468 = vmatprep.subr.bf16.mxu0 %v16110_v1  ;;  %v16285_v1 = vcombine.low %v317_v46, %v325_v19  ;;  %v285_v5 = vld [vmem:[#allocation5 + $0x4b8] sm:$0xff] }
 0x403   :  { %7508 = vmatpush1.bf16.msra.mxu1 %v16381_v62  ;;  %v565_v62 = vld [vmem:[#allocation5 + $0xd78] sm:$0xff] }
 0x404   :  { %7509 = vmatprep.subr.bf16.mxu1 %v16366_v2  ;;  %v16541_v2 = vcombine.low %v573_v48, %v581_v49  ;;  %v16526_v25 = vcombine.high %v557_v60, %v565_v62  ;;  %v293_v6 = vld [vmem:[#allocation5 + $0x4f8] sm:$0xff] }
 0x405   :  { %7469 = vmatpush1.bf16.msra.mxu0 %v16109_v0  ;;  %v541_v0 = vld [vmem:[#allocation5 + $0xcb8] sm:$0xff]  ;;  %v16254_v15 = vcombine.high %v285_v5, %v293_v6 }
 0x406   :  { %7470 = vmatprep.subr.bf16.mxu0 %v16350_v12  ;;  %v16269_v12 = vcombine.low %v301_v55, %v309_v56  ;;  %v269_v8 = vld [vmem:[#allocation5 + $0x438] sm:$0xff] }
 0x407   :  { %7510 = vmatpush1.bf16.msra.mxu1 %v16365_v11  ;;  %v549_v11 = vld [vmem:[#allocation5 + $0xcf8] sm:$0xff] }
 0x408   :  { %7511 = vmatprep.subr.bf16.mxu1 %v16606_v30  ;;  %v16525_v30 = vcombine.low %v557_v60, %v565_v62  ;;  %v16510_v14 = vcombine.high %v541_v0, %v549_v11  ;;  %v277_v17 = vld [vmem:[#allocation5 + $0x478] sm:$0xff] }
 0x409   :  { %7471 = vmatpush2.bf16.msra.mxu0 %v16349_v21  ;;  %v525_v21 = vld [vmem:[#allocation5 + $0xc38] sm:$0xff]  ;;  %v16238_v53 = vcombine.high %v269_v8, %v277_v17 }
 0x40a   :  { %7472 = vmatprep.subr.bf16.mxu0 %v16334_v41  ;;  %v16253_v41 = vcombine.low %v285_v5, %v293_v6  ;;  %v765_v27 = vld [vmem:[#allocation5 + $0x13b8] sm:$0xff] }
 0x40b   :  { %7512 = vmatpush2.bf16.msra.mxu1 %v16605_v24  ;;  %v533_v24 = vld [vmem:[#allocation5 + $0xc78] sm:$0xff] }
 0x40c   :  { %7513 = vmatprep.subr.bf16.mxu1 %v16590_v58  ;;  %v16509_v58 = vcombine.low %v541_v0, %v549_v11  ;;  %v16494_v26 = vcombine.high %v525_v21, %v533_v24  ;;  %v773_v59 = vld [vmem:[#allocation5 + $0x13f8] sm:$0xff] }
 0x40d   :  { %7473 = vmatpush2.bf16.msra.mxu0 %v16333_v28  ;;  %v1021_v28 = vld [vmem:[#allocation5 + $0x1bb8] sm:$0xff]  ;;  %v16734_v35 = vcombine.high %v765_v27, %v773_v59 }
 0x40e   :  { %7474 = vmatprep.subr.bf16.mxu0 %v16318_v32  ;;  %v16237_v32 = vcombine.low %v269_v8, %v277_v17  ;;  %v749_v40 = vld [vmem:[#allocation5 + $0x1338] sm:$0xff] }
 0x40f   :  { %7514 = vmatpush2.bf16.msra.mxu1 %v16589_v31  ;;  %v1029_v31 = vld [vmem:[#allocation5 + $0x1bf8] sm:$0xff] }
 0x410   :  { %7515 = vmatprep.subr.bf16.mxu1 %v16574_v34  ;;  %v16493_v34 = vcombine.low %v525_v21, %v533_v24  ;;  %v16990_v37 = vcombine.high %v1021_v28, %v1029_v31  ;;  %v757_v42 = vld [vmem:[#allocation5 + $0x1378] sm:$0xff] }
 0x411   :  { %7475 = vmatpush2.bf16.msra.mxu0 %v16317_v43  ;;  %v1005_v43 = vld [vmem:[#allocation5 + $0x1b38] sm:$0xff]  ;;  %v16718_v46 = vcombine.high %v749_v40, %v757_v42  ;;  %v16717_v56 = vcombine.low %v749_v40, %v757_v42 }
 0x412   :  { %7476 = vmatprep.subr.bf16.mxu0 %v16302_v22  ;;  %v16733_v22 = vcombine.low %v765_v27, %v773_v59  ;;  %v733_v48 = vld [vmem:[#allocation5 + $0x12b8] sm:$0xff] }
 0x413   :  { %7516 = vmatpush2.bf16.msra.mxu1 %v16573_v44  ;;  %v1013_v44 = vld [vmem:[#allocation5 + $0x1b78] sm:$0xff] }
 0x414   :  { %7517 = vmatprep.subr.bf16.mxu1 %v16558_v45  ;;  %v16989_v45 = vcombine.low %v1021_v28, %v1029_v31  ;;  %v16974_v19 = vcombine.high %v1005_v43, %v1013_v44  ;;  %v741_v49 = vld [vmem:[#allocation5 + $0x12f8] sm:$0xff]  ;;  %v16973_v62 = vcombine.low %v1005_v43, %v1013_v44 }
 0x415   :  { %7477 = vmatpush2.bf16.msra.mxu0 %v16301_v57  ;;  %v717_v5 = vld [vmem:[#allocation5 + $0x1238] sm:$0xff] }
 0x416   :  { %7478 = vmatprep.subr.bf16.mxu0 %v16286_v51  ;;  %v997_v51 = vld [vmem:[#allocation5 + $0x1af8] sm:$0xff] }
 0x417   :  { %7518 = vmatpush2.bf16.msra.mxu1 %v16557_v50  ;;  %v989_v50 = vld [vmem:[#allocation5 + $0x1ab8] sm:$0xff] }
 0x418   :  { %7519 = vmatprep.subr.bf16.mxu1 %v16542_v52  ;;  %v725_v6 = vld [vmem:[#allocation5 + $0x1278] sm:$0xff] }
 0x419   :  { %7479 = vmatpush2.bf16.msra.mxu0 %v16285_v1  ;;  %v16702_v1 = vcombine.high %v733_v48, %v741_v49  ;;  %v981_v0 = vld [vmem:[#allocation5 + $0x1a78] sm:$0xff] }
 0x41a   :  { %7480 = vmatprep.subr.bf16.mxu0 %v16270_v4  ;;  %v701_v21 = vld [vmem:[#allocation5 + $0x11b8] sm:$0xff] }
 0x41b   :  { %7520 = vmatpush2.bf16.msra.mxu1 %v16541_v2  ;;  %v957_v24 = vld [vmem:[#allocation5 + $0x19b8] sm:$0xff] }
 0x41c   :  { %7521 = vmatprep.subr.bf16.mxu1 %v16526_v25  ;;  %v685_v27 = vld [vmem:[#allocation5 + $0x1138] sm:$0xff] }
 0x41d   :  { %7481 = vmatpush2.bf16.msra.mxu0 %v16269_v12  ;;  %v693_v59 = vld [vmem:[#allocation5 + $0x1178] sm:$0xff] }
 0x41e   :  { %7482 = vmatprep.subr.bf16.mxu0 %v16254_v15  ;;  %v941_v28 = vld [vmem:[#allocation5 + $0x1938] sm:$0xff] }
 0x41f   :  { %7522 = vmatpush2.bf16.msra.mxu1 %v16525_v30  ;;  %v16701_v30 = vcombine.low %v733_v48, %v741_v49  ;;  %v949_v31 = vld [vmem:[#allocation5 + $0x1978] sm:$0xff] }
 0x420   :  { %7523 = vmatprep.subr.bf16.mxu1 %v16510_v14  ;;  %v16686_v14 = vcombine.high %v717_v5, %v725_v6  ;;  %v669_v40 = vld [vmem:[#allocation5 + $0x10b8] sm:$0xff] }
 0x421   :  { %7483 = vmatpush2.bf16.msra.mxu0 %v16253_v41  ;;  %v965_v41 = vld [vmem:[#allocation5 + $0x19f8] sm:$0xff] }
 0x422   :  { %7484 = vmatprep.subr.bf16.mxu0 %v16238_v53  ;;  %v677_v42 = vld [vmem:[#allocation5 + $0x10f8] sm:$0xff] }
 0x423   :  { %7524 = vmatpush2.bf16.msra.mxu1 %v16509_v58  ;;  %v16685_v58 = vcombine.low %v717_v5, %v725_v6  ;;  %v925_v43 = vld [vmem:[#allocation5 + $0x18b8] sm:$0xff] }
 0x424   :  { %7525 = vmatprep.subr.bf16.mxu1 %v16494_v26  ;;  %v16926_v26 = vcombine.high %v957_v24, %v965_v41  ;;  %v933_v44 = vld [vmem:[#allocation5 + $0x18f8] sm:$0xff] }
 0x425   :  { %7485 = vmatpush2.bf16.msra.mxu0 %v16237_v32  ;;  %v653_v48 = vld [vmem:[#allocation5 + $0x1038] sm:$0xff] }
 0x426   :  { %7536 = vmatprep.subr.bf16.mxu0 %v16734_v35  ;;  %v16654_v35 = vcombine.high %v685_v27, %v693_v59  ;;  %v661_v49 = vld [vmem:[#allocation5 + $0x1078] sm:$0xff] }
 0x427   :  { %7526 = vmatpush2.bf16.msra.mxu1 %v16493_v34  ;;  %v16925_v34 = vcombine.low %v957_v24, %v965_v41  ;;  %v7622_v41 = vlaneseq }
 0x428   :  { %7577 = vmatprep.subr.bf16.mxu1 %v16990_v37  ;;  %v7242_v57 = vpop.f32.mrf.mxu0  ;;  %7487 = vmatmul.mubr.bf16.vlgmr.msra.gmra.mxu0 %v18679_v16  ;;  %v16958_v16 = vcombine.high %v989_v50, %v997_v51  ;;  %v16910_v37 = vcombine.high %v941_v28, %v949_v31 }
 0x429   :  { %v7243_v52 = vadd.f32 %v7242_v57, %v18809_v61  ;;  %7537 = vmatpush1.bf16.msra.mxu0 %v16733_v22  ;;  %7568 = vmatprep.mubr.bf16.mxu0 %v18691_v29  ;;  %v709_v29 = vld [vmem:[#allocation5 + $0x11f8] sm:$0xff]  ;;  %v16653_v22 = vcombine.low %v685_v27, %v693_v59 }
 0x42a   :  { %v7283_v55 = vpop.f32.mrf.mxu1  ;;  %7528 = vmatmul.mubr.bf16.vlgmr.msra.gmra.mxu1 %v18685_v20  ;;  %v7244_v60 = vpop.f32.mrf.mxu0  ;;  %7538 = vmatprep.subr.bf16.mxu0 %v16718_v46  ;;  %v973_v20 = vld [vmem:[#allocation5 + $0x1a38] sm:$0xff]  ;;  %v16670_v53 = vcombine.high %v701_v21, %v709_v29  ;;  %v16669_v32 = vcombine.low %v701_v21, %v709_v29  ;;  %v16638_v46 = vcombine.high %v669_v40, %v677_v42 }
 0x42b   :  { %7578 = vmatpush1.bf16.msra.mxu1 %v16989_v45  ;;  %v18818_v2 = vadd.f32 %v7283_v55, %v7243_v52  ;;  %v7245_v4 = vadd.f32 %v7244_v60, %v18812_v9  ;;  %7609 = vmatprep.mubr.bf16.mxu1 %v18696_v54  ;;  %v16957_v9 = vcombine.low %v989_v50, %v997_v51  ;;  %v909_v57 = vld [vmem:[#allocation5 + $0x1838] sm:$0xff] }
 0x42c   :  { %v7285_v25 = vpop.f32.mrf.mxu1  ;;  %7579 = vmatprep.subr.bf16.mxu1 %v16974_v19  ;;  %v7246_v61 = vpop.f32.mrf.mxu0  ;;  %v16942_v17 = vcombine.high %v973_v20, %v981_v0  ;;  %v16941_v54 = vcombine.low %v973_v20, %v981_v0  ;;  %v16909_v45 = vcombine.low %v941_v28, %v949_v31  ;;  %v16894_v19 = vcombine.high %v925_v43, %v933_v44  ;;  %v917_v50 = vld [vmem:[#allocation5 + $0x1878] sm:$0xff] }
 0x42d   :  { %v18823_v11 = vadd.f32 %v7285_v25, %v7245_v4  ;;  %7539 = vmatpush1.bf16.msra.mxu0 %v16717_v56  ;;  %v16637_v51 = vcombine.low %v669_v40, %v677_v42  ;;  %v16893_v52 = vcombine.low %v925_v43, %v933_v44  ;;  %v16622_v55 = vcombine.high %v653_v48, %v661_v49  ;;  %v893_v60 = vld [vmem:[#allocation5 + $0x17b8] sm:$0xff] }
 0x42e   :  { %v7287_v12 = vpop.f32.mrf.mxu1  ;;  %v7247_v15 = vpop.f32.mrf.mxu0  ;;  %7540 = vmatprep.subr.bf16.mxu0 %v16702_v1  ;;  %v16878_v56 = vcombine.high %v909_v57, %v917_v50  ;;  %v1149_v1 = vld [vmem:[#allocation5 + $0x1fb8] sm:$0xff]  ;;  %v16621_v25 = vcombine.low %v653_v48, %v661_v49  ;;  %v18833_v49 = vld [vmem:[#allocation7] sm:$0xff] }
 0x42f   :  { %7580 = vmatpush1.bf16.msra.mxu1 %v16973_v62  ;;  %v901_v62 = vld [vmem:[#allocation5 + $0x17f8] sm:$0xff] }
 0x430   :  { %v7288_v8 = vpop.f32.mrf.mxu1  ;;  %7581 = vmatprep.subr.bf16.mxu1 %v16958_v16  ;;  %v1157_v4 = vld [vmem:[#allocation5 + $0x1ff8] sm:$0xff]  ;;  %v16877_v16 = vcombine.low %v909_v57, %v917_v50  ;;  %v16862_v5 = vcombine.high %v893_v60, %v901_v62 }
 0x431   :  { %7541 = vmatpush1.bf16.msra.mxu0 %v16701_v30  ;;  %v17118_v6 = vcombine.high %v1149_v1, %v1157_v4  ;;  %v877_v61 = vld [vmem:[#allocation5 + $0x1738] sm:$0xff]  ;;  %v16861_v30 = vcombine.low %v893_v60, %v901_v62  ;;  %v17117_v15 = vcombine.low %v1149_v1, %v1157_v4 }
 0x432   :  { %7542 = vmatprep.subr.bf16.mxu0 %v16686_v14  ;;  %v885_v20 = vld [vmem:[#allocation5 + $0x1778] sm:$0xff] }
 0x433   :  { %7582 = vmatpush1.bf16.msra.mxu1 %v16957_v9  ;;  %v1133_v0 = vld [vmem:[#allocation5 + $0x1f38] sm:$0xff]  ;;  %v16846_v9 = vcombine.high %v877_v61, %v885_v20  ;;  %v16845_v24 = vcombine.low %v877_v61, %v885_v20 }
 0x434   :  { %7583 = vmatprep.subr.bf16.mxu1 %v16942_v17  ;;  %v1141_v12 = vld [vmem:[#allocation5 + $0x1f78] sm:$0xff] }
 0x435   :  { %7543 = vmatpush1.bf16.msra.mxu0 %v16685_v58  ;;  %v17102_v14 = vcombine.high %v1133_v0, %v1141_v12  ;;  %v861_v8 = vld [vmem:[#allocation5 + $0x16b8] sm:$0xff]  ;;  %v17101_v58 = vcombine.low %v1133_v0, %v1141_v12 }
 0x436   :  { %7544 = vmatprep.subr.bf16.mxu0 %v16670_v53  ;;  %v869_v17 = vld [vmem:[#allocation5 + $0x16f8] sm:$0xff] }
 0x437   :  { %7584 = vmatpush1.bf16.msra.mxu1 %v16941_v54  ;;  %v1117_v21 = vld [vmem:[#allocation5 + $0x1eb8] sm:$0xff]  ;;  %v16830_v54 = vcombine.high %v861_v8, %v869_v17  ;;  %v16829_v31 = vcombine.low %v861_v8, %v869_v17 }
 0x438   :  { %7585 = vmatprep.subr.bf16.mxu1 %v16926_v26  ;;  %v1125_v29 = vld [vmem:[#allocation5 + $0x1ef8] sm:$0xff] }
 0x439   :  { %7545 = vmatpush1.bf16.msra.mxu0 %v16669_v32  ;;  %v17086_v53 = vcombine.high %v1117_v21, %v1125_v29  ;;  %v845_v26 = vld [vmem:[#allocation5 + $0x1638] sm:$0xff]  ;;  %v18825_v32 = vshrl.u32 %v7622_v41, 7 }
 0x43a   :  { %7546 = vmatprep.subr.bf16.mxu0 %v16654_v35  ;;  %v853_v27 = vld [vmem:[#allocation5 + $0x1678] sm:$0xff] }
 0x43b   :  { %7586 = vmatpush1.bf16.msra.mxu1 %v16925_v34  ;;  %v1101_v59 = vld [vmem:[#allocation5 + $0x1e38] sm:$0xff]  ;;  %v17085_v34 = vcombine.low %v1117_v21, %v1125_v29  ;;  %v16814_v35 = vcombine.high %v845_v26, %v853_v27  ;;  %v18828_v43 = vsub.s32 1, %v18825_v32 }
 0x43c   :  { %7587 = vmatprep.subr.bf16.mxu1 %v16910_v37  ;;  %v1109_v28 = vld [vmem:[#allocation5 + $0x1e78] sm:$0xff] }
 0x43d   :  { %7547 = vmatpush1.bf16.msra.mxu0 %v16653_v22  ;;  %v17070_v37 = vcombine.high %v1101_v59, %v1109_v28  ;;  %v829_v40 = vld [vmem:[#allocation5 + $0x15b8] sm:$0xff] }
 0x43e   :  { %7548 = vmatprep.subr.bf16.mxu0 %v16638_v46  ;;  %v837_v42 = vld [vmem:[#allocation5 + $0x15f8] sm:$0xff]  ;;  %v16813_v46 = vcombine.low %v845_v26, %v853_v27  ;;  %v7922_v27 = vld [vmem:[#allocation10 + $0x1c0] sm:$0xff] }
 0x43f   :  { %7588 = vmatpush1.bf16.msra.mxu1 %v16909_v45  ;;  %v1085_v44 = vld [vmem:[#allocation5 + $0x1db8] sm:$0xff]  ;;  %v18831_v45 = vsub.s32 3, %v18825_v32  ;;  %v16798_v48 = vcombine.high %v829_v40, %v837_v42  ;;  %v16797_v62 = vcombine.low %v829_v40, %v837_v42 }
 0x440   :  { %7589 = vmatprep.subr.bf16.mxu1 %v16894_v19  ;;  %v1093_v22 = vld [vmem:[#allocation5 + $0x1df8] sm:$0xff]  ;;  %v17069_v19 = vcombine.low %v1101_v59, %v1109_v28  ;;  %v7926_v59 = vld [vmem:[#allocation10 + $0x1e0] sm:$0xff] }
 0x441   :  { %7549 = vmatpush1.bf16.msra.mxu0 %v16637_v51  ;;  %v17054_v57 = vcombine.high %v1085_v44, %v1093_v22  ;;  %v813_v50 = vld [vmem:[#allocation5 + $0x1538] sm:$0xff]  ;;  %v7637_v60 = vrot.slane %v18833_v49, %v18831_v45  ;;  %v17053_v1 = vcombine.low %v1085_v44, %v1093_v22  ;;  %v17176_v42 = vcombine.high %v7922_v27, %v7926_v59 }
 0x442   :  { %7550 = vmatprep.subr.bf16.mxu0 %v16622_v55  ;;  %v821_v51 = vld [vmem:[#allocation5 + $0x1578] sm:$0xff] }
 0x443   :  { %7590 = vmatpush1.bf16.msra.mxu1 %v16893_v52  ;;  %v7629_v52 = vrot.slane %v18833_v49, %v18828_v43  ;;  %v1069_v55 = vld [vmem:[#allocation5 + $0x1d38] sm:$0xff]  ;;  %v16782_v4 = vcombine.high %v813_v50, %v821_v51 }
 0x444   :  { %7591 = vmatprep.subr.bf16.mxu1 %v16878_v56  ;;  %v1077_v56 = vld [vmem:[#allocation5 + $0x1d78] sm:$0xff] }
 0x445   :  { %7551 = vmatpush1.bf16.msra.mxu0 %v16621_v25  ;;  %v18839_v25 = vld [vmem:[#allocation8] sm:$0xff]  ;;  %v7703_v61 = vmul.f32 %v7629_v52, %v18733_v7  ;;  %v1053_v0 = vld [vmem:[#allocation5 + $0x1cb8] sm:$0xff] }
 0x446   :  { %7552 = vmatprep.subr.bf16.mxu0 %v16862_v5  ;;  %v797_v5 = vld [vmem:[#allocation5 + $0x14b8] sm:$0xff]  ;;  %v7729_v20 = vrot.slane %v18839_v25, %v18828_v43 }
 0x447   :  { %7592 = vmatpush1.bf16.msra.mxu1 %v16877_v16  ;;  %v17038_v16 = vcombine.high %v1069_v55, %v1077_v56  ;;  %v1061_v12 = vld [vmem:[#allocation5 + $0x1cf8] sm:$0xff] }
 0x448   :  { %7593 = vmatprep.subr.bf16.mxu1 %v17118_v6  ;;  %v805_v6 = vld [vmem:[#allocation5 + $0x14f8] sm:$0xff]  ;;  %v17022_v17 = vcombine.high %v1053_v0, %v1061_v12  ;;  %v7803_v29 = vadd.f32 %v7729_v20, %v7703_v61 }
 0x449   :  { %7553 = vmatpush2.bf16.msra.mxu0 %v16861_v30  ;;  %v7705_v30 = vmul.f32 %v7637_v60, %v18751_v18  ;;  %v16766_v8 = vcombine.high %v797_v5, %v805_v6  ;;  %v781_v21 = vld [vmem:[#allocation5 + $0x1438] sm:$0xff]  ;;  %v17021_v18 = vcombine.low %v1053_v0, %v1061_v12  ;;  %v7910_v60 = vld [vmem:[#allocation10 + $0x160] sm:$0xff] }
 0x44a   :  { %7554 = vmatprep.subr.bf16.mxu0 %v16846_v9  ;;  %v16781_v9 = vcombine.low %v813_v50, %v821_v51  ;;  %v789_v7 = vld [vmem:[#allocation5 + $0x1478] sm:$0xff]  ;;  %v7819_v28 = vmax.f32 %v7803_v29, 0.0  ;;  %v8042_v50 = vld [vmem:[#allocation10 + $0x580] sm:$0xff] }
 0x44b   :  { %7594 = vmatpush2.bf16.msra.mxu1 %v17117_v15  ;;  %v7737_v15 = vrot.slane %v18839_v25, %v18831_v45  ;;  %v1045_v41 = vld [vmem:[#allocation5 + $0x1c78] sm:$0xff]  ;;  %v8046_v51 = vld [vmem:[#allocation10 + $0x5a0] sm:$0xff] }
 0x44c   :  { %7595 = vmatprep.subr.bf16.mxu1 %v17102_v14  ;;  %v17037_v14 = vcombine.low %v1069_v55, %v1077_v56  ;;  %v7835_v22 = vmin.f32 %v7819_v28, 6.0  ;;  %v7906_v56 = vld [vmem:[#allocation10 + $0x140] sm:$0xff] }
 0x44d   :  { %7555 = vmatpush2.bf16.msra.mxu0 %v16845_v24  ;;  %v1037_v24 = vld [vmem:[#allocation5 + $0x1c38] sm:$0xff]  ;;  %v8022_v28 = vld [vmem:[#allocation10 + $0x4e0] sm:$0xff] }
 0x44e   :  { %7556 = vmatprep.subr.bf16.mxu0 %v16830_v54  ;;  %v16765_v54 = vcombine.low %v797_v5, %v805_v6  ;;  %v17006_v26 = vcombine.high %v1037_v24, %v1045_v41  ;;  %v17005_v40 = vcombine.low %v1037_v24, %v1045_v41  ;;  %v8038_v5 = vld [vmem:[#allocation10 + $0x560] sm:$0xff]  ;;  %v17159_v24 = vcombine.low %v7906_v56, %v7910_v60 }
 0x44f   :  { %7596 = vmatpush2.bf16.msra.mxu1 %v17101_v58  ;;  %v7805_v58 = vadd.f32 %v7737_v15, %v7705_v30  ;;  %v17295_v30 = vcombine.low %v8042_v50, %v8046_v51  ;;  %v17160_v15 = vcombine.high %v7906_v56, %v7910_v60 }
 0x450   :  { %7597 = vmatprep.subr.bf16.mxu1 %v17086_v53  ;;  %v16750_v53 = vcombine.high %v781_v21, %v789_v7 }
 0x451   :  { %7557 = vmatpush2.bf16.msra.mxu0 %v16829_v31  ;;  %v8050_v31 = vld [vmem:[#allocation10 + $0x5c0] sm:$0xff] }
 0x452   :  { %7558 = vmatprep.subr.bf16.mxu0 %v16814_v35  ;;  %v7821_v35 = vmax.f32 %v7805_v58, 0.0 }
 0x453   :  { %7598 = vmatpush2.bf16.msra.mxu1 %v17085_v34  ;;  %v8054_v34 = vld [vmem:[#allocation10 + $0x5e0] sm:$0xff] }
 0x454   :  { %7599 = vmatprep.subr.bf16.mxu1 %v17070_v37  ;;  %v16749_v37 = vcombine.low %v781_v21, %v789_v7  ;;  %v17304_v44 = vcombine.high %v8050_v31, %v8054_v34  ;;  %v17303_v52 = vcombine.low %v8050_v31, %v8054_v34  ;;  %v8026_v21 = vld [vmem:[#allocation10 + $0x500] sm:$0xff] }
 0x455   :  { %7559 = vmatpush2.bf16.msra.mxu0 %v16813_v46  ;;  %v7914_v46 = vld [vmem:[#allocation10 + $0x180] sm:$0xff] }
 0x456   :  { %7560 = vmatprep.subr.bf16.mxu0 %v16798_v48  ;;  %v7837_v48 = vmin.f32 %v7821_v35, 6.0  ;;  %v8030_v7 = vld [vmem:[#allocation10 + $0x520] sm:$0xff] }
 0x457   :  { %7600 = vmatpush2.bf16.msra.mxu1 %v17069_v19  ;;  %v7918_v19 = vld [vmem:[#allocation10 + $0x1a0] sm:$0xff]  ;;  %v17279_v34 = vcombine.low %v8026_v21, %v8030_v7 }
 0x458   :  { %7601 = vmatprep.subr.bf16.mxu1 %v17054_v57  ;;  %v17175_v57 = vcombine.low %v7922_v27, %v7926_v59  ;;  %v17168_v55 = vcombine.high %v7914_v46, %v7918_v19  ;;  %v18850_v6 = vpack.c.bf16 %v7837_v48, %v7837_v48  ;;  %v17167_v20 = vcombine.low %v7914_v46, %v7918_v19  ;;  %v7894_v27 = vld [vmem:[#allocation10 + $0xe0] sm:$0xff] }
 0x459   :  { %7561 = vmatpush2.bf16.msra.mxu0 %v16797_v62  ;;  %v18847_v62 = vpack.c.bf16 %v7835_v22, %v7835_v22  ;;  %v8018_v59 = vld [vmem:[#allocation10 + $0x4c0] sm:$0xff] }
 0x45a   :  { %7562 = vmatprep.subr.bf16.mxu0 %v16782_v4  ;;  %v17296_v4 = vcombine.high %v8042_v50, %v8046_v51  ;;  %v8014_v22 = vld [vmem:[#allocation10 + $0x4a0] sm:$0xff]  ;;  %v17271_v19 = vcombine.low %v8018_v59, %v8022_v28 }
 0x45b   :  { %7602 = vmatpush2.bf16.msra.mxu1 %v17053_v1  ;;  %v7874_v50 = vld [vmem:[#allocation10 + $0x40] sm:$0xff] }
 0x45c   :  { %7603 = vmatprep.subr.bf16.mxu1 %v17038_v16  ;;  %v8034_v16 = vld [vmem:[#allocation10 + $0x540] sm:$0xff] }
 0x45d   :  { %7563 = vmatpush2.bf16.msra.mxu0 %v16781_v9  ;;  %v17288_v9 = vcombine.high %v8034_v16, %v8038_v5  ;;  %v17287_v58 = vcombine.low %v8034_v16, %v8038_v5  ;;  %v7878_v51 = vld [vmem:[#allocation10 + $0x60] sm:$0xff] }
 0x45e   :  { %7564 = vmatprep.subr.bf16.mxu0 %v16766_v8  ;;  %v7902_v8 = vld [vmem:[#allocation10 + $0x120] sm:$0xff] }
 0x45f   :  { %7604 = vmatpush2.bf16.msra.mxu1 %v17037_v14  ;;  %v7898_v14 = vld [vmem:[#allocation10 + $0x100] sm:$0xff] }
 0x460   :  { %7605 = vmatprep.subr.bf16.mxu1 %v17022_v17  ;;  %v17151_v31 = vcombine.low %v7898_v14, %v7902_v8  ;;  %v7866_v16 = vld [vmem:[#allocation10] sm:$0xff] }
 0x461   :  { %7565 = vmatpush2.bf16.msra.mxu0 %v16765_v54  ;;  %v17152_v54 = vcombine.high %v7898_v14, %v7902_v8  ;;  %v7870_v5 = vld [vmem:[#allocation10 + $0x20] sm:$0xff] }
 0x462   :  { %7566 = vmatprep.subr.bf16.mxu0 %v16750_v53  ;;  %v17280_v53 = vcombine.high %v8026_v21, %v8030_v7  ;;  %v7990_v14 = vld [vmem:[#allocation10 + $0x3e0] sm:$0xff]  ;;  %v17119_v21 = vcombine.low %v7866_v16, %v7870_v5 }
 0x463   :  { %7606 = vmatpush2.bf16.msra.mxu1 %v17021_v18  ;;  %v8114_v8 = vld [vmem:[#allocation10 + $0x7c0] sm:$0xff] }
 0x464   :  { %7607 = vmatprep.subr.bf16.mxu1 %v17006_v26  ;;  %v7890_v26 = vld [vmem:[#allocation10 + $0xc0] sm:$0xff] }
 0x465   :  { %7567 = vmatpush2.bf16.msra.mxu0 %v16749_v37  ;;  %v17144_v35 = vcombine.high %v7890_v26, %v7894_v27  ;;  %v17272_v37 = vcombine.high %v8018_v59, %v8022_v28  ;;  %v17143_v46 = vcombine.low %v7890_v26, %v7894_v27  ;;  %v7970_v28 = vld [vmem:[#allocation10 + $0x340] sm:$0xff] }
 0x466   :  { %14052 = vmatprep.subr.bf16.mxu0 %v17176_v42  ;;  %v7886_v42 = vld [vmem:[#allocation10 + $0xa0] sm:$0xff] }
 0x467   :  { %7608 = vmatpush2.bf16.msra.mxu1 %v17005_v40  ;;  %v7882_v40 = vld [vmem:[#allocation10 + $0x80] sm:$0xff] }
 0x468   :  { %14093 = vmatprep.subr.bf16.mxu1 %v17304_v44  ;;  %v7324_v1 = vpop.f32.mrf.mxu0  ;;  %7569 = vmatmul.mubr.bf16.vlgmr.msra.gmra.mxu0 %v18703_v38  ;;  %v8010_v44 = vld [vmem:[#allocation10 + $0x480] sm:$0xff]  ;;  %v17136_v48 = vcombine.high %v7882_v40, %v7886_v42  ;;  %v17135_v56 = vcombine.low %v7882_v40, %v7886_v42 }
 0x469   :  { %14053 = vmatpush1.bf16.msra.mxu0 %v17175_v57  ;;  %14084 = vmatprep.mubr.bf16.mxu0 %v18847_v62  ;;  %v17264_v57 = vcombine.high %v8010_v44, %v8014_v22  ;;  %v17263_v60 = vcombine.low %v8010_v44, %v8014_v22  ;;  %v7962_v22 = vld [vmem:[#allocation10 + $0x300] sm:$0xff] }
 0x46a   :  { %v7365_v61 = vpop.f32.mrf.mxu1  ;;  %7610 = vmatmul.mubr.bf16.vlgmr.msra.gmra.mxu1 %v18707_v39  ;;  %v7326_v12 = vpop.f32.mrf.mxu0  ;;  %14054 = vmatprep.subr.bf16.mxu0 %v17168_v55  ;;  %v8006_v55 = vld [vmem:[#allocation10 + $0x460] sm:$0xff] }
 0x46b   :  { %v18853_v0 = vadd.f32 %v7365_v61, %v7324_v1  ;;  %14094 = vmatpush1.bf16.msra.mxu1 %v17303_v52  ;;  %14125 = vmatprep.mubr.bf16.mxu1 %v18850_v6  ;;  %v8002_v52 = vld [vmem:[#allocation10 + $0x440] sm:$0xff]  ;;  %v17128_v1 = vcombine.high %v7874_v50, %v7878_v51 }
 0x46c   :  { %v7367_v38 = vpop.f32.mrf.mxu1  ;;  %v7328_v39 = vpop.f32.mrf.mxu0  ;;  %14095 = vmatprep.subr.bf16.mxu1 %v17296_v4  ;;  %v17256_v4 = vcombine.high %v8002_v52, %v8006_v55  ;;  %v7994_v61 = vld [vmem:[#allocation10 + $0x400] sm:$0xff] }
 0x46d   :  { %v18857_v17 = vadd.f32 %v7367_v38, %v7326_v12  ;;  %14055 = vmatpush1.bf16.msra.mxu0 %v17167_v20  ;;  %v7998_v20 = vld [vmem:[#allocation10 + $0x420] sm:$0xff]  ;;  %v17127_v12 = vcombine.low %v7874_v50, %v7878_v51  ;;  %v18860_v50 = vsub.s32 0, %v18825_v32 }
 0x46e   :  { %v7369_v29 = vpop.f32.mrf.mxu1  ;;  %v7329_v41 = vpop.f32.mrf.mxu0  ;;  %14056 = vmatprep.subr.bf16.mxu0 %v17160_v15  ;;  %v17120_v15 = vcombine.high %v7866_v16, %v7870_v5  ;;  %v17248_v38 = vcombine.high %v7994_v61, %v7998_v20  ;;  %v8118_v39 = vld [vmem:[#allocation10 + $0x7e0] sm:$0xff]  ;;  %v17247_v7 = vcombine.low %v7994_v61, %v7998_v20  ;;  %v18869_v61 = vsub.s32 7, %v18825_v32 }
 0x46f   :  { %14096 = vmatpush1.bf16.msra.mxu1 %v17295_v30  ;;  %v17255_v30 = vcombine.low %v8002_v52, %v8006_v55  ;;  %v7978_v41 = vld [vmem:[#allocation10 + $0x380] sm:$0xff]  ;;  %v17367_v26 = vcombine.low %v8114_v8, %v8118_v39  ;;  %v18863_v55 = vsub.s32 2, %v18825_v32 }
 0x470   :  { %v7370_v18 = vpop.f32.mrf.mxu1  ;;  %14097 = vmatprep.subr.bf16.mxu1 %v17288_v9  ;;  %v7986_v9 = vld [vmem:[#allocation10 + $0x3c0] sm:$0xff] }
 0x471   :  { %14057 = vmatpush1.bf16.msra.mxu0 %v17159_v24  ;;  %v17240_v29 = vcombine.high %v7986_v9, %v7990_v14  ;;  %v17368_v24 = vcombine.high %v8114_v8, %v8118_v39  ;;  %v8110_v18 = vld [vmem:[#allocation10 + $0x7a0] sm:$0xff] }
 0x472   :  { %14058 = vmatprep.subr.bf16.mxu0 %v17152_v54  ;;  %v8106_v54 = vld [vmem:[#allocation10 + $0x780] sm:$0xff] }
 0x473   :  { %14098 = vmatpush1.bf16.msra.mxu1 %v17287_v58  ;;  %v7982_v58 = vld [vmem:[#allocation10 + $0x3a0] sm:$0xff]  ;;  %v17360_v59 = vcombine.high %v8106_v54, %v8110_v18  ;;  %v17359_v40 = vcombine.low %v8106_v54, %v8110_v18 }
 0x474   :  { %14099 = vmatprep.subr.bf16.mxu1 %v17280_v53  ;;  %v17239_v53 = vcombine.low %v7986_v9, %v7990_v14  ;;  %v17232_v27 = vcombine.high %v7978_v41, %v7982_v58  ;;  %v8082_v16 = vld [vmem:[#allocation10 + $0x6c0] sm:$0xff] }
 0x475   :  { %14059 = vmatpush1.bf16.msra.mxu0 %v17151_v31  ;;  %v7974_v31 = vld [vmem:[#allocation10 + $0x360] sm:$0xff] }
 0x476   :  { %14060 = vmatprep.subr.bf16.mxu0 %v17144_v35  ;;  %v8102_v35 = vld [vmem:[#allocation10 + $0x760] sm:$0xff]  ;;  %v17224_v42 = vcombine.high %v7970_v28, %v7974_v31 }
 0x477   :  { %14100 = vmatpush1.bf16.msra.mxu1 %v17279_v34  ;;  %v8098_v34 = vld [vmem:[#allocation10 + $0x740] sm:$0xff] }
 0x478   :  { %14101 = vmatprep.subr.bf16.mxu1 %v17272_v37  ;;  %v17231_v37 = vcombine.low %v7978_v41, %v7982_v58  ;;  %v17352_v44 = vcombine.high %v8098_v34, %v8102_v35  ;;  %v17351_v51 = vcombine.low %v8098_v34, %v8102_v35  ;;  %v8086_v5 = vld [vmem:[#allocation10 + $0x6e0] sm:$0xff] }
 0x479   :  { %14061 = vmatpush1.bf16.msra.mxu0 %v17143_v46  ;;  %v7966_v46 = vld [vmem:[#allocation10 + $0x320] sm:$0xff]  ;;  %v17336_v9 = vcombine.high %v8082_v16, %v8086_v5  ;;  %v17335_v54 = vcombine.low %v8082_v16, %v8086_v5 }
 0x47a   :  { %14062 = vmatprep.subr.bf16.mxu0 %v17136_v48  ;;  %v8094_v48 = vld [vmem:[#allocation10 + $0x720] sm:$0xff]  ;;  %v17216_v52 = vcombine.high %v7962_v22, %v7966_v46  ;;  %v17215_v20 = vcombine.low %v7962_v22, %v7966_v46 }
 0x47b   :  { %14102 = vmatpush1.bf16.msra.mxu1 %v17271_v19  ;;  %v8090_v19 = vld [vmem:[#allocation10 + $0x700] sm:$0xff] }
 0x47c   :  { %14103 = vmatprep.subr.bf16.mxu1 %v17264_v57  ;;  %v17223_v57 = vcombine.low %v7970_v28, %v7974_v31  ;;  %v7946_v14 = vld [vmem:[#allocation10 + $0x280] sm:$0xff] }
 0x47d   :  { %14063 = vmatpush1.bf16.msra.mxu0 %v17135_v56  ;;  %v17344_v56 = vcombine.high %v8090_v19, %v8094_v48  ;;  %v7950_v8 = vld [vmem:[#allocation10 + $0x2a0] sm:$0xff] }
 0x47e   :  { %14064 = vmatprep.subr.bf16.mxu0 %v17128_v1  ;;  %v7958_v1 = vld [vmem:[#allocation10 + $0x2e0] sm:$0xff]  ;;  %v17200_v18 = vcombine.high %v7946_v14, %v7950_v8 }
 0x47f   :  { %14104 = vmatpush1.bf16.msra.mxu1 %v17263_v60  ;;  %v7954_v60 = vld [vmem:[#allocation10 + $0x2c0] sm:$0xff] }
 0x480   :  { %14105 = vmatprep.subr.bf16.mxu1 %v17256_v4  ;;  %v18866_v4 = vsub.s32 5, %v18825_v32  ;;  %v17207_v41 = vcombine.low %v7954_v60, %v7958_v1  ;;  %v7942_v28 = vld [vmem:[#allocation10 + $0x260] sm:$0xff] }
 0x481   :  { %14065 = vmatpush1.bf16.msra.mxu0 %v17127_v12  ;;  %v7625_v12 = vrot.slane %v18833_v49, %v18860_v50  ;;  %v8066_v35 = vld [vmem:[#allocation10 + $0x640] sm:$0xff] }
 0x482   :  { %14066 = vmatprep.subr.bf16.mxu0 %v17120_v15  ;;  %v17208_v15 = vcombine.high %v7954_v60, %v7958_v1  ;;  %v7645_v39 = vrot.slane %v18833_v49, %v18866_v4  ;;  %v7745_v34 = vrot.slane %v18839_v25, %v18866_v4 }
 0x483   :  { %14106 = vmatpush1.bf16.msra.mxu1 %v17255_v30  ;;  %v17343_v30 = vcombine.low %v8090_v19, %v8094_v48  ;;  %v7702_v58 = vmul.f32 %v7625_v12, %v18728_v63  ;;  %v8070_v63 = vld [vmem:[#allocation10 + $0x660] sm:$0xff] }
 0x484   :  { %14107 = vmatprep.subr.bf16.mxu1 %v17248_v38  ;;  %v7633_v38 = vrot.slane %v18833_v49, %v18863_v55  ;;  %v7707_v31 = vmul.f32 %v7645_v39, %v18769_v47  ;;  %v17320_v47 = vcombine.high %v8066_v35, %v8070_v63  ;;  %v7930_v19 = vld [vmem:[#allocation10 + $0x200] sm:$0xff]  ;;  %v17319_v1 = vcombine.low %v8066_v35, %v8070_v63 }
 0x485   :  { %14067 = vmatpush1.bf16.msra.mxu0 %v17119_v21  ;;  %v8074_v21 = vld [vmem:[#allocation10 + $0x680] sm:$0xff] }
 0x486   :  { %14068 = vmatprep.subr.bf16.mxu0 %v17240_v29  ;;  %v7725_v29 = vrot.slane %v18839_v25, %v18860_v50  ;;  %v7934_v48 = vld [vmem:[#allocation10 + $0x220] sm:$0xff] }
 0x487   :  { %14108 = vmatpush1.bf16.msra.mxu1 %v17247_v7  ;;  %v8078_v7 = vld [vmem:[#allocation10 + $0x6a0] sm:$0xff]  ;;  %v17184_v16 = vcombine.high %v7930_v19, %v7934_v48 }
 0x488   :  { %14109 = vmatprep.subr.bf16.mxu1 %v17368_v24  ;;  %v7653_v24 = vrot.slane %v18833_v49, %v18869_v61  ;;  %v8178_v12 = vld [vmem:[#allocation10 + $0x9c0] sm:$0xff] }
 0x489   :  { %14069 = vmatpush2.bf16.msra.mxu0 %v17239_v53  ;;  %v7704_v53 = vmul.f32 %v7633_v38, %v18746_v10  ;;  %v17199_v10 = vcombine.low %v7946_v14, %v7950_v8  ;;  %v8306_v38 = vld [vmem:[#allocation10 + $0xdc0] sm:$0xff]  ;;  %v17183_v8 = vcombine.low %v7930_v19, %v7934_v48 }
 0x48a   :  { %14070 = vmatprep.subr.bf16.mxu0 %v17232_v27  ;;  %v17328_v27 = vcombine.high %v8074_v21, %v8078_v7  ;;  %v8162_v35 = vld [vmem:[#allocation10 + $0x940] sm:$0xff] }
 0x48b   :  { %14110 = vmatpush2.bf16.msra.mxu1 %v17367_v26  ;;  %v7733_v26 = vrot.slane %v18839_v25, %v18863_v55  ;;  %v8166_v63 = vld [vmem:[#allocation10 + $0x960] sm:$0xff] }
 0x48c   :  { %14111 = vmatprep.subr.bf16.mxu1 %v17360_v59  ;;  %v7938_v59 = vld [vmem:[#allocation10 + $0x240] sm:$0xff] }
 0x48d   :  { %14071 = vmatpush2.bf16.msra.mxu0 %v17231_v37  ;;  %v7709_v37 = vmul.f32 %v7653_v24, %v18787_v23  ;;  %v17192_v22 = vcombine.high %v7938_v59, %v7942_v28  ;;  %v7804_v46 = vadd.f32 %v7733_v26, %v7704_v53  ;;  %v17191_v23 = vcombine.low %v7938_v59, %v7942_v28  ;;  %v8298_v26 = vld [vmem:[#allocation10 + $0xd80] sm:$0xff] }
 0x48e   :  { %14072 = vmatprep.subr.bf16.mxu0 %v17224_v42  ;;  %v7802_v42 = vadd.f32 %v7725_v29, %v7702_v58  ;;  %v8170_v58 = vld [vmem:[#allocation10 + $0x980] sm:$0xff] }
 0x48f   :  { %14112 = vmatpush2.bf16.msra.mxu1 %v17359_v40  ;;  %v7753_v40 = vrot.slane %v18839_v25, %v18869_v61  ;;  %v7820_v5 = vmax.f32 %v7804_v46, 0.0 }
 0x490   :  { %14113 = vmatprep.subr.bf16.mxu1 %v17352_v44  ;;  %v17327_v44 = vcombine.low %v8074_v21, %v8078_v7  ;;  %v7818_v60 = vmax.f32 %v7802_v42, 0.0  ;;  %v8290_v42 = vld [vmem:[#allocation10 + $0xd40] sm:$0xff] }
 0x491   :  { %14073 = vmatpush2.bf16.msra.mxu0 %v17223_v57  ;;  %v7807_v57 = vadd.f32 %v7745_v34, %v7707_v31  ;;  %v7836_v29 = vmin.f32 %v7820_v5, 6.0  ;;  %v8282_v5 = vld [vmem:[#allocation10 + $0xd00] sm:$0xff] }
 0x492   :  { %14074 = vmatprep.subr.bf16.mxu0 %v17216_v52  ;;  %v8062_v52 = vld [vmem:[#allocation10 + $0x620] sm:$0xff]  ;;  %v7834_v39 = vmin.f32 %v7818_v60, 6.0 }
 0x493   :  { %14114 = vmatpush2.bf16.msra.mxu1 %v17351_v51  ;;  %v8058_v51 = vld [vmem:[#allocation10 + $0x600] sm:$0xff]  ;;  %v18893_v31 = vpack.c.bf16 %v7836_v29, %v7836_v29 }
 0x494   :  { %14115 = vmatprep.subr.bf16.mxu1 %v17344_v56  ;;  %v7809_v56 = vadd.f32 %v7753_v40, %v7709_v37  ;;  %v17311_v21 = vcombine.low %v8058_v51, %v8062_v52  ;;  %v18891_v59 = vpack.c.bf16 %v7834_v39, %v7834_v39  ;;  %v8154_v60 = vld [vmem:[#allocation10 + $0x900] sm:$0xff] }
 0x495   :  { %14075 = vmatpush2.bf16.msra.mxu0 %v17215_v20  ;;  %v17312_v20 = vcombine.high %v8058_v51, %v8062_v52  ;;  %v17416_v51 = vcombine.high %v8162_v35, %v8166_v63  ;;  %v8146_v39 = vld [vmem:[#allocation10 + $0x8c0] sm:$0xff] }
 0x496   :  { %14076 = vmatprep.subr.bf16.mxu0 %v17208_v15  ;;  %v7823_v15 = vmax.f32 %v7807_v57, 0.0  ;;  %v7825_v14 = vmax.f32 %v7809_v56, 0.0  ;;  %v8278_v29 = vld [vmem:[#allocation10 + $0xce0] sm:$0xff] }
 0x497   :  { %14116 = vmatpush2.bf16.msra.mxu1 %v17343_v30  ;;  %v8182_v30 = vld [vmem:[#allocation10 + $0x9e0] sm:$0xff] }
 0x498   :  { %14117 = vmatprep.subr.bf16.mxu1 %v17336_v9  ;;  %v8310_v9 = vld [vmem:[#allocation10 + $0xde0] sm:$0xff]  ;;  %v17432_v7 = vcombine.high %v8178_v12, %v8182_v30  ;;  %v17431_v53 = vcombine.low %v8178_v12, %v8182_v30 }
 0x499   :  { %14077 = vmatpush2.bf16.msra.mxu0 %v17207_v41  ;;  %v17560_v24 = vcombine.high %v8306_v38, %v8310_v9  ;;  %v7839_v41 = vmin.f32 %v7823_v15, 6.0  ;;  %v17559_v28 = vcombine.low %v8306_v38, %v8310_v9  ;;  %v17415_v15 = vcombine.low %v8162_v35, %v8166_v63 }
 0x49a   :  { %14078 = vmatprep.subr.bf16.mxu0 %v17200_v18  ;;  %v7841_v18 = vmin.f32 %v7825_v14, 6.0 }
 0x49b   :  { %14118 = vmatpush2.bf16.msra.mxu1 %v17335_v54  ;;  %v8174_v54 = vld [vmem:[#allocation10 + $0x9a0] sm:$0xff]  ;;  %v18895_v37 = vpack.c.bf16 %v7839_v41, %v7839_v41 }
 0x49c   :  { %14119 = vmatprep.subr.bf16.mxu1 %v17328_v27  ;;  %v8302_v27 = vld [vmem:[#allocation10 + $0xda0] sm:$0xff]  ;;  %v17424_v34 = vcombine.high %v8170_v58, %v8174_v54  ;;  %v17423_v19 = vcombine.low %v8170_v58, %v8174_v54 }
 0x49d   :  { %14079 = vmatpush2.bf16.msra.mxu0 %v17199_v10  ;;  %v17552_v10 = vcombine.high %v8298_v26, %v8302_v27  ;;  %v17551_v57 = vcombine.low %v8298_v26, %v8302_v27  ;;  %v8266_v26 = vld [vmem:[#allocation10 + $0xc80] sm:$0xff] }
 0x49e   :  { %14080 = vmatprep.subr.bf16.mxu0 %v17192_v22  ;;  %v18898_v22 = vpack.c.bf16 %v7841_v18, %v7841_v18  ;;  %v8138_v18 = vld [vmem:[#allocation10 + $0x880] sm:$0xff] }
 0x49f   :  { %14120 = vmatpush2.bf16.msra.mxu1 %v17327_v44  ;;  %v8294_v44 = vld [vmem:[#allocation10 + $0xd60] sm:$0xff] }
 0x4a0   :  { %14121 = vmatprep.subr.bf16.mxu1 %v17320_v47  ;;  %v17543_v9 = vcombine.low %v8290_v42, %v8294_v44  ;;  %v8270_v27 = vld [vmem:[#allocation10 + $0xca0] sm:$0xff] }
 0x4a1   :  { %14081 = vmatpush2.bf16.msra.mxu0 %v17191_v23  ;;  %v17520_v63 = vcombine.high %v8266_v26, %v8270_v27 }
 0x4a2   :  { %14082 = vmatprep.subr.bf16.mxu0 %v17184_v16 }
 0x4a3   :  { %14122 = vmatpush2.bf16.msra.mxu1 %v17319_v1  ;;  %v8158_v1 = vld [vmem:[#allocation10 + $0x920] sm:$0xff] }
 0x4a4   :  { %14123 = vmatprep.subr.bf16.mxu1 %v17312_v20  ;;  %v8286_v20 = vld [vmem:[#allocation10 + $0xd20] sm:$0xff]  ;;  %v17408_v14 = vcombine.high %v8154_v60, %v8158_v1 }
 0x4a5   :  { %14083 = vmatpush2.bf16.msra.mxu0 %v17183_v8  ;;  %v17536_v8 = vcombine.high %v8282_v5, %v8286_v20  ;;  %v17535_v41 = vcombine.low %v8282_v5, %v8286_v20  ;;  %v8242_v5 = vld [vmem:[#allocation10 + $0xbc0] sm:$0xff] }
 0x4a6   :  { %14134 = vmatprep.subr.bf16.mxu0 %v17432_v7  ;;  %v8274_v7 = vld [vmem:[#allocation10 + $0xcc0] sm:$0xff] }
 0x4a7   :  { %14124 = vmatpush2.bf16.msra.mxu1 %v17311_v21  ;;  %v8150_v21 = vld [vmem:[#allocation10 + $0x8e0] sm:$0xff]  ;;  %v17528_v54 = vcombine.high %v8274_v7, %v8278_v29 }
 0x4a8   :  { %14175 = vmatprep.subr.bf16.mxu1 %v17560_v24  ;;  %v7406_v40 = vpop.f32.mrf.mxu0  ;;  %14085 = vmatmul.mubr.bf16.vlgmr.msra.gmra.mxu0 %v18891_v59  ;;  %v17407_v24 = vcombine.low %v8154_v60, %v8158_v1  ;;  %v17400_v58 = vcombine.high %v8146_v39, %v8150_v21  ;;  %v8246_v20 = vld [vmem:[#allocation10 + $0xbe0] sm:$0xff] }
 0x4a9   :  { %v7407_v46 = vadd.f32 %v7406_v40, %v18853_v0  ;;  %14135 = vmatpush1.bf16.msra.mxu0 %v17431_v53  ;;  %14166 = vmatprep.mubr.bf16.mxu0 %v18895_v37  ;;  %v17544_v0 = vcombine.high %v8290_v42, %v8294_v44  ;;  %v8142_v53 = vld [vmem:[#allocation10 + $0x8a0] sm:$0xff] }
 0x4aa   :  { %v7447_v47 = vpop.f32.mrf.mxu1  ;;  %14126 = vmatmul.mubr.bf16.vlgmr.msra.gmra.mxu1 %v18893_v31  ;;  %v7408_v48 = vpop.f32.mrf.mxu0  ;;  %14136 = vmatprep.subr.bf16.mxu0 %v17424_v34  ;;  %v17527_v34 = vcombine.low %v8274_v7, %v8278_v29  ;;  %v17392_v35 = vcombine.high %v8138_v18, %v8142_v53  ;;  %v8130_v40 = vld [vmem:[#allocation10 + $0x840] sm:$0xff]  ;;  %v17495_v29 = vcombine.low %v8242_v5, %v8246_v20 }
 0x4ab   :  { %14176 = vmatpush1.bf16.msra.mxu1 %v17559_v28  ;;  %v18903_v52 = vadd.f32 %v7447_v47, %v7407_v46  ;;  %14207 = vmatprep.mubr.bf16.mxu1 %v18898_v22  ;;  %v7409_v56 = vadd.f32 %v7408_v48, %v18857_v17  ;;  %v17399_v28 = vcombine.low %v8146_v39, %v8150_v21  ;;  %v8258_v42 = vld [vmem:[#allocation10 + $0xc40] sm:$0xff] }
 0x4ac   :  { %v7449_v23 = vpop.f32.mrf.mxu1  ;;  %v7410_v16 = vpop.f32.mrf.mxu0  ;;  %14177 = vmatprep.subr.bf16.mxu1 %v17552_v10  ;;  %v8134_v10 = vld [vmem:[#allocation10 + $0x860] sm:$0xff]  ;;  %v17391_v46 = vcombine.low %v8138_v18, %v8142_v53  ;;  %v17519_v47 = vcombine.low %v8266_v26, %v8270_v27 }
 0x4ad   :  { %v18907_v12 = vadd.f32 %v7449_v23, %v7409_v56  ;;  %14137 = vmatpush1.bf16.msra.mxu0 %v17423_v19  ;;  %v8262_v44 = vld [vmem:[#allocation10 + $0xc60] sm:$0xff]  ;;  %v17384_v19 = vcombine.high %v8130_v40, %v8134_v10 }
 0x4ae   :  { %v7451_v30 = vpop.f32.mrf.mxu1  ;;  %v7411_v38 = vpop.f32.mrf.mxu0  ;;  %14138 = vmatprep.subr.bf16.mxu0 %v17416_v51  ;;  %v17512_v48 = vcombine.high %v8258_v42, %v8262_v44  ;;  %v8126_v51 = vld [vmem:[#allocation10 + $0x820] sm:$0xff]  ;;  %v17511_v60 = vcombine.low %v8258_v42, %v8262_v44 }
 0x4af   :  { %14178 = vmatpush1.bf16.msra.mxu1 %v17551_v57  ;;  %v8122_v57 = vld [vmem:[#allocation10 + $0x800] sm:$0xff] }
 0x4b0   :  { %v7452_v17 = vpop.f32.mrf.mxu1  ;;  %14179 = vmatprep.subr.bf16.mxu1 %v17544_v0  ;;  %v8250_v56 = vld [vmem:[#allocation10 + $0xc00] sm:$0xff]  ;;  %v17383_v0 = vcombine.low %v8130_v40, %v8134_v10  ;;  %v17376_v1 = vcombine.high %v8122_v57, %v8126_v51  ;;  %v17375_v38 = vcombine.low %v8122_v57, %v8126_v51 }
 0x4b1   :  { %14139 = vmatpush1.bf16.msra.mxu0 %v17415_v15  ;;  %v8254_v23 = vld [vmem:[#allocation10 + $0xc20] sm:$0xff] }
 0x4b2   :  { %14140 = vmatprep.subr.bf16.mxu0 %v17408_v14  ;;  %v17504_v16 = vcombine.high %v8250_v56, %v8254_v23  ;;  %v8370_v30 = vld [vmem:[#allocation10 + $0xfc0] sm:$0xff]  ;;  %v17496_v14 = vcombine.high %v8242_v5, %v8246_v20 }
 0x4b3   :  { %14180 = vmatpush1.bf16.msra.mxu1 %v17543_v9  ;;  %v8374_v15 = vld [vmem:[#allocation10 + $0xfe0] sm:$0xff]  ;;  %v17503_v9 = vcombine.low %v8250_v56, %v8254_v23 }
 0x4b4   :  { %14181 = vmatprep.subr.bf16.mxu1 %v17536_v8  ;;  %v17624_v17 = vcombine.high %v8370_v30, %v8374_v15  ;;  %v8234_v8 = vld [vmem:[#allocation10 + $0xb80] sm:$0xff] }
 0x4b5   :  { %14141 = vmatpush1.bf16.msra.mxu0 %v17407_v24  ;;  %v8238_v39 = vld [vmem:[#allocation10 + $0xba0] sm:$0xff]  ;;  %v17623_v24 = vcombine.low %v8370_v30, %v8374_v15 }
 0x4b6   :  { %14142 = vmatprep.subr.bf16.mxu0 %v17400_v58  ;;  %v8362_v21 = vld [vmem:[#allocation10 + $0xf80] sm:$0xff]  ;;  %v17487_v27 = vcombine.low %v8234_v8, %v8238_v39 }
 0x4b7   :  { %14182 = vmatpush1.bf16.msra.mxu1 %v17535_v41  ;;  %v8366_v7 = vld [vmem:[#allocation10 + $0xfa0] sm:$0xff]  ;;  %v17488_v41 = vcombine.high %v8234_v8, %v8238_v39 }
 0x4b8   :  { %14183 = vmatprep.subr.bf16.mxu1 %v17528_v54  ;;  %v17616_v58 = vcombine.high %v8362_v21, %v8366_v7  ;;  %v8226_v54 = vld [vmem:[#allocation10 + $0xb40] sm:$0xff] }
 0x4b9   :  { %14143 = vmatpush1.bf16.msra.mxu0 %v17399_v28  ;;  %v8230_v18 = vld [vmem:[#allocation10 + $0xb60] sm:$0xff]  ;;  %v17615_v28 = vcombine.low %v8362_v21, %v8366_v7 }
 0x4ba   :  { %14144 = vmatprep.subr.bf16.mxu0 %v17392_v35  ;;  %v8354_v53 = vld [vmem:[#allocation10 + $0xf40] sm:$0xff]  ;;  %v17479_v44 = vcombine.low %v8226_v54, %v8230_v18 }
 0x4bb   :  { %14184 = vmatpush1.bf16.msra.mxu1 %v17527_v34  ;;  %v8358_v26 = vld [vmem:[#allocation10 + $0xf60] sm:$0xff]  ;;  %v17480_v34 = vcombine.high %v8226_v54, %v8230_v18 }
 0x4bc   :  { %14185 = vmatprep.subr.bf16.mxu1 %v17520_v63  ;;  %v17608_v35 = vcombine.high %v8354_v53, %v8358_v26  ;;  %v8218_v63 = vld [vmem:[#allocation10 + $0xb00] sm:$0xff] }
 0x4bd   :  { %14145 = vmatpush1.bf16.msra.mxu0 %v17391_v46  ;;  %v8222_v40 = vld [vmem:[#allocation10 + $0xb20] sm:$0xff]  ;;  %v18910_v46 = vsub.s32 4, %v18825_v32 }
 0x4be   :  { %14146 = vmatprep.subr.bf16.mxu0 %v17384_v19  ;;  %v8346_v10 = vld [vmem:[#allocation10 + $0xf00] sm:$0xff]  ;;  %v17472_v19 = vcombine.high %v8218_v63, %v8222_v40 }
 0x4bf   :  { %14186 = vmatpush1.bf16.msra.mxu1 %v17519_v47  ;;  %v8350_v42 = vld [vmem:[#allocation10 + $0xf20] sm:$0xff]  ;;  %v17607_v47 = vcombine.low %v8354_v53, %v8358_v26  ;;  %v7741_v8 = vrot.slane %v18839_v25, %v18910_v46 }
 0x4c0   :  { %14187 = vmatprep.subr.bf16.mxu1 %v17512_v48  ;;  %v18913_v48 = vsub.s32 6, %v18825_v32  ;;  %v17600_v57 = vcombine.high %v8346_v10, %v8350_v42  ;;  %v8210_v51 = vld [vmem:[#allocation10 + $0xac0] sm:$0xff]  ;;  %v18919_v32 = vld [vmem:[#allocation7 + $0x8] sm:$0xff] }
 0x4c1   :  { %14147 = vmatpush1.bf16.msra.mxu0 %v17383_v0  ;;  %v8214_v56 = vld [vmem:[#allocation10 + $0xae0] sm:$0xff]  ;;  %v7669_v39 = vrot.slane %v18919_v32, %v18831_v45 }
 0x4c2   :  { %14148 = vmatprep.subr.bf16.mxu0 %v17376_v1  ;;  %v8338_v23 = vld [vmem:[#allocation10 + $0xec0] sm:$0xff]  ;;  %v7641_v1 = vrot.slane %v18833_v49, %v18910_v46  ;;  %v17464_v5 = vcombine.high %v8210_v51, %v8214_v56  ;;  %v7649_v20 = vrot.slane %v18833_v49, %v18913_v48  ;;  %v17463_v21 = vcombine.low %v8210_v51, %v8214_v56 }
 0x4c3   :  { %14188 = vmatpush1.bf16.msra.mxu1 %v17511_v60  ;;  %v8342_v0 = vld [vmem:[#allocation10 + $0xee0] sm:$0xff]  ;;  %v17471_v60 = vcombine.low %v8218_v63, %v8222_v40 }
 0x4c4   :  { %14189 = vmatprep.subr.bf16.mxu1 %v17504_v16  ;;  %v17599_v16 = vcombine.low %v8346_v10, %v8350_v42  ;;  %v17592_v30 = vcombine.high %v8338_v23, %v8342_v0  ;;  %v8202_v15 = vld [vmem:[#allocation10 + $0xa80] sm:$0xff]  ;;  %v7706_v49 = vmul.f32 %v7641_v1, %v18764_v36  ;;  %v17591_v7 = vcombine.low %v8338_v23, %v8342_v0 }
 0x4c5   :  { %14149 = vmatpush1.bf16.msra.mxu0 %v17375_v38  ;;  %v8206_v38 = vld [vmem:[#allocation10 + $0xaa0] sm:$0xff] }
 0x4c6   :  { %14150 = vmatprep.subr.bf16.mxu0 %v17496_v14  ;;  %v8330_v14 = vld [vmem:[#allocation10 + $0xe80] sm:$0xff] }
 0x4c7   :  { %14190 = vmatpush1.bf16.msra.mxu1 %v17503_v9  ;;  %v7661_v9 = vrot.slane %v18919_v32, %v18828_v43  ;;  %v8194_v18 = vld [vmem:[#allocation10 + $0xa40] sm:$0xff] }
 0x4c8   :  { %14191 = vmatprep.subr.bf16.mxu1 %v17624_v17  ;;  %v8334_v17 = vld [vmem:[#allocation10 + $0xea0] sm:$0xff] }
 0x4c9   :  { %14151 = vmatpush2.bf16.msra.mxu0 %v17495_v29  ;;  %v17456_v29 = vcombine.high %v8202_v15, %v8206_v38  ;;  %v17584_v54 = vcombine.high %v8330_v14, %v8334_v17  ;;  %v8198_v53 = vld [vmem:[#allocation10 + $0xa60] sm:$0xff]  ;;  %v7711_v26 = vmul.f32 %v7661_v9, %v18805_v13  ;;  %v17583_v63 = vcombine.low %v8330_v14, %v8334_v17 }
 0x4ca   :  { %14152 = vmatprep.subr.bf16.mxu0 %v17488_v41  ;;  %v7749_v41 = vrot.slane %v18839_v25, %v18913_v48  ;;  %v17455_v25 = vcombine.low %v8202_v15, %v8206_v38  ;;  %v17448_v40 = vcombine.high %v8194_v18, %v8198_v53  ;;  %v8186_v42 = vld [vmem:[#allocation10 + $0xa00] sm:$0xff] }
 0x4cb   :  { %14192 = vmatpush2.bf16.msra.mxu1 %v17623_v24  ;;  %v7708_v24 = vmul.f32 %v7649_v20, %v18782_v33  ;;  %v8566_v15 = vld [vmem:[#allocation10 + $0x15e0] sm:$0xff] }
 0x4cc   :  { %14193 = vmatprep.subr.bf16.mxu1 %v17616_v58  ;;  %v18931_v58 = vld [vmem:[#allocation8 + $0x8] sm:$0xff] }
 0x4cd   :  { %14153 = vmatpush2.bf16.msra.mxu0 %v17487_v27  ;;  %v7761_v36 = vrot.slane %v18931_v58, %v18828_v43  ;;  %v8322_v27 = vld [vmem:[#allocation10 + $0xe40] sm:$0xff]  ;;  %v7769_v33 = vrot.slane %v18931_v58, %v18831_v45  ;;  %v7808_v10 = vadd.f32 %v7749_v41, %v7708_v24 }
 0x4ce   :  { %14154 = vmatprep.subr.bf16.mxu0 %v17480_v34  ;;  %v7713_v34 = vmul.f32 %v7669_v39, %v18823_v11  ;;  %v17447_v11 = vcombine.low %v8194_v18, %v8198_v53  ;;  %v8558_v18 = vld [vmem:[#allocation10 + $0x15a0] sm:$0xff] }
 0x4cf   :  { %14194 = vmatpush2.bf16.msra.mxu1 %v17615_v28  ;;  %v8326_v28 = vld [vmem:[#allocation10 + $0xe60] sm:$0xff] }
 0x4d0   :  { %14195 = vmatprep.subr.bf16.mxu1 %v17608_v35  ;;  %v7806_v35 = vadd.f32 %v7741_v8, %v7706_v49  ;;  %v17576_v13 = vcombine.high %v8322_v27, %v8326_v28  ;;  %v7813_v51 = vadd.f32 %v7769_v33, %v7713_v34  ;;  %v17575_v23 = vcombine.low %v8322_v27, %v8326_v28  ;;  %v8418_v28 = vld [vmem:[#allocation10 + $0x1140] sm:$0xff] }
 0x4d1   :  { %14155 = vmatpush2.bf16.msra.mxu0 %v17479_v44  ;;  %v8190_v44 = vld [vmem:[#allocation10 + $0xa20] sm:$0xff] }
 0x4d2   :  { %14156 = vmatprep.subr.bf16.mxu0 %v17472_v19  ;;  %v8314_v19 = vld [vmem:[#allocation10 + $0xe00] sm:$0xff]  ;;  %v7822_v56 = vmax.f32 %v7806_v35, 0.0  ;;  %v17440_v0 = vcombine.high %v8186_v42, %v8190_v44  ;;  %v7829_v38 = vmax.f32 %v7813_v51, 0.0  ;;  %v17439_v9 = vcombine.low %v8186_v42, %v8190_v44 }
 0x4d3   :  { %14196 = vmatpush2.bf16.msra.mxu1 %v17607_v47  ;;  %v7811_v47 = vadd.f32 %v7761_v36, %v7711_v26  ;;  %v8422_v34 = vld [vmem:[#allocation10 + $0x1160] sm:$0xff] }
 0x4d4   :  { %14197 = vmatprep.subr.bf16.mxu1 %v17600_v57  ;;  %v8318_v57 = vld [vmem:[#allocation10 + $0xe20] sm:$0xff]  ;;  %v7838_v14 = vmin.f32 %v7822_v56, 6.0  ;;  %v7845_v24 = vmin.f32 %v7829_v38, 6.0 }
 0x4d5   :  { %14157 = vmatpush2.bf16.msra.mxu0 %v17471_v60  ;;  %v7824_v60 = vmax.f32 %v7808_v10, 0.0  ;;  %v17568_v1 = vcombine.high %v8314_v19, %v8318_v57  ;;  %v7827_v20 = vmax.f32 %v7811_v47, 0.0  ;;  %v17567_v17 = vcombine.low %v8314_v19, %v8318_v57  ;;  %v8410_v56 = vld [vmem:[#allocation10 + $0x1100] sm:$0xff] }
 0x4d6   :  { %14158 = vmatprep.subr.bf16.mxu0 %v17464_v5  ;;  %v8438_v5 = vld [vmem:[#allocation10 + $0x11e0] sm:$0xff]  ;;  %v18939_v53 = vpack.c.bf16 %v7838_v14, %v7838_v14  ;;  %v18946_v10 = vpack.c.bf16 %v7845_v24, %v7845_v24  ;;  %v17672_v57 = vcombine.high %v8418_v28, %v8422_v34 }
 0x4d7   :  { %14198 = vmatpush2.bf16.msra.mxu1 %v17599_v16  ;;  %v8434_v16 = vld [vmem:[#allocation10 + $0x11c0] sm:$0xff]  ;;  %v7840_v39 = vmin.f32 %v7824_v60, 6.0  ;;  %v7843_v49 = vmin.f32 %v7827_v20, 6.0 }
 0x4d8   :  { %14199 = vmatprep.subr.bf16.mxu1 %v17592_v30  ;;  %v8562_v30 = vld [vmem:[#allocation10 + $0x15c0] sm:$0xff]  ;;  %v17688_v8 = vcombine.high %v8434_v16, %v8438_v5  ;;  %v17687_v41 = vcombine.low %v8434_v16, %v8438_v5  ;;  %v17671_v5 = vcombine.low %v8418_v28, %v8422_v34 }
 0x4d9   :  { %14159 = vmatpush2.bf16.msra.mxu0 %v17463_v21  ;;  %v17816_v21 = vcombine.high %v8562_v30, %v8566_v15  ;;  %v17815_v26 = vcombine.low %v8562_v30, %v8566_v15  ;;  %v18941_v36 = vpack.c.bf16 %v7840_v39, %v7840_v39  ;;  %v18943_v33 = vpack.c.bf16 %v7843_v49, %v7843_v49  ;;  %v8538_v60 = vld [vmem:[#allocation10 + $0x1500] sm:$0xff] }
 0x4da   :  { %14160 = vmatprep.subr.bf16.mxu0 %v17456_v29  ;;  %v8430_v29 = vld [vmem:[#allocation10 + $0x11a0] sm:$0xff] }
 0x4db   :  { %14200 = vmatpush2.bf16.msra.mxu1 %v17591_v7  ;;  %v8426_v7 = vld [vmem:[#allocation10 + $0x1180] sm:$0xff] }
 0x4dc   :  { %14201 = vmatprep.subr.bf16.mxu1 %v17584_v54  ;;  %v8554_v54 = vld [vmem:[#allocation10 + $0x1580] sm:$0xff]  ;;  %v17680_v27 = vcombine.high %v8426_v7, %v8430_v29  ;;  %v17679_v42 = vcombine.low %v8426_v7, %v8430_v29 }
 0x4dd   :  { %14161 = vmatpush2.bf16.msra.mxu0 %v17455_v25  ;;  %v17808_v35 = vcombine.high %v8554_v54, %v8558_v18  ;;  %v17807_v19 = vcombine.low %v8554_v54, %v8558_v18  ;;  %v8402_v14 = vld [vmem:[#allocation10 + $0x10c0] sm:$0xff] }
 0x4de   :  { %14162 = vmatprep.subr.bf16.mxu0 %v17448_v40  ;;  %v8550_v40 = vld [vmem:[#allocation10 + $0x1560] sm:$0xff] }
 0x4df   :  { %14202 = vmatpush2.bf16.msra.mxu1 %v17583_v63  ;;  %v8546_v63 = vld [vmem:[#allocation10 + $0x1540] sm:$0xff] }
 0x4e0   :  { %14203 = vmatprep.subr.bf16.mxu1 %v17576_v13  ;;  %v17799_v30 = vcombine.low %v8546_v63, %v8550_v40  ;;  %v8534_v39 = vld [vmem:[#allocation10 + $0x14e0] sm:$0xff] }
 0x4e1   :  { %14163 = vmatpush2.bf16.msra.mxu0 %v17447_v11  ;;  %v17800_v11 = vcombine.high %v8546_v63, %v8550_v40  ;;  %v8394_v24 = vld [vmem:[#allocation10 + $0x1080] sm:$0xff] }
 0x4e2   :  { %14164 = vmatprep.subr.bf16.mxu0 %v17440_v0  ;;  %v8522_v54 = vld [vmem:[#allocation10 + $0x1480] sm:$0xff] }
 0x4e3   :  { %14204 = vmatpush2.bf16.msra.mxu1 %v17575_v23  ;;  %v8414_v23 = vld [vmem:[#allocation10 + $0x1120] sm:$0xff] }
 0x4e4   :  { %14205 = vmatprep.subr.bf16.mxu1 %v17568_v1  ;;  %v8542_v1 = vld [vmem:[#allocation10 + $0x1520] sm:$0xff]  ;;  %v17664_v15 = vcombine.high %v8410_v56, %v8414_v23 }
 0x4e5   :  { %14165 = vmatpush2.bf16.msra.mxu0 %v17439_v9  ;;  %v17792_v9 = vcombine.high %v8538_v60, %v8542_v1  ;;  %v17791_v49 = vcombine.low %v8538_v60, %v8542_v1  ;;  %v8526_v18 = vld [vmem:[#allocation10 + $0x14a0] sm:$0xff] }
 0x4e6   :  { %14216 = vmatprep.subr.bf16.mxu0 %v17688_v8  ;;  %v8530_v8 = vld [vmem:[#allocation10 + $0x14c0] sm:$0xff]  ;;  %v17776_v34 = vcombine.high %v8522_v54, %v8526_v18 }
 0x4e7   :  { %14206 = vmatpush2.bf16.msra.mxu1 %v17567_v17  ;;  %v8406_v17 = vld [vmem:[#allocation10 + $0x10e0] sm:$0xff]  ;;  %v17784_v29 = vcombine.high %v8530_v8, %v8534_v39 }
 0x4e8   :  { %14257 = vmatprep.subr.bf16.mxu1 %v17816_v21  ;;  %v7488_v25 = vpop.f32.mrf.mxu0  ;;  %14167 = vmatmul.mubr.bf16.vlgmr.msra.gmra.mxu0 %v18939_v53  ;;  %v17663_v21 = vcombine.low %v8410_v56, %v8414_v23  ;;  %v17656_v7 = vcombine.high %v8402_v14, %v8406_v17  ;;  %v8514_v63 = vld [vmem:[#allocation10 + $0x1440] sm:$0xff] }
 0x4e9   :  { %14217 = vmatpush1.bf16.msra.mxu0 %v17687_v41  ;;  %14248 = vmatprep.mubr.bf16.mxu0 %v18943_v33  ;;  %v8398_v41 = vld [vmem:[#allocation10 + $0x10a0] sm:$0xff] }
 0x4ea   :  { %v7529_v13 = vpop.f32.mrf.mxu1  ;;  %14208 = vmatmul.mubr.bf16.vlgmr.msra.gmra.mxu1 %v18941_v36  ;;  %v18952_v47 = vpop.f32.mrf.mxu0  ;;  %14218 = vmatprep.subr.bf16.mxu0 %v17680_v27  ;;  %v17783_v27 = vcombine.low %v8530_v8, %v8534_v39  ;;  %v17648_v28 = vcombine.high %v8394_v24, %v8398_v41  ;;  %v8518_v40 = vld [vmem:[#allocation10 + $0x1460] sm:$0xff] }
 0x4eb   :  { %v18949_v44 = vadd.f32 %v7529_v13, %v7488_v25  ;;  %14258 = vmatpush1.bf16.msra.mxu1 %v17815_v26  ;;  %14289 = vmatprep.mubr.bf16.mxu1 %v18946_v10  ;;  %v17655_v26 = vcombine.low %v8402_v14, %v8406_v17  ;;  %v8386_v25 = vld [vmem:[#allocation10 + $0x1040] sm:$0xff]  ;;  %v17647_v13 = vcombine.low %v8394_v24, %v8398_v41 }
 0x4ec   :  { %v18955_v51 = vpop.f32.mrf.mxu1  ;;  %v7492_v0 = vpop.f32.mrf.mxu0  ;;  %14259 = vmatprep.subr.bf16.mxu1 %v17808_v35  ;;  %v8390_v35 = vld [vmem:[#allocation10 + $0x1060] sm:$0xff]  ;;  %v17767_v1 = vcombine.low %v8514_v63, %v8518_v40 }
 0x4ed   :  { %14219 = vmatpush1.bf16.msra.mxu0 %v17679_v42  ;;  %v17775_v42 = vcombine.low %v8522_v54, %v8526_v18  ;;  %v8382_v56 = vld [vmem:[#allocation10 + $0x1020] sm:$0xff]  ;;  %v17639_v60 = vcombine.low %v8386_v25, %v8390_v35 }
 0x4ee   :  { %v7533_v16 = vpop.f32.mrf.mxu1  ;;  %v7493_v20 = vpop.f32.mrf.mxu0  ;;  %14220 = vmatprep.subr.bf16.mxu0 %v17672_v57  ;;  %v17768_v57 = vcombine.high %v8514_v63, %v8518_v40  ;;  %v8506_v23 = vld [vmem:[#allocation10 + $0x1400] sm:$0xff] }
 0x4ef   :  { %14260 = vmatpush1.bf16.msra.mxu1 %v17807_v19  ;;  %v17640_v19 = vcombine.high %v8386_v25, %v8390_v35  ;;  %v8510_v0 = vld [vmem:[#allocation10 + $0x1420] sm:$0xff] }
 0x4f0   :  { %v7534_v38 = vpop.f32.mrf.mxu1  ;;  %14261 = vmatprep.subr.bf16.mxu1 %v17800_v11  ;;  %v8378_v11 = vld [vmem:[#allocation10 + $0x1000] sm:$0xff]  ;;  %v17759_v14 = vcombine.low %v8506_v23, %v8510_v0 }
 0x4f1   :  { %14221 = vmatpush1.bf16.msra.mxu0 %v17671_v5  ;;  %v17632_v16 = vcombine.high %v8378_v11, %v8382_v56  ;;  %v17760_v5 = vcombine.high %v8506_v23, %v8510_v0  ;;  %v8498_v20 = vld [vmem:[#allocation10 + $0x13c0] sm:$0xff] }
 0x4f2   :  { %14222 = vmatprep.subr.bf16.mxu0 %v17664_v15  ;;  %v8626_v15 = vld [vmem:[#allocation10 + $0x17c0] sm:$0xff] }
 0x4f3   :  { %14262 = vmatpush1.bf16.msra.mxu1 %v17799_v30  ;;  %v8502_v30 = vld [vmem:[#allocation10 + $0x13e0] sm:$0xff] }
 0x4f4   :  { %14263 = vmatprep.subr.bf16.mxu1 %v17792_v9  ;;  %v8630_v38 = vld [vmem:[#allocation10 + $0x17e0] sm:$0xff]  ;;  %v17631_v9 = vcombine.low %v8378_v11, %v8382_v56  ;;  %v17752_v17 = vcombine.high %v8498_v20, %v8502_v30 }
 0x4f5   :  { %14223 = vmatpush1.bf16.msra.mxu0 %v17663_v21  ;;  %v17880_v8 = vcombine.high %v8626_v15, %v8630_v38  ;;  %v8490_v39 = vld [vmem:[#allocation10 + $0x1380] sm:$0xff]  ;;  %v17879_v24 = vcombine.low %v8626_v15, %v8630_v38  ;;  %v7665_v38 = vrot.slane %v18919_v32, %v18863_v55 }
 0x4f6   :  { %14224 = vmatprep.subr.bf16.mxu0 %v17656_v7  ;;  %v8494_v21 = vld [vmem:[#allocation10 + $0x13a0] sm:$0xff] }
 0x4f7   :  { %14264 = vmatpush1.bf16.msra.mxu1 %v17791_v49  ;;  %v8618_v49 = vld [vmem:[#allocation10 + $0x1780] sm:$0xff]  ;;  %v17744_v41 = vcombine.high %v8490_v39, %v8494_v21 }
 0x4f8   :  { %14265 = vmatprep.subr.bf16.mxu1 %v17784_v29  ;;  %v8622_v7 = vld [vmem:[#allocation10 + $0x17a0] sm:$0xff]  ;;  %v17751_v29 = vcombine.low %v8498_v20, %v8502_v30  ;;  %v7657_v20 = vrot.slane %v18919_v32, %v18860_v50 }
 0x4f9   :  { %14225 = vmatpush1.bf16.msra.mxu0 %v17655_v26  ;;  %v17872_v54 = vcombine.high %v8618_v49, %v8622_v7  ;;  %v8482_v18 = vld [vmem:[#allocation10 + $0x1340] sm:$0xff]  ;;  %v17871_v25 = vcombine.low %v8618_v49, %v8622_v7  ;;  %v7757_v49 = vrot.slane %v18931_v58, %v18860_v50 }
 0x4fa   :  { %14226 = vmatprep.subr.bf16.mxu0 %v17648_v28  ;;  %v8486_v26 = vld [vmem:[#allocation10 + $0x1360] sm:$0xff] }
 0x4fb   :  { %14266 = vmatpush1.bf16.msra.mxu1 %v17783_v27  ;;  %v8610_v27 = vld [vmem:[#allocation10 + $0x1740] sm:$0xff]  ;;  %v17736_v35 = vcombine.high %v8482_v18, %v8486_v26 }
 0x4fc   :  { %14267 = vmatprep.subr.bf16.mxu1 %v17776_v34  ;;  %v8614_v28 = vld [vmem:[#allocation10 + $0x1760] sm:$0xff]  ;;  %v17743_v34 = vcombine.low %v8490_v39, %v8494_v21 }
 0x4fd   :  { %14227 = vmatpush1.bf16.msra.mxu0 %v17647_v13  ;;  %v17864_v63 = vcombine.high %v8610_v27, %v8614_v28  ;;  %v8474_v40 = vld [vmem:[#allocation10 + $0x1300] sm:$0xff]  ;;  %v17863_v11 = vcombine.low %v8610_v27, %v8614_v28 }
 0x4fe   :  { %14228 = vmatprep.subr.bf16.mxu0 %v17640_v19  ;;  %v8478_v13 = vld [vmem:[#allocation10 + $0x1320] sm:$0xff] }
 0x4ff   :  { %14268 = vmatpush1.bf16.msra.mxu1 %v17775_v42  ;;  %v8602_v42 = vld [vmem:[#allocation10 + $0x1700] sm:$0xff]  ;;  %v17728_v56 = vcombine.high %v8474_v40, %v8478_v13 }
 0x500   :  { %14269 = vmatprep.subr.bf16.mxu1 %v17768_v57  ;;  %v8606_v19 = vld [vmem:[#allocation10 + $0x1720] sm:$0xff]  ;;  %v17735_v57 = vcombine.low %v8482_v18, %v8486_v26  ;;  %v7765_v18 = vrot.slane %v18931_v58, %v18863_v55 }
 0x501   :  { %14229 = vmatpush1.bf16.msra.mxu0 %v17639_v60  ;;  %v17856_v23 = vcombine.high %v8602_v42, %v8606_v19  ;;  %v8466_v0 = vld [vmem:[#allocation10 + $0x12c0] sm:$0xff]  ;;  %v17855_v30 = vcombine.low %v8602_v42, %v8606_v19 }
 0x502   :  { %14230 = vmatprep.subr.bf16.mxu0 %v17632_v16  ;;  %v8470_v60 = vld [vmem:[#allocation10 + $0x12e0] sm:$0xff] }
 0x503   :  { %14270 = vmatpush1.bf16.msra.mxu1 %v17767_v1  ;;  %v8594_v1 = vld [vmem:[#allocation10 + $0x16c0] sm:$0xff]  ;;  %v17720_v15 = vcombine.high %v8466_v0, %v8470_v60  ;;  %v17719_v7 = vcombine.low %v8466_v0, %v8470_v60 }
 0x504   :  { %14271 = vmatprep.subr.bf16.mxu1 %v17760_v5  ;;  %v8598_v16 = vld [vmem:[#allocation10 + $0x16e0] sm:$0xff]  ;;  %v17727_v5 = vcombine.low %v8474_v40, %v8478_v13 }
 0x505   :  { %14231 = vmatpush1.bf16.msra.mxu0 %v17631_v9  ;;  %v17848_v9 = vcombine.high %v8594_v1, %v8598_v16  ;;  %v8586_v39 = vld [vmem:[#allocation10 + $0x1680] sm:$0xff] }
 0x506   :  { %14232 = vmatprep.subr.bf16.mxu0 %v17752_v17  ;;  %v8462_v17 = vld [vmem:[#allocation10 + $0x12a0] sm:$0xff] }
 0x507   :  { %14272 = vmatpush1.bf16.msra.mxu1 %v17759_v14  ;;  %v8458_v14 = vld [vmem:[#allocation10 + $0x1280] sm:$0xff] }
 0x508   :  { %14273 = vmatprep.subr.bf16.mxu1 %v17880_v8  ;;  %v7677_v8 = vrot.slane %v18919_v32, %v18866_v4  ;;  %v8590_v21 = vld [vmem:[#allocation10 + $0x16a0] sm:$0xff] }
 0x509   :  { %14233 = vmatpush2.bf16.msra.mxu0 %v17751_v29  ;;  %v7710_v29 = vmul.f32 %v7657_v20, %v18800_v3  ;;  %v17840_v26 = vcombine.high %v8586_v39, %v8590_v21  ;;  %v8450_v27 = vld [vmem:[#allocation10 + $0x1240] sm:$0xff] }
 0x50a   :  { %14234 = vmatprep.subr.bf16.mxu0 %v17744_v41  ;;  %v17712_v41 = vcombine.high %v8458_v14, %v8462_v17  ;;  %v8454_v28 = vld [vmem:[#allocation10 + $0x1260] sm:$0xff] }
 0x50b   :  { %14274 = vmatpush2.bf16.msra.mxu1 %v17879_v24  ;;  %v17847_v24 = vcombine.low %v8594_v1, %v8598_v16  ;;  %v8582_v3 = vld [vmem:[#allocation10 + $0x1660] sm:$0xff]  ;;  %v7810_v40 = vadd.f32 %v7757_v49, %v7710_v29  ;;  %v17704_v13 = vcombine.high %v8450_v27, %v8454_v28  ;;  %v17703_v0 = vcombine.low %v8450_v27, %v8454_v28 }
 0x50c   :  { %14275 = vmatprep.subr.bf16.mxu1 %v17872_v54  ;;  %v7712_v54 = vmul.f32 %v7665_v38, %v18818_v2  ;;  %v17839_v2 = vcombine.low %v8586_v39, %v8590_v21  ;;  %v8682_v29 = vld [vmem:[#allocation10 + $0x1980] sm:$0xff] }
 0x50d   :  { %14235 = vmatpush2.bf16.msra.mxu0 %v17743_v34  ;;  %v7715_v34 = vmul.f32 %v7677_v8, %v18907_v12  ;;  %v8574_v12 = vld [vmem:[#allocation10 + $0x1620] sm:$0xff]  ;;  %v7826_v60 = vmax.f32 %v7810_v40, 0.0 }
 0x50e   :  { %14236 = vmatprep.subr.bf16.mxu0 %v17736_v35  ;;  %v8578_v35 = vld [vmem:[#allocation10 + $0x1640] sm:$0xff]  ;;  %v7812_v42 = vadd.f32 %v7765_v18, %v7712_v54 }
 0x50f   :  { %14276 = vmatpush2.bf16.msra.mxu1 %v17871_v25  ;;  %v7777_v25 = vrot.slane %v18931_v58, %v18866_v4  ;;  %v17832_v19 = vcombine.high %v8578_v35, %v8582_v3  ;;  %v17831_v1 = vcombine.low %v8578_v35, %v8582_v3  ;;  %v7842_v8 = vmin.f32 %v7826_v60, 6.0  ;;  %v8810_v54 = vld [vmem:[#allocation10 + $0x1d80] sm:$0xff] }
 0x510   :  { %14277 = vmatprep.subr.bf16.mxu1 %v17864_v63  ;;  %v17711_v63 = vcombine.low %v8458_v14, %v8462_v17  ;;  %v8822_v14 = vld [vmem:[#allocation10 + $0x1de0] sm:$0xff] }
 0x511   :  { %14237 = vmatpush2.bf16.msra.mxu0 %v17735_v57  ;;  %v8442_v57 = vld [vmem:[#allocation10 + $0x1200] sm:$0xff]  ;;  %v18972_v27 = vpack.c.bf16 %v7842_v8, %v7842_v8 }
 0x512   :  { %14238 = vmatprep.subr.bf16.mxu0 %v17728_v56  ;;  %v7815_v56 = vadd.f32 %v7777_v25, %v7715_v34  ;;  %v8814_v18 = vld [vmem:[#allocation10 + $0x1da0] sm:$0xff] }
 0x513   :  { %14278 = vmatpush2.bf16.msra.mxu1 %v17863_v11  ;;  %v8446_v11 = vld [vmem:[#allocation10 + $0x1220] sm:$0xff]  ;;  %v18064_v35 = vcombine.high %v8810_v54, %v8814_v18 }
 0x514   :  { %14279 = vmatprep.subr.bf16.mxu1 %v17856_v23  ;;  %v8570_v23 = vld [vmem:[#allocation10 + $0x1600] sm:$0xff]  ;;  %v17696_v16 = vcombine.high %v8442_v57, %v8446_v11  ;;  %v7831_v38 = vmax.f32 %v7815_v56, 0.0  ;;  %v17695_v17 = vcombine.low %v8442_v57, %v8446_v11 }
 0x515   :  { %14239 = vmatpush2.bf16.msra.mxu0 %v17727_v5  ;;  %v7828_v5 = vmax.f32 %v7812_v42, 0.0  ;;  %v17824_v20 = vcombine.high %v8570_v23, %v8574_v12  ;;  %v17823_v39 = vcombine.low %v8570_v23, %v8574_v12  ;;  %v8674_v3 = vld [vmem:[#allocation10 + $0x1940] sm:$0xff]  ;;  %v18063_v23 = vcombine.low %v8810_v54, %v8814_v18 }
 0x516   :  { %14240 = vmatprep.subr.bf16.mxu0 %v17720_v15  ;;  %v8694_v15 = vld [vmem:[#allocation10 + $0x19e0] sm:$0xff] }
 0x517   :  { %14280 = vmatpush2.bf16.msra.mxu1 %v17855_v30  ;;  %v8690_v30 = vld [vmem:[#allocation10 + $0x19c0] sm:$0xff]  ;;  %v7844_v49 = vmin.f32 %v7828_v5, 6.0 }
 0x518   :  { %14281 = vmatprep.subr.bf16.mxu1 %v17848_v9  ;;  %v8818_v9 = vld [vmem:[#allocation10 + $0x1dc0] sm:$0xff]  ;;  %v17944_v21 = vcombine.high %v8690_v30, %v8694_v15 }
 0x519   :  { %14241 = vmatpush2.bf16.msra.mxu0 %v17719_v7  ;;  %v18072_v7 = vcombine.high %v8818_v9, %v8822_v14  ;;  %v18071_v28 = vcombine.low %v8818_v9, %v8822_v14  ;;  %v18974_v34 = vpack.c.bf16 %v7844_v49, %v7844_v49  ;;  %v8806_v42 = vld [vmem:[#allocation10 + $0x1d60] sm:$0xff] }
 0x51a   :  { %14242 = vmatprep.subr.bf16.mxu0 %v17712_v41  ;;  %v8686_v41 = vld [vmem:[#allocation10 + $0x19a0] sm:$0xff] }
 0x51b   :  { %14282 = vmatpush2.bf16.msra.mxu1 %v17847_v24  ;;  %v7847_v24 = vmin.f32 %v7831_v38, 6.0  ;;  %v17936_v25 = vcombine.high %v8682_v29, %v8686_v41  ;;  %v17935_v11 = vcombine.low %v8682_v29, %v8686_v41  ;;  %v7785_v38 = vrot.slane %v18931_v58, %v18869_v61  ;;  %v8658_v29 = vld [vmem:[#allocation10 + $0x18c0] sm:$0xff] }
 0x51c   :  { %14283 = vmatprep.subr.bf16.mxu1 %v17840_v26  ;;  %v17943_v26 = vcombine.low %v8690_v30, %v8694_v15  ;;  %v8798_v30 = vld [vmem:[#allocation10 + $0x1d20] sm:$0xff] }
 0x51d   :  { %14243 = vmatpush2.bf16.msra.mxu0 %v17711_v63  ;;  %v8678_v63 = vld [vmem:[#allocation10 + $0x1960] sm:$0xff]  ;;  %v18976_v40 = vpack.c.bf16 %v7847_v24, %v7847_v24 }
 0x51e   :  { %14244 = vmatprep.subr.bf16.mxu0 %v17704_v13  ;;  %v8802_v13 = vld [vmem:[#allocation10 + $0x1d40] sm:$0xff]  ;;  %v17928_v12 = vcombine.high %v8674_v3, %v8678_v63  ;;  %v17927_v14 = vcombine.low %v8674_v3, %v8678_v63 }
 0x51f   :  { %14284 = vmatpush2.bf16.msra.mxu1 %v17839_v2  ;;  %v18055_v8 = vcombine.low %v8802_v13, %v8806_v42  ;;  %v8662_v24 = vld [vmem:[#allocation10 + $0x18e0] sm:$0xff] }
 0x520   :  { %14285 = vmatprep.subr.bf16.mxu1 %v17832_v19  ;;  %v7532_v19 = vadd.f32 %v18955_v51, %v18952_v47  ;;  %v18056_v47 = vcombine.high %v8802_v13, %v8806_v42  ;;  %v8666_v51 = vld [vmem:[#allocation10 + $0x1900] sm:$0xff] }
 0x521   :  { %14245 = vmatpush2.bf16.msra.mxu0 %v17703_v0  ;;  %v8786_v41 = vld [vmem:[#allocation10 + $0x1cc0] sm:$0xff] }
 0x522   :  { %14246 = vmatprep.subr.bf16.mxu0 %v17696_v16  ;;  %v8670_v16 = vld [vmem:[#allocation10 + $0x1920] sm:$0xff] }
 0x523   :  { %14286 = vmatpush2.bf16.msra.mxu1 %v17831_v1  ;;  %v7685_v1 = vrot.slane %v18919_v32, %v18869_v61  ;;  %v8790_v54 = vld [vmem:[#allocation10 + $0x1ce0] sm:$0xff] }
 0x524   :  { %14287 = vmatprep.subr.bf16.mxu1 %v17824_v20  ;;  %v8794_v20 = vld [vmem:[#allocation10 + $0x1d00] sm:$0xff]  ;;  %v18040_v3 = vcombine.high %v8786_v41, %v8790_v54 }
 0x525   :  { %14247 = vmatpush2.bf16.msra.mxu0 %v17695_v17  ;;  %v8650_v63 = vld [vmem:[#allocation10 + $0x1880] sm:$0xff] }
 0x526   :  { %14298 = vmatprep.subr.bf16.mxu0 %v17944_v21  ;;  %v8654_v13 = vld [vmem:[#allocation10 + $0x18a0] sm:$0xff] }
 0x527   :  { %14288 = vmatpush2.bf16.msra.mxu1 %v17823_v39  ;;  %v17920_v39 = vcombine.high %v8666_v51, %v8670_v16  ;;  %v8778_v42 = vld [vmem:[#allocation10 + $0x1c80] sm:$0xff] }
 0x528   :  { %14339 = vmatprep.subr.bf16.mxu1 %v18072_v7  ;;  %v18978_v2 = vpop.f32.mrf.mxu0  ;;  %14249 = vmatmul.mubr.bf16.vlgmr.msra.gmra.mxu0 %v18972_v27  ;;  %v18048_v7 = vcombine.high %v8794_v20, %v8798_v30 }
 0x529   :  { %14299 = vmatpush1.bf16.msra.mxu0 %v17943_v26  ;;  %14330 = vmatprep.mubr.bf16.mxu0 %v18976_v40  ;;  %v17919_v26 = vcombine.low %v8666_v51, %v8670_v16  ;;  %v8770_v51 = vld [vmem:[#allocation10 + $0x1c40] sm:$0xff] }
 0x52a   :  { %v18983_v57 = vpop.f32.mrf.mxu1  ;;  %14290 = vmatmul.mubr.bf16.vlgmr.msra.gmra.mxu1 %v18974_v34  ;;  %v7572_v56 = vpop.f32.mrf.mxu0  ;;  %14300 = vmatprep.subr.bf16.mxu0 %v17936_v25  ;;  %v17912_v25 = vcombine.high %v8658_v29, %v8662_v24  ;;  %v8774_v16 = vld [vmem:[#allocation10 + $0x1c60] sm:$0xff] }
 0x52b   :  { %14340 = vmatpush1.bf16.msra.mxu1 %v18071_v28  ;;  %v7573_v0 = vadd.f32 %v7572_v56, %v7532_v19  ;;  %v18047_v28 = vcombine.low %v8794_v20, %v8798_v30  ;;  %v8782_v19 = vld [vmem:[#allocation10 + $0x1ca0] sm:$0xff]  ;;  %v17911_v56 = vcombine.low %v8658_v29, %v8662_v24 }
 0x52c   :  { %v7613_v60 = vpop.f32.mrf.mxu1  ;;  %14341 = vmatprep.subr.bf16.mxu1 %v18064_v35  ;;  %v7574_v5 = vpop.f32.mrf.mxu0  ;;  %v18031_v20 = vcombine.low %v8778_v42, %v8782_v19  ;;  %v8758_v29 = vld [vmem:[#allocation10 + $0x1be0] sm:$0xff] }
 0x52d   :  { %v7614_v15 = vadd.f32 %v7613_v60, %v7573_v0  ;;  %14301 = vmatpush1.bf16.msra.mxu0 %v17935_v11  ;;  %v18032_v60 = vcombine.high %v8778_v42, %v8782_v19  ;;  %v17903_v5 = vcombine.low %v8650_v63, %v8654_v13  ;;  %v8882_v24 = vld [vmem:[#allocation10 + $0x1fc0] sm:$0xff] }
 0x52e   :  { %v7615_v9 = vpop.f32.mrf.mxu1  ;;  %v7575_v17 = vpop.f32.mrf.mxu0  ;;  %14302 = vmatprep.subr.bf16.mxu0 %v17928_v12  ;;  %v17904_v12 = vcombine.high %v8650_v63, %v8654_v13  ;;  %v8878_v63 = vld [vmem:[#allocation10 + $0x1fa0] sm:$0xff] }
 0x52f   :  { %14342 = vmatpush1.bf16.msra.mxu1 %v18063_v23  ;;  %v7717_v21 = vmul.f32 %v7685_v1, %v7614_v15  ;;  %v18039_v23 = vcombine.low %v8786_v41, %v8790_v54  ;;  %v8642_v1 = vld [vmem:[#allocation10 + $0x1840] sm:$0xff]  ;;  %v18024_v15 = vcombine.high %v8770_v51, %v8774_v16 }
 0x530   :  { %v7616_v49 = vpop.f32.mrf.mxu1  ;;  %14343 = vmatprep.subr.bf16.mxu1 %v18056_v47  ;;  %v8646_v47 = vld [vmem:[#allocation10 + $0x1860] sm:$0xff] }
 0x531   :  { %v7817_v18 = vadd.f32 %v7785_v38, %v7717_v21  ;;  %14303 = vmatpush1.bf16.msra.mxu0 %v17927_v14  ;;  %v17896_v30 = vcombine.high %v8642_v1, %v8646_v47  ;;  %v8634_v38 = vld [vmem:[#allocation10 + $0x1800] sm:$0xff] }
 0x532   :  { %14304 = vmatprep.subr.bf16.mxu0 %v17920_v39  ;;  %v8638_v9 = vld [vmem:[#allocation10 + $0x1820] sm:$0xff]  ;;  %v18023_v39 = vcombine.low %v8770_v51, %v8774_v16 }
 0x533   :  { %14344 = vmatpush1.bf16.msra.mxu1 %v18055_v8  ;;  %v7833_v35 = vmax.f32 %v7817_v18, 0.0  ;;  %v8762_v14 = vld [vmem:[#allocation10 + $0x1c00] sm:$0xff]  ;;  %v17895_v8 = vcombine.low %v8642_v1, %v8646_v47  ;;  %v17888_v21 = vcombine.high %v8634_v38, %v8638_v9  ;;  %v17887_v54 = vcombine.low %v8634_v38, %v8638_v9 }
 0x534   :  { %14345 = vmatprep.subr.bf16.mxu1 %v18048_v7  ;;  %v8766_v17 = vld [vmem:[#allocation10 + $0x1c20] sm:$0xff] }
 0x535   :  { %v7849_v11 = vmin.f32 %v7833_v35, 6.0  ;;  %14305 = vmatpush1.bf16.msra.mxu0 %v17919_v26  ;;  %v18016_v49 = vcombine.high %v8762_v14, %v8766_v17  ;;  %v8754_v7 = vld [vmem:[#allocation10 + $0x1bc0] sm:$0xff]  ;;  %v18015_v18 = vcombine.low %v8762_v14, %v8766_v17  ;;  %v7571_v17 = vadd.f32 %v18978_v2, %v18949_v44 }
 0x536   :  { %14306 = vmatprep.subr.bf16.mxu0 %v17912_v25  ;;  %v8886_v41 = vld [vmem:[#allocation10 + $0x1fe0] sm:$0xff]  ;;  %v18008_v26 = vcombine.high %v8754_v7, %v8758_v29  ;;  %v18007_v13 = vcombine.low %v8754_v7, %v8758_v29  ;;  %v7681_v44 = vrot.slane %v18919_v32, %v18913_v48 }
 0x537   :  { %14346 = vmatpush1.bf16.msra.mxu1 %v18047_v28  ;;  %v18991_v0 = vpack.c.bf16 %v7849_v11, %v7849_v11  ;;  %v18136_v28 = vcombine.high %v8882_v24, %v8886_v41  ;;  %v8746_v25 = vld [vmem:[#allocation10 + $0x1b80] sm:$0xff]  ;;  %v18135_v42 = vcombine.low %v8882_v24, %v8886_v41  ;;  %v7673_v24 = vrot.slane %v18919_v32, %v18910_v46 }
 0x538   :  { %14347 = vmatprep.subr.bf16.mxu1 %v18040_v3  ;;  %v8750_v35 = vld [vmem:[#allocation10 + $0x1ba0] sm:$0xff]  ;;  %v7781_v32 = vrot.slane %v18931_v58, %v18913_v48 }
 0x539   :  { %14307 = vmatpush1.bf16.msra.mxu0 %v17911_v56  ;;  %14371 = vmatprep.mubr.bf16.mxu1 %v18991_v0  ;;  %v8874_v3 = vld [vmem:[#allocation10 + $0x1f80] sm:$0xff]  ;;  %v18000_v19 = vcombine.high %v8746_v25, %v8750_v35  ;;  %v17999_v1 = vcombine.low %v8746_v25, %v8750_v35 }
 0x53a   :  { %14308 = vmatprep.subr.bf16.mxu0 %v17904_v12  ;;  %v18128_v11 = vcombine.high %v8874_v3, %v8878_v63  ;;  %v8738_v56 = vld [vmem:[#allocation10 + $0x1b40] sm:$0xff]  ;;  %v18127_v47 = vcombine.low %v8874_v3, %v8878_v63  ;;  %v7773_v3 = vrot.slane %v18931_v58, %v18910_v46 }
 0x53b   :  { %14348 = vmatpush1.bf16.msra.mxu1 %v18039_v23  ;;  %v8742_v23 = vld [vmem:[#allocation10 + $0x1b60] sm:$0xff] }
 0x53c   :  { %14349 = vmatprep.subr.bf16.mxu1 %v18032_v60  ;;  %v8866_v12 = vld [vmem:[#allocation10 + $0x1f40] sm:$0xff]  ;;  %v17992_v51 = vcombine.high %v8738_v56, %v8742_v23  ;;  %v17991_v38 = vcombine.low %v8738_v56, %v8742_v23 }
 0x53d   :  { %14309 = vmatpush1.bf16.msra.mxu0 %v17903_v5  ;;  %v8870_v60 = vld [vmem:[#allocation10 + $0x1f60] sm:$0xff] }
 0x53e   :  { %14310 = vmatprep.subr.bf16.mxu0 %v17896_v30  ;;  %v18120_v16 = vcombine.high %v8866_v12, %v8870_v60  ;;  %v8730_v5 = vld [vmem:[#allocation10 + $0x1b00] sm:$0xff]  ;;  %v18119_v9 = vcombine.low %v8866_v12, %v8870_v60 }
 0x53f   :  { %14350 = vmatpush1.bf16.msra.mxu1 %v18031_v20  ;;  %v8734_v20 = vld [vmem:[#allocation10 + $0x1b20] sm:$0xff] }
 0x540   :  { %14351 = vmatprep.subr.bf16.mxu1 %v18024_v15  ;;  %v8858_v30 = vld [vmem:[#allocation10 + $0x1f00] sm:$0xff]  ;;  %v17984_v14 = vcombine.high %v8730_v5, %v8734_v20  ;;  %v17983_v29 = vcombine.low %v8730_v5, %v8734_v20 }
 0x541   :  { %14311 = vmatpush1.bf16.msra.mxu0 %v17895_v8  ;;  %v8862_v15 = vld [vmem:[#allocation10 + $0x1f20] sm:$0xff] }
 0x542   :  { %14312 = vmatprep.subr.bf16.mxu0 %v17888_v21  ;;  %v18112_v8 = vcombine.high %v8858_v30, %v8862_v15  ;;  %v8726_v21 = vld [vmem:[#allocation10 + $0x1ae0] sm:$0xff]  ;;  %v18111_v41 = vcombine.low %v8858_v30, %v8862_v15 }
 0x543   :  { %14352 = vmatpush1.bf16.msra.mxu1 %v18023_v39  ;;  %v8722_v39 = vld [vmem:[#allocation10 + $0x1ac0] sm:$0xff] }
 0x544   :  { %14353 = vmatprep.subr.bf16.mxu1 %v18016_v49  ;;  %v8850_v49 = vld [vmem:[#allocation10 + $0x1ec0] sm:$0xff]  ;;  %v17975_v63 = vcombine.low %v8722_v39, %v8726_v21 }
 0x545   :  { %14313 = vmatpush1.bf16.msra.mxu0 %v17887_v54  ;;  %v8854_v7 = vld [vmem:[#allocation10 + $0x1ee0] sm:$0xff]  ;;  %v17976_v54 = vcombine.high %v8722_v39, %v8726_v21  ;;  %v7923_v21 = vld [vmem:[#allocation10 + $0x1c8] sm:$0xff] }
 0x546   :  { %14314 = vmatprep.subr.bf16.mxu0 %v18008_v26  ;;  %v18104_v2 = vcombine.high %v8850_v49, %v8854_v7  ;;  %v8714_v26 = vld [vmem:[#allocation10 + $0x1a80] sm:$0xff] }
 0x547   :  { %14354 = vmatpush1.bf16.msra.mxu1 %v18015_v18  ;;  %v7612_v18 = vadd.f32 %v18983_v57, %v7571_v17  ;;  %v8842_v25 = vld [vmem:[#allocation10 + $0x1e80] sm:$0xff] }
 0x548   :  { %14355 = vmatprep.subr.bf16.mxu1 %v18136_v28  ;;  %v8718_v28 = vld [vmem:[#allocation10 + $0x1aa0] sm:$0xff] }
 0x549   :  { %14315 = vmatpush2.bf16.msra.mxu0 %v18007_v13  ;;  %v8846_v35 = vld [vmem:[#allocation10 + $0x1ea0] sm:$0xff]  ;;  %v7714_v13 = vmul.f32 %v7673_v24, %v18903_v52  ;;  %v17968_v57 = vcombine.high %v8714_v26, %v8718_v28 }
 0x54a   :  { %14316 = vmatprep.subr.bf16.mxu0 %v18000_v19  ;;  %v7716_v19 = vmul.f32 %v7681_v44, %v7612_v18  ;;  %v8706_v56 = vld [vmem:[#allocation10 + $0x1a40] sm:$0xff]  ;;  %v18095_v52 = vcombine.low %v8842_v25, %v8846_v35 }
 0x54b   :  { %14356 = vmatpush2.bf16.msra.mxu1 %v18135_v42  ;;  %v18103_v42 = vcombine.low %v8850_v49, %v8854_v7  ;;  %v8710_v23 = vld [vmem:[#allocation10 + $0x1a60] sm:$0xff]  ;;  %v7927_v49 = vld [vmem:[#allocation10 + $0x1e8] sm:$0xff] }
 0x54c   :  { %14357 = vmatprep.subr.bf16.mxu1 %v18128_v11  ;;  %v18096_v11 = vcombine.high %v8842_v25, %v8846_v35  ;;  %v8834_v12 = vld [vmem:[#allocation10 + $0x1e40] sm:$0xff]  ;;  %v8051_v7 = vld [vmem:[#allocation10 + $0x5c8] sm:$0xff]  ;;  %v17178_v44 = vcombine.high %v7923_v21, %v7927_v49 }
 0x54d   :  { %14317 = vmatpush2.bf16.msra.mxu0 %v17999_v1  ;;  %v8838_v60 = vld [vmem:[#allocation10 + $0x1e60] sm:$0xff]  ;;  %v17967_v1 = vcombine.low %v8714_v26, %v8718_v28  ;;  %v7915_v28 = vld [vmem:[#allocation10 + $0x188] sm:$0xff] }
 0x54e   :  { %14318 = vmatprep.subr.bf16.mxu0 %v17992_v51  ;;  %v17960_v51 = vcombine.high %v8706_v56, %v8710_v23  ;;  %v18088_v5 = vcombine.high %v8834_v12, %v8838_v60  ;;  %v8698_v20 = vld [vmem:[#allocation10 + $0x1a00] sm:$0xff]  ;;  %v7919_v25 = vld [vmem:[#allocation10 + $0x1a8] sm:$0xff] }
 0x54f   :  { %14358 = vmatpush2.bf16.msra.mxu1 %v18127_v47  ;;  %v7814_v47 = vadd.f32 %v7773_v3, %v7714_v13  ;;  %v8702_v30 = vld [vmem:[#allocation10 + $0x1a20] sm:$0xff]  ;;  %v17177_v3 = vcombine.low %v7923_v21, %v7927_v49  ;;  %v8047_v13 = vld [vmem:[#allocation10 + $0x5a8] sm:$0xff] }
 0x550   :  { %14359 = vmatprep.subr.bf16.mxu1 %v18120_v16  ;;  %v7816_v16 = vadd.f32 %v7781_v32, %v7716_v19  ;;  %v8826_v15 = vld [vmem:[#allocation10 + $0x1e00] sm:$0xff]  ;;  %v17952_v17 = vcombine.high %v8698_v20, %v8702_v30  ;;  %v17951_v24 = vcombine.low %v8698_v20, %v8702_v30 }
 0x551   :  { %14319 = vmatpush2.bf16.msra.mxu0 %v17991_v38  ;;  %v8830_v58 = vld [vmem:[#allocation10 + $0x1e20] sm:$0xff]  ;;  %v17959_v38 = vcombine.low %v8706_v56, %v8710_v23  ;;  %v7907_v56 = vld [vmem:[#allocation10 + $0x148] sm:$0xff] }
 0x552   :  { %14320 = vmatprep.subr.bf16.mxu0 %v17984_v14  ;;  %v18087_v14 = vcombine.low %v8834_v12, %v8838_v60  ;;  %v18080_v39 = vcombine.high %v8826_v15, %v8830_v58  ;;  %v8890_v18 = vld [vmem:[#allocation11] sm:$0xff]  ;;  %v7911_v23 = vld [vmem:[#allocation10 + $0x168] sm:$0xff] }
 0x553   :  { %14360 = vmatpush2.bf16.msra.mxu1 %v18119_v9  ;;  %v7830_v9 = vmax.f32 %v7814_v47, 0.0  ;;  %v8895_v35 = vrot.slane %v8890_v18, %v18860_v50  ;;  %v8899_v32 = vrot.slane %v8890_v18, %v18828_v43  ;;  %v8035_v60 = vld [vmem:[#allocation10 + $0x548] sm:$0xff]  ;;  %v17161_v49 = vcombine.low %v7907_v56, %v7911_v23 }
 0x554   :  { %14361 = vmatprep.subr.bf16.mxu1 %v18112_v8  ;;  %v7832_v8 = vmax.f32 %v7816_v16, 0.0  ;;  %v7891_v18 = vld [vmem:[#allocation10 + $0xc8] sm:$0xff] }
 0x555   :  { %14321 = vmatpush2.bf16.msra.mxu0 %v17983_v29  ;;  %v8055_v29 = vld [vmem:[#allocation10 + $0x5e8] sm:$0xff] }
 0x556   :  { %14322 = vmatprep.subr.bf16.mxu0 %v17976_v54  ;;  %v18079_v54 = vcombine.low %v8826_v15, %v8830_v58  ;;  %v17306_v26 = vcombine.high %v8051_v7, %v8055_v29 }
 0x557   :  { %14362 = vmatpush2.bf16.msra.mxu1 %v18111_v41  ;;  %v7846_v41 = vmin.f32 %v7830_v9, 6.0  ;;  %v7903_v9 = vld [vmem:[#allocation10 + $0x128] sm:$0xff] }
 0x558   :  { %14363 = vmatprep.subr.bf16.mxu1 %v18104_v2  ;;  %v7848_v2 = vmin.f32 %v7832_v8, 6.0  ;;  %v8031_v8 = vld [vmem:[#allocation10 + $0x528] sm:$0xff] }
 0x559   :  { %14323 = vmatpush2.bf16.msra.mxu0 %v17975_v63  ;;  %v8043_v63 = vld [vmem:[#allocation10 + $0x588] sm:$0xff] }
 0x55a   :  { %14324 = vmatprep.subr.bf16.mxu0 %v17968_v57  ;;  %v17305_v57 = vcombine.low %v8051_v7, %v8055_v29  ;;  %v19009_v19 = vpack.c.bf16 %v7848_v2, %v7848_v2  ;;  %v17298_v50 = vcombine.high %v8043_v63, %v8047_v13  ;;  %v17297_v43 = vcombine.low %v8043_v63, %v8047_v13  ;;  %v8019_v2 = vld [vmem:[#allocation10 + $0x4c8] sm:$0xff] }
 0x55b   :  { %14364 = vmatpush2.bf16.msra.mxu1 %v18103_v42  ;;  %v19007_v42 = vpack.c.bf16 %v7846_v41, %v7846_v41  ;;  %v7883_v63 = vld [vmem:[#allocation10 + $0x88] sm:$0xff] }
 0x55c   :  { %14365 = vmatprep.subr.bf16.mxu1 %v18096_v11  ;;  %v17170_v11 = vcombine.high %v7915_v28, %v7919_v25  ;;  %v7887_v13 = vld [vmem:[#allocation10 + $0xa8] sm:$0xff] }
 0x55d   :  { %14325 = vmatpush2.bf16.msra.mxu0 %v17967_v1  ;;  %v8039_v1 = vld [vmem:[#allocation10 + $0x568] sm:$0xff] }
 0x55e   :  { %14326 = vmatprep.subr.bf16.mxu0 %v17960_v51  ;;  %v17169_v51 = vcombine.low %v7915_v28, %v7919_v25  ;;  %v17290_v58 = vcombine.high %v8035_v60, %v8039_v1  ;;  %v17289_v29 = vcombine.low %v8035_v60, %v8039_v1  ;;  %v7879_v60 = vld [vmem:[#allocation10 + $0x68] sm:$0xff] }
 0x55f   :  { %14366 = vmatpush2.bf16.msra.mxu1 %v18095_v52  ;;  %v8003_v1 = vld [vmem:[#allocation10 + $0x448] sm:$0xff] }
 0x560   :  { %14367 = vmatprep.subr.bf16.mxu1 %v18088_v5  ;;  %v17162_v5 = vcombine.high %v7907_v56, %v7911_v23  ;;  %v17138_v23 = vcombine.high %v7883_v63, %v7887_v13 }
 0x561   :  { %14327 = vmatpush2.bf16.msra.mxu0 %v17959_v38  ;;  %v7899_v38 = vld [vmem:[#allocation10 + $0x108] sm:$0xff] }
 0x562   :  { %14328 = vmatprep.subr.bf16.mxu0 %v17952_v17  ;;  %v8027_v17 = vld [vmem:[#allocation10 + $0x508] sm:$0xff]  ;;  %v17153_v28 = vcombine.low %v7899_v38, %v7903_v9 }
 0x563   :  { %14368 = vmatpush2.bf16.msra.mxu1 %v18087_v14  ;;  %v17281_v25 = vcombine.low %v8027_v17, %v8031_v8 }
 0x564   :  { %14369 = vmatprep.subr.bf16.mxu1 %v18080_v39 }
 0x565   :  { %14329 = vmatpush2.bf16.msra.mxu0 %v17951_v24  ;;  %v17154_v24 = vcombine.high %v7899_v38, %v7903_v9 }
 0x566   :  { %14380 = vmatprep.subr.bf16.mxu0 %v17178_v44  ;;  %v7895_v44 = vld [vmem:[#allocation10 + $0xe8] sm:$0xff] }
 0x567   :  { %14370 = vmatpush2.bf16.msra.mxu1 %v18079_v54  ;;  %v17282_v54 = vcombine.high %v8027_v17, %v8031_v8  ;;  %v7987_v8 = vld [vmem:[#allocation10 + $0x3c8] sm:$0xff] }
 0x568   :  { %14421 = vmatprep.subr.bf16.mxu1 %v17306_v26  ;;  %v14086_v12 = vpop.f32.mrf.mxu0  ;;  %14331 = vmatmul.mubr.bf16.vlgmr.msra.gmra.mxu0 %v19007_v42  ;;  %v8023_v26 = vld [vmem:[#allocation10 + $0x4e8] sm:$0xff] }
 0x569   :  { %v14087_v47 = vadd.f32 %v14086_v12, %v8895_v35  ;;  %14381 = vmatpush1.bf16.msra.mxu0 %v17177_v3  ;;  %14412 = vmatprep.mubr.bf16.mxu0 %v18847_v62  ;;  %v17146_v35 = vcombine.high %v7891_v18, %v7895_v44  ;;  %v17274_v3 = vcombine.high %v8019_v2, %v8023_v26 }
 0x56a   :  { %v14127_v52 = vpop.f32.mrf.mxu1  ;;  %14372 = vmatmul.mubr.bf16.vlgmr.msra.gmra.mxu1 %v19009_v19  ;;  %v14088_v16 = vpop.f32.mrf.mxu0  ;;  %14382 = vmatprep.subr.bf16.mxu0 %v17170_v11  ;;  %v17145_v11 = vcombine.low %v7891_v18, %v7895_v44  ;;  %v17273_v56 = vcombine.low %v8019_v2, %v8023_v26  ;;  %v7979_v18 = vld [vmem:[#allocation10 + $0x388] sm:$0xff] }
 0x56b   :  { %14422 = vmatpush1.bf16.msra.mxu1 %v17305_v57  ;;  %v19015_v20 = vadd.f32 %v14127_v52, %v14087_v47  ;;  %14453 = vmatprep.mubr.bf16.mxu1 %v18850_v6  ;;  %v14089_v30 = vadd.f32 %v14088_v16, %v8899_v32  ;;  %v8011_v57 = vld [vmem:[#allocation10 + $0x488] sm:$0xff]  ;;  %v17137_v52 = vcombine.low %v7883_v63, %v7887_v13 }
 0x56c   :  { %v14129_v15 = vpop.f32.mrf.mxu1  ;;  %v14090_v14 = vpop.f32.mrf.mxu0  ;;  %14423 = vmatprep.subr.bf16.mxu1 %v17298_v50  ;;  %v8015_v32 = vld [vmem:[#allocation10 + $0x4a8] sm:$0xff] }
 0x56d   :  { %v19018_v39 = vadd.f32 %v14129_v15, %v14089_v30  ;;  %14383 = vmatpush1.bf16.msra.mxu0 %v17169_v51  ;;  %v17266_v12 = vcombine.high %v8011_v57, %v8015_v32  ;;  %v7875_v50 = vld [vmem:[#allocation10 + $0x48] sm:$0xff]  ;;  %v17265_v51 = vcombine.low %v8011_v57, %v8015_v32 }
 0x56e   :  { %v14131_v21 = vpop.f32.mrf.mxu1  ;;  %v14091_v7 = vpop.f32.mrf.mxu0  ;;  %14384 = vmatprep.subr.bf16.mxu0 %v17162_v5  ;;  %v8007_v47 = vld [vmem:[#allocation10 + $0x468] sm:$0xff]  ;;  %v17130_v16 = vcombine.high %v7875_v50, %v7879_v60  ;;  %v17129_v38 = vcombine.low %v7875_v50, %v7879_v60 }
 0x56f   :  { %14424 = vmatpush1.bf16.msra.mxu1 %v17297_v43  ;;  %v17258_v43 = vcombine.high %v8003_v1, %v8007_v47  ;;  %v7867_v5 = vld [vmem:[#allocation10 + $0x8] sm:$0xff]  ;;  %v17257_v9 = vcombine.low %v8003_v1, %v8007_v47 }
 0x570   :  { %v14132_v41 = vpop.f32.mrf.mxu1  ;;  %14425 = vmatprep.subr.bf16.mxu1 %v17290_v58  ;;  %v7871_v30 = vld [vmem:[#allocation10 + $0x28] sm:$0xff] }
 0x571   :  { %14385 = vmatpush1.bf16.msra.mxu0 %v17161_v49  ;;  %v7995_v15 = vld [vmem:[#allocation10 + $0x408] sm:$0xff]  ;;  %v17122_v14 = vcombine.high %v7867_v5, %v7871_v30 }
 0x572   :  { %14386 = vmatprep.subr.bf16.mxu0 %v17154_v24  ;;  %v7999_v58 = vld [vmem:[#allocation10 + $0x428] sm:$0xff] }
 0x573   :  { %14426 = vmatpush1.bf16.msra.mxu1 %v17289_v29  ;;  %v17250_v17 = vcombine.high %v7995_v15, %v7999_v58  ;;  %v7991_v21 = vld [vmem:[#allocation10 + $0x3e8] sm:$0xff]  ;;  %v17121_v29 = vcombine.low %v7867_v5, %v7871_v30  ;;  %v17249_v24 = vcombine.low %v7995_v15, %v7999_v58 }
 0x574   :  { %14427 = vmatprep.subr.bf16.mxu1 %v17282_v54  ;;  %v8115_v49 = vld [vmem:[#allocation10 + $0x7c8] sm:$0xff]  ;;  %v17242_v41 = vcombine.high %v7987_v8, %v7991_v21 }
 0x575   :  { %14387 = vmatpush1.bf16.msra.mxu0 %v17153_v28  ;;  %v8119_v7 = vld [vmem:[#allocation10 + $0x7e8] sm:$0xff]  ;;  %v17241_v28 = vcombine.low %v7987_v8, %v7991_v21 }
 0x576   :  { %14388 = vmatprep.subr.bf16.mxu0 %v17146_v35  ;;  %v17370_v54 = vcombine.high %v8115_v49, %v8119_v7  ;;  %v7983_v44 = vld [vmem:[#allocation10 + $0x3a8] sm:$0xff] }
 0x577   :  { %14428 = vmatpush1.bf16.msra.mxu1 %v17281_v25  ;;  %v8107_v2 = vld [vmem:[#allocation10 + $0x788] sm:$0xff]  ;;  %v17369_v25 = vcombine.low %v8115_v49, %v8119_v7  ;;  %v17234_v35 = vcombine.high %v7979_v18, %v7983_v44 }
 0x578   :  { %14429 = vmatprep.subr.bf16.mxu1 %v17274_v3  ;;  %v8111_v26 = vld [vmem:[#allocation10 + $0x7a8] sm:$0xff] }
 0x579   :  { %14389 = vmatpush1.bf16.msra.mxu0 %v17145_v11  ;;  %v17362_v3 = vcombine.high %v8107_v2, %v8111_v26  ;;  %v7971_v63 = vld [vmem:[#allocation10 + $0x348] sm:$0xff]  ;;  %v17233_v11 = vcombine.low %v7979_v18, %v7983_v44 }
 0x57a   :  { %14390 = vmatprep.subr.bf16.mxu0 %v17138_v23  ;;  %v7975_v13 = vld [vmem:[#allocation10 + $0x368] sm:$0xff] }
 0x57b   :  { %14430 = vmatpush1.bf16.msra.mxu1 %v17273_v56  ;;  %v8099_v57 = vld [vmem:[#allocation10 + $0x748] sm:$0xff]  ;;  %v17361_v56 = vcombine.low %v8107_v2, %v8111_v26  ;;  %v17226_v23 = vcombine.high %v7971_v63, %v7975_v13 }
 0x57c   :  { %14431 = vmatprep.subr.bf16.mxu1 %v17266_v12  ;;  %v8103_v32 = vld [vmem:[#allocation10 + $0x768] sm:$0xff] }
 0x57d   :  { %14391 = vmatpush1.bf16.msra.mxu0 %v17137_v52  ;;  %v17354_v12 = vcombine.high %v8099_v57, %v8103_v32  ;;  %v7963_v50 = vld [vmem:[#allocation10 + $0x308] sm:$0xff]  ;;  %v17225_v52 = vcombine.low %v7971_v63, %v7975_v13 }
 0x57e   :  { %14392 = vmatprep.subr.bf16.mxu0 %v17130_v16  ;;  %v7967_v60 = vld [vmem:[#allocation10 + $0x328] sm:$0xff] }
 0x57f   :  { %14432 = vmatpush1.bf16.msra.mxu1 %v17265_v51  ;;  %v8091_v1 = vld [vmem:[#allocation10 + $0x708] sm:$0xff]  ;;  %v17353_v51 = vcombine.low %v8099_v57, %v8103_v32  ;;  %v17218_v16 = vcombine.high %v7963_v50, %v7967_v60 }
 0x580   :  { %14433 = vmatprep.subr.bf16.mxu1 %v17258_v43  ;;  %v8095_v47 = vld [vmem:[#allocation10 + $0x728] sm:$0xff] }
 0x581   :  { %14393 = vmatpush1.bf16.msra.mxu0 %v17129_v38  ;;  %v17346_v43 = vcombine.high %v8091_v1, %v8095_v47  ;;  %v7955_v5 = vld [vmem:[#allocation10 + $0x2c8] sm:$0xff]  ;;  %v17217_v38 = vcombine.low %v7963_v50, %v7967_v60 }
 0x582   :  { %14394 = vmatprep.subr.bf16.mxu0 %v17122_v14  ;;  %v7959_v30 = vld [vmem:[#allocation10 + $0x2e8] sm:$0xff] }
 0x583   :  { %14434 = vmatpush1.bf16.msra.mxu1 %v17257_v9  ;;  %v8083_v15 = vld [vmem:[#allocation10 + $0x6c8] sm:$0xff]  ;;  %v17345_v9 = vcombine.low %v8091_v1, %v8095_v47  ;;  %v17210_v14 = vcombine.high %v7955_v5, %v7959_v30 }
 0x584   :  { %14435 = vmatprep.subr.bf16.mxu1 %v17250_v17  ;;  %v8087_v58 = vld [vmem:[#allocation10 + $0x6e8] sm:$0xff] }
 0x585   :  { %14395 = vmatpush1.bf16.msra.mxu0 %v17121_v29  ;;  %v17338_v17 = vcombine.high %v8083_v15, %v8087_v58  ;;  %v7947_v8 = vld [vmem:[#allocation10 + $0x288] sm:$0xff]  ;;  %v17209_v29 = vcombine.low %v7955_v5, %v7959_v30 }
 0x586   :  { %14396 = vmatprep.subr.bf16.mxu0 %v17242_v41  ;;  %v7951_v21 = vld [vmem:[#allocation10 + $0x2a8] sm:$0xff] }
 0x587   :  { %14436 = vmatpush1.bf16.msra.mxu1 %v17249_v24  ;;  %v8075_v49 = vld [vmem:[#allocation10 + $0x688] sm:$0xff]  ;;  %v17337_v24 = vcombine.low %v8083_v15, %v8087_v58  ;;  %v17202_v41 = vcombine.high %v7947_v8, %v7951_v21 }
 0x588   :  { %14437 = vmatprep.subr.bf16.mxu1 %v17370_v54  ;;  %v8079_v7 = vld [vmem:[#allocation10 + $0x6a8] sm:$0xff] }
 0x589   :  { %14397 = vmatpush2.bf16.msra.mxu0 %v17241_v28  ;;  %v17330_v54 = vcombine.high %v8075_v49, %v8079_v7  ;;  %v7939_v18 = vld [vmem:[#allocation10 + $0x248] sm:$0xff]  ;;  %v17201_v28 = vcombine.low %v7947_v8, %v7951_v21 }
 0x58a   :  { %14398 = vmatprep.subr.bf16.mxu0 %v17234_v35  ;;  %v7943_v44 = vld [vmem:[#allocation10 + $0x268] sm:$0xff] }
 0x58b   :  { %14438 = vmatpush2.bf16.msra.mxu1 %v17369_v25  ;;  %v8067_v2 = vld [vmem:[#allocation10 + $0x648] sm:$0xff]  ;;  %v17329_v25 = vcombine.low %v8075_v49, %v8079_v7  ;;  %v17194_v35 = vcombine.high %v7939_v18, %v7943_v44 }
 0x58c   :  { %14439 = vmatprep.subr.bf16.mxu1 %v17362_v3  ;;  %v8071_v26 = vld [vmem:[#allocation10 + $0x668] sm:$0xff] }
 0x58d   :  { %14399 = vmatpush2.bf16.msra.mxu0 %v17233_v11  ;;  %v17322_v3 = vcombine.high %v8067_v2, %v8071_v26  ;;  %v7931_v63 = vld [vmem:[#allocation10 + $0x208] sm:$0xff]  ;;  %v17193_v11 = vcombine.low %v7939_v18, %v7943_v44 }
 0x58e   :  { %14400 = vmatprep.subr.bf16.mxu0 %v17226_v23  ;;  %v7935_v13 = vld [vmem:[#allocation10 + $0x228] sm:$0xff] }
 0x58f   :  { %14440 = vmatpush2.bf16.msra.mxu1 %v17361_v56  ;;  %v8059_v57 = vld [vmem:[#allocation10 + $0x608] sm:$0xff]  ;;  %v17321_v56 = vcombine.low %v8067_v2, %v8071_v26  ;;  %v17186_v23 = vcombine.high %v7931_v63, %v7935_v13 }
 0x590   :  { %14441 = vmatprep.subr.bf16.mxu1 %v17354_v12  ;;  %v8063_v32 = vld [vmem:[#allocation10 + $0x628] sm:$0xff] }
 0x591   :  { %14401 = vmatpush2.bf16.msra.mxu0 %v17225_v52  ;;  %v17314_v12 = vcombine.high %v8059_v57, %v8063_v32  ;;  %v8179_v50 = vld [vmem:[#allocation10 + $0x9c8] sm:$0xff]  ;;  %v17185_v52 = vcombine.low %v7931_v63, %v7935_v13 }
 0x592   :  { %14402 = vmatprep.subr.bf16.mxu0 %v17218_v16  ;;  %v8183_v60 = vld [vmem:[#allocation10 + $0x9e8] sm:$0xff] }
 0x593   :  { %14442 = vmatpush2.bf16.msra.mxu1 %v17353_v51  ;;  %v8307_v1 = vld [vmem:[#allocation10 + $0xdc8] sm:$0xff]  ;;  %v17313_v51 = vcombine.low %v8059_v57, %v8063_v32  ;;  %v17434_v16 = vcombine.high %v8179_v50, %v8183_v60  ;;  %v17433_v15 = vcombine.low %v8179_v50, %v8183_v60 }
 0x594   :  { %14443 = vmatprep.subr.bf16.mxu1 %v17346_v43  ;;  %v8311_v47 = vld [vmem:[#allocation10 + $0xde8] sm:$0xff] }
 0x595   :  { %14403 = vmatpush2.bf16.msra.mxu0 %v17217_v38  ;;  %v17562_v43 = vcombine.high %v8307_v1, %v8311_v47  ;;  %v8171_v5 = vld [vmem:[#allocation10 + $0x988] sm:$0xff] }
 0x596   :  { %14404 = vmatprep.subr.bf16.mxu0 %v17210_v14  ;;  %v8175_v30 = vld [vmem:[#allocation10 + $0x9a8] sm:$0xff] }
 0x597   :  { %14444 = vmatpush2.bf16.msra.mxu1 %v17345_v9  ;;  %v8299_v58 = vld [vmem:[#allocation10 + $0xd88] sm:$0xff]  ;;  %v17561_v9 = vcombine.low %v8307_v1, %v8311_v47  ;;  %v17426_v14 = vcombine.high %v8171_v5, %v8175_v30 }
 0x598   :  { %14445 = vmatprep.subr.bf16.mxu1 %v17338_v17  ;;  %v8303_v38 = vld [vmem:[#allocation10 + $0xda8] sm:$0xff] }
 0x599   :  { %14405 = vmatpush2.bf16.msra.mxu0 %v17209_v29  ;;  %v8163_v17 = vld [vmem:[#allocation10 + $0x948] sm:$0xff]  ;;  %v17554_v49 = vcombine.high %v8299_v58, %v8303_v38  ;;  %v17553_v44 = vcombine.low %v8299_v58, %v8303_v38 }
 0x59a   :  { %14406 = vmatprep.subr.bf16.mxu0 %v17202_v41  ;;  %v8167_v8 = vld [vmem:[#allocation10 + $0x968] sm:$0xff] }
 0x59b   :  { %14446 = vmatpush2.bf16.msra.mxu1 %v17337_v24  ;;  %v8291_v7 = vld [vmem:[#allocation10 + $0xd48] sm:$0xff]  ;;  %v17418_v2 = vcombine.high %v8163_v17, %v8167_v8 }
 0x59c   :  { %14447 = vmatprep.subr.bf16.mxu1 %v17330_v54  ;;  %v8295_v29 = vld [vmem:[#allocation10 + $0xd68] sm:$0xff]  ;;  %v17425_v54 = vcombine.low %v8171_v5, %v8175_v30 }
 0x59d   :  { %14407 = vmatpush2.bf16.msra.mxu0 %v17201_v28  ;;  %v8283_v13 = vld [vmem:[#allocation10 + $0xd08] sm:$0xff] }
 0x59e   :  { %14408 = vmatprep.subr.bf16.mxu0 %v17194_v35  ;;  %v8155_v35 = vld [vmem:[#allocation10 + $0x908] sm:$0xff] }
 0x59f   :  { %14448 = vmatpush2.bf16.msra.mxu1 %v17329_v25  ;;  %v8287_v57 = vld [vmem:[#allocation10 + $0xd28] sm:$0xff] }
 0x5a0   :  { %14449 = vmatprep.subr.bf16.mxu1 %v17322_v3  ;;  %v8159_v3 = vld [vmem:[#allocation10 + $0x928] sm:$0xff]  ;;  %v17538_v60 = vcombine.high %v8283_v13, %v8287_v57 }
 0x5a1   :  { %14409 = vmatpush2.bf16.msra.mxu0 %v17193_v11  ;;  %v17410_v50 = vcombine.high %v8155_v35, %v8159_v3  ;;  %v8147_v1 = vld [vmem:[#allocation10 + $0x8c8] sm:$0xff] }
 0x5a2   :  { %14410 = vmatprep.subr.bf16.mxu0 %v17186_v23  ;;  %v8151_v47 = vld [vmem:[#allocation10 + $0x8e8] sm:$0xff] }
 0x5a3   :  { %14450 = vmatpush2.bf16.msra.mxu1 %v17321_v56  ;;  %v17417_v56 = vcombine.low %v8163_v17, %v8167_v8  ;;  %v17402_v5 = vcombine.high %v8147_v1, %v8151_v47  ;;  %v8143_v58 = vld [vmem:[#allocation10 + $0x8a8] sm:$0xff] }
 0x5a4   :  { %14451 = vmatprep.subr.bf16.mxu1 %v17314_v12  ;;  %v17545_v12 = vcombine.low %v8291_v7, %v8295_v29  ;;  %v8267_v38 = vld [vmem:[#allocation10 + $0xc88] sm:$0xff] }
 0x5a5   :  { %14411 = vmatpush2.bf16.msra.mxu0 %v17185_v52  ;;  %v8275_v52 = vld [vmem:[#allocation10 + $0xcc8] sm:$0xff] }
 0x5a6   :  { %14462 = vmatprep.subr.bf16.mxu0 %v17434_v16  ;;  %v17409_v16 = vcombine.low %v8155_v35, %v8159_v3 }
 0x5a7   :  { %14452 = vmatpush2.bf16.msra.mxu1 %v17313_v51  ;;  %v8279_v51 = vld [vmem:[#allocation10 + $0xce8] sm:$0xff] }
 0x5a8   :  { %14503 = vmatprep.subr.bf16.mxu1 %v17562_v43  ;;  %v14168_v21 = vpop.f32.mrf.mxu0  ;;  %14413 = vmatmul.mubr.bf16.vlgmr.msra.gmra.mxu0 %v18891_v59  ;;  %v17537_v43 = vcombine.low %v8283_v13, %v8287_v57  ;;  %v17530_v30 = vcombine.high %v8275_v52, %v8279_v51  ;;  %v17529_v17 = vcombine.low %v8275_v52, %v8279_v51  ;;  %v8243_v57 = vld [vmem:[#allocation10 + $0xbc8] sm:$0xff] }
 0x5a9   :  { %v14169_v24 = vadd.f32 %v14168_v21, %v19015_v20  ;;  %14463 = vmatpush1.bf16.msra.mxu0 %v17433_v15  ;;  %14494 = vmatprep.mubr.bf16.mxu0 %v18895_v37  ;;  %v17546_v20 = vcombine.high %v8291_v7, %v8295_v29  ;;  %v8139_v15 = vld [vmem:[#allocation10 + $0x888] sm:$0xff] }
 0x5aa   :  { %v14209_v41 = vpop.f32.mrf.mxu1  ;;  %14454 = vmatmul.mubr.bf16.vlgmr.msra.gmra.mxu1 %v18893_v31  ;;  %v14170_v18 = vpop.f32.mrf.mxu0  ;;  %14464 = vmatprep.subr.bf16.mxu0 %v17426_v14  ;;  %v17401_v14 = vcombine.low %v8147_v1, %v8151_v47  ;;  %v17394_v8 = vcombine.high %v8139_v15, %v8143_v58  ;;  %v8135_v7 = vld [vmem:[#allocation10 + $0x868] sm:$0xff] }
 0x5ab   :  { %14504 = vmatpush1.bf16.msra.mxu1 %v17561_v9  ;;  %v19024_v26 = vadd.f32 %v14209_v41, %v14169_v24  ;;  %14535 = vmatprep.mubr.bf16.mxu1 %v18898_v22  ;;  %v14171_v28 = vadd.f32 %v14170_v18, %v19018_v39  ;;  %v8271_v9 = vld [vmem:[#allocation10 + $0xca8] sm:$0xff]  ;;  %v17393_v41 = vcombine.low %v8139_v15, %v8143_v58 }
 0x5ac   :  { %v14211_v25 = vpop.f32.mrf.mxu1  ;;  %v14172_v63 = vpop.f32.mrf.mxu0  ;;  %14505 = vmatprep.subr.bf16.mxu1 %v17554_v49  ;;  %v17522_v21 = vcombine.high %v8267_v38, %v8271_v9  ;;  %v8131_v49 = vld [vmem:[#allocation10 + $0x848] sm:$0xff] }
 0x5ad   :  { %v19028_v32 = vadd.f32 %v14211_v25, %v14171_v28  ;;  %14465 = vmatpush1.bf16.msra.mxu0 %v17425_v54  ;;  %v8259_v29 = vld [vmem:[#allocation10 + $0xc48] sm:$0xff]  ;;  %v17521_v54 = vcombine.low %v8267_v38, %v8271_v9  ;;  %v17386_v18 = vcombine.high %v8131_v49, %v8135_v7  ;;  %v17385_v35 = vcombine.low %v8131_v49, %v8135_v7 }
 0x5ae   :  { %v14213_v11 = vpop.f32.mrf.mxu1  ;;  %v14173_v23 = vpop.f32.mrf.mxu0  ;;  %14466 = vmatprep.subr.bf16.mxu0 %v17418_v2  ;;  %v8263_v24 = vld [vmem:[#allocation10 + $0xc68] sm:$0xff] }
 0x5af   :  { %14506 = vmatpush1.bf16.msra.mxu1 %v17553_v44  ;;  %v17514_v44 = vcombine.high %v8259_v29, %v8263_v24  ;;  %v8123_v2 = vld [vmem:[#allocation10 + $0x808] sm:$0xff]  ;;  %v17513_v3 = vcombine.low %v8259_v29, %v8263_v24 }
 0x5b0   :  { %v14214_v39 = vpop.f32.mrf.mxu1  ;;  %14507 = vmatprep.subr.bf16.mxu1 %v17546_v20  ;;  %v8127_v28 = vld [vmem:[#allocation10 + $0x828] sm:$0xff] }
 0x5b1   :  { %14467 = vmatpush1.bf16.msra.mxu0 %v17417_v56  ;;  %v8251_v25 = vld [vmem:[#allocation10 + $0xc08] sm:$0xff]  ;;  %v17378_v63 = vcombine.high %v8123_v2, %v8127_v28 }
 0x5b2   :  { %14468 = vmatprep.subr.bf16.mxu0 %v17410_v50  ;;  %v8255_v20 = vld [vmem:[#allocation10 + $0xc28] sm:$0xff] }
 0x5b3   :  { %14508 = vmatpush1.bf16.msra.mxu1 %v17545_v12  ;;  %v17506_v13 = vcombine.high %v8251_v25, %v8255_v20  ;;  %v8247_v11 = vld [vmem:[#allocation10 + $0xbe8] sm:$0xff]  ;;  %v17377_v12 = vcombine.low %v8123_v2, %v8127_v28  ;;  %v17505_v50 = vcombine.low %v8251_v25, %v8255_v20 }
 0x5b4   :  { %14509 = vmatprep.subr.bf16.mxu1 %v17538_v60  ;;  %v8371_v56 = vld [vmem:[#allocation10 + $0xfc8] sm:$0xff]  ;;  %v17498_v39 = vcombine.high %v8243_v57, %v8247_v11 }
 0x5b5   :  { %14469 = vmatpush1.bf16.msra.mxu0 %v17409_v16  ;;  %v8375_v23 = vld [vmem:[#allocation10 + $0xfe8] sm:$0xff]  ;;  %v17497_v16 = vcombine.low %v8243_v57, %v8247_v11 }
 0x5b6   :  { %14470 = vmatprep.subr.bf16.mxu0 %v17402_v5  ;;  %v17626_v60 = vcombine.high %v8371_v56, %v8375_v23  ;;  %v8235_v1 = vld [vmem:[#allocation10 + $0xb88] sm:$0xff] }
 0x5b7   :  { %14510 = vmatpush1.bf16.msra.mxu1 %v17537_v43  ;;  %v8239_v47 = vld [vmem:[#allocation10 + $0xba8] sm:$0xff]  ;;  %v17625_v43 = vcombine.low %v8371_v56, %v8375_v23 }
 0x5b8   :  { %14511 = vmatprep.subr.bf16.mxu1 %v17530_v30  ;;  %v8363_v52 = vld [vmem:[#allocation10 + $0xf88] sm:$0xff]  ;;  %v17490_v5 = vcombine.high %v8235_v1, %v8239_v47 }
 0x5b9   :  { %14471 = vmatpush1.bf16.msra.mxu0 %v17401_v14  ;;  %v8367_v51 = vld [vmem:[#allocation10 + $0xfa8] sm:$0xff]  ;;  %v17489_v14 = vcombine.low %v8235_v1, %v8239_v47 }
 0x5ba   :  { %14472 = vmatprep.subr.bf16.mxu0 %v17394_v8  ;;  %v17618_v30 = vcombine.high %v8363_v52, %v8367_v51  ;;  %v8227_v15 = vld [vmem:[#allocation10 + $0xb48] sm:$0xff] }
 0x5bb   :  { %14512 = vmatpush1.bf16.msra.mxu1 %v17529_v17  ;;  %v8231_v58 = vld [vmem:[#allocation10 + $0xb68] sm:$0xff]  ;;  %v17617_v17 = vcombine.low %v8363_v52, %v8367_v51 }
 0x5bc   :  { %14513 = vmatprep.subr.bf16.mxu1 %v17522_v21  ;;  %v8355_v38 = vld [vmem:[#allocation10 + $0xf48] sm:$0xff]  ;;  %v17482_v8 = vcombine.high %v8227_v15, %v8231_v58 }
 0x5bd   :  { %14473 = vmatpush1.bf16.msra.mxu0 %v17393_v41  ;;  %v8359_v9 = vld [vmem:[#allocation10 + $0xf68] sm:$0xff]  ;;  %v17481_v41 = vcombine.low %v8227_v15, %v8231_v58 }
 0x5be   :  { %14474 = vmatprep.subr.bf16.mxu0 %v17386_v18  ;;  %v17610_v21 = vcombine.high %v8355_v38, %v8359_v9  ;;  %v8219_v49 = vld [vmem:[#allocation10 + $0xb08] sm:$0xff] }
 0x5bf   :  { %14514 = vmatpush1.bf16.msra.mxu1 %v17521_v54  ;;  %v8223_v7 = vld [vmem:[#allocation10 + $0xb28] sm:$0xff]  ;;  %v17609_v54 = vcombine.low %v8355_v38, %v8359_v9 }
 0x5c0   :  { %14515 = vmatprep.subr.bf16.mxu1 %v17514_v44  ;;  %v8347_v29 = vld [vmem:[#allocation10 + $0xf08] sm:$0xff]  ;;  %v17474_v18 = vcombine.high %v8219_v49, %v8223_v7 }
 0x5c1   :  { %14475 = vmatpush1.bf16.msra.mxu0 %v17385_v35  ;;  %v8351_v24 = vld [vmem:[#allocation10 + $0xf28] sm:$0xff]  ;;  %v17473_v35 = vcombine.low %v8219_v49, %v8223_v7 }
 0x5c2   :  { %14476 = vmatprep.subr.bf16.mxu0 %v17378_v63  ;;  %v17602_v44 = vcombine.high %v8347_v29, %v8351_v24  ;;  %v8211_v2 = vld [vmem:[#allocation10 + $0xac8] sm:$0xff] }
 0x5c3   :  { %14516 = vmatpush1.bf16.msra.mxu1 %v17513_v3  ;;  %v8215_v28 = vld [vmem:[#allocation10 + $0xae8] sm:$0xff]  ;;  %v17601_v3 = vcombine.low %v8347_v29, %v8351_v24 }
 0x5c4   :  { %14517 = vmatprep.subr.bf16.mxu1 %v17506_v13  ;;  %v8339_v25 = vld [vmem:[#allocation10 + $0xec8] sm:$0xff]  ;;  %v17466_v63 = vcombine.high %v8211_v2, %v8215_v28 }
 0x5c5   :  { %14477 = vmatpush1.bf16.msra.mxu0 %v17377_v12  ;;  %v8343_v20 = vld [vmem:[#allocation10 + $0xee8] sm:$0xff]  ;;  %v17465_v12 = vcombine.low %v8211_v2, %v8215_v28 }
 0x5c6   :  { %14478 = vmatprep.subr.bf16.mxu0 %v17498_v39  ;;  %v17594_v13 = vcombine.high %v8339_v25, %v8343_v20  ;;  %v8203_v57 = vld [vmem:[#allocation10 + $0xa88] sm:$0xff] }
 0x5c7   :  { %14518 = vmatpush1.bf16.msra.mxu1 %v17505_v50  ;;  %v8207_v11 = vld [vmem:[#allocation10 + $0xaa8] sm:$0xff]  ;;  %v17593_v50 = vcombine.low %v8339_v25, %v8343_v20 }
 0x5c8   :  { %14519 = vmatprep.subr.bf16.mxu1 %v17626_v60  ;;  %v8331_v56 = vld [vmem:[#allocation10 + $0xe88] sm:$0xff]  ;;  %v17458_v39 = vcombine.high %v8203_v57, %v8207_v11 }
 0x5c9   :  { %14479 = vmatpush2.bf16.msra.mxu0 %v17497_v16  ;;  %v8335_v23 = vld [vmem:[#allocation10 + $0xea8] sm:$0xff]  ;;  %v17457_v16 = vcombine.low %v8203_v57, %v8207_v11 }
 0x5ca   :  { %14480 = vmatprep.subr.bf16.mxu0 %v17490_v5  ;;  %v17586_v60 = vcombine.high %v8331_v56, %v8335_v23  ;;  %v8195_v1 = vld [vmem:[#allocation10 + $0xa48] sm:$0xff] }
 0x5cb   :  { %14520 = vmatpush2.bf16.msra.mxu1 %v17625_v43  ;;  %v8199_v47 = vld [vmem:[#allocation10 + $0xa68] sm:$0xff]  ;;  %v17585_v43 = vcombine.low %v8331_v56, %v8335_v23 }
 0x5cc   :  { %14521 = vmatprep.subr.bf16.mxu1 %v17618_v30  ;;  %v8323_v52 = vld [vmem:[#allocation10 + $0xe48] sm:$0xff]  ;;  %v17450_v5 = vcombine.high %v8195_v1, %v8199_v47 }
 0x5cd   :  { %14481 = vmatpush2.bf16.msra.mxu0 %v17489_v14  ;;  %v8327_v51 = vld [vmem:[#allocation10 + $0xe68] sm:$0xff]  ;;  %v17449_v14 = vcombine.low %v8195_v1, %v8199_v47 }
 0x5ce   :  { %14482 = vmatprep.subr.bf16.mxu0 %v17482_v8  ;;  %v17578_v30 = vcombine.high %v8323_v52, %v8327_v51  ;;  %v8187_v15 = vld [vmem:[#allocation10 + $0xa08] sm:$0xff] }
 0x5cf   :  { %14522 = vmatpush2.bf16.msra.mxu1 %v17617_v17  ;;  %v8191_v58 = vld [vmem:[#allocation10 + $0xa28] sm:$0xff]  ;;  %v17577_v17 = vcombine.low %v8323_v52, %v8327_v51 }
 0x5d0   :  { %14523 = vmatprep.subr.bf16.mxu1 %v17610_v21  ;;  %v8315_v38 = vld [vmem:[#allocation10 + $0xe08] sm:$0xff]  ;;  %v17442_v8 = vcombine.high %v8187_v15, %v8191_v58 }
 0x5d1   :  { %14483 = vmatpush2.bf16.msra.mxu0 %v17481_v41  ;;  %v8319_v9 = vld [vmem:[#allocation10 + $0xe28] sm:$0xff]  ;;  %v17441_v41 = vcombine.low %v8187_v15, %v8191_v58 }
 0x5d2   :  { %14484 = vmatprep.subr.bf16.mxu0 %v17474_v18  ;;  %v17570_v21 = vcombine.high %v8315_v38, %v8319_v9  ;;  %v8435_v49 = vld [vmem:[#allocation10 + $0x11c8] sm:$0xff] }
 0x5d3   :  { %14524 = vmatpush2.bf16.msra.mxu1 %v17609_v54  ;;  %v8439_v7 = vld [vmem:[#allocation10 + $0x11e8] sm:$0xff]  ;;  %v17569_v54 = vcombine.low %v8315_v38, %v8319_v9 }
 0x5d4   :  { %14525 = vmatprep.subr.bf16.mxu1 %v17602_v44  ;;  %v8563_v29 = vld [vmem:[#allocation10 + $0x15c8] sm:$0xff]  ;;  %v17690_v18 = vcombine.high %v8435_v49, %v8439_v7  ;;  %v17689_v25 = vcombine.low %v8435_v49, %v8439_v7 }
 0x5d5   :  { %14485 = vmatpush2.bf16.msra.mxu0 %v17473_v35  ;;  %v8567_v24 = vld [vmem:[#allocation10 + $0x15e8] sm:$0xff] }
 0x5d6   :  { %14486 = vmatprep.subr.bf16.mxu0 %v17466_v63  ;;  %v17818_v44 = vcombine.high %v8563_v29, %v8567_v24  ;;  %v8427_v2 = vld [vmem:[#allocation10 + $0x1188] sm:$0xff] }
 0x5d7   :  { %14526 = vmatpush2.bf16.msra.mxu1 %v17601_v3  ;;  %v8431_v28 = vld [vmem:[#allocation10 + $0x11a8] sm:$0xff]  ;;  %v17817_v3 = vcombine.low %v8563_v29, %v8567_v24 }
 0x5d8   :  { %14527 = vmatprep.subr.bf16.mxu1 %v17594_v13  ;;  %v8555_v20 = vld [vmem:[#allocation10 + $0x1588] sm:$0xff]  ;;  %v17682_v63 = vcombine.high %v8427_v2, %v8431_v28 }
 0x5d9   :  { %14487 = vmatpush2.bf16.msra.mxu0 %v17465_v12  ;;  %v8559_v35 = vld [vmem:[#allocation10 + $0x15a8] sm:$0xff] }
 0x5da   :  { %14488 = vmatprep.subr.bf16.mxu0 %v17458_v39  ;;  %v8419_v13 = vld [vmem:[#allocation10 + $0x1148] sm:$0xff]  ;;  %v17810_v56 = vcombine.high %v8555_v20, %v8559_v35  ;;  %v17809_v47 = vcombine.low %v8555_v20, %v8559_v35 }
 0x5db   :  { %14528 = vmatpush2.bf16.msra.mxu1 %v17593_v50  ;;  %v8423_v57 = vld [vmem:[#allocation10 + $0x1168] sm:$0xff] }
 0x5dc   :  { %14529 = vmatprep.subr.bf16.mxu1 %v17586_v60  ;;  %v8547_v23 = vld [vmem:[#allocation10 + $0x1548] sm:$0xff]  ;;  %v17681_v60 = vcombine.low %v8427_v2, %v8431_v28  ;;  %v17674_v52 = vcombine.high %v8419_v13, %v8423_v57 }
 0x5dd   :  { %14489 = vmatpush2.bf16.msra.mxu0 %v17457_v16  ;;  %v8551_v12 = vld [vmem:[#allocation10 + $0x1568] sm:$0xff] }
 0x5de   :  { %14490 = vmatprep.subr.bf16.mxu0 %v17450_v5  ;;  %v8411_v5 = vld [vmem:[#allocation10 + $0x1108] sm:$0xff] }
 0x5df   :  { %14530 = vmatpush2.bf16.msra.mxu1 %v17585_v43  ;;  %v8539_v58 = vld [vmem:[#allocation10 + $0x1508] sm:$0xff] }
 0x5e0   :  { %14531 = vmatprep.subr.bf16.mxu1 %v17578_v30  ;;  %v8415_v30 = vld [vmem:[#allocation10 + $0x1128] sm:$0xff] }
 0x5e1   :  { %14491 = vmatpush2.bf16.msra.mxu0 %v17449_v14  ;;  %v8543_v38 = vld [vmem:[#allocation10 + $0x1528] sm:$0xff]  ;;  %v17666_v49 = vcombine.high %v8411_v5, %v8415_v30 }
 0x5e2   :  { %14492 = vmatprep.subr.bf16.mxu0 %v17442_v8  ;;  %v17794_v7 = vcombine.high %v8539_v58, %v8543_v38  ;;  %v8403_v29 = vld [vmem:[#allocation10 + $0x10c8] sm:$0xff] }
 0x5e3   :  { %14532 = vmatpush2.bf16.msra.mxu1 %v17577_v17  ;;  %v17673_v17 = vcombine.low %v8419_v13, %v8423_v57  ;;  %v8407_v24 = vld [vmem:[#allocation10 + $0x10e8] sm:$0xff] }
 0x5e4   :  { %14533 = vmatprep.subr.bf16.mxu1 %v17570_v21  ;;  %v17801_v21 = vcombine.low %v8547_v23, %v8551_v12  ;;  %v17658_v2 = vcombine.high %v8403_v29, %v8407_v24  ;;  %v8399_v20 = vld [vmem:[#allocation10 + $0x10a8] sm:$0xff] }
 0x5e5   :  { %14493 = vmatpush2.bf16.msra.mxu0 %v17441_v41  ;;  %v8531_v41 = vld [vmem:[#allocation10 + $0x14c8] sm:$0xff] }
 0x5e6   :  { %14544 = vmatprep.subr.bf16.mxu0 %v17690_v18  ;;  %v17665_v18 = vcombine.low %v8411_v5, %v8415_v30  ;;  %v8523_v35 = vld [vmem:[#allocation10 + $0x1488] sm:$0xff] }
 0x5e7   :  { %14534 = vmatpush2.bf16.msra.mxu1 %v17569_v54  ;;  %v8535_v54 = vld [vmem:[#allocation10 + $0x14e8] sm:$0xff] }
 0x5e8   :  { %14585 = vmatprep.subr.bf16.mxu1 %v17818_v44  ;;  %v14250_v11 = vpop.f32.mrf.mxu0  ;;  %14495 = vmatmul.mubr.bf16.vlgmr.msra.gmra.mxu0 %v18939_v53  ;;  %v17793_v44 = vcombine.low %v8539_v58, %v8543_v38  ;;  %v17786_v28 = vcombine.high %v8531_v41, %v8535_v54  ;;  %v17785_v13 = vcombine.low %v8531_v41, %v8535_v54  ;;  %v8499_v38 = vld [vmem:[#allocation10 + $0x13c8] sm:$0xff] }
 0x5e9   :  { %v14251_v50 = vadd.f32 %v14250_v11, %v19024_v26  ;;  %14545 = vmatpush1.bf16.msra.mxu0 %v17689_v25  ;;  %14576 = vmatprep.mubr.bf16.mxu0 %v18943_v33  ;;  %v17802_v26 = vcombine.high %v8547_v23, %v8551_v12  ;;  %v8395_v25 = vld [vmem:[#allocation10 + $0x1088] sm:$0xff] }
 0x5ea   :  { %v14291_v39 = vpop.f32.mrf.mxu1  ;;  %14536 = vmatmul.mubr.bf16.vlgmr.msra.gmra.mxu1 %v18941_v36  ;;  %v14252_v1 = vpop.f32.mrf.mxu0  ;;  %14546 = vmatprep.subr.bf16.mxu0 %v17682_v63  ;;  %v17657_v63 = vcombine.low %v8403_v29, %v8407_v24  ;;  %v17650_v57 = vcombine.high %v8395_v25, %v8399_v20  ;;  %v8391_v23 = vld [vmem:[#allocation10 + $0x1068] sm:$0xff] }
 0x5eb   :  { %14586 = vmatpush1.bf16.msra.mxu1 %v17817_v3  ;;  %v19034_v51 = vadd.f32 %v14291_v39, %v14251_v50  ;;  %14617 = vmatprep.mubr.bf16.mxu1 %v18946_v10  ;;  %v14253_v16 = vadd.f32 %v14252_v1, %v19028_v32  ;;  %v8527_v3 = vld [vmem:[#allocation10 + $0x14a8] sm:$0xff]  ;;  %v17649_v39 = vcombine.low %v8395_v25, %v8399_v20 }
 0x5ec   :  { %v14293_v43 = vpop.f32.mrf.mxu1  ;;  %v14254_v15 = vpop.f32.mrf.mxu0  ;;  %14587 = vmatprep.subr.bf16.mxu1 %v17810_v56  ;;  %v17778_v11 = vcombine.high %v8523_v35, %v8527_v3  ;;  %v8387_v56 = vld [vmem:[#allocation10 + $0x1048] sm:$0xff] }
 0x5ed   :  { %v19038_v9 = vadd.f32 %v14293_v43, %v14253_v16  ;;  %14547 = vmatpush1.bf16.msra.mxu0 %v17681_v60  ;;  %v8515_v12 = vld [vmem:[#allocation10 + $0x1448] sm:$0xff]  ;;  %v17777_v60 = vcombine.low %v8523_v35, %v8527_v3  ;;  %v17642_v1 = vcombine.high %v8387_v56, %v8391_v23  ;;  %v17641_v5 = vcombine.low %v8387_v56, %v8391_v23 }
 0x5ee   :  { %v14295_v14 = vpop.f32.mrf.mxu1  ;;  %v14255_v8 = vpop.f32.mrf.mxu0  ;;  %14548 = vmatprep.subr.bf16.mxu0 %v17674_v52  ;;  %v8519_v50 = vld [vmem:[#allocation10 + $0x1468] sm:$0xff] }
 0x5ef   :  { %14588 = vmatpush1.bf16.msra.mxu1 %v17809_v47  ;;  %v17770_v47 = vcombine.high %v8515_v12, %v8519_v50  ;;  %v8379_v52 = vld [vmem:[#allocation10 + $0x1008] sm:$0xff]  ;;  %v17769_v30 = vcombine.low %v8515_v12, %v8519_v50 }
 0x5f0   :  { %v14296_v32 = vpop.f32.mrf.mxu1  ;;  %14589 = vmatprep.subr.bf16.mxu1 %v17802_v26  ;;  %v8383_v16 = vld [vmem:[#allocation10 + $0x1028] sm:$0xff] }
 0x5f1   :  { %14549 = vmatpush1.bf16.msra.mxu0 %v17673_v17  ;;  %v8507_v43 = vld [vmem:[#allocation10 + $0x1408] sm:$0xff]  ;;  %v17634_v15 = vcombine.high %v8379_v52, %v8383_v16 }
 0x5f2   :  { %14550 = vmatprep.subr.bf16.mxu0 %v17666_v49  ;;  %v8511_v26 = vld [vmem:[#allocation10 + $0x1428] sm:$0xff] }
 0x5f3   :  { %14590 = vmatpush1.bf16.msra.mxu1 %v17801_v21  ;;  %v17762_v58 = vcombine.high %v8507_v43, %v8511_v26  ;;  %v8503_v14 = vld [vmem:[#allocation10 + $0x13e8] sm:$0xff]  ;;  %v17633_v21 = vcombine.low %v8379_v52, %v8383_v16  ;;  %v17761_v49 = vcombine.low %v8507_v43, %v8511_v26 }
 0x5f4   :  { %14591 = vmatprep.subr.bf16.mxu1 %v17794_v7  ;;  %v8627_v17 = vld [vmem:[#allocation10 + $0x17c8] sm:$0xff]  ;;  %v17754_v32 = vcombine.high %v8499_v38, %v8503_v14 }
 0x5f5   :  { %14551 = vmatpush1.bf16.msra.mxu0 %v17665_v18  ;;  %v8631_v8 = vld [vmem:[#allocation10 + $0x17e8] sm:$0xff]  ;;  %v17753_v18 = vcombine.low %v8499_v38, %v8503_v14 }
 0x5f6   :  { %14552 = vmatprep.subr.bf16.mxu0 %v17658_v2  ;;  %v17882_v7 = vcombine.high %v8627_v17, %v8631_v8  ;;  %v8491_v29 = vld [vmem:[#allocation10 + $0x1388] sm:$0xff] }
 0x5f7   :  { %14592 = vmatpush1.bf16.msra.mxu1 %v17793_v44  ;;  %v8495_v24 = vld [vmem:[#allocation10 + $0x13a8] sm:$0xff]  ;;  %v17881_v44 = vcombine.low %v8627_v17, %v8631_v8 }
 0x5f8   :  { %14593 = vmatprep.subr.bf16.mxu1 %v17786_v28  ;;  %v8619_v41 = vld [vmem:[#allocation10 + $0x1788] sm:$0xff]  ;;  %v17746_v2 = vcombine.high %v8491_v29, %v8495_v24 }
 0x5f9   :  { %14553 = vmatpush1.bf16.msra.mxu0 %v17657_v63  ;;  %v8623_v54 = vld [vmem:[#allocation10 + $0x17a8] sm:$0xff]  ;;  %v17745_v63 = vcombine.low %v8491_v29, %v8495_v24 }
 0x5fa   :  { %14554 = vmatprep.subr.bf16.mxu0 %v17650_v57  ;;  %v17874_v28 = vcombine.high %v8619_v41, %v8623_v54  ;;  %v8483_v25 = vld [vmem:[#allocation10 + $0x1348] sm:$0xff] }
 0x5fb   :  { %14594 = vmatpush1.bf16.msra.mxu1 %v17785_v13  ;;  %v8487_v20 = vld [vmem:[#allocation10 + $0x1368] sm:$0xff]  ;;  %v17873_v13 = vcombine.low %v8619_v41, %v8623_v54 }
 0x5fc   :  { %14595 = vmatprep.subr.bf16.mxu1 %v17778_v11  ;;  %v8611_v35 = vld [vmem:[#allocation10 + $0x1748] sm:$0xff]  ;;  %v17738_v57 = vcombine.high %v8483_v25, %v8487_v20 }
 0x5fd   :  { %14555 = vmatpush1.bf16.msra.mxu0 %v17649_v39  ;;  %v8615_v3 = vld [vmem:[#allocation10 + $0x1768] sm:$0xff]  ;;  %v17737_v39 = vcombine.low %v8483_v25, %v8487_v20 }
 0x5fe   :  { %14556 = vmatprep.subr.bf16.mxu0 %v17642_v1  ;;  %v17866_v11 = vcombine.high %v8611_v35, %v8615_v3  ;;  %v8475_v56 = vld [vmem:[#allocation10 + $0x1308] sm:$0xff] }
 0x5ff   :  { %14596 = vmatpush1.bf16.msra.mxu1 %v17777_v60  ;;  %v8479_v23 = vld [vmem:[#allocation10 + $0x1328] sm:$0xff]  ;;  %v17865_v60 = vcombine.low %v8611_v35, %v8615_v3 }
 0x600   :  { %14597 = vmatprep.subr.bf16.mxu1 %v17770_v47  ;;  %v8603_v12 = vld [vmem:[#allocation10 + $0x1708] sm:$0xff]  ;;  %v17730_v1 = vcombine.high %v8475_v56, %v8479_v23 }
 0x601   :  { %14557 = vmatpush1.bf16.msra.mxu0 %v17641_v5  ;;  %v8607_v50 = vld [vmem:[#allocation10 + $0x1728] sm:$0xff]  ;;  %v17729_v5 = vcombine.low %v8475_v56, %v8479_v23 }
 0x602   :  { %14558 = vmatprep.subr.bf16.mxu0 %v17634_v15  ;;  %v17858_v47 = vcombine.high %v8603_v12, %v8607_v50  ;;  %v8467_v52 = vld [vmem:[#allocation10 + $0x12c8] sm:$0xff] }
 0x603   :  { %14598 = vmatpush1.bf16.msra.mxu1 %v17769_v30  ;;  %v8471_v16 = vld [vmem:[#allocation10 + $0x12e8] sm:$0xff]  ;;  %v17857_v30 = vcombine.low %v8603_v12, %v8607_v50 }
 0x604   :  { %14599 = vmatprep.subr.bf16.mxu1 %v17762_v58  ;;  %v8595_v43 = vld [vmem:[#allocation10 + $0x16c8] sm:$0xff]  ;;  %v17722_v15 = vcombine.high %v8467_v52, %v8471_v16 }
 0x605   :  { %14559 = vmatpush1.bf16.msra.mxu0 %v17633_v21  ;;  %v8599_v26 = vld [vmem:[#allocation10 + $0x16e8] sm:$0xff]  ;;  %v17721_v21 = vcombine.low %v8467_v52, %v8471_v16 }
 0x606   :  { %14560 = vmatprep.subr.bf16.mxu0 %v17754_v32  ;;  %v17850_v58 = vcombine.high %v8595_v43, %v8599_v26  ;;  %v8459_v38 = vld [vmem:[#allocation10 + $0x1288] sm:$0xff] }
 0x607   :  { %14600 = vmatpush1.bf16.msra.mxu1 %v17761_v49  ;;  %v8463_v14 = vld [vmem:[#allocation10 + $0x12a8] sm:$0xff]  ;;  %v17849_v49 = vcombine.low %v8595_v43, %v8599_v26 }
 0x608   :  { %14601 = vmatprep.subr.bf16.mxu1 %v17882_v7  ;;  %v8587_v17 = vld [vmem:[#allocation10 + $0x1688] sm:$0xff]  ;;  %v17714_v32 = vcombine.high %v8459_v38, %v8463_v14 }
 0x609   :  { %14561 = vmatpush2.bf16.msra.mxu0 %v17753_v18  ;;  %v8591_v8 = vld [vmem:[#allocation10 + $0x16a8] sm:$0xff]  ;;  %v17713_v18 = vcombine.low %v8459_v38, %v8463_v14 }
 0x60a   :  { %14562 = vmatprep.subr.bf16.mxu0 %v17746_v2  ;;  %v17842_v7 = vcombine.high %v8587_v17, %v8591_v8  ;;  %v8451_v29 = vld [vmem:[#allocation10 + $0x1248] sm:$0xff] }
 0x60b   :  { %14602 = vmatpush2.bf16.msra.mxu1 %v17881_v44  ;;  %v8455_v24 = vld [vmem:[#allocation10 + $0x1268] sm:$0xff]  ;;  %v17841_v44 = vcombine.low %v8587_v17, %v8591_v8 }
 0x60c   :  { %14603 = vmatprep.subr.bf16.mxu1 %v17874_v28  ;;  %v8579_v41 = vld [vmem:[#allocation10 + $0x1648] sm:$0xff]  ;;  %v17706_v2 = vcombine.high %v8451_v29, %v8455_v24 }
 0x60d   :  { %14563 = vmatpush2.bf16.msra.mxu0 %v17745_v63  ;;  %v8583_v54 = vld [vmem:[#allocation10 + $0x1668] sm:$0xff]  ;;  %v17705_v63 = vcombine.low %v8451_v29, %v8455_v24 }
 0x60e   :  { %14564 = vmatprep.subr.bf16.mxu0 %v17738_v57  ;;  %v17834_v28 = vcombine.high %v8579_v41, %v8583_v54  ;;  %v8443_v25 = vld [vmem:[#allocation10 + $0x1208] sm:$0xff] }
 0x60f   :  { %14604 = vmatpush2.bf16.msra.mxu1 %v17873_v13  ;;  %v8447_v20 = vld [vmem:[#allocation10 + $0x1228] sm:$0xff]  ;;  %v17833_v13 = vcombine.low %v8579_v41, %v8583_v54 }
 0x610   :  { %14605 = vmatprep.subr.bf16.mxu1 %v17866_v11  ;;  %v8571_v35 = vld [vmem:[#allocation10 + $0x1608] sm:$0xff]  ;;  %v17698_v57 = vcombine.high %v8443_v25, %v8447_v20 }
 0x611   :  { %14565 = vmatpush2.bf16.msra.mxu0 %v17737_v39  ;;  %v8575_v3 = vld [vmem:[#allocation10 + $0x1628] sm:$0xff]  ;;  %v17697_v39 = vcombine.low %v8443_v25, %v8447_v20 }
 0x612   :  { %14566 = vmatprep.subr.bf16.mxu0 %v17730_v1  ;;  %v17826_v11 = vcombine.high %v8571_v35, %v8575_v3  ;;  %v8691_v56 = vld [vmem:[#allocation10 + $0x19c8] sm:$0xff] }
 0x613   :  { %14606 = vmatpush2.bf16.msra.mxu1 %v17865_v60  ;;  %v8695_v23 = vld [vmem:[#allocation10 + $0x19e8] sm:$0xff]  ;;  %v17825_v60 = vcombine.low %v8571_v35, %v8575_v3 }
 0x614   :  { %14607 = vmatprep.subr.bf16.mxu1 %v17858_v47  ;;  %v8819_v12 = vld [vmem:[#allocation10 + $0x1dc8] sm:$0xff]  ;;  %v17946_v1 = vcombine.high %v8691_v56, %v8695_v23  ;;  %v17945_v43 = vcombine.low %v8691_v56, %v8695_v23 }
 0x615   :  { %14567 = vmatpush2.bf16.msra.mxu0 %v17729_v5  ;;  %v8823_v50 = vld [vmem:[#allocation10 + $0x1de8] sm:$0xff] }
 0x616   :  { %14568 = vmatprep.subr.bf16.mxu0 %v17722_v15  ;;  %v18074_v47 = vcombine.high %v8819_v12, %v8823_v50  ;;  %v8683_v52 = vld [vmem:[#allocation10 + $0x1988] sm:$0xff] }
 0x617   :  { %14608 = vmatpush2.bf16.msra.mxu1 %v17857_v30  ;;  %v8687_v16 = vld [vmem:[#allocation10 + $0x19a8] sm:$0xff]  ;;  %v18073_v30 = vcombine.low %v8819_v12, %v8823_v50 }
 0x618   :  { %14609 = vmatprep.subr.bf16.mxu1 %v17850_v58  ;;  %v8811_v26 = vld [vmem:[#allocation10 + $0x1d88] sm:$0xff]  ;;  %v17938_v15 = vcombine.high %v8683_v52, %v8687_v16 }
 0x619   :  { %14569 = vmatpush2.bf16.msra.mxu0 %v17721_v21  ;;  %v8815_v5 = vld [vmem:[#allocation10 + $0x1da8] sm:$0xff] }
 0x61a   :  { %14570 = vmatprep.subr.bf16.mxu0 %v17714_v32  ;;  %v8675_v58 = vld [vmem:[#allocation10 + $0x1948] sm:$0xff]  ;;  %v18066_v17 = vcombine.high %v8811_v26, %v8815_v5  ;;  %v18065_v24 = vcombine.low %v8811_v26, %v8815_v5 }
 0x61b   :  { %14610 = vmatpush2.bf16.msra.mxu1 %v17849_v49  ;;  %v8679_v38 = vld [vmem:[#allocation10 + $0x1968] sm:$0xff] }
 0x61c   :  { %14611 = vmatprep.subr.bf16.mxu1 %v17842_v7  ;;  %v8803_v8 = vld [vmem:[#allocation10 + $0x1d48] sm:$0xff]  ;;  %v17937_v7 = vcombine.low %v8683_v52, %v8687_v16  ;;  %v17930_v41 = vcombine.high %v8675_v58, %v8679_v38 }
 0x61d   :  { %14571 = vmatpush2.bf16.msra.mxu0 %v17713_v18  ;;  %v8807_v21 = vld [vmem:[#allocation10 + $0x1d68] sm:$0xff] }
 0x61e   :  { %14572 = vmatprep.subr.bf16.mxu0 %v17706_v2  ;;  %v8667_v2 = vld [vmem:[#allocation10 + $0x1908] sm:$0xff] }
 0x61f   :  { %14612 = vmatpush2.bf16.msra.mxu1 %v17841_v44  ;;  %v8795_v20 = vld [vmem:[#allocation10 + $0x1d08] sm:$0xff] }
 0x620   :  { %14613 = vmatprep.subr.bf16.mxu1 %v17834_v28  ;;  %v8671_v28 = vld [vmem:[#allocation10 + $0x1928] sm:$0xff] }
 0x621   :  { %14573 = vmatpush2.bf16.msra.mxu0 %v17705_v63  ;;  %v8799_v35 = vld [vmem:[#allocation10 + $0x1d28] sm:$0xff]  ;;  %v17922_v56 = vcombine.high %v8667_v2, %v8671_v28 }
 0x622   :  { %14574 = vmatprep.subr.bf16.mxu0 %v17698_v57  ;;  %v18050_v23 = vcombine.high %v8795_v20, %v8799_v35  ;;  %v8659_v12 = vld [vmem:[#allocation10 + $0x18c8] sm:$0xff] }
 0x623   :  { %14614 = vmatpush2.bf16.msra.mxu1 %v17833_v13  ;;  %v17929_v13 = vcombine.low %v8675_v58, %v8679_v38  ;;  %v8663_v50 = vld [vmem:[#allocation10 + $0x18e8] sm:$0xff] }
 0x624   :  { %14615 = vmatprep.subr.bf16.mxu1 %v17826_v11  ;;  %v18057_v11 = vcombine.low %v8803_v8, %v8807_v21  ;;  %v17914_v52 = vcombine.high %v8659_v12, %v8663_v50  ;;  %v8655_v26 = vld [vmem:[#allocation10 + $0x18a8] sm:$0xff] }
 0x625   :  { %14575 = vmatpush2.bf16.msra.mxu0 %v17697_v39  ;;  %v8787_v39 = vld [vmem:[#allocation10 + $0x1cc8] sm:$0xff] }
 0x626   :  { %14626 = vmatprep.subr.bf16.mxu0 %v17946_v1  ;;  %v17921_v1 = vcombine.low %v8667_v2, %v8671_v28  ;;  %v8779_v5 = vld [vmem:[#allocation10 + $0x1c88] sm:$0xff] }
 0x627   :  { %14616 = vmatpush2.bf16.msra.mxu1 %v17825_v60  ;;  %v8791_v60 = vld [vmem:[#allocation10 + $0x1ce8] sm:$0xff] }
 0x628   :  { %14667 = vmatprep.subr.bf16.mxu1 %v18074_v47  ;;  %v14332_v14 = vpop.f32.mrf.mxu0  ;;  %14577 = vmatmul.mubr.bf16.vlgmr.msra.gmra.mxu0 %v18972_v27  ;;  %v18049_v47 = vcombine.low %v8795_v20, %v8799_v35  ;;  %v18042_v16 = vcombine.high %v8787_v39, %v8791_v60  ;;  %v18041_v58 = vcombine.low %v8787_v39, %v8791_v60  ;;  %v8755_v35 = vld [vmem:[#allocation10 + $0x1bc8] sm:$0xff] }
 0x629   :  { %v14333_v49 = vadd.f32 %v14332_v14, %v19034_v51  ;;  %14627 = vmatpush1.bf16.msra.mxu0 %v17945_v43  ;;  %14658 = vmatprep.mubr.bf16.mxu0 %v18976_v40  ;;  %v18058_v51 = vcombine.high %v8803_v8, %v8807_v21  ;;  %v8651_v43 = vld [vmem:[#allocation10 + $0x1888] sm:$0xff] }
 0x62a   :  { %v14373_v32 = vpop.f32.mrf.mxu1  ;;  %14618 = vmatmul.mubr.bf16.vlgmr.msra.gmra.mxu1 %v18974_v34  ;;  %v14334_v29 = vpop.f32.mrf.mxu0  ;;  %14628 = vmatprep.subr.bf16.mxu0 %v17938_v15  ;;  %v17913_v15 = vcombine.low %v8659_v12, %v8663_v50  ;;  %v17906_v38 = vcombine.high %v8651_v43, %v8655_v26  ;;  %v8647_v8 = vld [vmem:[#allocation10 + $0x1868] sm:$0xff] }
 0x62b   :  { %14668 = vmatpush1.bf16.msra.mxu1 %v18073_v30  ;;  %v19044_v54 = vadd.f32 %v14373_v32, %v14333_v49  ;;  %14699 = vmatprep.mubr.bf16.mxu1 %v18991_v0  ;;  %v14335_v18 = vadd.f32 %v14334_v29, %v19038_v9  ;;  %v8783_v30 = vld [vmem:[#allocation10 + $0x1ca8] sm:$0xff]  ;;  %v17905_v32 = vcombine.low %v8651_v43, %v8655_v26 }
 0x62c   :  { %v14375_v44 = vpop.f32.mrf.mxu1  ;;  %v14336_v25 = vpop.f32.mrf.mxu0  ;;  %14669 = vmatprep.subr.bf16.mxu1 %v18066_v17  ;;  %v18034_v14 = vcombine.high %v8779_v5, %v8783_v30  ;;  %v8643_v17 = vld [vmem:[#allocation10 + $0x1848] sm:$0xff] }
 0x62d   :  { %v19048_v3 = vadd.f32 %v14375_v44, %v14335_v18  ;;  %14629 = vmatpush1.bf16.msra.mxu0 %v17937_v7  ;;  %v8771_v21 = vld [vmem:[#allocation10 + $0x1c48] sm:$0xff]  ;;  %v18033_v7 = vcombine.low %v8779_v5, %v8783_v30  ;;  %v17898_v29 = vcombine.high %v8643_v17, %v8647_v8  ;;  %v17897_v2 = vcombine.low %v8643_v17, %v8647_v8 }
 0x62e   :  { %v14377_v63 = vpop.f32.mrf.mxu1  ;;  %v14337_v57 = vpop.f32.mrf.mxu0  ;;  %14630 = vmatprep.subr.bf16.mxu0 %v17930_v41  ;;  %v8775_v49 = vld [vmem:[#allocation10 + $0x1c68] sm:$0xff] }
 0x62f   :  { %14670 = vmatpush1.bf16.msra.mxu1 %v18065_v24  ;;  %v18026_v24 = vcombine.high %v8771_v21, %v8775_v49  ;;  %v8635_v41 = vld [vmem:[#allocation10 + $0x1808] sm:$0xff]  ;;  %v18025_v28 = vcombine.low %v8771_v21, %v8775_v49 }
 0x630   :  { %v14378_v9 = vpop.f32.mrf.mxu1  ;;  %14671 = vmatprep.subr.bf16.mxu1 %v18058_v51  ;;  %v8639_v18 = vld [vmem:[#allocation10 + $0x1828] sm:$0xff] }
 0x631   :  { %14631 = vmatpush1.bf16.msra.mxu0 %v17929_v13  ;;  %v8763_v44 = vld [vmem:[#allocation10 + $0x1c08] sm:$0xff]  ;;  %v17890_v25 = vcombine.high %v8635_v41, %v8639_v18 }
 0x632   :  { %14632 = vmatprep.subr.bf16.mxu0 %v17922_v56  ;;  %v8767_v51 = vld [vmem:[#allocation10 + $0x1c28] sm:$0xff] }
 0x633   :  { %14672 = vmatpush1.bf16.msra.mxu1 %v18057_v11  ;;  %v18018_v20 = vcombine.high %v8763_v44, %v8767_v51  ;;  %v8759_v63 = vld [vmem:[#allocation10 + $0x1be8] sm:$0xff]  ;;  %v17889_v11 = vcombine.low %v8635_v41, %v8639_v18  ;;  %v18017_v56 = vcombine.low %v8763_v44, %v8767_v51 }
 0x634   :  { %14673 = vmatprep.subr.bf16.mxu1 %v18050_v23  ;;  %v8883_v13 = vld [vmem:[#allocation10 + $0x1fc8] sm:$0xff]  ;;  %v18010_v9 = vcombine.high %v8755_v35, %v8759_v63 }
 0x635   :  { %14633 = vmatpush1.bf16.msra.mxu0 %v17921_v1  ;;  %v8887_v57 = vld [vmem:[#allocation10 + $0x1fe8] sm:$0xff]  ;;  %v18009_v1 = vcombine.low %v8755_v35, %v8759_v63 }
 0x636   :  { %14634 = vmatprep.subr.bf16.mxu0 %v17914_v52  ;;  %v18138_v23 = vcombine.high %v8883_v13, %v8887_v57  ;;  %v8747_v12 = vld [vmem:[#allocation10 + $0x1b88] sm:$0xff] }
 0x637   :  { %14674 = vmatpush1.bf16.msra.mxu1 %v18049_v47  ;;  %v8751_v50 = vld [vmem:[#allocation10 + $0x1ba8] sm:$0xff]  ;;  %v18137_v47 = vcombine.low %v8883_v13, %v8887_v57 }
 0x638   :  { %14675 = vmatprep.subr.bf16.mxu1 %v18042_v16  ;;  %v8875_v39 = vld [vmem:[#allocation10 + $0x1f88] sm:$0xff]  ;;  %v18002_v52 = vcombine.high %v8747_v12, %v8751_v50 }
 0x639   :  { %14635 = vmatpush1.bf16.msra.mxu0 %v17913_v15  ;;  %v8879_v60 = vld [vmem:[#allocation10 + $0x1fa8] sm:$0xff]  ;;  %v18001_v15 = vcombine.low %v8747_v12, %v8751_v50 }
 0x63a   :  { %14636 = vmatprep.subr.bf16.mxu0 %v17906_v38  ;;  %v18130_v16 = vcombine.high %v8875_v39, %v8879_v60  ;;  %v8739_v43 = vld [vmem:[#allocation10 + $0x1b48] sm:$0xff] }
 0x63b   :  { %14676 = vmatpush1.bf16.msra.mxu1 %v18041_v58  ;;  %v8743_v26 = vld [vmem:[#allocation10 + $0x1b68] sm:$0xff]  ;;  %v18129_v58 = vcombine.low %v8875_v39, %v8879_v60 }
 0x63c   :  { %14677 = vmatprep.subr.bf16.mxu1 %v18034_v14  ;;  %v8867_v5 = vld [vmem:[#allocation10 + $0x1f48] sm:$0xff]  ;;  %v17994_v38 = vcombine.high %v8739_v43, %v8743_v26 }
 0x63d   :  { %14637 = vmatpush1.bf16.msra.mxu0 %v17905_v32  ;;  %v8871_v30 = vld [vmem:[#allocation10 + $0x1f68] sm:$0xff]  ;;  %v17993_v32 = vcombine.low %v8739_v43, %v8743_v26 }
 0x63e   :  { %14638 = vmatprep.subr.bf16.mxu0 %v17898_v29  ;;  %v18122_v14 = vcombine.high %v8867_v5, %v8871_v30  ;;  %v8731_v17 = vld [vmem:[#allocation10 + $0x1b08] sm:$0xff] }
 0x63f   :  { %14678 = vmatpush1.bf16.msra.mxu1 %v18033_v7  ;;  %v8735_v8 = vld [vmem:[#allocation10 + $0x1b28] sm:$0xff]  ;;  %v18121_v7 = vcombine.low %v8867_v5, %v8871_v30 }
 0x640   :  { %14679 = vmatprep.subr.bf16.mxu1 %v18026_v24  ;;  %v8859_v21 = vld [vmem:[#allocation10 + $0x1f08] sm:$0xff]  ;;  %v17986_v29 = vcombine.high %v8731_v17, %v8735_v8 }
 0x641   :  { %14639 = vmatpush1.bf16.msra.mxu0 %v17897_v2  ;;  %v8863_v49 = vld [vmem:[#allocation10 + $0x1f28] sm:$0xff]  ;;  %v17985_v2 = vcombine.low %v8731_v17, %v8735_v8  ;;  %v7924_v17 = vld [vmem:[#allocation10 + $0x1d0] sm:$0xff] }
 0x642   :  { %14640 = vmatprep.subr.bf16.mxu0 %v17890_v25  ;;  %v18114_v24 = vcombine.high %v8859_v21, %v8863_v49  ;;  %v8723_v41 = vld [vmem:[#allocation10 + $0x1ac8] sm:$0xff]  ;;  %v7928_v8 = vld [vmem:[#allocation10 + $0x1f0] sm:$0xff] }
 0x643   :  { %14680 = vmatpush1.bf16.msra.mxu1 %v18025_v28  ;;  %v8727_v18 = vld [vmem:[#allocation10 + $0x1ae8] sm:$0xff]  ;;  %v18113_v28 = vcombine.low %v8859_v21, %v8863_v49  ;;  %v8052_v21 = vld [vmem:[#allocation10 + $0x5d0] sm:$0xff] }
 0x644   :  { %14681 = vmatprep.subr.bf16.mxu1 %v18018_v20  ;;  %v8851_v44 = vld [vmem:[#allocation10 + $0x1ec8] sm:$0xff]  ;;  %v17978_v25 = vcombine.high %v8723_v41, %v8727_v18  ;;  %v8056_v49 = vld [vmem:[#allocation10 + $0x5f0] sm:$0xff] }
 0x645   :  { %14641 = vmatpush1.bf16.msra.mxu0 %v17889_v11  ;;  %v8855_v51 = vld [vmem:[#allocation10 + $0x1ee8] sm:$0xff]  ;;  %v17977_v11 = vcombine.low %v8723_v41, %v8727_v18  ;;  %v7916_v41 = vld [vmem:[#allocation10 + $0x190] sm:$0xff] }
 0x646   :  { %14642 = vmatprep.subr.bf16.mxu0 %v18010_v9  ;;  %v18106_v20 = vcombine.high %v8851_v44, %v8855_v51  ;;  %v8715_v35 = vld [vmem:[#allocation10 + $0x1a88] sm:$0xff]  ;;  %v7920_v18 = vld [vmem:[#allocation10 + $0x1b0] sm:$0xff] }
 0x647   :  { %14682 = vmatpush1.bf16.msra.mxu1 %v18017_v56  ;;  %v8719_v63 = vld [vmem:[#allocation10 + $0x1aa8] sm:$0xff]  ;;  %v18105_v56 = vcombine.low %v8851_v44, %v8855_v51  ;;  %v18382_v44 = vld [vmem:[#allocation11] sm:$0xff] }
 0x648   :  { %14683 = vmatprep.subr.bf16.mxu1 %v18138_v23  ;;  %v8843_v13 = vld [vmem:[#allocation10 + $0x1e88] sm:$0xff]  ;;  %v17970_v9 = vcombine.high %v8715_v35, %v8719_v63  ;;  %v8903_v51 = vrot.slane %v18382_v44, %v18863_v55 }
 0x649   :  { %14643 = vmatpush2.bf16.msra.mxu0 %v18009_v1  ;;  %v8847_v57 = vld [vmem:[#allocation10 + $0x1ea8] sm:$0xff]  ;;  %v17969_v1 = vcombine.low %v8715_v35, %v8719_v63  ;;  %v8907_v35 = vrot.slane %v18382_v44, %v18831_v45  ;;  %v17172_v63 = vcombine.high %v7916_v41, %v7920_v18 }
 0x64a   :  { %14644 = vmatprep.subr.bf16.mxu0 %v18002_v52  ;;  %v18098_v23 = vcombine.high %v8843_v13, %v8847_v57  ;;  %v8707_v12 = vld [vmem:[#allocation10 + $0x1a48] sm:$0xff] }
 0x64b   :  { %14684 = vmatpush2.bf16.msra.mxu1 %v18137_v47  ;;  %v8711_v50 = vld [vmem:[#allocation10 + $0x1a68] sm:$0xff]  ;;  %v18097_v47 = vcombine.low %v8843_v13, %v8847_v57  ;;  %v7908_v13 = vld [vmem:[#allocation10 + $0x150] sm:$0xff] }
 0x64c   :  { %14685 = vmatprep.subr.bf16.mxu1 %v18130_v16  ;;  %v8835_v39 = vld [vmem:[#allocation10 + $0x1e48] sm:$0xff]  ;;  %v17962_v52 = vcombine.high %v8707_v12, %v8711_v50  ;;  %v7912_v57 = vld [vmem:[#allocation10 + $0x170] sm:$0xff] }
 0x64d   :  { %14645 = vmatpush2.bf16.msra.mxu0 %v18001_v15  ;;  %v8839_v60 = vld [vmem:[#allocation10 + $0x1e68] sm:$0xff]  ;;  %v17961_v15 = vcombine.low %v8707_v12, %v8711_v50  ;;  %v17171_v50 = vcombine.low %v7916_v41, %v7920_v18  ;;  %v8024_v41 = vld [vmem:[#allocation10 + $0x4f0] sm:$0xff] }
 0x64e   :  { %14646 = vmatprep.subr.bf16.mxu0 %v17994_v38  ;;  %v18090_v16 = vcombine.high %v8835_v39, %v8839_v60  ;;  %v8699_v43 = vld [vmem:[#allocation10 + $0x1a08] sm:$0xff] }
 0x64f   :  { %14686 = vmatpush2.bf16.msra.mxu1 %v18129_v58  ;;  %v8703_v26 = vld [vmem:[#allocation10 + $0x1a28] sm:$0xff]  ;;  %v18089_v58 = vcombine.low %v8835_v39, %v8839_v60  ;;  %v17164_v60 = vcombine.high %v7908_v13, %v7912_v57 }
 0x650   :  { %14687 = vmatprep.subr.bf16.mxu1 %v18122_v14  ;;  %v8827_v5 = vld [vmem:[#allocation10 + $0x1e08] sm:$0xff]  ;;  %v17954_v38 = vcombine.high %v8699_v43, %v8703_v26 }
 0x651   :  { %14647 = vmatpush2.bf16.msra.mxu0 %v17993_v32  ;;  %v8831_v30 = vld [vmem:[#allocation10 + $0x1e28] sm:$0xff]  ;;  %v17953_v32 = vcombine.low %v8699_v43, %v8703_v26  ;;  %v7900_v43 = vld [vmem:[#allocation10 + $0x110] sm:$0xff] }
 0x652   :  { %14648 = vmatprep.subr.bf16.mxu0 %v17986_v29  ;;  %v18082_v14 = vcombine.high %v8827_v5, %v8831_v30  ;;  %v17180_v29 = vcombine.high %v7924_v17, %v7928_v8  ;;  %v7904_v26 = vld [vmem:[#allocation10 + $0x130] sm:$0xff] }
 0x653   :  { %14688 = vmatpush2.bf16.msra.mxu1 %v18121_v7  ;;  %v18081_v7 = vcombine.low %v8827_v5, %v8831_v30  ;;  %v8028_v30 = vld [vmem:[#allocation10 + $0x510] sm:$0xff]  ;;  %v17155_v18 = vcombine.low %v7900_v43, %v7904_v26 }
 0x654   :  { %14689 = vmatprep.subr.bf16.mxu1 %v18114_v24  ;;  %v17308_v24 = vcombine.high %v8052_v21, %v8056_v49 }
 0x655   :  { %14649 = vmatpush2.bf16.msra.mxu0 %v17985_v2  ;;  %v17179_v2 = vcombine.low %v7924_v17, %v7928_v8 }
 0x656   :  { %14650 = vmatprep.subr.bf16.mxu0 %v17978_v25  ;;  %v8048_v25 = vld [vmem:[#allocation10 + $0x5b0] sm:$0xff] }
 0x657   :  { %14690 = vmatpush2.bf16.msra.mxu1 %v18113_v28  ;;  %v8044_v28 = vld [vmem:[#allocation10 + $0x590] sm:$0xff] }
 0x658   :  { %14691 = vmatprep.subr.bf16.mxu1 %v18106_v20  ;;  %v17307_v20 = vcombine.low %v8052_v21, %v8056_v49  ;;  %v17299_v45 = vcombine.low %v8044_v28, %v8048_v25  ;;  %v17156_v21 = vcombine.high %v7900_v43, %v7904_v26 }
 0x659   :  { %14651 = vmatpush2.bf16.msra.mxu0 %v17977_v11 }
 0x65a   :  { %14652 = vmatprep.subr.bf16.mxu0 %v17970_v9  ;;  %v8036_v9 = vld [vmem:[#allocation10 + $0x550] sm:$0xff] }
 0x65b   :  { %14692 = vmatpush2.bf16.msra.mxu1 %v18105_v56  ;;  %v17300_v56 = vcombine.high %v8044_v28, %v8048_v25  ;;  %v7884_v28 = vld [vmem:[#allocation10 + $0x90] sm:$0xff] }
 0x65c   :  { %14693 = vmatprep.subr.bf16.mxu1 %v18098_v23  ;;  %v8040_v23 = vld [vmem:[#allocation10 + $0x570] sm:$0xff] }
 0x65d   :  { %14653 = vmatpush2.bf16.msra.mxu0 %v17969_v1  ;;  %v17291_v8 = vcombine.low %v8036_v9, %v8040_v23  ;;  %v7888_v25 = vld [vmem:[#allocation10 + $0xb0] sm:$0xff] }
 0x65e   :  { %14654 = vmatprep.subr.bf16.mxu0 %v17962_v52 }
 0x65f   :  { %14694 = vmatpush2.bf16.msra.mxu1 %v18097_v47 }
 0x660   :  { %14695 = vmatprep.subr.bf16.mxu1 %v18090_v16  ;;  %v17292_v16 = vcombine.high %v8036_v9, %v8040_v23  ;;  %v7880_v9 = vld [vmem:[#allocation10 + $0x70] sm:$0xff] }
 0x661   :  { %14655 = vmatpush2.bf16.msra.mxu0 %v17961_v15  ;;  %v8032_v15 = vld [vmem:[#allocation10 + $0x530] sm:$0xff] }
 0x662   :  { %14656 = vmatprep.subr.bf16.mxu0 %v17954_v38  ;;  %v17283_v44 = vcombine.low %v8028_v30, %v8032_v15  ;;  %v8004_v23 = vld [vmem:[#allocation10 + $0x450] sm:$0xff] }
 0x663   :  { %14696 = vmatpush2.bf16.msra.mxu1 %v18089_v58 }
 0x664   :  { %14697 = vmatprep.subr.bf16.mxu1 %v18082_v14  ;;  %v17163_v14 = vcombine.low %v7908_v13, %v7912_v57  ;;  %v17140_v57 = vcombine.high %v7884_v28, %v7888_v25 }
 0x665   :  { %14657 = vmatpush2.bf16.msra.mxu0 %v17953_v32  ;;  %v17284_v32 = vcombine.high %v8028_v30, %v8032_v15  ;;  %v7988_v15 = vld [vmem:[#allocation10 + $0x3d0] sm:$0xff] }
 0x666   :  { %14708 = vmatprep.subr.bf16.mxu0 %v17180_v29  ;;  %v7896_v29 = vld [vmem:[#allocation10 + $0xf0] sm:$0xff] }
 0x667   :  { %14698 = vmatpush2.bf16.msra.mxu1 %v18081_v7  ;;  %v7892_v7 = vld [vmem:[#allocation10 + $0xd0] sm:$0xff] }
 0x668   :  { %14749 = vmatprep.subr.bf16.mxu1 %v17308_v24  ;;  %v14414_v11 = vpop.f32.mrf.mxu0  ;;  %14659 = vmatmul.mubr.bf16.vlgmr.msra.gmra.mxu0 %v19007_v42  ;;  %v8020_v24 = vld [vmem:[#allocation10 + $0x4d0] sm:$0xff] }
 0x669   :  { %v14415_v12 = vadd.f32 %v14414_v11, %v8903_v51  ;;  %14709 = vmatpush1.bf16.msra.mxu0 %v17179_v2  ;;  %14740 = vmatprep.mubr.bf16.mxu0 %v18847_v62  ;;  %v17148_v51 = vcombine.high %v7892_v7, %v7896_v29  ;;  %v17276_v2 = vcombine.high %v8020_v24, %v8024_v41 }
 0x66a   :  { %v14455_v55 = vpop.f32.mrf.mxu1  ;;  %14700 = vmatmul.mubr.bf16.vlgmr.msra.gmra.mxu1 %v19009_v19  ;;  %v14416_v39 = vpop.f32.mrf.mxu0  ;;  %14710 = vmatprep.subr.bf16.mxu0 %v17172_v63  ;;  %v17147_v63 = vcombine.low %v7892_v7, %v7896_v29  ;;  %v17275_v13 = vcombine.low %v8020_v24, %v8024_v41  ;;  %v7980_v7 = vld [vmem:[#allocation10 + $0x390] sm:$0xff] }
 0x66b   :  { %14750 = vmatpush1.bf16.msra.mxu1 %v17307_v20  ;;  %v19055_v1 = vadd.f32 %v14455_v55, %v14415_v12  ;;  %14781 = vmatprep.mubr.bf16.mxu1 %v18850_v6  ;;  %v14417_v47 = vadd.f32 %v14416_v39, %v8907_v35  ;;  %v8012_v20 = vld [vmem:[#allocation10 + $0x490] sm:$0xff]  ;;  %v17139_v55 = vcombine.low %v7884_v28, %v7888_v25 }
 0x66c   :  { %v14457_v52 = vpop.f32.mrf.mxu1  ;;  %v14418_v5 = vpop.f32.mrf.mxu0  ;;  %14751 = vmatprep.subr.bf16.mxu1 %v17300_v56  ;;  %v8016_v35 = vld [vmem:[#allocation10 + $0x4b0] sm:$0xff] }
 0x66d   :  { %v19058_v58 = vadd.f32 %v14457_v52, %v14417_v47  ;;  %14711 = vmatpush1.bf16.msra.mxu0 %v17171_v50  ;;  %v17268_v11 = vcombine.high %v8012_v20, %v8016_v35  ;;  %v7876_v56 = vld [vmem:[#allocation10 + $0x50] sm:$0xff]  ;;  %v17267_v50 = vcombine.low %v8012_v20, %v8016_v35 }
 0x66e   :  { %v14459_v38 = vpop.f32.mrf.mxu1  ;;  %v14419_v17 = vpop.f32.mrf.mxu0  ;;  %14712 = vmatprep.subr.bf16.mxu0 %v17164_v60  ;;  %v8008_v12 = vld [vmem:[#allocation10 + $0x470] sm:$0xff]  ;;  %v17132_v39 = vcombine.high %v7876_v56, %v7880_v9  ;;  %v17131_v43 = vcombine.low %v7876_v56, %v7880_v9 }
 0x66f   :  { %14752 = vmatpush1.bf16.msra.mxu1 %v17299_v45  ;;  %v17260_v45 = vcombine.high %v8004_v23, %v8008_v12  ;;  %v7868_v60 = vld [vmem:[#allocation10 + $0x10] sm:$0xff]  ;;  %v17259_v26 = vcombine.low %v8004_v23, %v8008_v12 }
 0x670   :  { %v14460_v49 = vpop.f32.mrf.mxu1  ;;  %14753 = vmatprep.subr.bf16.mxu1 %v17292_v16  ;;  %v7872_v47 = vld [vmem:[#allocation10 + $0x30] sm:$0xff] }
 0x671   :  { %14713 = vmatpush1.bf16.msra.mxu0 %v17163_v14  ;;  %v7996_v52 = vld [vmem:[#allocation10 + $0x410] sm:$0xff]  ;;  %v17124_v5 = vcombine.high %v7868_v60, %v7872_v47 }
 0x672   :  { %14714 = vmatprep.subr.bf16.mxu0 %v17156_v21  ;;  %v8000_v16 = vld [vmem:[#allocation10 + $0x430] sm:$0xff] }
 0x673   :  { %14754 = vmatpush1.bf16.msra.mxu1 %v17291_v8  ;;  %v17252_v30 = vcombine.high %v7996_v52, %v8000_v16  ;;  %v7992_v38 = vld [vmem:[#allocation10 + $0x3f0] sm:$0xff]  ;;  %v17123_v8 = vcombine.low %v7868_v60, %v7872_v47  ;;  %v17251_v21 = vcombine.low %v7996_v52, %v8000_v16 }
 0x674   :  { %14755 = vmatprep.subr.bf16.mxu1 %v17284_v32  ;;  %v8116_v14 = vld [vmem:[#allocation10 + $0x7d0] sm:$0xff]  ;;  %v17244_v49 = vcombine.high %v7988_v15, %v7992_v38 }
 0x675   :  { %14715 = vmatpush1.bf16.msra.mxu0 %v17155_v18  ;;  %v8120_v17 = vld [vmem:[#allocation10 + $0x7f0] sm:$0xff]  ;;  %v17243_v18 = vcombine.low %v7988_v15, %v7992_v38 }
 0x676   :  { %14716 = vmatprep.subr.bf16.mxu0 %v17148_v51  ;;  %v17372_v32 = vcombine.high %v8116_v14, %v8120_v17  ;;  %v7984_v29 = vld [vmem:[#allocation10 + $0x3b0] sm:$0xff] }
 0x677   :  { %14756 = vmatpush1.bf16.msra.mxu1 %v17283_v44  ;;  %v8108_v24 = vld [vmem:[#allocation10 + $0x790] sm:$0xff]  ;;  %v17371_v44 = vcombine.low %v8116_v14, %v8120_v17  ;;  %v17236_v51 = vcombine.high %v7980_v7, %v7984_v29 }
 0x678   :  { %14757 = vmatprep.subr.bf16.mxu1 %v17276_v2  ;;  %v8112_v41 = vld [vmem:[#allocation10 + $0x7b0] sm:$0xff] }
 0x679   :  { %14717 = vmatpush1.bf16.msra.mxu0 %v17147_v63  ;;  %v17364_v2 = vcombine.high %v8108_v24, %v8112_v41  ;;  %v7972_v28 = vld [vmem:[#allocation10 + $0x350] sm:$0xff]  ;;  %v17235_v63 = vcombine.low %v7980_v7, %v7984_v29 }
 0x67a   :  { %14718 = vmatprep.subr.bf16.mxu0 %v17140_v57  ;;  %v7976_v25 = vld [vmem:[#allocation10 + $0x370] sm:$0xff] }
 0x67b   :  { %14758 = vmatpush1.bf16.msra.mxu1 %v17275_v13  ;;  %v8100_v20 = vld [vmem:[#allocation10 + $0x750] sm:$0xff]  ;;  %v17363_v13 = vcombine.low %v8108_v24, %v8112_v41  ;;  %v17228_v57 = vcombine.high %v7972_v28, %v7976_v25 }
 0x67c   :  { %14759 = vmatprep.subr.bf16.mxu1 %v17268_v11  ;;  %v8104_v35 = vld [vmem:[#allocation10 + $0x770] sm:$0xff] }
 0x67d   :  { %14719 = vmatpush1.bf16.msra.mxu0 %v17139_v55  ;;  %v17356_v11 = vcombine.high %v8100_v20, %v8104_v35  ;;  %v7964_v56 = vld [vmem:[#allocation10 + $0x310] sm:$0xff]  ;;  %v17227_v55 = vcombine.low %v7972_v28, %v7976_v25 }
 0x67e   :  { %14720 = vmatprep.subr.bf16.mxu0 %v17132_v39  ;;  %v7968_v9 = vld [vmem:[#allocation10 + $0x330] sm:$0xff] }
 0x67f   :  { %14760 = vmatpush1.bf16.msra.mxu1 %v17267_v50  ;;  %v8092_v23 = vld [vmem:[#allocation10 + $0x710] sm:$0xff]  ;;  %v17355_v50 = vcombine.low %v8100_v20, %v8104_v35  ;;  %v17220_v39 = vcombine.high %v7964_v56, %v7968_v9 }
 0x680   :  { %14761 = vmatprep.subr.bf16.mxu1 %v17260_v45  ;;  %v8096_v12 = vld [vmem:[#allocation10 + $0x730] sm:$0xff] }
 0x681   :  { %14721 = vmatpush1.bf16.msra.mxu0 %v17131_v43  ;;  %v17348_v45 = vcombine.high %v8092_v23, %v8096_v12  ;;  %v7956_v60 = vld [vmem:[#allocation10 + $0x2d0] sm:$0xff]  ;;  %v17219_v43 = vcombine.low %v7964_v56, %v7968_v9 }
 0x682   :  { %14722 = vmatprep.subr.bf16.mxu0 %v17124_v5  ;;  %v7960_v47 = vld [vmem:[#allocation10 + $0x2f0] sm:$0xff] }
 0x683   :  { %14762 = vmatpush1.bf16.msra.mxu1 %v17259_v26  ;;  %v8084_v52 = vld [vmem:[#allocation10 + $0x6d0] sm:$0xff]  ;;  %v17347_v26 = vcombine.low %v8092_v23, %v8096_v12  ;;  %v17212_v5 = vcombine.high %v7956_v60, %v7960_v47 }
 0x684   :  { %14763 = vmatprep.subr.bf16.mxu1 %v17252_v30  ;;  %v8088_v16 = vld [vmem:[#allocation10 + $0x6f0] sm:$0xff] }
 0x685   :  { %14723 = vmatpush1.bf16.msra.mxu0 %v17123_v8  ;;  %v17340_v30 = vcombine.high %v8084_v52, %v8088_v16  ;;  %v7948_v15 = vld [vmem:[#allocation10 + $0x290] sm:$0xff]  ;;  %v17211_v8 = vcombine.low %v7956_v60, %v7960_v47 }
 0x686   :  { %14724 = vmatprep.subr.bf16.mxu0 %v17244_v49  ;;  %v7952_v38 = vld [vmem:[#allocation10 + $0x2b0] sm:$0xff] }
 0x687   :  { %14764 = vmatpush1.bf16.msra.mxu1 %v17251_v21  ;;  %v8076_v14 = vld [vmem:[#allocation10 + $0x690] sm:$0xff]  ;;  %v17339_v21 = vcombine.low %v8084_v52, %v8088_v16  ;;  %v17204_v49 = vcombine.high %v7948_v15, %v7952_v38 }
 0x688   :  { %14765 = vmatprep.subr.bf16.mxu1 %v17372_v32  ;;  %v8080_v17 = vld [vmem:[#allocation10 + $0x6b0] sm:$0xff] }
 0x689   :  { %14725 = vmatpush2.bf16.msra.mxu0 %v17243_v18  ;;  %v17332_v32 = vcombine.high %v8076_v14, %v8080_v17  ;;  %v7940_v7 = vld [vmem:[#allocation10 + $0x250] sm:$0xff]  ;;  %v17203_v18 = vcombine.low %v7948_v15, %v7952_v38 }
 0x68a   :  { %14726 = vmatprep.subr.bf16.mxu0 %v17236_v51  ;;  %v7944_v29 = vld [vmem:[#allocation10 + $0x270] sm:$0xff] }
 0x68b   :  { %14766 = vmatpush2.bf16.msra.mxu1 %v17371_v44  ;;  %v8068_v24 = vld [vmem:[#allocation10 + $0x650] sm:$0xff]  ;;  %v17331_v44 = vcombine.low %v8076_v14, %v8080_v17  ;;  %v17196_v51 = vcombine.high %v7940_v7, %v7944_v29 }
 0x68c   :  { %14767 = vmatprep.subr.bf16.mxu1 %v17364_v2  ;;  %v8072_v41 = vld [vmem:[#allocation10 + $0x670] sm:$0xff] }
 0x68d   :  { %14727 = vmatpush2.bf16.msra.mxu0 %v17235_v63  ;;  %v17324_v2 = vcombine.high %v8068_v24, %v8072_v41  ;;  %v7932_v28 = vld [vmem:[#allocation10 + $0x210] sm:$0xff]  ;;  %v17195_v63 = vcombine.low %v7940_v7, %v7944_v29 }
 0x68e   :  { %14728 = vmatprep.subr.bf16.mxu0 %v17228_v57  ;;  %v7936_v25 = vld [vmem:[#allocation10 + $0x230] sm:$0xff] }
 0x68f   :  { %14768 = vmatpush2.bf16.msra.mxu1 %v17363_v13  ;;  %v8060_v20 = vld [vmem:[#allocation10 + $0x610] sm:$0xff]  ;;  %v17323_v13 = vcombine.low %v8068_v24, %v8072_v41  ;;  %v17188_v57 = vcombine.high %v7932_v28, %v7936_v25 }
 0x690   :  { %14769 = vmatprep.subr.bf16.mxu1 %v17356_v11  ;;  %v8064_v35 = vld [vmem:[#allocation10 + $0x630] sm:$0xff] }
 0x691   :  { %14729 = vmatpush2.bf16.msra.mxu0 %v17227_v55  ;;  %v17316_v11 = vcombine.high %v8060_v20, %v8064_v35  ;;  %v8180_v56 = vld [vmem:[#allocation10 + $0x9d0] sm:$0xff]  ;;  %v17187_v55 = vcombine.low %v7932_v28, %v7936_v25 }
 0x692   :  { %14730 = vmatprep.subr.bf16.mxu0 %v17220_v39  ;;  %v8184_v9 = vld [vmem:[#allocation10 + $0x9f0] sm:$0xff] }
 0x693   :  { %14770 = vmatpush2.bf16.msra.mxu1 %v17355_v50  ;;  %v8308_v23 = vld [vmem:[#allocation10 + $0xdd0] sm:$0xff]  ;;  %v17315_v50 = vcombine.low %v8060_v20, %v8064_v35  ;;  %v17436_v39 = vcombine.high %v8180_v56, %v8184_v9  ;;  %v17435_v52 = vcombine.low %v8180_v56, %v8184_v9 }
 0x694   :  { %14771 = vmatprep.subr.bf16.mxu1 %v17348_v45  ;;  %v8312_v12 = vld [vmem:[#allocation10 + $0xdf0] sm:$0xff] }
 0x695   :  { %14731 = vmatpush2.bf16.msra.mxu0 %v17219_v43  ;;  %v17564_v45 = vcombine.high %v8308_v23, %v8312_v12  ;;  %v8172_v60 = vld [vmem:[#allocation10 + $0x990] sm:$0xff] }
 0x696   :  { %14732 = vmatprep.subr.bf16.mxu0 %v17212_v5  ;;  %v8176_v47 = vld [vmem:[#allocation10 + $0x9b0] sm:$0xff] }
 0x697   :  { %14772 = vmatpush2.bf16.msra.mxu1 %v17347_v26  ;;  %v8300_v16 = vld [vmem:[#allocation10 + $0xd90] sm:$0xff]  ;;  %v17563_v26 = vcombine.low %v8308_v23, %v8312_v12  ;;  %v17428_v5 = vcombine.high %v8172_v60, %v8176_v47 }
 0x698   :  { %14773 = vmatprep.subr.bf16.mxu1 %v17340_v30  ;;  %v8304_v43 = vld [vmem:[#allocation10 + $0xdb0] sm:$0xff] }
 0x699   :  { %14733 = vmatpush2.bf16.msra.mxu0 %v17211_v8  ;;  %v8164_v30 = vld [vmem:[#allocation10 + $0x950] sm:$0xff]  ;;  %v17556_v14 = vcombine.high %v8300_v16, %v8304_v43  ;;  %v17555_v29 = vcombine.low %v8300_v16, %v8304_v43 }
 0x69a   :  { %14734 = vmatprep.subr.bf16.mxu0 %v17204_v49  ;;  %v8168_v15 = vld [vmem:[#allocation10 + $0x970] sm:$0xff] }
 0x69b   :  { %14774 = vmatpush2.bf16.msra.mxu1 %v17339_v21  ;;  %v8292_v17 = vld [vmem:[#allocation10 + $0xd50] sm:$0xff]  ;;  %v17420_v24 = vcombine.high %v8164_v30, %v8168_v15 }
 0x69c   :  { %14775 = vmatprep.subr.bf16.mxu1 %v17332_v32  ;;  %v8296_v8 = vld [vmem:[#allocation10 + $0xd70] sm:$0xff]  ;;  %v17427_v32 = vcombine.low %v8172_v60, %v8176_v47 }
 0x69d   :  { %14735 = vmatpush2.bf16.msra.mxu0 %v17203_v18  ;;  %v8284_v25 = vld [vmem:[#allocation10 + $0xd10] sm:$0xff] }
 0x69e   :  { %14736 = vmatprep.subr.bf16.mxu0 %v17196_v51  ;;  %v8156_v51 = vld [vmem:[#allocation10 + $0x910] sm:$0xff] }
 0x69f   :  { %14776 = vmatpush2.bf16.msra.mxu1 %v17331_v44  ;;  %v8288_v20 = vld [vmem:[#allocation10 + $0xd30] sm:$0xff] }
 0x6a0   :  { %14777 = vmatprep.subr.bf16.mxu1 %v17324_v2  ;;  %v8160_v2 = vld [vmem:[#allocation10 + $0x930] sm:$0xff]  ;;  %v17540_v9 = vcombine.high %v8284_v25, %v8288_v20 }
 0x6a1   :  { %14737 = vmatpush2.bf16.msra.mxu0 %v17195_v63  ;;  %v17412_v56 = vcombine.high %v8156_v51, %v8160_v2  ;;  %v8148_v23 = vld [vmem:[#allocation10 + $0x8d0] sm:$0xff] }
 0x6a2   :  { %14738 = vmatprep.subr.bf16.mxu0 %v17188_v57  ;;  %v8152_v12 = vld [vmem:[#allocation10 + $0x8f0] sm:$0xff] }
 0x6a3   :  { %14778 = vmatpush2.bf16.msra.mxu1 %v17323_v13  ;;  %v17419_v13 = vcombine.low %v8164_v30, %v8168_v15  ;;  %v17404_v60 = vcombine.high %v8148_v23, %v8152_v12  ;;  %v8144_v16 = vld [vmem:[#allocation10 + $0x8b0] sm:$0xff] }
 0x6a4   :  { %14779 = vmatprep.subr.bf16.mxu1 %v17316_v11  ;;  %v17547_v11 = vcombine.low %v8292_v17, %v8296_v8  ;;  %v8268_v43 = vld [vmem:[#allocation10 + $0xc90] sm:$0xff] }
 0x6a5   :  { %14739 = vmatpush2.bf16.msra.mxu0 %v17187_v55  ;;  %v8276_v55 = vld [vmem:[#allocation10 + $0xcd0] sm:$0xff] }
 0x6a6   :  { %14790 = vmatprep.subr.bf16.mxu0 %v17436_v39  ;;  %v17411_v39 = vcombine.low %v8156_v51, %v8160_v2 }
 0x6a7   :  { %14780 = vmatpush2.bf16.msra.mxu1 %v17315_v50  ;;  %v8280_v50 = vld [vmem:[#allocation10 + $0xcf0] sm:$0xff] }
 0x6a8   :  { %14831 = vmatprep.subr.bf16.mxu1 %v17564_v45  ;;  %v14496_v38 = vpop.f32.mrf.mxu0  ;;  %14741 = vmatmul.mubr.bf16.vlgmr.msra.gmra.mxu0 %v18891_v59  ;;  %v17539_v45 = vcombine.low %v8284_v25, %v8288_v20  ;;  %v17532_v47 = vcombine.high %v8276_v55, %v8280_v50  ;;  %v17531_v30 = vcombine.low %v8276_v55, %v8280_v50  ;;  %v8244_v20 = vld [vmem:[#allocation10 + $0xbd0] sm:$0xff] }
 0x6a9   :  { %v14497_v21 = vadd.f32 %v14496_v38, %v19055_v1  ;;  %14791 = vmatpush1.bf16.msra.mxu0 %v17435_v52  ;;  %14822 = vmatprep.mubr.bf16.mxu0 %v18895_v37  ;;  %v17548_v1 = vcombine.high %v8292_v17, %v8296_v8  ;;  %v8140_v52 = vld [vmem:[#allocation10 + $0x890] sm:$0xff] }
 0x6aa   :  { %v14537_v49 = vpop.f32.mrf.mxu1  ;;  %14782 = vmatmul.mubr.bf16.vlgmr.msra.gmra.mxu1 %v18893_v31  ;;  %v14498_v7 = vpop.f32.mrf.mxu0  ;;  %14792 = vmatprep.subr.bf16.mxu0 %v17428_v5  ;;  %v17403_v5 = vcombine.low %v8148_v23, %v8152_v12  ;;  %v17396_v15 = vcombine.high %v8140_v52, %v8144_v16  ;;  %v8136_v17 = vld [vmem:[#allocation10 + $0x870] sm:$0xff] }
 0x6ab   :  { %14832 = vmatpush1.bf16.msra.mxu1 %v17563_v26  ;;  %v19064_v41 = vadd.f32 %v14537_v49, %v14497_v21  ;;  %14863 = vmatprep.mubr.bf16.mxu1 %v18898_v22  ;;  %v14499_v18 = vadd.f32 %v14498_v7, %v19058_v58  ;;  %v8272_v26 = vld [vmem:[#allocation10 + $0xcb0] sm:$0xff]  ;;  %v17395_v49 = vcombine.low %v8140_v52, %v8144_v16 }
 0x6ac   :  { %v14539_v44 = vpop.f32.mrf.mxu1  ;;  %v14500_v28 = vpop.f32.mrf.mxu0  ;;  %14833 = vmatprep.subr.bf16.mxu1 %v17556_v14  ;;  %v17524_v38 = vcombine.high %v8268_v43, %v8272_v26  ;;  %v8132_v14 = vld [vmem:[#allocation10 + $0x850] sm:$0xff] }
 0x6ad   :  { %v19068_v35 = vadd.f32 %v14539_v44, %v14499_v18  ;;  %14793 = vmatpush1.bf16.msra.mxu0 %v17427_v32  ;;  %v8260_v8 = vld [vmem:[#allocation10 + $0xc50] sm:$0xff]  ;;  %v17523_v32 = vcombine.low %v8268_v43, %v8272_v26  ;;  %v17388_v7 = vcombine.high %v8132_v14, %v8136_v17  ;;  %v17387_v51 = vcombine.low %v8132_v14, %v8136_v17 }
 0x6ae   :  { %v14541_v63 = vpop.f32.mrf.mxu1  ;;  %v14501_v57 = vpop.f32.mrf.mxu0  ;;  %14794 = vmatprep.subr.bf16.mxu0 %v17420_v24  ;;  %v8264_v21 = vld [vmem:[#allocation10 + $0xc70] sm:$0xff] }
 0x6af   :  { %14834 = vmatpush1.bf16.msra.mxu1 %v17555_v29  ;;  %v17516_v29 = vcombine.high %v8260_v8, %v8264_v21  ;;  %v8124_v24 = vld [vmem:[#allocation10 + $0x810] sm:$0xff]  ;;  %v17515_v2 = vcombine.low %v8260_v8, %v8264_v21 }
 0x6b0   :  { %v14542_v58 = vpop.f32.mrf.mxu1  ;;  %14835 = vmatprep.subr.bf16.mxu1 %v17548_v1  ;;  %v8128_v18 = vld [vmem:[#allocation10 + $0x830] sm:$0xff] }
 0x6b1   :  { %14795 = vmatpush1.bf16.msra.mxu0 %v17419_v13  ;;  %v8252_v44 = vld [vmem:[#allocation10 + $0xc10] sm:$0xff]  ;;  %v17380_v28 = vcombine.high %v8124_v24, %v8128_v18 }
 0x6b2   :  { %14796 = vmatprep.subr.bf16.mxu0 %v17412_v56  ;;  %v8256_v1 = vld [vmem:[#allocation10 + $0xc30] sm:$0xff] }
 0x6b3   :  { %14836 = vmatpush1.bf16.msra.mxu1 %v17547_v11  ;;  %v17508_v25 = vcombine.high %v8252_v44, %v8256_v1  ;;  %v8248_v63 = vld [vmem:[#allocation10 + $0xbf0] sm:$0xff]  ;;  %v17379_v11 = vcombine.low %v8124_v24, %v8128_v18  ;;  %v17507_v56 = vcombine.low %v8252_v44, %v8256_v1 }
 0x6b4   :  { %14837 = vmatprep.subr.bf16.mxu1 %v17540_v9  ;;  %v8372_v13 = vld [vmem:[#allocation10 + $0xfd0] sm:$0xff]  ;;  %v17500_v58 = vcombine.high %v8244_v20, %v8248_v63 }
 0x6b5   :  { %14797 = vmatpush1.bf16.msra.mxu0 %v17411_v39  ;;  %v8376_v57 = vld [vmem:[#allocation10 + $0xff0] sm:$0xff]  ;;  %v17499_v39 = vcombine.low %v8244_v20, %v8248_v63 }
 0x6b6   :  { %14798 = vmatprep.subr.bf16.mxu0 %v17404_v60  ;;  %v17628_v9 = vcombine.high %v8372_v13, %v8376_v57  ;;  %v8236_v23 = vld [vmem:[#allocation10 + $0xb90] sm:$0xff] }
 0x6b7   :  { %14838 = vmatpush1.bf16.msra.mxu1 %v17539_v45  ;;  %v8240_v12 = vld [vmem:[#allocation10 + $0xbb0] sm:$0xff]  ;;  %v17627_v45 = vcombine.low %v8372_v13, %v8376_v57 }
 0x6b8   :  { %14839 = vmatprep.subr.bf16.mxu1 %v17532_v47  ;;  %v8364_v55 = vld [vmem:[#allocation10 + $0xf90] sm:$0xff]  ;;  %v17492_v60 = vcombine.high %v8236_v23, %v8240_v12 }
 0x6b9   :  { %14799 = vmatpush1.bf16.msra.mxu0 %v17403_v5  ;;  %v8368_v50 = vld [vmem:[#allocation10 + $0xfb0] sm:$0xff]  ;;  %v17491_v5 = vcombine.low %v8236_v23, %v8240_v12 }
 0x6ba   :  { %14800 = vmatprep.subr.bf16.mxu0 %v17396_v15  ;;  %v17620_v47 = vcombine.high %v8364_v55, %v8368_v50  ;;  %v8228_v52 = vld [vmem:[#allocation10 + $0xb50] sm:$0xff] }
 0x6bb   :  { %14840 = vmatpush1.bf16.msra.mxu1 %v17531_v30  ;;  %v8232_v16 = vld [vmem:[#allocation10 + $0xb70] sm:$0xff]  ;;  %v17619_v30 = vcombine.low %v8364_v55, %v8368_v50 }
 0x6bc   :  { %14841 = vmatprep.subr.bf16.mxu1 %v17524_v38  ;;  %v8356_v43 = vld [vmem:[#allocation10 + $0xf50] sm:$0xff]  ;;  %v17484_v15 = vcombine.high %v8228_v52, %v8232_v16 }
 0x6bd   :  { %14801 = vmatpush1.bf16.msra.mxu0 %v17395_v49  ;;  %v8360_v26 = vld [vmem:[#allocation10 + $0xf70] sm:$0xff]  ;;  %v17483_v49 = vcombine.low %v8228_v52, %v8232_v16 }
 0x6be   :  { %14802 = vmatprep.subr.bf16.mxu0 %v17388_v7  ;;  %v17612_v38 = vcombine.high %v8356_v43, %v8360_v26  ;;  %v8220_v14 = vld [vmem:[#allocation10 + $0xb10] sm:$0xff] }
 0x6bf   :  { %14842 = vmatpush1.bf16.msra.mxu1 %v17523_v32  ;;  %v8224_v17 = vld [vmem:[#allocation10 + $0xb30] sm:$0xff]  ;;  %v17611_v32 = vcombine.low %v8356_v43, %v8360_v26 }
 0x6c0   :  { %14843 = vmatprep.subr.bf16.mxu1 %v17516_v29  ;;  %v8348_v8 = vld [vmem:[#allocation10 + $0xf10] sm:$0xff]  ;;  %v17476_v7 = vcombine.high %v8220_v14, %v8224_v17 }
 0x6c1   :  { %14803 = vmatpush1.bf16.msra.mxu0 %v17387_v51  ;;  %v8352_v21 = vld [vmem:[#allocation10 + $0xf30] sm:$0xff]  ;;  %v17475_v51 = vcombine.low %v8220_v14, %v8224_v17 }
 0x6c2   :  { %14804 = vmatprep.subr.bf16.mxu0 %v17380_v28  ;;  %v17604_v29 = vcombine.high %v8348_v8, %v8352_v21  ;;  %v8212_v24 = vld [vmem:[#allocation10 + $0xad0] sm:$0xff] }
 0x6c3   :  { %14844 = vmatpush1.bf16.msra.mxu1 %v17515_v2  ;;  %v8216_v18 = vld [vmem:[#allocation10 + $0xaf0] sm:$0xff]  ;;  %v17603_v2 = vcombine.low %v8348_v8, %v8352_v21 }
 0x6c4   :  { %14845 = vmatprep.subr.bf16.mxu1 %v17508_v25  ;;  %v8340_v44 = vld [vmem:[#allocation10 + $0xed0] sm:$0xff]  ;;  %v17468_v28 = vcombine.high %v8212_v24, %v8216_v18 }
 0x6c5   :  { %14805 = vmatpush1.bf16.msra.mxu0 %v17379_v11  ;;  %v8344_v1 = vld [vmem:[#allocation10 + $0xef0] sm:$0xff]  ;;  %v17467_v11 = vcombine.low %v8212_v24, %v8216_v18 }
 0x6c6   :  { %14806 = vmatprep.subr.bf16.mxu0 %v17500_v58  ;;  %v17596_v25 = vcombine.high %v8340_v44, %v8344_v1  ;;  %v8204_v20 = vld [vmem:[#allocation10 + $0xa90] sm:$0xff] }
 0x6c7   :  { %14846 = vmatpush1.bf16.msra.mxu1 %v17507_v56  ;;  %v8208_v63 = vld [vmem:[#allocation10 + $0xab0] sm:$0xff]  ;;  %v17595_v56 = vcombine.low %v8340_v44, %v8344_v1 }
 0x6c8   :  { %14847 = vmatprep.subr.bf16.mxu1 %v17628_v9  ;;  %v8332_v13 = vld [vmem:[#allocation10 + $0xe90] sm:$0xff]  ;;  %v17460_v58 = vcombine.high %v8204_v20, %v8208_v63 }
 0x6c9   :  { %14807 = vmatpush2.bf16.msra.mxu0 %v17499_v39  ;;  %v8336_v57 = vld [vmem:[#allocation10 + $0xeb0] sm:$0xff]  ;;  %v17459_v39 = vcombine.low %v8204_v20, %v8208_v63 }
 0x6ca   :  { %14808 = vmatprep.subr.bf16.mxu0 %v17492_v60  ;;  %v17588_v9 = vcombine.high %v8332_v13, %v8336_v57  ;;  %v8196_v23 = vld [vmem:[#allocation10 + $0xa50] sm:$0xff] }
 0x6cb   :  { %14848 = vmatpush2.bf16.msra.mxu1 %v17627_v45  ;;  %v8200_v12 = vld [vmem:[#allocation10 + $0xa70] sm:$0xff]  ;;  %v17587_v45 = vcombine.low %v8332_v13, %v8336_v57 }
 0x6cc   :  { %14849 = vmatprep.subr.bf16.mxu1 %v17620_v47  ;;  %v8324_v55 = vld [vmem:[#allocation10 + $0xe50] sm:$0xff]  ;;  %v17452_v60 = vcombine.high %v8196_v23, %v8200_v12 }
 0x6cd   :  { %14809 = vmatpush2.bf16.msra.mxu0 %v17491_v5  ;;  %v8328_v50 = vld [vmem:[#allocation10 + $0xe70] sm:$0xff]  ;;  %v17451_v5 = vcombine.low %v8196_v23, %v8200_v12 }
 0x6ce   :  { %14810 = vmatprep.subr.bf16.mxu0 %v17484_v15  ;;  %v17580_v47 = vcombine.high %v8324_v55, %v8328_v50  ;;  %v8188_v52 = vld [vmem:[#allocation10 + $0xa10] sm:$0xff] }
 0x6cf   :  { %14850 = vmatpush2.bf16.msra.mxu1 %v17619_v30  ;;  %v8192_v16 = vld [vmem:[#allocation10 + $0xa30] sm:$0xff]  ;;  %v17579_v30 = vcombine.low %v8324_v55, %v8328_v50 }
 0x6d0   :  { %14851 = vmatprep.subr.bf16.mxu1 %v17612_v38  ;;  %v8316_v43 = vld [vmem:[#allocation10 + $0xe10] sm:$0xff]  ;;  %v17444_v15 = vcombine.high %v8188_v52, %v8192_v16 }
 0x6d1   :  { %14811 = vmatpush2.bf16.msra.mxu0 %v17483_v49  ;;  %v8320_v26 = vld [vmem:[#allocation10 + $0xe30] sm:$0xff]  ;;  %v17443_v49 = vcombine.low %v8188_v52, %v8192_v16 }
 0x6d2   :  { %14812 = vmatprep.subr.bf16.mxu0 %v17476_v7  ;;  %v17572_v38 = vcombine.high %v8316_v43, %v8320_v26  ;;  %v8436_v14 = vld [vmem:[#allocation10 + $0x11d0] sm:$0xff] }
 0x6d3   :  { %14852 = vmatpush2.bf16.msra.mxu1 %v17611_v32  ;;  %v8440_v17 = vld [vmem:[#allocation10 + $0x11f0] sm:$0xff]  ;;  %v17571_v32 = vcombine.low %v8316_v43, %v8320_v26 }
 0x6d4   :  { %14853 = vmatprep.subr.bf16.mxu1 %v17604_v29  ;;  %v8564_v8 = vld [vmem:[#allocation10 + $0x15d0] sm:$0xff]  ;;  %v17692_v7 = vcombine.high %v8436_v14, %v8440_v17  ;;  %v17691_v44 = vcombine.low %v8436_v14, %v8440_v17 }
 0x6d5   :  { %14813 = vmatpush2.bf16.msra.mxu0 %v17475_v51  ;;  %v8568_v21 = vld [vmem:[#allocation10 + $0x15f0] sm:$0xff] }
 0x6d6   :  { %14814 = vmatprep.subr.bf16.mxu0 %v17468_v28  ;;  %v17820_v29 = vcombine.high %v8564_v8, %v8568_v21  ;;  %v8428_v24 = vld [vmem:[#allocation10 + $0x1190] sm:$0xff] }
 0x6d7   :  { %14854 = vmatpush2.bf16.msra.mxu1 %v17603_v2  ;;  %v8432_v18 = vld [vmem:[#allocation10 + $0x11b0] sm:$0xff]  ;;  %v17819_v2 = vcombine.low %v8564_v8, %v8568_v21 }
 0x6d8   :  { %14855 = vmatprep.subr.bf16.mxu1 %v17596_v25  ;;  %v8556_v1 = vld [vmem:[#allocation10 + $0x1590] sm:$0xff]  ;;  %v17684_v28 = vcombine.high %v8428_v24, %v8432_v18 }
 0x6d9   :  { %14815 = vmatpush2.bf16.msra.mxu0 %v17467_v11  ;;  %v8560_v51 = vld [vmem:[#allocation10 + $0x15b0] sm:$0xff] }
 0x6da   :  { %14816 = vmatprep.subr.bf16.mxu0 %v17460_v58  ;;  %v8420_v25 = vld [vmem:[#allocation10 + $0x1150] sm:$0xff]  ;;  %v17812_v13 = vcombine.high %v8556_v1, %v8560_v51  ;;  %v17811_v12 = vcombine.low %v8556_v1, %v8560_v51 }
 0x6db   :  { %14856 = vmatpush2.bf16.msra.mxu1 %v17595_v56  ;;  %v8424_v20 = vld [vmem:[#allocation10 + $0x1170] sm:$0xff] }
 0x6dc   :  { %14857 = vmatprep.subr.bf16.mxu1 %v17588_v9  ;;  %v8548_v57 = vld [vmem:[#allocation10 + $0x1550] sm:$0xff]  ;;  %v17683_v9 = vcombine.low %v8428_v24, %v8432_v18  ;;  %v17676_v55 = vcombine.high %v8420_v25, %v8424_v20 }
 0x6dd   :  { %14817 = vmatpush2.bf16.msra.mxu0 %v17459_v39  ;;  %v8552_v11 = vld [vmem:[#allocation10 + $0x1570] sm:$0xff] }
 0x6de   :  { %14818 = vmatprep.subr.bf16.mxu0 %v17452_v60  ;;  %v8412_v60 = vld [vmem:[#allocation10 + $0x1110] sm:$0xff] }
 0x6df   :  { %14858 = vmatpush2.bf16.msra.mxu1 %v17587_v45  ;;  %v8540_v16 = vld [vmem:[#allocation10 + $0x1510] sm:$0xff] }
 0x6e0   :  { %14859 = vmatprep.subr.bf16.mxu1 %v17580_v47  ;;  %v8416_v47 = vld [vmem:[#allocation10 + $0x1130] sm:$0xff] }
 0x6e1   :  { %14819 = vmatpush2.bf16.msra.mxu0 %v17451_v5  ;;  %v8544_v43 = vld [vmem:[#allocation10 + $0x1530] sm:$0xff]  ;;  %v17668_v14 = vcombine.high %v8412_v60, %v8416_v47 }
 0x6e2   :  { %14820 = vmatprep.subr.bf16.mxu0 %v17444_v15  ;;  %v17796_v17 = vcombine.high %v8540_v16, %v8544_v43  ;;  %v8404_v8 = vld [vmem:[#allocation10 + $0x10d0] sm:$0xff] }
 0x6e3   :  { %14860 = vmatpush2.bf16.msra.mxu1 %v17579_v30  ;;  %v17675_v30 = vcombine.low %v8420_v25, %v8424_v20  ;;  %v8408_v21 = vld [vmem:[#allocation10 + $0x10f0] sm:$0xff] }
 0x6e4   :  { %14861 = vmatprep.subr.bf16.mxu1 %v17572_v38  ;;  %v17803_v38 = vcombine.low %v8548_v57, %v8552_v11  ;;  %v17660_v24 = vcombine.high %v8404_v8, %v8408_v21  ;;  %v8400_v1 = vld [vmem:[#allocation10 + $0x10b0] sm:$0xff] }
 0x6e5   :  { %14821 = vmatpush2.bf16.msra.mxu0 %v17443_v49  ;;  %v8532_v49 = vld [vmem:[#allocation10 + $0x14d0] sm:$0xff] }
 0x6e6   :  { %14872 = vmatprep.subr.bf16.mxu0 %v17692_v7  ;;  %v17667_v7 = vcombine.low %v8412_v60, %v8416_v47  ;;  %v8524_v51 = vld [vmem:[#allocation10 + $0x1490] sm:$0xff] }
 0x6e7   :  { %14862 = vmatpush2.bf16.msra.mxu1 %v17571_v32  ;;  %v8536_v32 = vld [vmem:[#allocation10 + $0x14f0] sm:$0xff] }
 0x6e8   :  { %14913 = vmatprep.subr.bf16.mxu1 %v17820_v29  ;;  %v14578_v63 = vpop.f32.mrf.mxu0  ;;  %14823 = vmatmul.mubr.bf16.vlgmr.msra.gmra.mxu0 %v18939_v53  ;;  %v17795_v29 = vcombine.low %v8540_v16, %v8544_v43  ;;  %v17788_v18 = vcombine.high %v8532_v49, %v8536_v32  ;;  %v17787_v25 = vcombine.low %v8532_v49, %v8536_v32  ;;  %v8500_v43 = vld [vmem:[#allocation10 + $0x13d0] sm:$0xff] }
 0x6e9   :  { %v14579_v56 = vadd.f32 %v14578_v63, %v19064_v41  ;;  %14873 = vmatpush1.bf16.msra.mxu0 %v17691_v44  ;;  %14904 = vmatprep.mubr.bf16.mxu0 %v18943_v33  ;;  %v17804_v41 = vcombine.high %v8548_v57, %v8552_v11  ;;  %v8396_v44 = vld [vmem:[#allocation10 + $0x1090] sm:$0xff] }
 0x6ea   :  { %v14619_v58 = vpop.f32.mrf.mxu1  ;;  %14864 = vmatmul.mubr.bf16.vlgmr.msra.gmra.mxu1 %v18941_v36  ;;  %v14580_v23 = vpop.f32.mrf.mxu0  ;;  %14874 = vmatprep.subr.bf16.mxu0 %v17684_v28  ;;  %v17659_v28 = vcombine.low %v8404_v8, %v8408_v21  ;;  %v17652_v20 = vcombine.high %v8396_v44, %v8400_v1  ;;  %v8392_v57 = vld [vmem:[#allocation10 + $0x1070] sm:$0xff] }
 0x6eb   :  { %14914 = vmatpush1.bf16.msra.mxu1 %v17819_v2  ;;  %v19074_v50 = vadd.f32 %v14619_v58, %v14579_v56  ;;  %14945 = vmatprep.mubr.bf16.mxu1 %v18946_v10  ;;  %v14581_v39 = vadd.f32 %v14580_v23, %v19068_v35  ;;  %v8528_v2 = vld [vmem:[#allocation10 + $0x14b0] sm:$0xff]  ;;  %v17651_v58 = vcombine.low %v8396_v44, %v8400_v1 }
 0x6ec   :  { %v14621_v45 = vpop.f32.mrf.mxu1  ;;  %v14582_v52 = vpop.f32.mrf.mxu0  ;;  %14915 = vmatprep.subr.bf16.mxu1 %v17812_v13  ;;  %v17780_v63 = vcombine.high %v8524_v51, %v8528_v2  ;;  %v8388_v13 = vld [vmem:[#allocation10 + $0x1050] sm:$0xff] }
 0x6ed   :  { %v19078_v26 = vadd.f32 %v14621_v45, %v14581_v39  ;;  %14875 = vmatpush1.bf16.msra.mxu0 %v17683_v9  ;;  %v8516_v11 = vld [vmem:[#allocation10 + $0x1450] sm:$0xff]  ;;  %v17779_v9 = vcombine.low %v8524_v51, %v8528_v2  ;;  %v17644_v23 = vcombine.high %v8388_v13, %v8392_v57  ;;  %v17643_v60 = vcombine.low %v8388_v13, %v8392_v57 }
 0x6ee   :  { %v14623_v5 = vpop.f32.mrf.mxu1  ;;  %v14583_v15 = vpop.f32.mrf.mxu0  ;;  %14876 = vmatprep.subr.bf16.mxu0 %v17676_v55  ;;  %v8520_v56 = vld [vmem:[#allocation10 + $0x1470] sm:$0xff] }
 0x6ef   :  { %14916 = vmatpush1.bf16.msra.mxu1 %v17811_v12  ;;  %v17772_v12 = vcombine.high %v8516_v11, %v8520_v56  ;;  %v8380_v55 = vld [vmem:[#allocation10 + $0x1010] sm:$0xff]  ;;  %v17771_v47 = vcombine.low %v8516_v11, %v8520_v56 }
 0x6f0   :  { %v14624_v35 = vpop.f32.mrf.mxu1  ;;  %14917 = vmatprep.subr.bf16.mxu1 %v17804_v41  ;;  %v8384_v39 = vld [vmem:[#allocation10 + $0x1030] sm:$0xff] }
 0x6f1   :  { %14877 = vmatpush1.bf16.msra.mxu0 %v17675_v30  ;;  %v8508_v45 = vld [vmem:[#allocation10 + $0x1410] sm:$0xff]  ;;  %v17636_v52 = vcombine.high %v8380_v55, %v8384_v39 }
 0x6f2   :  { %14878 = vmatprep.subr.bf16.mxu0 %v17668_v14  ;;  %v8512_v41 = vld [vmem:[#allocation10 + $0x1430] sm:$0xff] }
 0x6f3   :  { %14918 = vmatpush1.bf16.msra.mxu1 %v17803_v38  ;;  %v17764_v16 = vcombine.high %v8508_v45, %v8512_v41  ;;  %v8504_v5 = vld [vmem:[#allocation10 + $0x13f0] sm:$0xff]  ;;  %v17635_v38 = vcombine.low %v8380_v55, %v8384_v39  ;;  %v17763_v14 = vcombine.low %v8508_v45, %v8512_v41 }
 0x6f4   :  { %14919 = vmatprep.subr.bf16.mxu1 %v17796_v17  ;;  %v8628_v30 = vld [vmem:[#allocation10 + $0x17d0] sm:$0xff]  ;;  %v17756_v35 = vcombine.high %v8500_v43, %v8504_v5 }
 0x6f5   :  { %14879 = vmatpush1.bf16.msra.mxu0 %v17667_v7  ;;  %v8632_v15 = vld [vmem:[#allocation10 + $0x17f0] sm:$0xff]  ;;  %v17755_v7 = vcombine.low %v8500_v43, %v8504_v5 }
 0x6f6   :  { %14880 = vmatprep.subr.bf16.mxu0 %v17660_v24  ;;  %v17884_v17 = vcombine.high %v8628_v30, %v8632_v15  ;;  %v8492_v8 = vld [vmem:[#allocation10 + $0x1390] sm:$0xff] }
 0x6f7   :  { %14920 = vmatpush1.bf16.msra.mxu1 %v17795_v29  ;;  %v8496_v21 = vld [vmem:[#allocation10 + $0x13b0] sm:$0xff]  ;;  %v17883_v29 = vcombine.low %v8628_v30, %v8632_v15 }
 0x6f8   :  { %14921 = vmatprep.subr.bf16.mxu1 %v17788_v18  ;;  %v8620_v49 = vld [vmem:[#allocation10 + $0x1790] sm:$0xff]  ;;  %v17748_v24 = vcombine.high %v8492_v8, %v8496_v21 }
 0x6f9   :  { %14881 = vmatpush1.bf16.msra.mxu0 %v17659_v28  ;;  %v8624_v32 = vld [vmem:[#allocation10 + $0x17b0] sm:$0xff]  ;;  %v17747_v28 = vcombine.low %v8492_v8, %v8496_v21 }
 0x6fa   :  { %14882 = vmatprep.subr.bf16.mxu0 %v17652_v20  ;;  %v17876_v18 = vcombine.high %v8620_v49, %v8624_v32  ;;  %v8484_v44 = vld [vmem:[#allocation10 + $0x1350] sm:$0xff] }
 0x6fb   :  { %14922 = vmatpush1.bf16.msra.mxu1 %v17787_v25  ;;  %v8488_v1 = vld [vmem:[#allocation10 + $0x1370] sm:$0xff]  ;;  %v17875_v25 = vcombine.low %v8620_v49, %v8624_v32 }
 0x6fc   :  { %14923 = vmatprep.subr.bf16.mxu1 %v17780_v63  ;;  %v8612_v51 = vld [vmem:[#allocation10 + $0x1750] sm:$0xff]  ;;  %v17740_v20 = vcombine.high %v8484_v44, %v8488_v1 }
 0x6fd   :  { %14883 = vmatpush1.bf16.msra.mxu0 %v17651_v58  ;;  %v8616_v2 = vld [vmem:[#allocation10 + $0x1770] sm:$0xff]  ;;  %v17739_v58 = vcombine.low %v8484_v44, %v8488_v1 }
 0x6fe   :  { %14884 = vmatprep.subr.bf16.mxu0 %v17644_v23  ;;  %v17868_v63 = vcombine.high %v8612_v51, %v8616_v2  ;;  %v8476_v13 = vld [vmem:[#allocation10 + $0x1310] sm:$0xff] }
 0x6ff   :  { %14924 = vmatpush1.bf16.msra.mxu1 %v17779_v9  ;;  %v8480_v57 = vld [vmem:[#allocation10 + $0x1330] sm:$0xff]  ;;  %v17867_v9 = vcombine.low %v8612_v51, %v8616_v2 }
 0x700   :  { %14925 = vmatprep.subr.bf16.mxu1 %v17772_v12  ;;  %v8604_v11 = vld [vmem:[#allocation10 + $0x1710] sm:$0xff]  ;;  %v17732_v23 = vcombine.high %v8476_v13, %v8480_v57 }
 0x701   :  { %14885 = vmatpush1.bf16.msra.mxu0 %v17643_v60  ;;  %v8608_v56 = vld [vmem:[#allocation10 + $0x1730] sm:$0xff]  ;;  %v17731_v60 = vcombine.low %v8476_v13, %v8480_v57 }
 0x702   :  { %14886 = vmatprep.subr.bf16.mxu0 %v17636_v52  ;;  %v17860_v12 = vcombine.high %v8604_v11, %v8608_v56  ;;  %v8468_v55 = vld [vmem:[#allocation10 + $0x12d0] sm:$0xff] }
 0x703   :  { %14926 = vmatpush1.bf16.msra.mxu1 %v17771_v47  ;;  %v8472_v39 = vld [vmem:[#allocation10 + $0x12f0] sm:$0xff]  ;;  %v17859_v47 = vcombine.low %v8604_v11, %v8608_v56 }
 0x704   :  { %14927 = vmatprep.subr.bf16.mxu1 %v17764_v16  ;;  %v8596_v45 = vld [vmem:[#allocation10 + $0x16d0] sm:$0xff]  ;;  %v17724_v52 = vcombine.high %v8468_v55, %v8472_v39 }
 0x705   :  { %14887 = vmatpush1.bf16.msra.mxu0 %v17635_v38  ;;  %v8600_v41 = vld [vmem:[#allocation10 + $0x16f0] sm:$0xff]  ;;  %v17723_v38 = vcombine.low %v8468_v55, %v8472_v39 }
 0x706   :  { %14888 = vmatprep.subr.bf16.mxu0 %v17756_v35  ;;  %v17852_v16 = vcombine.high %v8596_v45, %v8600_v41  ;;  %v8460_v43 = vld [vmem:[#allocation10 + $0x1290] sm:$0xff] }
 0x707   :  { %14928 = vmatpush1.bf16.msra.mxu1 %v17763_v14  ;;  %v8464_v5 = vld [vmem:[#allocation10 + $0x12b0] sm:$0xff]  ;;  %v17851_v14 = vcombine.low %v8596_v45, %v8600_v41 }
 0x708   :  { %14929 = vmatprep.subr.bf16.mxu1 %v17884_v17  ;;  %v8588_v30 = vld [vmem:[#allocation10 + $0x1690] sm:$0xff]  ;;  %v17716_v35 = vcombine.high %v8460_v43, %v8464_v5 }
 0x709   :  { %14889 = vmatpush2.bf16.msra.mxu0 %v17755_v7  ;;  %v8592_v15 = vld [vmem:[#allocation10 + $0x16b0] sm:$0xff]  ;;  %v17715_v7 = vcombine.low %v8460_v43, %v8464_v5 }
 0x70a   :  { %14890 = vmatprep.subr.bf16.mxu0 %v17748_v24  ;;  %v17844_v17 = vcombine.high %v8588_v30, %v8592_v15  ;;  %v8452_v8 = vld [vmem:[#allocation10 + $0x1250] sm:$0xff] }
 0x70b   :  { %14930 = vmatpush2.bf16.msra.mxu1 %v17883_v29  ;;  %v8456_v21 = vld [vmem:[#allocation10 + $0x1270] sm:$0xff]  ;;  %v17843_v29 = vcombine.low %v8588_v30, %v8592_v15 }
 0x70c   :  { %14931 = vmatprep.subr.bf16.mxu1 %v17876_v18  ;;  %v8580_v49 = vld [vmem:[#allocation10 + $0x1650] sm:$0xff]  ;;  %v17708_v24 = vcombine.high %v8452_v8, %v8456_v21 }
 0x70d   :  { %14891 = vmatpush2.bf16.msra.mxu0 %v17747_v28  ;;  %v8584_v32 = vld [vmem:[#allocation10 + $0x1670] sm:$0xff]  ;;  %v17707_v28 = vcombine.low %v8452_v8, %v8456_v21 }
 0x70e   :  { %14892 = vmatprep.subr.bf16.mxu0 %v17740_v20  ;;  %v17836_v18 = vcombine.high %v8580_v49, %v8584_v32  ;;  %v8444_v44 = vld [vmem:[#allocation10 + $0x1210] sm:$0xff] }
 0x70f   :  { %14932 = vmatpush2.bf16.msra.mxu1 %v17875_v25  ;;  %v8448_v1 = vld [vmem:[#allocation10 + $0x1230] sm:$0xff]  ;;  %v17835_v25 = vcombine.low %v8580_v49, %v8584_v32 }
 0x710   :  { %14933 = vmatprep.subr.bf16.mxu1 %v17868_v63  ;;  %v8572_v51 = vld [vmem:[#allocation10 + $0x1610] sm:$0xff]  ;;  %v17700_v20 = vcombine.high %v8444_v44, %v8448_v1 }
 0x711   :  { %14893 = vmatpush2.bf16.msra.mxu0 %v17739_v58  ;;  %v8576_v2 = vld [vmem:[#allocation10 + $0x1630] sm:$0xff]  ;;  %v17699_v58 = vcombine.low %v8444_v44, %v8448_v1 }
 0x712   :  { %14894 = vmatprep.subr.bf16.mxu0 %v17732_v23  ;;  %v17828_v63 = vcombine.high %v8572_v51, %v8576_v2  ;;  %v8692_v13 = vld [vmem:[#allocation10 + $0x19d0] sm:$0xff] }
 0x713   :  { %14934 = vmatpush2.bf16.msra.mxu1 %v17867_v9  ;;  %v8696_v57 = vld [vmem:[#allocation10 + $0x19f0] sm:$0xff]  ;;  %v17827_v9 = vcombine.low %v8572_v51, %v8576_v2 }
 0x714   :  { %14935 = vmatprep.subr.bf16.mxu1 %v17860_v12  ;;  %v8820_v11 = vld [vmem:[#allocation10 + $0x1dd0] sm:$0xff]  ;;  %v17948_v23 = vcombine.high %v8692_v13, %v8696_v57  ;;  %v17947_v45 = vcombine.low %v8692_v13, %v8696_v57 }
 0x715   :  { %14895 = vmatpush2.bf16.msra.mxu0 %v17731_v60  ;;  %v8824_v56 = vld [vmem:[#allocation10 + $0x1df0] sm:$0xff] }
 0x716   :  { %14896 = vmatprep.subr.bf16.mxu0 %v17724_v52  ;;  %v18076_v12 = vcombine.high %v8820_v11, %v8824_v56  ;;  %v8684_v55 = vld [vmem:[#allocation10 + $0x1990] sm:$0xff] }
 0x717   :  { %14936 = vmatpush2.bf16.msra.mxu1 %v17859_v47  ;;  %v8688_v39 = vld [vmem:[#allocation10 + $0x19b0] sm:$0xff]  ;;  %v18075_v47 = vcombine.low %v8820_v11, %v8824_v56 }
 0x718   :  { %14937 = vmatprep.subr.bf16.mxu1 %v17852_v16  ;;  %v8812_v41 = vld [vmem:[#allocation10 + $0x1d90] sm:$0xff]  ;;  %v17940_v52 = vcombine.high %v8684_v55, %v8688_v39 }
 0x719   :  { %14897 = vmatpush2.bf16.msra.mxu0 %v17723_v38  ;;  %v8816_v60 = vld [vmem:[#allocation10 + $0x1db0] sm:$0xff] }
 0x71a   :  { %14898 = vmatprep.subr.bf16.mxu0 %v17716_v35  ;;  %v8676_v16 = vld [vmem:[#allocation10 + $0x1950] sm:$0xff]  ;;  %v18068_v30 = vcombine.high %v8812_v41, %v8816_v60  ;;  %v18067_v21 = vcombine.low %v8812_v41, %v8816_v60 }
 0x71b   :  { %14938 = vmatpush2.bf16.msra.mxu1 %v17851_v14  ;;  %v8680_v43 = vld [vmem:[#allocation10 + $0x1970] sm:$0xff] }
 0x71c   :  { %14939 = vmatprep.subr.bf16.mxu1 %v17844_v17  ;;  %v8804_v15 = vld [vmem:[#allocation10 + $0x1d50] sm:$0xff]  ;;  %v17939_v17 = vcombine.low %v8684_v55, %v8688_v39  ;;  %v17932_v49 = vcombine.high %v8676_v16, %v8680_v43 }
 0x71d   :  { %14899 = vmatpush2.bf16.msra.mxu0 %v17715_v7  ;;  %v8808_v38 = vld [vmem:[#allocation10 + $0x1d70] sm:$0xff] }
 0x71e   :  { %14900 = vmatprep.subr.bf16.mxu0 %v17708_v24  ;;  %v8668_v24 = vld [vmem:[#allocation10 + $0x1910] sm:$0xff] }
 0x71f   :  { %14940 = vmatpush2.bf16.msra.mxu1 %v17843_v29  ;;  %v8796_v1 = vld [vmem:[#allocation10 + $0x1d10] sm:$0xff] }
 0x720   :  { %14941 = vmatprep.subr.bf16.mxu1 %v17836_v18  ;;  %v8672_v18 = vld [vmem:[#allocation10 + $0x1930] sm:$0xff] }
 0x721   :  { %14901 = vmatpush2.bf16.msra.mxu0 %v17707_v28  ;;  %v8800_v51 = vld [vmem:[#allocation10 + $0x1d30] sm:$0xff]  ;;  %v17924_v13 = vcombine.high %v8668_v24, %v8672_v18 }
 0x722   :  { %14902 = vmatprep.subr.bf16.mxu0 %v17700_v20  ;;  %v18052_v57 = vcombine.high %v8796_v1, %v8800_v51  ;;  %v8660_v11 = vld [vmem:[#allocation10 + $0x18d0] sm:$0xff] }
 0x723   :  { %14942 = vmatpush2.bf16.msra.mxu1 %v17835_v25  ;;  %v17931_v25 = vcombine.low %v8676_v16, %v8680_v43  ;;  %v8664_v56 = vld [vmem:[#allocation10 + $0x18f0] sm:$0xff] }
 0x724   :  { %14943 = vmatprep.subr.bf16.mxu1 %v17828_v63  ;;  %v18059_v63 = vcombine.low %v8804_v15, %v8808_v38  ;;  %v17916_v55 = vcombine.high %v8660_v11, %v8664_v56  ;;  %v8656_v41 = vld [vmem:[#allocation10 + $0x18b0] sm:$0xff] }
 0x725   :  { %14903 = vmatpush2.bf16.msra.mxu0 %v17699_v58  ;;  %v8788_v58 = vld [vmem:[#allocation10 + $0x1cd0] sm:$0xff] }
 0x726   :  { %14954 = vmatprep.subr.bf16.mxu0 %v17948_v23  ;;  %v17923_v23 = vcombine.low %v8668_v24, %v8672_v18  ;;  %v8780_v60 = vld [vmem:[#allocation10 + $0x1c90] sm:$0xff] }
 0x727   :  { %14944 = vmatpush2.bf16.msra.mxu1 %v17827_v9  ;;  %v8792_v9 = vld [vmem:[#allocation10 + $0x1cf0] sm:$0xff] }
 0x728   :  { %14995 = vmatprep.subr.bf16.mxu1 %v18076_v12  ;;  %v14660_v5 = vpop.f32.mrf.mxu0  ;;  %14905 = vmatmul.mubr.bf16.vlgmr.msra.gmra.mxu0 %v18972_v27  ;;  %v18051_v12 = vcombine.low %v8796_v1, %v8800_v51  ;;  %v18044_v39 = vcombine.high %v8788_v58, %v8792_v9  ;;  %v18043_v16 = vcombine.low %v8788_v58, %v8792_v9  ;;  %v8756_v51 = vld [vmem:[#allocation10 + $0x1bd0] sm:$0xff] }
 0x729   :  { %v14661_v14 = vadd.f32 %v14660_v5, %v19074_v50  ;;  %14955 = vmatpush1.bf16.msra.mxu0 %v17947_v45  ;;  %14986 = vmatprep.mubr.bf16.mxu0 %v18976_v40  ;;  %v18060_v50 = vcombine.high %v8804_v15, %v8808_v38  ;;  %v8652_v45 = vld [vmem:[#allocation10 + $0x1890] sm:$0xff] }
 0x72a   :  { %v14701_v35 = vpop.f32.mrf.mxu1  ;;  %14946 = vmatmul.mubr.bf16.vlgmr.msra.gmra.mxu1 %v18974_v34  ;;  %v14662_v8 = vpop.f32.mrf.mxu0  ;;  %14956 = vmatprep.subr.bf16.mxu0 %v17940_v52  ;;  %v17915_v52 = vcombine.low %v8660_v11, %v8664_v56  ;;  %v17908_v43 = vcombine.high %v8652_v45, %v8656_v41  ;;  %v8648_v15 = vld [vmem:[#allocation10 + $0x1870] sm:$0xff] }
 0x72b   :  { %14996 = vmatpush1.bf16.msra.mxu1 %v18075_v47  ;;  %v19084_v32 = vadd.f32 %v14701_v35, %v14661_v14  ;;  %15027 = vmatprep.mubr.bf16.mxu1 %v18991_v0  ;;  %v14663_v7 = vadd.f32 %v14662_v8, %v19078_v26  ;;  %v8784_v47 = vld [vmem:[#allocation10 + $0x1cb0] sm:$0xff]  ;;  %v17907_v35 = vcombine.low %v8652_v45, %v8656_v41 }
 0x72c   :  { %v14703_v29 = vpop.f32.mrf.mxu1  ;;  %v14664_v44 = vpop.f32.mrf.mxu0  ;;  %14997 = vmatprep.subr.bf16.mxu1 %v18068_v30  ;;  %v18036_v5 = vcombine.high %v8780_v60, %v8784_v47  ;;  %v8644_v30 = vld [vmem:[#allocation10 + $0x1850] sm:$0xff] }
 0x72d   :  { %v19088_v2 = vadd.f32 %v14703_v29, %v14663_v7  ;;  %14957 = vmatpush1.bf16.msra.mxu0 %v17939_v17  ;;  %v8772_v38 = vld [vmem:[#allocation10 + $0x1c50] sm:$0xff]  ;;  %v18035_v17 = vcombine.low %v8780_v60, %v8784_v47  ;;  %v17900_v8 = vcombine.high %v8644_v30, %v8648_v15  ;;  %v17899_v24 = vcombine.low %v8644_v30, %v8648_v15 }
 0x72e   :  { %v14705_v28 = vpop.f32.mrf.mxu1  ;;  %v14665_v20 = vpop.f32.mrf.mxu0  ;;  %14958 = vmatprep.subr.bf16.mxu0 %v17932_v49  ;;  %v8776_v14 = vld [vmem:[#allocation10 + $0x1c70] sm:$0xff] }
 0x72f   :  { %14998 = vmatpush1.bf16.msra.mxu1 %v18067_v21  ;;  %v18028_v21 = vcombine.high %v8772_v38, %v8776_v14  ;;  %v8636_v49 = vld [vmem:[#allocation10 + $0x1810] sm:$0xff]  ;;  %v18027_v18 = vcombine.low %v8772_v38, %v8776_v14 }
 0x730   :  { %v14706_v26 = vpop.f32.mrf.mxu1  ;;  %14999 = vmatprep.subr.bf16.mxu1 %v18060_v50  ;;  %v8640_v7 = vld [vmem:[#allocation10 + $0x1830] sm:$0xff] }
 0x731   :  { %14959 = vmatpush1.bf16.msra.mxu0 %v17931_v25  ;;  %v8764_v29 = vld [vmem:[#allocation10 + $0x1c10] sm:$0xff]  ;;  %v17892_v44 = vcombine.high %v8636_v49, %v8640_v7 }
 0x732   :  { %14960 = vmatprep.subr.bf16.mxu0 %v17924_v13  ;;  %v8768_v50 = vld [vmem:[#allocation10 + $0x1c30] sm:$0xff] }
 0x733   :  { %15000 = vmatpush1.bf16.msra.mxu1 %v18059_v63  ;;  %v18020_v1 = vcombine.high %v8764_v29, %v8768_v50  ;;  %v8760_v28 = vld [vmem:[#allocation10 + $0x1bf0] sm:$0xff]  ;;  %v17891_v63 = vcombine.low %v8636_v49, %v8640_v7  ;;  %v18019_v13 = vcombine.low %v8764_v29, %v8768_v50 }
 0x734   :  { %15001 = vmatprep.subr.bf16.mxu1 %v18052_v57  ;;  %v8884_v25 = vld [vmem:[#allocation10 + $0x1fd0] sm:$0xff]  ;;  %v18012_v26 = vcombine.high %v8756_v51, %v8760_v28 }
 0x735   :  { %14961 = vmatpush1.bf16.msra.mxu0 %v17923_v23  ;;  %v8888_v20 = vld [vmem:[#allocation10 + $0x1ff0] sm:$0xff]  ;;  %v18011_v23 = vcombine.low %v8756_v51, %v8760_v28 }
 0x736   :  { %14962 = vmatprep.subr.bf16.mxu0 %v17916_v55  ;;  %v18140_v57 = vcombine.high %v8884_v25, %v8888_v20  ;;  %v8748_v11 = vld [vmem:[#allocation10 + $0x1b90] sm:$0xff] }
 0x737   :  { %15002 = vmatpush1.bf16.msra.mxu1 %v18051_v12  ;;  %v8752_v56 = vld [vmem:[#allocation10 + $0x1bb0] sm:$0xff]  ;;  %v18139_v12 = vcombine.low %v8884_v25, %v8888_v20 }
 0x738   :  { %15003 = vmatprep.subr.bf16.mxu1 %v18044_v39  ;;  %v8876_v58 = vld [vmem:[#allocation10 + $0x1f90] sm:$0xff]  ;;  %v18004_v55 = vcombine.high %v8748_v11, %v8752_v56 }
 0x739   :  { %14963 = vmatpush1.bf16.msra.mxu0 %v17915_v52  ;;  %v8880_v9 = vld [vmem:[#allocation10 + $0x1fb0] sm:$0xff]  ;;  %v18003_v52 = vcombine.low %v8748_v11, %v8752_v56 }
 0x73a   :  { %14964 = vmatprep.subr.bf16.mxu0 %v17908_v43  ;;  %v18132_v39 = vcombine.high %v8876_v58, %v8880_v9  ;;  %v8740_v45 = vld [vmem:[#allocation10 + $0x1b50] sm:$0xff] }
 0x73b   :  { %15004 = vmatpush1.bf16.msra.mxu1 %v18043_v16  ;;  %v8744_v41 = vld [vmem:[#allocation10 + $0x1b70] sm:$0xff]  ;;  %v18131_v16 = vcombine.low %v8876_v58, %v8880_v9 }
 0x73c   :  { %15005 = vmatprep.subr.bf16.mxu1 %v18036_v5  ;;  %v8868_v60 = vld [vmem:[#allocation10 + $0x1f50] sm:$0xff]  ;;  %v17996_v43 = vcombine.high %v8740_v45, %v8744_v41 }
 0x73d   :  { %14965 = vmatpush1.bf16.msra.mxu0 %v17907_v35  ;;  %v8872_v47 = vld [vmem:[#allocation10 + $0x1f70] sm:$0xff]  ;;  %v17995_v35 = vcombine.low %v8740_v45, %v8744_v41 }
 0x73e   :  { %14966 = vmatprep.subr.bf16.mxu0 %v17900_v8  ;;  %v18124_v5 = vcombine.high %v8868_v60, %v8872_v47  ;;  %v8732_v30 = vld [vmem:[#allocation10 + $0x1b10] sm:$0xff] }
 0x73f   :  { %15006 = vmatpush1.bf16.msra.mxu1 %v18035_v17  ;;  %v8736_v15 = vld [vmem:[#allocation10 + $0x1b30] sm:$0xff]  ;;  %v18123_v17 = vcombine.low %v8868_v60, %v8872_v47 }
 0x740   :  { %15007 = vmatprep.subr.bf16.mxu1 %v18028_v21  ;;  %v8860_v38 = vld [vmem:[#allocation10 + $0x1f10] sm:$0xff]  ;;  %v17988_v8 = vcombine.high %v8732_v30, %v8736_v15 }
 0x741   :  { %14967 = vmatpush1.bf16.msra.mxu0 %v17899_v24  ;;  %v8864_v14 = vld [vmem:[#allocation10 + $0x1f30] sm:$0xff]  ;;  %v17987_v24 = vcombine.low %v8732_v30, %v8736_v15  ;;  %v7925_v30 = vld [vmem:[#allocation10 + $0x1d8] sm:$0xff] }
 0x742   :  { %14968 = vmatprep.subr.bf16.mxu0 %v17892_v44  ;;  %v18116_v21 = vcombine.high %v8860_v38, %v8864_v14  ;;  %v8724_v49 = vld [vmem:[#allocation10 + $0x1ad0] sm:$0xff]  ;;  %v7929_v15 = vld [vmem:[#allocation10 + $0x1f8] sm:$0xff] }
 0x743   :  { %15008 = vmatpush1.bf16.msra.mxu1 %v18027_v18  ;;  %v8728_v7 = vld [vmem:[#allocation10 + $0x1af0] sm:$0xff]  ;;  %v18115_v18 = vcombine.low %v8860_v38, %v8864_v14  ;;  %v8053_v38 = vld [vmem:[#allocation10 + $0x5d8] sm:$0xff] }
 0x744   :  { %15009 = vmatprep.subr.bf16.mxu1 %v18020_v1  ;;  %v8852_v29 = vld [vmem:[#allocation10 + $0x1ed0] sm:$0xff]  ;;  %v17980_v44 = vcombine.high %v8724_v49, %v8728_v7  ;;  %v8057_v14 = vld [vmem:[#allocation10 + $0x5f8] sm:$0xff] }
 0x745   :  { %14969 = vmatpush1.bf16.msra.mxu0 %v17891_v63  ;;  %v8856_v50 = vld [vmem:[#allocation10 + $0x1ef0] sm:$0xff]  ;;  %v17979_v63 = vcombine.low %v8724_v49, %v8728_v7  ;;  %v7917_v49 = vld [vmem:[#allocation10 + $0x198] sm:$0xff] }
 0x746   :  { %14970 = vmatprep.subr.bf16.mxu0 %v18012_v26  ;;  %v18108_v1 = vcombine.high %v8852_v29, %v8856_v50  ;;  %v8716_v51 = vld [vmem:[#allocation10 + $0x1a90] sm:$0xff]  ;;  %v7921_v7 = vld [vmem:[#allocation10 + $0x1b8] sm:$0xff] }
 0x747   :  { %15010 = vmatpush1.bf16.msra.mxu1 %v18019_v13  ;;  %v8720_v28 = vld [vmem:[#allocation10 + $0x1ab0] sm:$0xff]  ;;  %v18107_v13 = vcombine.low %v8852_v29, %v8856_v50  ;;  %v18383_v29 = vld [vmem:[#allocation11] sm:$0xff] }
 0x748   :  { %15011 = vmatprep.subr.bf16.mxu1 %v18140_v57  ;;  %v8844_v25 = vld [vmem:[#allocation10 + $0x1e90] sm:$0xff]  ;;  %v17972_v26 = vcombine.high %v8716_v51, %v8720_v28  ;;  %v8911_v50 = vrot.slane %v18383_v29, %v18910_v46 }
 0x749   :  { %14971 = vmatpush2.bf16.msra.mxu0 %v18011_v23  ;;  %v8848_v20 = vld [vmem:[#allocation10 + $0x1eb0] sm:$0xff]  ;;  %v17971_v23 = vcombine.low %v8716_v51, %v8720_v28  ;;  %v8915_v51 = vrot.slane %v18383_v29, %v18866_v4  ;;  %v17174_v28 = vcombine.high %v7917_v49, %v7921_v7 }
 0x74a   :  { %14972 = vmatprep.subr.bf16.mxu0 %v18004_v55  ;;  %v18100_v57 = vcombine.high %v8844_v25, %v8848_v20  ;;  %v8708_v11 = vld [vmem:[#allocation10 + $0x1a50] sm:$0xff] }
 0x74b   :  { %15012 = vmatpush2.bf16.msra.mxu1 %v18139_v12  ;;  %v8712_v56 = vld [vmem:[#allocation10 + $0x1a70] sm:$0xff]  ;;  %v18099_v12 = vcombine.low %v8844_v25, %v8848_v20  ;;  %v7909_v25 = vld [vmem:[#allocation10 + $0x158] sm:$0xff] }
 0x74c   :  { %15013 = vmatprep.subr.bf16.mxu1 %v18132_v39  ;;  %v8836_v58 = vld [vmem:[#allocation10 + $0x1e50] sm:$0xff]  ;;  %v17964_v55 = vcombine.high %v8708_v11, %v8712_v56  ;;  %v7913_v20 = vld [vmem:[#allocation10 + $0x178] sm:$0xff] }
 0x74d   :  { %14973 = vmatpush2.bf16.msra.mxu0 %v18003_v52  ;;  %v8840_v9 = vld [vmem:[#allocation10 + $0x1e70] sm:$0xff]  ;;  %v17963_v52 = vcombine.low %v8708_v11, %v8712_v56  ;;  %v17173_v56 = vcombine.low %v7917_v49, %v7921_v7 }
 0x74e   :  { %14974 = vmatprep.subr.bf16.mxu0 %v17996_v43  ;;  %v18092_v39 = vcombine.high %v8836_v58, %v8840_v9  ;;  %v8700_v45 = vld [vmem:[#allocation10 + $0x1a10] sm:$0xff] }
 0x74f   :  { %15014 = vmatpush2.bf16.msra.mxu1 %v18131_v16  ;;  %v8704_v41 = vld [vmem:[#allocation10 + $0x1a30] sm:$0xff]  ;;  %v18091_v16 = vcombine.low %v8836_v58, %v8840_v9  ;;  %v17166_v9 = vcombine.high %v7909_v25, %v7913_v20 }
 0x750   :  { %15015 = vmatprep.subr.bf16.mxu1 %v18124_v5  ;;  %v8828_v60 = vld [vmem:[#allocation10 + $0x1e10] sm:$0xff]  ;;  %v17956_v43 = vcombine.high %v8700_v45, %v8704_v41 }
 0x751   :  { %14975 = vmatpush2.bf16.msra.mxu0 %v17995_v35  ;;  %v8832_v47 = vld [vmem:[#allocation10 + $0x1e30] sm:$0xff]  ;;  %v17955_v35 = vcombine.low %v8700_v45, %v8704_v41  ;;  %v7901_v45 = vld [vmem:[#allocation10 + $0x118] sm:$0xff] }
 0x752   :  { %14976 = vmatprep.subr.bf16.mxu0 %v17988_v8  ;;  %v18084_v5 = vcombine.high %v8828_v60, %v8832_v47  ;;  %v17182_v8 = vcombine.high %v7925_v30, %v7929_v15  ;;  %v7905_v41 = vld [vmem:[#allocation10 + $0x138] sm:$0xff] }
 0x753   :  { %15016 = vmatpush2.bf16.msra.mxu1 %v18123_v17  ;;  %v18083_v17 = vcombine.low %v8828_v60, %v8832_v47  ;;  %v8029_v47 = vld [vmem:[#allocation10 + $0x518] sm:$0xff] }
 0x754   :  { %15017 = vmatprep.subr.bf16.mxu1 %v18116_v21  ;;  %v17310_v21 = vcombine.high %v8053_v38, %v8057_v14 }
 0x755   :  { %14977 = vmatpush2.bf16.msra.mxu0 %v17987_v24  ;;  %v17181_v24 = vcombine.low %v7925_v30, %v7929_v15 }
 0x756   :  { %14978 = vmatprep.subr.bf16.mxu0 %v17980_v44  ;;  %v8049_v44 = vld [vmem:[#allocation10 + $0x5b8] sm:$0xff] }
 0x757   :  { %15018 = vmatpush2.bf16.msra.mxu1 %v18115_v18  ;;  %v8045_v18 = vld [vmem:[#allocation10 + $0x598] sm:$0xff] }
 0x758   :  { %15019 = vmatprep.subr.bf16.mxu1 %v18108_v1  ;;  %v17309_v1 = vcombine.low %v8053_v38, %v8057_v14  ;;  %v17301_v4 = vcombine.low %v8045_v18, %v8049_v44  ;;  %v7893_v14 = vld [vmem:[#allocation10 + $0xd8] sm:$0xff] }
 0x759   :  { %14979 = vmatpush2.bf16.msra.mxu0 %v17979_v63 }
 0x75a   :  { %14980 = vmatprep.subr.bf16.mxu0 %v17972_v26  ;;  %v8037_v26 = vld [vmem:[#allocation10 + $0x558] sm:$0xff] }
 0x75b   :  { %15020 = vmatpush2.bf16.msra.mxu1 %v18107_v13  ;;  %v17302_v13 = vcombine.high %v8045_v18, %v8049_v44  ;;  %v8013_v18 = vld [vmem:[#allocation10 + $0x498] sm:$0xff] }
 0x75c   :  { %15021 = vmatprep.subr.bf16.mxu1 %v18100_v57  ;;  %v8041_v57 = vld [vmem:[#allocation10 + $0x578] sm:$0xff] }
 0x75d   :  { %14981 = vmatpush2.bf16.msra.mxu0 %v17971_v23  ;;  %v17293_v30 = vcombine.low %v8037_v26, %v8041_v57  ;;  %v8017_v44 = vld [vmem:[#allocation10 + $0x4b8] sm:$0xff] }
 0x75e   :  { %14982 = vmatprep.subr.bf16.mxu0 %v17964_v55 }
 0x75f   :  { %15022 = vmatpush2.bf16.msra.mxu1 %v18099_v12 }
 0x760   :  { %15023 = vmatprep.subr.bf16.mxu1 %v18092_v39  ;;  %v17294_v39 = vcombine.high %v8037_v26, %v8041_v57  ;;  %v8009_v26 = vld [vmem:[#allocation10 + $0x478] sm:$0xff] }
 0x761   :  { %14983 = vmatpush2.bf16.msra.mxu0 %v17963_v52  ;;  %v8033_v52 = vld [vmem:[#allocation10 + $0x538] sm:$0xff] }
 0x762   :  { %14984 = vmatprep.subr.bf16.mxu0 %v17956_v43  ;;  %v17165_v43 = vcombine.low %v7909_v25, %v7913_v20  ;;  %v17286_v38 = vcombine.high %v8029_v47, %v8033_v52  ;;  %v17285_v49 = vcombine.low %v8029_v47, %v8033_v52  ;;  %v17270_v25 = vcombine.high %v8013_v18, %v8017_v44  ;;  %v7877_v20 = vld [vmem:[#allocation10 + $0x58] sm:$0xff] }
 0x763   :  { %15024 = vmatpush2.bf16.msra.mxu1 %v18091_v16  ;;  %v7993_v47 = vld [vmem:[#allocation10 + $0x3f8] sm:$0xff] }
 0x764   :  { %15025 = vmatprep.subr.bf16.mxu1 %v18084_v5  ;;  %v8117_v52 = vld [vmem:[#allocation10 + $0x7d8] sm:$0xff] }
 0x765   :  { %14985 = vmatpush2.bf16.msra.mxu0 %v17955_v35  ;;  %v7897_v35 = vld [vmem:[#allocation10 + $0xf8] sm:$0xff] }
 0x766   :  { %15036 = vmatprep.subr.bf16.mxu0 %v17182_v8  ;;  %v8025_v8 = vld [vmem:[#allocation10 + $0x4f8] sm:$0xff]  ;;  %v17150_v7 = vcombine.high %v7893_v14, %v7897_v35 }
 0x767   :  { %15026 = vmatpush2.bf16.msra.mxu1 %v18083_v17  ;;  %v8021_v17 = vld [vmem:[#allocation10 + $0x4d8] sm:$0xff] }
 0x768   :  { %15077 = vmatprep.subr.bf16.mxu1 %v17310_v21  ;;  %v14742_v63 = vpop.f32.mrf.mxu0  ;;  %14987 = vmatmul.mubr.bf16.vlgmr.msra.gmra.mxu0 %v19007_v42  ;;  %v17157_v21 = vcombine.low %v7901_v45, %v7905_v41  ;;  %v17278_v29 = vcombine.high %v8021_v17, %v8025_v8 }
 0x769   :  { %v14743_v11 = vadd.f32 %v14742_v63, %v8911_v50  ;;  %15037 = vmatpush1.bf16.msra.mxu0 %v17181_v24  ;;  %15068 = vmatprep.mubr.bf16.mxu0 %v18847_v62  ;;  %v7885_v50 = vld [vmem:[#allocation10 + $0x98] sm:$0xff] }
 0x76a   :  { %v14783_v46 = vpop.f32.mrf.mxu1  ;;  %15028 = vmatmul.mubr.bf16.vlgmr.msra.gmra.mxu1 %v19009_v19  ;;  %v14744_v58 = vpop.f32.mrf.mxu0  ;;  %15038 = vmatprep.subr.bf16.mxu0 %v17174_v28  ;;  %v7889_v24 = vld [vmem:[#allocation10 + $0xb8] sm:$0xff] }
 0x76b   :  { %15078 = vmatpush1.bf16.msra.mxu1 %v17309_v1  ;;  %v19095_v23 = vadd.f32 %v14783_v46, %v14743_v11  ;;  %15109 = vmatprep.mubr.bf16.mxu1 %v18850_v6  ;;  %v14745_v12 = vadd.f32 %v14744_v58, %v8915_v51  ;;  %v17158_v6 = vcombine.high %v7901_v45, %v7905_v41  ;;  %v7881_v63 = vld [vmem:[#allocation10 + $0x78] sm:$0xff] }
 0x76c   :  { %v14785_v55 = vpop.f32.mrf.mxu1  ;;  %v14746_v60 = vpop.f32.mrf.mxu0  ;;  %15079 = vmatprep.subr.bf16.mxu1 %v17302_v13  ;;  %v17149_v1 = vcombine.low %v7893_v14, %v7897_v35  ;;  %v17277_v51 = vcombine.low %v8021_v17, %v8025_v8  ;;  %v17142_v28 = vcombine.high %v7885_v50, %v7889_v24  ;;  %v8005_v13 = vld [vmem:[#allocation10 + $0x458] sm:$0xff]  ;;  %v17141_v57 = vcombine.low %v7885_v50, %v7889_v24 }
 0x76d   :  { %v19098_v16 = vadd.f32 %v14785_v55, %v14745_v12  ;;  %15039 = vmatpush1.bf16.msra.mxu0 %v17173_v56  ;;  %v17269_v11 = vcombine.low %v8013_v18, %v8017_v44  ;;  %v17134_v46 = vcombine.high %v7877_v20, %v7881_v63  ;;  %v17262_v56 = vcombine.high %v8005_v13, %v8009_v26  ;;  %v7869_v58 = vld [vmem:[#allocation10 + $0x18] sm:$0xff] }
 0x76e   :  { %v14787_v62 = vpop.f32.mrf.mxu1  ;;  %v14747_v5 = vpop.f32.mrf.mxu0  ;;  %15040 = vmatprep.subr.bf16.mxu0 %v17166_v9  ;;  %v7997_v9 = vld [vmem:[#allocation10 + $0x418] sm:$0xff]  ;;  %v17133_v55 = vcombine.low %v7877_v20, %v7881_v63 }
 0x76f   :  { %15080 = vmatpush1.bf16.msra.mxu1 %v17301_v4  ;;  %v7873_v4 = vld [vmem:[#allocation10 + $0x38] sm:$0xff] }
 0x770   :  { %v14788_v15 = vpop.f32.mrf.mxu1  ;;  %15081 = vmatprep.subr.bf16.mxu1 %v17294_v39  ;;  %v8001_v12 = vld [vmem:[#allocation10 + $0x438] sm:$0xff]  ;;  %v17261_v39 = vcombine.low %v8005_v13, %v8009_v26  ;;  %v17126_v45 = vcombine.high %v7869_v58, %v7873_v4 }
 0x771   :  { %15041 = vmatpush1.bf16.msra.mxu0 %v17165_v43  ;;  %v17254_v41 = vcombine.high %v7997_v9, %v8001_v12  ;;  %v7989_v60 = vld [vmem:[#allocation10 + $0x3d8] sm:$0xff]  ;;  %v17125_v43 = vcombine.low %v7869_v58, %v7873_v4  ;;  %v17253_v5 = vcombine.low %v7997_v9, %v8001_v12 }
 0x772   :  { %15042 = vmatprep.subr.bf16.mxu0 %v17158_v6  ;;  %v8121_v62 = vld [vmem:[#allocation10 + $0x7f8] sm:$0xff]  ;;  %v17245_v17 = vcombine.low %v7989_v60, %v7993_v47 }
 0x773   :  { %15082 = vmatpush1.bf16.msra.mxu1 %v17293_v30  ;;  %v17246_v30 = vcombine.high %v7989_v60, %v7993_v47  ;;  %v17374_v6 = vcombine.high %v8117_v52, %v8121_v62  ;;  %v7981_v15 = vld [vmem:[#allocation10 + $0x398] sm:$0xff]  ;;  %v17373_v8 = vcombine.low %v8117_v52, %v8121_v62 }
 0x774   :  { %15083 = vmatprep.subr.bf16.mxu1 %v17286_v38  ;;  %v7985_v38 = vld [vmem:[#allocation10 + $0x3b8] sm:$0xff] }
 0x775   :  { %15043 = vmatpush1.bf16.msra.mxu0 %v17157_v21  ;;  %v8109_v14 = vld [vmem:[#allocation10 + $0x798] sm:$0xff]  ;;  %v17238_v21 = vcombine.high %v7981_v15, %v7985_v38  ;;  %v17237_v18 = vcombine.low %v7981_v15, %v7985_v38 }
 0x776   :  { %15044 = vmatprep.subr.bf16.mxu0 %v17150_v7  ;;  %v8113_v35 = vld [vmem:[#allocation10 + $0x7b8] sm:$0xff] }
 0x777   :  { %15084 = vmatpush1.bf16.msra.mxu1 %v17285_v49  ;;  %v17366_v49 = vcombine.high %v8109_v14, %v8113_v35  ;;  %v7973_v7 = vld [vmem:[#allocation10 + $0x358] sm:$0xff]  ;;  %v17365_v44 = vcombine.low %v8109_v14, %v8113_v35 }
 0x778   :  { %15085 = vmatprep.subr.bf16.mxu1 %v17278_v29  ;;  %v7977_v29 = vld [vmem:[#allocation10 + $0x378] sm:$0xff] }
 0x779   :  { %15045 = vmatpush1.bf16.msra.mxu0 %v17149_v1  ;;  %v8101_v50 = vld [vmem:[#allocation10 + $0x758] sm:$0xff]  ;;  %v17230_v1 = vcombine.high %v7973_v7, %v7977_v29  ;;  %v17229_v13 = vcombine.low %v7973_v7, %v7977_v29 }
 0x77a   :  { %15046 = vmatprep.subr.bf16.mxu0 %v17142_v28  ;;  %v8105_v24 = vld [vmem:[#allocation10 + $0x778] sm:$0xff] }
 0x77b   :  { %15086 = vmatpush1.bf16.msra.mxu1 %v17277_v51  ;;  %v17358_v51 = vcombine.high %v8101_v50, %v8105_v24  ;;  %v7965_v28 = vld [vmem:[#allocation10 + $0x318] sm:$0xff]  ;;  %v17357_v26 = vcombine.low %v8101_v50, %v8105_v24 }
 0x77c   :  { %15087 = vmatprep.subr.bf16.mxu1 %v17270_v25  ;;  %v7969_v25 = vld [vmem:[#allocation10 + $0x338] sm:$0xff] }
 0x77d   :  { %15047 = vmatpush1.bf16.msra.mxu0 %v17141_v57  ;;  %v8093_v20 = vld [vmem:[#allocation10 + $0x718] sm:$0xff]  ;;  %v17222_v57 = vcombine.high %v7965_v28, %v7969_v25  ;;  %v17221_v9 = vcombine.low %v7965_v28, %v7969_v25 }
 0x77e   :  { %15048 = vmatprep.subr.bf16.mxu0 %v17134_v46  ;;  %v8097_v63 = vld [vmem:[#allocation10 + $0x738] sm:$0xff] }
 0x77f   :  { %15088 = vmatpush1.bf16.msra.mxu1 %v17269_v11  ;;  %v17350_v11 = vcombine.high %v8093_v20, %v8097_v63  ;;  %v7957_v46 = vld [vmem:[#allocation10 + $0x2d8] sm:$0xff]  ;;  %v17349_v12 = vcombine.low %v8093_v20, %v8097_v63 }
 0x780   :  { %15089 = vmatprep.subr.bf16.mxu1 %v17262_v56  ;;  %v7961_v56 = vld [vmem:[#allocation10 + $0x2f8] sm:$0xff] }
 0x781   :  { %15049 = vmatpush1.bf16.msra.mxu0 %v17133_v55  ;;  %v8085_v58 = vld [vmem:[#allocation10 + $0x6d8] sm:$0xff]  ;;  %v17214_v55 = vcombine.high %v7957_v46, %v7961_v56  ;;  %v17213_v52 = vcombine.low %v7957_v46, %v7961_v56 }
 0x782   :  { %15050 = vmatprep.subr.bf16.mxu0 %v17126_v45  ;;  %v8089_v4 = vld [vmem:[#allocation10 + $0x6f8] sm:$0xff] }
 0x783   :  { %15090 = vmatpush1.bf16.msra.mxu1 %v17261_v39  ;;  %v17342_v39 = vcombine.high %v8085_v58, %v8089_v4  ;;  %v7949_v45 = vld [vmem:[#allocation10 + $0x298] sm:$0xff]  ;;  %v17341_v62 = vcombine.low %v8085_v58, %v8089_v4 }
 0x784   :  { %15091 = vmatprep.subr.bf16.mxu1 %v17254_v41  ;;  %v7953_v41 = vld [vmem:[#allocation10 + $0x2b8] sm:$0xff] }
 0x785   :  { %15051 = vmatpush1.bf16.msra.mxu0 %v17125_v43  ;;  %v8077_v60 = vld [vmem:[#allocation10 + $0x698] sm:$0xff]  ;;  %v17206_v43 = vcombine.high %v7949_v45, %v7953_v41  ;;  %v17205_v14 = vcombine.low %v7949_v45, %v7953_v41 }
 0x786   :  { %15052 = vmatprep.subr.bf16.mxu0 %v17246_v30  ;;  %v8081_v47 = vld [vmem:[#allocation10 + $0x6b8] sm:$0xff] }
 0x787   :  { %15092 = vmatpush1.bf16.msra.mxu1 %v17253_v5  ;;  %v17334_v5 = vcombine.high %v8077_v60, %v8081_v47  ;;  %v7941_v30 = vld [vmem:[#allocation10 + $0x258] sm:$0xff]  ;;  %v17333_v35 = vcombine.low %v8077_v60, %v8081_v47 }
 0x788   :  { %15093 = vmatprep.subr.bf16.mxu1 %v17374_v6  ;;  %v7945_v6 = vld [vmem:[#allocation10 + $0x278] sm:$0xff] }
 0x789   :  { %15053 = vmatpush2.bf16.msra.mxu0 %v17245_v17  ;;  %v8069_v15 = vld [vmem:[#allocation10 + $0x658] sm:$0xff]  ;;  %v17198_v17 = vcombine.high %v7941_v30, %v7945_v6  ;;  %v17197_v50 = vcombine.low %v7941_v30, %v7945_v6 }
 0x78a   :  { %15054 = vmatprep.subr.bf16.mxu0 %v17238_v21  ;;  %v8073_v38 = vld [vmem:[#allocation10 + $0x678] sm:$0xff] }
 0x78b   :  { %15094 = vmatpush2.bf16.msra.mxu1 %v17373_v8  ;;  %v17326_v8 = vcombine.high %v8069_v15, %v8073_v38  ;;  %v7933_v21 = vld [vmem:[#allocation10 + $0x218] sm:$0xff]  ;;  %v17325_v24 = vcombine.low %v8069_v15, %v8073_v38 }
 0x78c   :  { %15095 = vmatprep.subr.bf16.mxu1 %v17366_v49  ;;  %v7937_v49 = vld [vmem:[#allocation10 + $0x238] sm:$0xff] }
 0x78d   :  { %15055 = vmatpush2.bf16.msra.mxu0 %v17237_v18  ;;  %v8061_v7 = vld [vmem:[#allocation10 + $0x618] sm:$0xff]  ;;  %v17190_v18 = vcombine.high %v7933_v21, %v7937_v49  ;;  %v17189_v20 = vcombine.low %v7933_v21, %v7937_v49 }
 0x78e   :  { %15056 = vmatprep.subr.bf16.mxu0 %v17230_v1  ;;  %v8065_v29 = vld [vmem:[#allocation10 + $0x638] sm:$0xff] }
 0x78f   :  { %15096 = vmatpush2.bf16.msra.mxu1 %v17365_v44  ;;  %v17318_v44 = vcombine.high %v8061_v7, %v8065_v29  ;;  %v8181_v1 = vld [vmem:[#allocation10 + $0x9d8] sm:$0xff]  ;;  %v17317_v63 = vcombine.low %v8061_v7, %v8065_v29 }
 0x790   :  { %15097 = vmatprep.subr.bf16.mxu1 %v17358_v51  ;;  %v8185_v51 = vld [vmem:[#allocation10 + $0x9f8] sm:$0xff] }
 0x791   :  { %15057 = vmatpush2.bf16.msra.mxu0 %v17229_v13  ;;  %v8309_v28 = vld [vmem:[#allocation10 + $0xdd8] sm:$0xff]  ;;  %v17438_v13 = vcombine.high %v8181_v1, %v8185_v51  ;;  %v17437_v46 = vcombine.low %v8181_v1, %v8185_v51 }
 0x792   :  { %15058 = vmatprep.subr.bf16.mxu0 %v17222_v57  ;;  %v8313_v25 = vld [vmem:[#allocation10 + $0xdf8] sm:$0xff] }
 0x793   :  { %15098 = vmatpush2.bf16.msra.mxu1 %v17357_v26  ;;  %v17566_v26 = vcombine.high %v8309_v28, %v8313_v25  ;;  %v8173_v57 = vld [vmem:[#allocation10 + $0x998] sm:$0xff]  ;;  %v17565_v4 = vcombine.low %v8309_v28, %v8313_v25 }
 0x794   :  { %15099 = vmatprep.subr.bf16.mxu1 %v17350_v11  ;;  %v8177_v11 = vld [vmem:[#allocation10 + $0x9b8] sm:$0xff] }
 0x795   :  { %15059 = vmatpush2.bf16.msra.mxu0 %v17221_v9  ;;  %v8301_v56 = vld [vmem:[#allocation10 + $0xd98] sm:$0xff]  ;;  %v17430_v9 = vcombine.high %v8173_v57, %v8177_v11 }
 0x796   :  { %15060 = vmatprep.subr.bf16.mxu0 %v17214_v55  ;;  %v8305_v58 = vld [vmem:[#allocation10 + $0xdb8] sm:$0xff] }
 0x797   :  { %15100 = vmatpush2.bf16.msra.mxu1 %v17349_v12  ;;  %v8165_v12 = vld [vmem:[#allocation10 + $0x958] sm:$0xff]  ;;  %v17558_v45 = vcombine.high %v8301_v56, %v8305_v58 }
 0x798   :  { %15101 = vmatprep.subr.bf16.mxu1 %v17342_v39  ;;  %v8169_v55 = vld [vmem:[#allocation10 + $0x978] sm:$0xff] }
 0x799   :  { %15061 = vmatpush2.bf16.msra.mxu0 %v17213_v52  ;;  %v8293_v41 = vld [vmem:[#allocation10 + $0xd58] sm:$0xff]  ;;  %v17422_v30 = vcombine.high %v8165_v12, %v8169_v55  ;;  %v17421_v21 = vcombine.low %v8165_v12, %v8169_v55 }
 0x79a   :  { %15062 = vmatprep.subr.bf16.mxu0 %v17206_v43  ;;  %v8297_v60 = vld [vmem:[#allocation10 + $0xd78] sm:$0xff] }
 0x79b   :  { %15102 = vmatpush2.bf16.msra.mxu1 %v17341_v62  ;;  %v17429_v62 = vcombine.low %v8173_v57, %v8177_v11  ;;  %v8157_v38 = vld [vmem:[#allocation10 + $0x918] sm:$0xff] }
 0x79c   :  { %15103 = vmatprep.subr.bf16.mxu1 %v17334_v5  ;;  %v17557_v5 = vcombine.low %v8301_v56, %v8305_v58  ;;  %v8133_v58 = vld [vmem:[#allocation10 + $0x858] sm:$0xff] }
 0x79d   :  { %15063 = vmatpush2.bf16.msra.mxu0 %v17205_v14  ;;  %v8161_v14 = vld [vmem:[#allocation10 + $0x938] sm:$0xff] }
 0x79e   :  { %15064 = vmatprep.subr.bf16.mxu0 %v17198_v17  ;;  %v8289_v17 = vld [vmem:[#allocation10 + $0xd38] sm:$0xff]  ;;  %v17414_v7 = vcombine.high %v8157_v38, %v8161_v14  ;;  %v17413_v1 = vcombine.low %v8157_v38, %v8161_v14 }
 0x79f   :  { %15104 = vmatpush2.bf16.msra.mxu1 %v17333_v35  ;;  %v8285_v35 = vld [vmem:[#allocation10 + $0xd18] sm:$0xff] }
 0x7a0   :  { %15105 = vmatprep.subr.bf16.mxu1 %v17326_v8  ;;  %v17542_v29 = vcombine.high %v8285_v35, %v8289_v17  ;;  %v17541_v51 = vcombine.low %v8285_v35, %v8289_v17  ;;  %v8265_v12 = vld [vmem:[#allocation10 + $0xc78] sm:$0xff] }
 0x7a1   :  { %15065 = vmatpush2.bf16.msra.mxu0 %v17197_v50  ;;  %v8149_v50 = vld [vmem:[#allocation10 + $0x8d8] sm:$0xff] }
 0x7a2   :  { %15066 = vmatprep.subr.bf16.mxu0 %v17190_v18  ;;  %v8277_v18 = vld [vmem:[#allocation10 + $0xcd8] sm:$0xff] }
 0x7a3   :  { %15106 = vmatpush2.bf16.msra.mxu1 %v17325_v24  ;;  %v8153_v24 = vld [vmem:[#allocation10 + $0x8f8] sm:$0xff] }
 0x7a4   :  { %15107 = vmatprep.subr.bf16.mxu1 %v17318_v44  ;;  %v8281_v44 = vld [vmem:[#allocation10 + $0xcf8] sm:$0xff]  ;;  %v17406_v28 = vcombine.high %v8149_v50, %v8153_v24  ;;  %v17405_v57 = vcombine.low %v8149_v50, %v8153_v24 }
 0x7a5   :  { %15067 = vmatpush2.bf16.msra.mxu0 %v17189_v20  ;;  %v17534_v25 = vcombine.high %v8277_v18, %v8281_v44  ;;  %v8141_v20 = vld [vmem:[#allocation10 + $0x898] sm:$0xff]  ;;  %v17533_v11 = vcombine.low %v8277_v18, %v8281_v44 }
 0x7a6   :  { %15118 = vmatprep.subr.bf16.mxu0 %v17438_v13  ;;  %v8269_v13 = vld [vmem:[#allocation10 + $0xc98] sm:$0xff] }
 0x7a7   :  { %15108 = vmatpush2.bf16.msra.mxu1 %v17317_v63  ;;  %v8145_v63 = vld [vmem:[#allocation10 + $0x8b8] sm:$0xff] }
 0x7a8   :  { %15159 = vmatprep.subr.bf16.mxu1 %v17566_v26  ;;  %v14824_v39 = vpop.f32.mrf.mxu0  ;;  %15069 = vmatmul.mubr.bf16.vlgmr.msra.gmra.mxu0 %v18891_v59  ;;  %v8273_v26 = vld [vmem:[#allocation10 + $0xcb8] sm:$0xff]  ;;  %v17397_v55 = vcombine.low %v8141_v20, %v8145_v63 }
 0x7a9   :  { %v14825_v47 = vadd.f32 %v14824_v39, %v19095_v23  ;;  %15119 = vmatpush1.bf16.msra.mxu0 %v17437_v46  ;;  %15150 = vmatprep.mubr.bf16.mxu0 %v18895_v37  ;;  %v17550_v23 = vcombine.high %v8293_v41, %v8297_v60  ;;  %v17398_v46 = vcombine.high %v8141_v20, %v8145_v63  ;;  %v8373_v38 = vld [vmem:[#allocation10 + $0xfd8] sm:$0xff] }
 0x7aa   :  { %v14865_v52 = vpop.f32.mrf.mxu1  ;;  %15110 = vmatmul.mubr.bf16.vlgmr.msra.gmra.mxu1 %v18893_v31  ;;  %v14826_v43 = vpop.f32.mrf.mxu0  ;;  %15120 = vmatprep.subr.bf16.mxu0 %v17430_v9  ;;  %v17526_v56 = vcombine.high %v8269_v13, %v8273_v26  ;;  %v8261_v9 = vld [vmem:[#allocation10 + $0xc58] sm:$0xff]  ;;  %v17525_v39 = vcombine.low %v8269_v13, %v8273_v26 }
 0x7ab   :  { %15160 = vmatpush1.bf16.msra.mxu1 %v17565_v4  ;;  %v19104_v6 = vadd.f32 %v14865_v52, %v14825_v47  ;;  %15191 = vmatprep.mubr.bf16.mxu1 %v18898_v22  ;;  %v14827_v59 = vadd.f32 %v14826_v43, %v19098_v16  ;;  %v17549_v22 = vcombine.low %v8293_v41, %v8297_v60  ;;  %v8137_v4 = vld [vmem:[#allocation10 + $0x878] sm:$0xff] }
 0x7ac   :  { %v14867_v15 = vpop.f32.mrf.mxu1  ;;  %v14828_v31 = vpop.f32.mrf.mxu0  ;;  %15161 = vmatprep.subr.bf16.mxu1 %v17558_v45  ;;  %v17390_v45 = vcombine.high %v8133_v58, %v8137_v4  ;;  %v17518_v41 = vcombine.high %v8261_v9, %v8265_v12  ;;  %v8125_v60 = vld [vmem:[#allocation10 + $0x818] sm:$0xff]  ;;  %v17389_v43 = vcombine.low %v8133_v58, %v8137_v4 }
 0x7ad   :  { %v19108_v37 = vadd.f32 %v14867_v15, %v14827_v59  ;;  %15121 = vmatpush1.bf16.msra.mxu0 %v17429_v62  ;;  %v8129_v47 = vld [vmem:[#allocation10 + $0x838] sm:$0xff] }
 0x7ae   :  { %v14869_v8 = vpop.f32.mrf.mxu1  ;;  %v14829_v49 = vpop.f32.mrf.mxu0  ;;  %15122 = vmatprep.subr.bf16.mxu0 %v17422_v30  ;;  %v8253_v52 = vld [vmem:[#allocation10 + $0xc18] sm:$0xff]  ;;  %v17382_v30 = vcombine.high %v8125_v60, %v8129_v47  ;;  %v17381_v31 = vcombine.low %v8125_v60, %v8129_v47 }
 0x7af   :  { %15162 = vmatpush1.bf16.msra.mxu1 %v17557_v5  ;;  %v8257_v62 = vld [vmem:[#allocation10 + $0xc38] sm:$0xff]  ;;  %v17517_v5 = vcombine.low %v8261_v9, %v8265_v12 }
 0x7b0   :  { %v14870_v16 = vpop.f32.mrf.mxu1  ;;  %15163 = vmatprep.subr.bf16.mxu1 %v17550_v23  ;;  %v17510_v59 = vcombine.high %v8253_v52, %v8257_v62  ;;  %v8245_v15 = vld [vmem:[#allocation10 + $0xbd8] sm:$0xff]  ;;  %v17509_v35 = vcombine.low %v8253_v52, %v8257_v62 }
 0x7b1   :  { %15123 = vmatpush1.bf16.msra.mxu0 %v17421_v21  ;;  %v8249_v23 = vld [vmem:[#allocation10 + $0xbf8] sm:$0xff] }
 0x7b2   :  { %15124 = vmatprep.subr.bf16.mxu0 %v17414_v7  ;;  %v8377_v14 = vld [vmem:[#allocation10 + $0xff8] sm:$0xff]  ;;  %v17502_v17 = vcombine.high %v8245_v15, %v8249_v23  ;;  %v17501_v16 = vcombine.low %v8245_v15, %v8249_v23 }
 0x7b3   :  { %15164 = vmatpush1.bf16.msra.mxu1 %v17549_v22  ;;  %v17630_v8 = vcombine.high %v8373_v38, %v8377_v14  ;;  %v8237_v21 = vld [vmem:[#allocation10 + $0xb98] sm:$0xff] }
 0x7b4   :  { %15165 = vmatprep.subr.bf16.mxu1 %v17542_v29  ;;  %v8241_v49 = vld [vmem:[#allocation10 + $0xbb8] sm:$0xff]  ;;  %v17629_v29 = vcombine.low %v8373_v38, %v8377_v14 }
 0x7b5   :  { %15125 = vmatpush1.bf16.msra.mxu0 %v17413_v1  ;;  %v8365_v22 = vld [vmem:[#allocation10 + $0xf98] sm:$0xff]  ;;  %v17494_v50 = vcombine.high %v8237_v21, %v8241_v49 }
 0x7b6   :  { %15126 = vmatprep.subr.bf16.mxu0 %v17406_v28  ;;  %v8369_v7 = vld [vmem:[#allocation10 + $0xfb8] sm:$0xff]  ;;  %v17493_v28 = vcombine.low %v8237_v21, %v8241_v49 }
 0x7b7   :  { %15166 = vmatpush1.bf16.msra.mxu1 %v17541_v51  ;;  %v17622_v24 = vcombine.high %v8365_v22, %v8369_v7  ;;  %v8229_v18 = vld [vmem:[#allocation10 + $0xb58] sm:$0xff] }
 0x7b8   :  { %15167 = vmatprep.subr.bf16.mxu1 %v17534_v25  ;;  %v8233_v44 = vld [vmem:[#allocation10 + $0xb78] sm:$0xff]  ;;  %v17621_v25 = vcombine.low %v8365_v22, %v8369_v7 }
 0x7b9   :  { %15127 = vmatpush1.bf16.msra.mxu0 %v17405_v57  ;;  %v8357_v1 = vld [vmem:[#allocation10 + $0xf58] sm:$0xff]  ;;  %v17486_v20 = vcombine.high %v8229_v18, %v8233_v44 }
 0x7ba   :  { %15128 = vmatprep.subr.bf16.mxu0 %v17398_v46  ;;  %v8361_v51 = vld [vmem:[#allocation10 + $0xf78] sm:$0xff]  ;;  %v17485_v46 = vcombine.low %v8229_v18, %v8233_v44 }
 0x7bb   :  { %15168 = vmatpush1.bf16.msra.mxu1 %v17533_v11  ;;  %v17614_v63 = vcombine.high %v8357_v1, %v8361_v51  ;;  %v8221_v13 = vld [vmem:[#allocation10 + $0xb18] sm:$0xff] }
 0x7bc   :  { %15169 = vmatprep.subr.bf16.mxu1 %v17526_v56  ;;  %v8225_v26 = vld [vmem:[#allocation10 + $0xb38] sm:$0xff]  ;;  %v17613_v56 = vcombine.low %v8357_v1, %v8361_v51 }
 0x7bd   :  { %15129 = vmatpush1.bf16.msra.mxu0 %v17397_v55  ;;  %v8349_v57 = vld [vmem:[#allocation10 + $0xf18] sm:$0xff]  ;;  %v17478_v58 = vcombine.high %v8221_v13, %v8225_v26 }
 0x7be   :  { %15130 = vmatprep.subr.bf16.mxu0 %v17390_v45  ;;  %v8353_v11 = vld [vmem:[#allocation10 + $0xf38] sm:$0xff]  ;;  %v17477_v45 = vcombine.low %v8221_v13, %v8225_v26 }
 0x7bf   :  { %15170 = vmatpush1.bf16.msra.mxu1 %v17525_v39  ;;  %v17606_v4 = vcombine.high %v8349_v57, %v8353_v11  ;;  %v8213_v9 = vld [vmem:[#allocation10 + $0xad8] sm:$0xff] }
 0x7c0   :  { %15171 = vmatprep.subr.bf16.mxu1 %v17518_v41  ;;  %v8217_v12 = vld [vmem:[#allocation10 + $0xaf8] sm:$0xff]  ;;  %v17605_v41 = vcombine.low %v8349_v57, %v8353_v11 }
 0x7c1   :  { %15131 = vmatpush1.bf16.msra.mxu0 %v17389_v43  ;;  %v8341_v55 = vld [vmem:[#allocation10 + $0xed8] sm:$0xff]  ;;  %v17470_v60 = vcombine.high %v8213_v9, %v8217_v12 }
 0x7c2   :  { %15132 = vmatprep.subr.bf16.mxu0 %v17382_v30  ;;  %v8345_v39 = vld [vmem:[#allocation10 + $0xef8] sm:$0xff]  ;;  %v17469_v30 = vcombine.low %v8213_v9, %v8217_v12 }
 0x7c3   :  { %15172 = vmatpush1.bf16.msra.mxu1 %v17517_v5  ;;  %v17598_v47 = vcombine.high %v8341_v55, %v8345_v39  ;;  %v8205_v52 = vld [vmem:[#allocation10 + $0xa98] sm:$0xff] }
 0x7c4   :  { %15173 = vmatprep.subr.bf16.mxu1 %v17510_v59  ;;  %v8209_v62 = vld [vmem:[#allocation10 + $0xab8] sm:$0xff]  ;;  %v17597_v59 = vcombine.low %v8341_v55, %v8345_v39 }
 0x7c5   :  { %15133 = vmatpush1.bf16.msra.mxu0 %v17381_v31  ;;  %v8333_v43 = vld [vmem:[#allocation10 + $0xe98] sm:$0xff]  ;;  %v17462_v15 = vcombine.high %v8205_v52, %v8209_v62 }
 0x7c6   :  { %15134 = vmatprep.subr.bf16.mxu0 %v17502_v17  ;;  %v8337_v5 = vld [vmem:[#allocation10 + $0xeb8] sm:$0xff]  ;;  %v17461_v17 = vcombine.low %v8205_v52, %v8209_v62 }
 0x7c7   :  { %15174 = vmatpush1.bf16.msra.mxu1 %v17509_v35  ;;  %v17590_v23 = vcombine.high %v8333_v43, %v8337_v5  ;;  %v8197_v38 = vld [vmem:[#allocation10 + $0xa58] sm:$0xff] }
 0x7c8   :  { %15175 = vmatprep.subr.bf16.mxu1 %v17630_v8  ;;  %v8201_v14 = vld [vmem:[#allocation10 + $0xa78] sm:$0xff]  ;;  %v17589_v8 = vcombine.low %v8333_v43, %v8337_v5 }
 0x7c9   :  { %15135 = vmatpush2.bf16.msra.mxu0 %v17501_v16  ;;  %v8325_v31 = vld [vmem:[#allocation10 + $0xe58] sm:$0xff]  ;;  %v17454_v21 = vcombine.high %v8197_v38, %v8201_v14 }
 0x7ca   :  { %15136 = vmatprep.subr.bf16.mxu0 %v17494_v50  ;;  %v8329_v35 = vld [vmem:[#allocation10 + $0xe78] sm:$0xff]  ;;  %v17453_v50 = vcombine.low %v8197_v38, %v8201_v14 }
 0x7cb   :  { %15176 = vmatpush2.bf16.msra.mxu1 %v17629_v29  ;;  %v17582_v49 = vcombine.high %v8325_v31, %v8329_v35  ;;  %v8189_v22 = vld [vmem:[#allocation10 + $0xa18] sm:$0xff] }
 0x7cc   :  { %15177 = vmatprep.subr.bf16.mxu1 %v17622_v24  ;;  %v8193_v7 = vld [vmem:[#allocation10 + $0xa38] sm:$0xff]  ;;  %v17581_v24 = vcombine.low %v8325_v31, %v8329_v35 }
 0x7cd   :  { %15137 = vmatpush2.bf16.msra.mxu0 %v17493_v28  ;;  %v8317_v16 = vld [vmem:[#allocation10 + $0xe18] sm:$0xff]  ;;  %v17446_v18 = vcombine.high %v8189_v22, %v8193_v7 }
 0x7ce   :  { %15138 = vmatprep.subr.bf16.mxu0 %v17486_v20  ;;  %v8321_v29 = vld [vmem:[#allocation10 + $0xe38] sm:$0xff]  ;;  %v17445_v20 = vcombine.low %v8189_v22, %v8193_v7 }
 0x7cf   :  { %15178 = vmatpush2.bf16.msra.mxu1 %v17621_v25  ;;  %v17574_v44 = vcombine.high %v8317_v16, %v8321_v29  ;;  %v8437_v1 = vld [vmem:[#allocation10 + $0x11d8] sm:$0xff] }
 0x7d0   :  { %15179 = vmatprep.subr.bf16.mxu1 %v17614_v63  ;;  %v8441_v51 = vld [vmem:[#allocation10 + $0x11f8] sm:$0xff]  ;;  %v17573_v63 = vcombine.low %v8317_v16, %v8321_v29 }
 0x7d1   :  { %15139 = vmatpush2.bf16.msra.mxu0 %v17485_v46  ;;  %v8565_v28 = vld [vmem:[#allocation10 + $0x15d8] sm:$0xff]  ;;  %v17694_v13 = vcombine.high %v8437_v1, %v8441_v51  ;;  %v17693_v46 = vcombine.low %v8437_v1, %v8441_v51 }
 0x7d2   :  { %15140 = vmatprep.subr.bf16.mxu0 %v17478_v58  ;;  %v8569_v25 = vld [vmem:[#allocation10 + $0x15f8] sm:$0xff] }
 0x7d3   :  { %15180 = vmatpush2.bf16.msra.mxu1 %v17613_v56  ;;  %v17822_v26 = vcombine.high %v8565_v28, %v8569_v25  ;;  %v8429_v57 = vld [vmem:[#allocation10 + $0x1198] sm:$0xff] }
 0x7d4   :  { %15181 = vmatprep.subr.bf16.mxu1 %v17606_v4  ;;  %v8433_v11 = vld [vmem:[#allocation10 + $0x11b8] sm:$0xff]  ;;  %v17821_v4 = vcombine.low %v8565_v28, %v8569_v25 }
 0x7d5   :  { %15141 = vmatpush2.bf16.msra.mxu0 %v17477_v45  ;;  %v8557_v56 = vld [vmem:[#allocation10 + $0x1598] sm:$0xff]  ;;  %v17686_v9 = vcombine.high %v8429_v57, %v8433_v11  ;;  %v17685_v62 = vcombine.low %v8429_v57, %v8433_v11 }
 0x7d6   :  { %15142 = vmatprep.subr.bf16.mxu0 %v17470_v60  ;;  %v8561_v58 = vld [vmem:[#allocation10 + $0x15b8] sm:$0xff] }
 0x7d7   :  { %15182 = vmatpush2.bf16.msra.mxu1 %v17605_v41  ;;  %v8421_v12 = vld [vmem:[#allocation10 + $0x1158] sm:$0xff]  ;;  %v17814_v45 = vcombine.high %v8557_v56, %v8561_v58  ;;  %v17813_v5 = vcombine.low %v8557_v56, %v8561_v58 }
 0x7d8   :  { %15183 = vmatprep.subr.bf16.mxu1 %v17598_v47  ;;  %v8425_v55 = vld [vmem:[#allocation10 + $0x1178] sm:$0xff] }
 0x7d9   :  { %15143 = vmatpush2.bf16.msra.mxu0 %v17469_v30  ;;  %v8549_v41 = vld [vmem:[#allocation10 + $0x1558] sm:$0xff]  ;;  %v17678_v30 = vcombine.high %v8421_v12, %v8425_v55 }
 0x7da   :  { %15144 = vmatprep.subr.bf16.mxu0 %v17462_v15  ;;  %v8553_v60 = vld [vmem:[#allocation10 + $0x1578] sm:$0xff] }
 0x7db   :  { %15184 = vmatpush2.bf16.msra.mxu1 %v17597_v59  ;;  %v8417_v38 = vld [vmem:[#allocation10 + $0x1138] sm:$0xff] }
 0x7dc   :  { %15185 = vmatprep.subr.bf16.mxu1 %v17590_v23  ;;  %v8413_v23 = vld [vmem:[#allocation10 + $0x1118] sm:$0xff] }
 0x7dd   :  { %15145 = vmatpush2.bf16.msra.mxu0 %v17461_v17  ;;  %v8541_v14 = vld [vmem:[#allocation10 + $0x1518] sm:$0xff]  ;;  %v17677_v17 = vcombine.low %v8421_v12, %v8425_v55 }
 0x7de   :  { %15146 = vmatprep.subr.bf16.mxu0 %v17454_v21  ;;  %v8545_v31 = vld [vmem:[#allocation10 + $0x1538] sm:$0xff]  ;;  %v17670_v21 = vcombine.high %v8413_v23, %v8417_v38 }
 0x7df   :  { %15186 = vmatpush2.bf16.msra.mxu1 %v17589_v8  ;;  %v8405_v22 = vld [vmem:[#allocation10 + $0x10d8] sm:$0xff] }
 0x7e0   :  { %15187 = vmatprep.subr.bf16.mxu1 %v17582_v49  ;;  %v17798_v49 = vcombine.high %v8541_v14, %v8545_v31  ;;  %v8409_v7 = vld [vmem:[#allocation10 + $0x10f8] sm:$0xff] }
 0x7e1   :  { %15147 = vmatpush2.bf16.msra.mxu0 %v17453_v50  ;;  %v8533_v16 = vld [vmem:[#allocation10 + $0x14d8] sm:$0xff]  ;;  %v17669_v50 = vcombine.low %v8413_v23, %v8417_v38 }
 0x7e2   :  { %15148 = vmatprep.subr.bf16.mxu0 %v17446_v18  ;;  %v8537_v29 = vld [vmem:[#allocation10 + $0x14f8] sm:$0xff]  ;;  %v17662_v18 = vcombine.high %v8405_v22, %v8409_v7 }
 0x7e3   :  { %15188 = vmatpush2.bf16.msra.mxu1 %v17581_v24  ;;  %v17797_v24 = vcombine.low %v8541_v14, %v8545_v31  ;;  %v8397_v1 = vld [vmem:[#allocation10 + $0x1098] sm:$0xff] }
 0x7e4   :  { %15189 = vmatprep.subr.bf16.mxu1 %v17574_v44  ;;  %v17790_v44 = vcombine.high %v8533_v16, %v8537_v29  ;;  %v8401_v51 = vld [vmem:[#allocation10 + $0x10b8] sm:$0xff] }
 0x7e5   :  { %15149 = vmatpush2.bf16.msra.mxu0 %v17445_v20  ;;  %v8525_v28 = vld [vmem:[#allocation10 + $0x1498] sm:$0xff]  ;;  %v17661_v20 = vcombine.low %v8405_v22, %v8409_v7  ;;  %v17653_v58 = vcombine.low %v8397_v1, %v8401_v51 }
 0x7e6   :  { %15200 = vmatprep.subr.bf16.mxu0 %v17694_v13  ;;  %v8529_v25 = vld [vmem:[#allocation10 + $0x14b8] sm:$0xff]  ;;  %v17654_v13 = vcombine.high %v8397_v1, %v8401_v51 }
 0x7e7   :  { %15190 = vmatpush2.bf16.msra.mxu1 %v17573_v63  ;;  %v17789_v63 = vcombine.low %v8533_v16, %v8537_v29  ;;  %v8389_v57 = vld [vmem:[#allocation10 + $0x1058] sm:$0xff] }
 0x7e8   :  { %15241 = vmatprep.subr.bf16.mxu1 %v17822_v26  ;;  %v14906_v39 = vpop.f32.mrf.mxu0  ;;  %15151 = vmatmul.mubr.bf16.vlgmr.msra.gmra.mxu0 %v18939_v53  ;;  %v17782_v26 = vcombine.high %v8525_v28, %v8529_v25  ;;  %v8393_v11 = vld [vmem:[#allocation10 + $0x1078] sm:$0xff] }
 0x7e9   :  { %v14907_v47 = vadd.f32 %v14906_v39, %v19104_v6  ;;  %15201 = vmatpush1.bf16.msra.mxu0 %v17693_v46  ;;  %15232 = vmatprep.mubr.bf16.mxu0 %v18943_v33  ;;  %v17806_v6 = vcombine.high %v8549_v41, %v8553_v60  ;;  %v8517_v46 = vld [vmem:[#allocation10 + $0x1458] sm:$0xff] }
 0x7ea   :  { %v14947_v52 = vpop.f32.mrf.mxu1  ;;  %15192 = vmatmul.mubr.bf16.vlgmr.msra.gmra.mxu1 %v18941_v36  ;;  %v14908_v43 = vpop.f32.mrf.mxu0  ;;  %15202 = vmatprep.subr.bf16.mxu0 %v17686_v9  ;;  %v8521_v56 = vld [vmem:[#allocation10 + $0x1478] sm:$0xff]  ;;  %v17646_v9 = vcombine.high %v8389_v57, %v8393_v11 }
 0x7eb   :  { %15242 = vmatpush1.bf16.msra.mxu1 %v17821_v4  ;;  %v19114_v59 = vadd.f32 %v14947_v52, %v14907_v47  ;;  %15273 = vmatprep.mubr.bf16.mxu1 %v18946_v10  ;;  %v14909_v53 = vadd.f32 %v14908_v43, %v19108_v37  ;;  %v17805_v10 = vcombine.low %v8549_v41, %v8553_v60  ;;  %v8381_v55 = vld [vmem:[#allocation10 + $0x1018] sm:$0xff] }
 0x7ec   :  { %v14949_v15 = vpop.f32.mrf.mxu1  ;;  %v14910_v36 = vpop.f32.mrf.mxu0  ;;  %15243 = vmatprep.subr.bf16.mxu1 %v17814_v45  ;;  %v17781_v4 = vcombine.low %v8525_v28, %v8529_v25  ;;  %v17774_v12 = vcombine.high %v8517_v46, %v8521_v56  ;;  %v8385_v39 = vld [vmem:[#allocation10 + $0x1038] sm:$0xff]  ;;  %v17645_v60 = vcombine.low %v8389_v57, %v8393_v11  ;;  %v17773_v47 = vcombine.low %v8517_v46, %v8521_v56 }
 0x7ed   :  { %v19118_v33 = vadd.f32 %v14949_v15, %v14909_v53  ;;  %15203 = vmatpush1.bf16.msra.mxu0 %v17685_v62  ;;  %v8509_v45 = vld [vmem:[#allocation10 + $0x1418] sm:$0xff]  ;;  %v17638_v52 = vcombine.high %v8381_v55, %v8385_v39  ;;  %v17637_v15 = vcombine.low %v8381_v55, %v8385_v39 }
 0x7ee   :  { %v14951_v35 = vpop.f32.mrf.mxu1  ;;  %v14911_v8 = vpop.f32.mrf.mxu0  ;;  %15204 = vmatprep.subr.bf16.mxu0 %v17678_v30  ;;  %v8513_v41 = vld [vmem:[#allocation10 + $0x1438] sm:$0xff] }
 0x7ef   :  { %15244 = vmatpush1.bf16.msra.mxu1 %v17813_v5  ;;  %v17766_v62 = vcombine.high %v8509_v45, %v8513_v41  ;;  %v8501_v43 = vld [vmem:[#allocation10 + $0x13d8] sm:$0xff] }
 0x7f0   :  { %v14952_v37 = vpop.f32.mrf.mxu1  ;;  %15245 = vmatprep.subr.bf16.mxu1 %v17806_v6  ;;  %v8505_v5 = vld [vmem:[#allocation10 + $0x13f8] sm:$0xff]  ;;  %v17765_v6 = vcombine.low %v8509_v45, %v8513_v41 }
 0x7f1   :  { %15205 = vmatpush1.bf16.msra.mxu0 %v17677_v17  ;;  %v8629_v30 = vld [vmem:[#allocation10 + $0x17d8] sm:$0xff]  ;;  %v17758_v23 = vcombine.high %v8501_v43, %v8505_v5  ;;  %v17757_v17 = vcombine.low %v8501_v43, %v8505_v5 }
 0x7f2   :  { %15206 = vmatprep.subr.bf16.mxu0 %v17670_v21  ;;  %v8633_v53 = vld [vmem:[#allocation10 + $0x17f8] sm:$0xff] }
 0x7f3   :  { %15246 = vmatpush1.bf16.msra.mxu1 %v17805_v10  ;;  %v17886_v38 = vcombine.high %v8629_v30, %v8633_v53  ;;  %v8493_v36 = vld [vmem:[#allocation10 + $0x1398] sm:$0xff]  ;;  %v17885_v8 = vcombine.low %v8629_v30, %v8633_v53 }
 0x7f4   :  { %15247 = vmatprep.subr.bf16.mxu1 %v17798_v49  ;;  %v8497_v14 = vld [vmem:[#allocation10 + $0x13b8] sm:$0xff] }
 0x7f5   :  { %15207 = vmatpush1.bf16.msra.mxu0 %v17669_v50  ;;  %v8621_v31 = vld [vmem:[#allocation10 + $0x1798] sm:$0xff]  ;;  %v17750_v10 = vcombine.high %v8493_v36, %v8497_v14  ;;  %v17749_v16 = vcombine.low %v8493_v36, %v8497_v14 }
 0x7f6   :  { %15208 = vmatprep.subr.bf16.mxu0 %v17662_v18  ;;  %v8625_v35 = vld [vmem:[#allocation10 + $0x17b8] sm:$0xff] }
 0x7f7   :  { %15248 = vmatpush1.bf16.msra.mxu1 %v17797_v24  ;;  %v17878_v21 = vcombine.high %v8621_v31, %v8625_v35  ;;  %v8485_v37 = vld [vmem:[#allocation10 + $0x1358] sm:$0xff]  ;;  %v17877_v29 = vcombine.low %v8621_v31, %v8625_v35 }
 0x7f8   :  { %15249 = vmatprep.subr.bf16.mxu1 %v17790_v44  ;;  %v8489_v49 = vld [vmem:[#allocation10 + $0x1378] sm:$0xff] }
 0x7f9   :  { %15209 = vmatpush1.bf16.msra.mxu0 %v17661_v20  ;;  %v8613_v22 = vld [vmem:[#allocation10 + $0x1758] sm:$0xff]  ;;  %v17742_v50 = vcombine.high %v8485_v37, %v8489_v49  ;;  %v17741_v28 = vcombine.low %v8485_v37, %v8489_v49 }
 0x7fa   :  { %15210 = vmatprep.subr.bf16.mxu0 %v17654_v13  ;;  %v8617_v7 = vld [vmem:[#allocation10 + $0x1778] sm:$0xff] }
 0x7fb   :  { %15250 = vmatpush1.bf16.msra.mxu1 %v17789_v63  ;;  %v17870_v24 = vcombine.high %v8613_v22, %v8617_v7  ;;  %v8477_v18 = vld [vmem:[#allocation10 + $0x1318] sm:$0xff]  ;;  %v17869_v25 = vcombine.low %v8613_v22, %v8617_v7 }
 0x7fc   :  { %15251 = vmatprep.subr.bf16.mxu1 %v17782_v26  ;;  %v8481_v44 = vld [vmem:[#allocation10 + $0x1338] sm:$0xff] }
 0x7fd   :  { %15211 = vmatpush1.bf16.msra.mxu0 %v17653_v58  ;;  %v8605_v1 = vld [vmem:[#allocation10 + $0x1718] sm:$0xff]  ;;  %v17734_v20 = vcombine.high %v8477_v18, %v8481_v44  ;;  %v17733_v46 = vcombine.low %v8477_v18, %v8481_v44 }
 0x7fe   :  { %15212 = vmatprep.subr.bf16.mxu0 %v17646_v9  ;;  %v8609_v51 = vld [vmem:[#allocation10 + $0x1738] sm:$0xff] }
 0x7ff   :  { %15252 = vmatpush1.bf16.msra.mxu1 %v17781_v4  ;;  %v17862_v63 = vcombine.high %v8605_v1, %v8609_v51  ;;  %v8469_v13 = vld [vmem:[#allocation10 + $0x12d8] sm:$0xff]  ;;  %v17861_v56 = vcombine.low %v8605_v1, %v8609_v51 }
 0x800   :  { %15253 = vmatprep.subr.bf16.mxu1 %v17774_v12  ;;  %v8473_v26 = vld [vmem:[#allocation10 + $0x12f8] sm:$0xff] }
 0x801   :  { %15213 = vmatpush1.bf16.msra.mxu0 %v17645_v60  ;;  %v8597_v57 = vld [vmem:[#allocation10 + $0x16d8] sm:$0xff]  ;;  %v17726_v58 = vcombine.high %v8469_v13, %v8473_v26  ;;  %v17725_v45 = vcombine.low %v8469_v13, %v8473_v26 }
 0x802   :  { %15214 = vmatprep.subr.bf16.mxu0 %v17638_v52  ;;  %v8601_v11 = vld [vmem:[#allocation10 + $0x16f8] sm:$0xff] }
 0x803   :  { %15254 = vmatpush1.bf16.msra.mxu1 %v17773_v47  ;;  %v17854_v4 = vcombine.high %v8597_v57, %v8601_v11  ;;  %v8461_v9 = vld [vmem:[#allocation10 + $0x1298] sm:$0xff]  ;;  %v17853_v41 = vcombine.low %v8597_v57, %v8601_v11 }
 0x804   :  { %15255 = vmatprep.subr.bf16.mxu1 %v17766_v62  ;;  %v8465_v12 = vld [vmem:[#allocation10 + $0x12b8] sm:$0xff] }
 0x805   :  { %15215 = vmatpush1.bf16.msra.mxu0 %v17637_v15  ;;  %v8589_v55 = vld [vmem:[#allocation10 + $0x1698] sm:$0xff]  ;;  %v17718_v60 = vcombine.high %v8461_v9, %v8465_v12  ;;  %v17717_v30 = vcombine.low %v8461_v9, %v8465_v12 }
 0x806   :  { %15216 = vmatprep.subr.bf16.mxu0 %v17758_v23  ;;  %v8593_v39 = vld [vmem:[#allocation10 + $0x16b8] sm:$0xff] }
 0x807   :  { %15256 = vmatpush1.bf16.msra.mxu1 %v17765_v6  ;;  %v17846_v47 = vcombine.high %v8589_v55, %v8593_v39  ;;  %v8453_v52 = vld [vmem:[#allocation10 + $0x1258] sm:$0xff]  ;;  %v17845_v53 = vcombine.low %v8589_v55, %v8593_v39 }
 0x808   :  { %15257 = vmatprep.subr.bf16.mxu1 %v17886_v38  ;;  %v8457_v62 = vld [vmem:[#allocation10 + $0x1278] sm:$0xff] }
 0x809   :  { %15217 = vmatpush2.bf16.msra.mxu0 %v17757_v17  ;;  %v8581_v43 = vld [vmem:[#allocation10 + $0x1658] sm:$0xff]  ;;  %v17710_v15 = vcombine.high %v8453_v52, %v8457_v62  ;;  %v17709_v31 = vcombine.low %v8453_v52, %v8457_v62 }
 0x80a   :  { %15218 = vmatprep.subr.bf16.mxu0 %v17750_v10  ;;  %v8585_v5 = vld [vmem:[#allocation10 + $0x1678] sm:$0xff] }
 0x80b   :  { %15258 = vmatpush2.bf16.msra.mxu1 %v17885_v8  ;;  %v17838_v6 = vcombine.high %v8581_v43, %v8585_v5  ;;  %v8445_v23 = vld [vmem:[#allocation10 + $0x1218] sm:$0xff]  ;;  %v17837_v35 = vcombine.low %v8581_v43, %v8585_v5 }
 0x80c   :  { %15259 = vmatprep.subr.bf16.mxu1 %v17878_v21  ;;  %v8449_v38 = vld [vmem:[#allocation10 + $0x1238] sm:$0xff] }
 0x80d   :  { %15219 = vmatpush2.bf16.msra.mxu0 %v17749_v16  ;;  %v8573_v36 = vld [vmem:[#allocation10 + $0x1618] sm:$0xff]  ;;  %v17702_v17 = vcombine.high %v8445_v23, %v8449_v38  ;;  %v17701_v22 = vcombine.low %v8445_v23, %v8449_v38 }
 0x80e   :  { %15220 = vmatprep.subr.bf16.mxu0 %v17742_v50  ;;  %v8577_v14 = vld [vmem:[#allocation10 + $0x1638] sm:$0xff] }
 0x80f   :  { %15260 = vmatpush2.bf16.msra.mxu1 %v17877_v29  ;;  %v17830_v8 = vcombine.high %v8573_v36, %v8577_v14  ;;  %v8693_v10 = vld [vmem:[#allocation10 + $0x19d8] sm:$0xff]  ;;  %v17829_v7 = vcombine.low %v8573_v36, %v8577_v14 }
 0x810   :  { %15261 = vmatprep.subr.bf16.mxu1 %v17870_v24  ;;  %v8697_v21 = vld [vmem:[#allocation10 + $0x19f8] sm:$0xff] }
 0x811   :  { %15221 = vmatpush2.bf16.msra.mxu0 %v17741_v28  ;;  %v8821_v37 = vld [vmem:[#allocation10 + $0x1dd8] sm:$0xff]  ;;  %v17950_v16 = vcombine.high %v8693_v10, %v8697_v21  ;;  %v17949_v18 = vcombine.low %v8693_v10, %v8697_v21 }
 0x812   :  { %15222 = vmatprep.subr.bf16.mxu0 %v17734_v20  ;;  %v8825_v49 = vld [vmem:[#allocation10 + $0x1df8] sm:$0xff] }
 0x813   :  { %15262 = vmatpush2.bf16.msra.mxu1 %v17869_v25  ;;  %v18078_v29 = vcombine.high %v8821_v37, %v8825_v49  ;;  %v8685_v50 = vld [vmem:[#allocation10 + $0x1998] sm:$0xff]  ;;  %v18077_v51 = vcombine.low %v8821_v37, %v8825_v49 }
 0x814   :  { %15263 = vmatprep.subr.bf16.mxu1 %v17862_v63  ;;  %v8689_v24 = vld [vmem:[#allocation10 + $0x19b8] sm:$0xff] }
 0x815   :  { %15223 = vmatpush2.bf16.msra.mxu0 %v17733_v46  ;;  %v8813_v44 = vld [vmem:[#allocation10 + $0x1d98] sm:$0xff]  ;;  %v17942_v28 = vcombine.high %v8685_v50, %v8689_v24 }
 0x816   :  { %15224 = vmatprep.subr.bf16.mxu0 %v17726_v58  ;;  %v8817_v1 = vld [vmem:[#allocation10 + $0x1db8] sm:$0xff] }
 0x817   :  { %15264 = vmatpush2.bf16.msra.mxu1 %v17861_v56  ;;  %v8677_v25 = vld [vmem:[#allocation10 + $0x1958] sm:$0xff]  ;;  %v18070_v13 = vcombine.high %v8813_v44, %v8817_v1  ;;  %v17941_v56 = vcombine.low %v8685_v50, %v8689_v24 }
 0x818   :  { %15265 = vmatprep.subr.bf16.mxu1 %v17854_v4  ;;  %v8681_v20 = vld [vmem:[#allocation10 + $0x1978] sm:$0xff]  ;;  %v18069_v4 = vcombine.low %v8813_v44, %v8817_v1 }
 0x819   :  { %15225 = vmatpush2.bf16.msra.mxu0 %v17725_v45  ;;  %v8805_v26 = vld [vmem:[#allocation10 + $0x1d58] sm:$0xff]  ;;  %v17934_v9 = vcombine.high %v8677_v25, %v8681_v20  ;;  %v17933_v52 = vcombine.low %v8677_v25, %v8681_v20 }
 0x81a   :  { %15226 = vmatprep.subr.bf16.mxu0 %v17718_v60  ;;  %v8809_v57 = vld [vmem:[#allocation10 + $0x1d78] sm:$0xff] }
 0x81b   :  { %15266 = vmatpush2.bf16.msra.mxu1 %v17853_v41  ;;  %v8669_v39 = vld [vmem:[#allocation10 + $0x1918] sm:$0xff] }
 0x81c   :  { %15267 = vmatprep.subr.bf16.mxu1 %v17846_v47  ;;  %v8673_v45 = vld [vmem:[#allocation10 + $0x1938] sm:$0xff] }
 0x81d   :  { %15227 = vmatpush2.bf16.msra.mxu0 %v17717_v30  ;;  %v8797_v41 = vld [vmem:[#allocation10 + $0x1d18] sm:$0xff]  ;;  %v17926_v43 = vcombine.high %v8669_v39, %v8673_v45  ;;  %v17925_v23 = vcombine.low %v8669_v39, %v8673_v45 }
 0x81e   :  { %15228 = vmatprep.subr.bf16.mxu0 %v17710_v15  ;;  %v8801_v60 = vld [vmem:[#allocation10 + $0x1d38] sm:$0xff] }
 0x81f   :  { %15268 = vmatpush2.bf16.msra.mxu1 %v17845_v53  ;;  %v18054_v5 = vcombine.high %v8797_v41, %v8801_v60  ;;  %v8661_v30 = vld [vmem:[#allocation10 + $0x18d8] sm:$0xff]  ;;  %v18053_v38 = vcombine.low %v8797_v41, %v8801_v60 }
 0x820   :  { %15269 = vmatprep.subr.bf16.mxu1 %v17838_v6  ;;  %v8665_v53 = vld [vmem:[#allocation10 + $0x18f8] sm:$0xff] }
 0x821   :  { %15229 = vmatpush2.bf16.msra.mxu0 %v17709_v31  ;;  %v8789_v15 = vld [vmem:[#allocation10 + $0x1cd8] sm:$0xff]  ;;  %v17918_v36 = vcombine.high %v8661_v30, %v8665_v53  ;;  %v17917_v10 = vcombine.low %v8661_v30, %v8665_v53 }
 0x822   :  { %15230 = vmatprep.subr.bf16.mxu0 %v17702_v17  ;;  %v8793_v6 = vld [vmem:[#allocation10 + $0x1cf8] sm:$0xff] }
 0x823   :  { %15270 = vmatpush2.bf16.msra.mxu1 %v17837_v35  ;;  %v18046_v14 = vcombine.high %v8789_v15, %v8793_v6  ;;  %v8653_v31 = vld [vmem:[#allocation10 + $0x1898] sm:$0xff]  ;;  %v18045_v21 = vcombine.low %v8789_v15, %v8793_v6 }
 0x824   :  { %15271 = vmatprep.subr.bf16.mxu1 %v17830_v8  ;;  %v8657_v35 = vld [vmem:[#allocation10 + $0x18b8] sm:$0xff] }
 0x825   :  { %15231 = vmatpush2.bf16.msra.mxu0 %v17701_v22  ;;  %v8781_v17 = vld [vmem:[#allocation10 + $0x1c98] sm:$0xff]  ;;  %v17910_v37 = vcombine.high %v8653_v31, %v8657_v35  ;;  %v17909_v50 = vcombine.low %v8653_v31, %v8657_v35 }
 0x826   :  { %15282 = vmatprep.subr.bf16.mxu0 %v17950_v16  ;;  %v8785_v8 = vld [vmem:[#allocation10 + $0x1cb8] sm:$0xff] }
 0x827   :  { %15272 = vmatpush2.bf16.msra.mxu1 %v17829_v7  ;;  %v18038_v49 = vcombine.high %v8781_v17, %v8785_v8  ;;  %v8645_v22 = vld [vmem:[#allocation10 + $0x1858] sm:$0xff]  ;;  %v18037_v24 = vcombine.low %v8781_v17, %v8785_v8 }
 0x828   :  { %15323 = vmatprep.subr.bf16.mxu1 %v18078_v29  ;;  %v14988_v63 = vpop.f32.mrf.mxu0  ;;  %15233 = vmatmul.mubr.bf16.vlgmr.msra.gmra.mxu0 %v18972_v27  ;;  %v8649_v7 = vld [vmem:[#allocation10 + $0x1878] sm:$0xff] }
 0x829   :  { %v14989_v11 = vadd.f32 %v14988_v63, %v19114_v59  ;;  %15283 = vmatpush1.bf16.msra.mxu0 %v17949_v18  ;;  %15314 = vmatprep.mubr.bf16.mxu0 %v18976_v40  ;;  %v18062_v59 = vcombine.high %v8805_v26, %v8809_v57  ;;  %v8773_v16 = vld [vmem:[#allocation10 + $0x1c58] sm:$0xff]  ;;  %v17902_v18 = vcombine.high %v8645_v22, %v8649_v7 }
 0x82a   :  { %v15029_v46 = vpop.f32.mrf.mxu1  ;;  %15274 = vmatmul.mubr.bf16.vlgmr.msra.gmra.mxu1 %v18974_v34  ;;  %v14990_v58 = vpop.f32.mrf.mxu0  ;;  %15284 = vmatprep.subr.bf16.mxu0 %v17942_v28  ;;  %v8777_v29 = vld [vmem:[#allocation10 + $0x1c78] sm:$0xff]  ;;  %v17901_v20 = vcombine.low %v8645_v22, %v8649_v7 }
 0x82b   :  { %15324 = vmatpush1.bf16.msra.mxu1 %v18077_v51  ;;  %v19124_v12 = vadd.f32 %v15029_v46, %v14989_v11  ;;  %15355 = vmatprep.mubr.bf16.mxu1 %v18991_v0  ;;  %v14991_v27 = vadd.f32 %v14990_v58, %v19118_v33  ;;  %v18061_v0 = vcombine.low %v8805_v26, %v8809_v57  ;;  %v8637_v1 = vld [vmem:[#allocation10 + $0x1818] sm:$0xff] }
 0x82c   :  { %v15031_v55 = vpop.f32.mrf.mxu1  ;;  %v14992_v34 = vpop.f32.mrf.mxu0  ;;  %15325 = vmatprep.subr.bf16.mxu1 %v18070_v13  ;;  %v18030_v44 = vcombine.high %v8773_v16, %v8777_v29  ;;  %v8641_v51 = vld [vmem:[#allocation10 + $0x1838] sm:$0xff]  ;;  %v18029_v63 = vcombine.low %v8773_v16, %v8777_v29 }
 0x82d   :  { %v19128_v40 = vadd.f32 %v15031_v55, %v14991_v27  ;;  %15285 = vmatpush1.bf16.msra.mxu0 %v17941_v56  ;;  %v8765_v28 = vld [vmem:[#allocation10 + $0x1c18] sm:$0xff]  ;;  %v17894_v13 = vcombine.high %v8637_v1, %v8641_v51  ;;  %v17893_v58 = vcombine.low %v8637_v1, %v8641_v51 }
 0x82e   :  { %v15033_v47 = vpop.f32.mrf.mxu1  ;;  %v14993_v62 = vpop.f32.mrf.mxu0  ;;  %15286 = vmatprep.subr.bf16.mxu0 %v17934_v9  ;;  %v8769_v25 = vld [vmem:[#allocation10 + $0x1c38] sm:$0xff] }
 0x82f   :  { %15326 = vmatpush1.bf16.msra.mxu1 %v18069_v4  ;;  %v18022_v26 = vcombine.high %v8765_v28, %v8769_v25  ;;  %v8757_v57 = vld [vmem:[#allocation10 + $0x1bd8] sm:$0xff]  ;;  %v18021_v4 = vcombine.low %v8765_v28, %v8769_v25 }
 0x830   :  { %v15034_v33 = vpop.f32.mrf.mxu1  ;;  %15327 = vmatprep.subr.bf16.mxu1 %v18062_v59  ;;  %v8761_v11 = vld [vmem:[#allocation10 + $0x1bf8] sm:$0xff] }
 0x831   :  { %15287 = vmatpush1.bf16.msra.mxu0 %v17933_v52  ;;  %v8885_v46 = vld [vmem:[#allocation10 + $0x1fd8] sm:$0xff]  ;;  %v18014_v9 = vcombine.high %v8757_v57, %v8761_v11  ;;  %v18013_v34 = vcombine.low %v8757_v57, %v8761_v11 }
 0x832   :  { %15288 = vmatprep.subr.bf16.mxu0 %v17926_v43  ;;  %v8889_v56 = vld [vmem:[#allocation10 + $0x1ff8] sm:$0xff] }
 0x833   :  { %15328 = vmatpush1.bf16.msra.mxu1 %v18061_v0  ;;  %v18142_v27 = vcombine.high %v8885_v46, %v8889_v56  ;;  %v8749_v55 = vld [vmem:[#allocation10 + $0x1b98] sm:$0xff]  ;;  %v18141_v41 = vcombine.low %v8885_v46, %v8889_v56 }
 0x834   :  { %15329 = vmatprep.subr.bf16.mxu1 %v18054_v5  ;;  %v8753_v59 = vld [vmem:[#allocation10 + $0x1bb8] sm:$0xff] }
 0x835   :  { %15289 = vmatpush1.bf16.msra.mxu0 %v17925_v23  ;;  %v8877_v39 = vld [vmem:[#allocation10 + $0x1f98] sm:$0xff]  ;;  %v18006_v60 = vcombine.high %v8749_v55, %v8753_v59  ;;  %v18005_v33 = vcombine.low %v8749_v55, %v8753_v59 }
 0x836   :  { %15290 = vmatprep.subr.bf16.mxu0 %v17918_v36  ;;  %v8881_v45 = vld [vmem:[#allocation10 + $0x1fb8] sm:$0xff] }
 0x837   :  { %15330 = vmatpush1.bf16.msra.mxu1 %v18053_v38  ;;  %v18134_v47 = vcombine.high %v8877_v39, %v8881_v45  ;;  %v8741_v52 = vld [vmem:[#allocation10 + $0x1b58] sm:$0xff]  ;;  %v18133_v5 = vcombine.low %v8877_v39, %v8881_v45  ;;  %v15365_v39 = vmax.f32 %v19048_v3, 0.0  ;;  %v15367_v45 = vmax.f32 %v19088_v2, 0.0  ;;  %v18321_v3 = vld [vmem:[#allocation13 + $0xb8] sm:$0xff]  }
 0x838   :  { %15331 = vmatprep.subr.bf16.mxu1 %v18046_v14  ;;  %v8745_v62 = vld [vmem:[#allocation10 + $0x1b78] sm:$0xff] }
 0x839   :  { %15291 = vmatpush1.bf16.msra.mxu0 %v17917_v10  ;;  %v8869_v0 = vld [vmem:[#allocation10 + $0x1f58] sm:$0xff]  ;;  %v17998_v30 = vcombine.high %v8741_v52, %v8745_v62  ;;  %v17997_v36 = vcombine.low %v8741_v52, %v8745_v62  ;;  %v15373_v52 = vmin.f32 %v15365_v39, 6.0  ;;  %v15375_v62 = vmin.f32 %v15367_v45, 6.0 }
 0x83a   :  { %15292 = vmatprep.subr.bf16.mxu0 %v17910_v37  ;;  %v8873_v43 = vld [vmem:[#allocation10 + $0x1f78] sm:$0xff] }
 0x83b   :  { %15332 = vmatpush1.bf16.msra.mxu1 %v18045_v21  ;;  %v18126_v53 = vcombine.high %v8869_v0, %v8873_v43  ;;  %v8733_v15 = vld [vmem:[#allocation10 + $0x1b18] sm:$0xff]  ;;  %v18125_v14 = vcombine.low %v8869_v0, %v8873_v43  ;;  %v18384_v0 = vld [vmem:[#allocation11] sm:$0xff] }
 0x83c   :  { %15333 = vmatprep.subr.bf16.mxu1 %v18038_v49  ;;  %v8737_v6 = vld [vmem:[#allocation10 + $0x1b38] sm:$0xff]  ;;  %v8919_v43 = vrot.slane %v18384_v0, %v18913_v48  ;;  %v8923_v2 = vrot.slane %v18384_v0, %v18869_v61  ;;  %v18354_v0 = vld [vmem:[#allocation13 + $0x168] sm:$0xff]  }
 0x83d   :  { %15293 = vmatpush1.bf16.msra.mxu0 %v17909_v50  ;;  %v8861_v23 = vld [vmem:[#allocation10 + $0x1f18] sm:$0xff]  ;;  %v17990_v31 = vcombine.high %v8733_v15, %v8737_v6  ;;  %v17989_v37 = vcombine.low %v8733_v15, %v8737_v6  ;;  %v15383_v6 = vpack.c.bf16 %v15375_v62, %v15375_v62 }
 0x83e   :  { %15294 = vmatprep.subr.bf16.mxu0 %v17902_v18  ;;  %v8865_v38 = vld [vmem:[#allocation10 + $0x1f38] sm:$0xff] }
 0x83f   :  { %15334 = vmatpush1.bf16.msra.mxu1 %v18037_v24  ;;  %v18118_v35 = vcombine.high %v8861_v23, %v8865_v38  ;;  %v8725_v17 = vld [vmem:[#allocation10 + $0x1ad8] sm:$0xff]  ;;  %v18117_v49 = vcombine.low %v8861_v23, %v8865_v38 }
 0x840   :  { %15335 = vmatprep.subr.bf16.mxu1 %v18030_v44  ;;  %v8729_v8 = vld [vmem:[#allocation10 + $0x1af8] sm:$0xff] }
 0x841   :  { %15295 = vmatpush1.bf16.msra.mxu0 %v17901_v20  ;;  %v8853_v10 = vld [vmem:[#allocation10 + $0x1ed8] sm:$0xff]  ;;  %v17982_v22 = vcombine.high %v8725_v17, %v8729_v8  ;;  %v17981_v18 = vcombine.low %v8725_v17, %v8729_v8 }
 0x842   :  { %15296 = vmatprep.subr.bf16.mxu0 %v17894_v13  ;;  %v8857_v21 = vld [vmem:[#allocation10 + $0x1ef8] sm:$0xff] }
 0x843   :  { %15336 = vmatpush1.bf16.msra.mxu1 %v18029_v63  ;;  %v18110_v7 = vcombine.high %v8853_v10, %v8857_v21  ;;  %v8717_v16 = vld [vmem:[#allocation10 + $0x1a98] sm:$0xff]  ;;  %v18109_v44 = vcombine.low %v8853_v10, %v8857_v21 }
 0x844   :  { %15337 = vmatprep.subr.bf16.mxu1 %v18022_v26  ;;  %v8721_v29 = vld [vmem:[#allocation10 + $0x1ab8] sm:$0xff] }
 0x845   :  { %15297 = vmatpush1.bf16.msra.mxu0 %v17893_v58  ;;  %v8845_v50 = vld [vmem:[#allocation10 + $0x1e98] sm:$0xff]  ;;  %v17974_v1 = vcombine.high %v8717_v16, %v8721_v29  ;;  %v17973_v13 = vcombine.low %v8717_v16, %v8721_v29  ;;  %v18331_v16 = vld [vmem:[#allocation13 + $0xe0] sm:$0xff]  }
 0x846   :  { %15298 = vmatprep.subr.bf16.mxu0 %v18014_v9  ;;  %v8849_v24 = vld [vmem:[#allocation10 + $0x1eb8] sm:$0xff]  ;;  %v18332_v29 = vld [vmem:[#allocation13 + $0x20] sm:$0xff]  }
 0x847   :  { %15338 = vmatpush1.bf16.msra.mxu1 %v18021_v4  ;;  %v18102_v51 = vcombine.high %v8845_v50, %v8849_v24  ;;  %v8709_v28 = vld [vmem:[#allocation10 + $0x1a58] sm:$0xff]  ;;  %v18101_v26 = vcombine.low %v8845_v50, %v8849_v24  ;;  %v18333_v50 = vld [vmem:[#allocation13 + $0xa0] sm:$0xff]   ;;  %v18334_v24 = vld [vmem:[#allocation13 + $0x58] sm:$0xff]  }
 0x848   :  { %15339 = vmatprep.subr.bf16.mxu1 %v18142_v27  ;;  %v8713_v25 = vld [vmem:[#allocation10 + $0x1a78] sm:$0xff] }
 0x849   :  { %15299 = vmatpush2.bf16.msra.mxu0 %v18013_v34  ;;  %v8837_v20 = vld [vmem:[#allocation10 + $0x1e58] sm:$0xff]  ;;  %v17966_v57 = vcombine.high %v8709_v28, %v8713_v25  ;;  %v17965_v9 = vcombine.low %v8709_v28, %v8713_v25 }
 0x84a   :  { %15300 = vmatprep.subr.bf16.mxu0 %v18006_v60  ;;  %v8841_v63 = vld [vmem:[#allocation10 + $0x1e78] sm:$0xff]  ;;  %v18318_v60 = vld [vmem:[#allocation13 + $0x78] sm:$0xff]  }
 0x84b   :  { %15340 = vmatpush2.bf16.msra.mxu1 %v18141_v41  ;;  %v18094_v11 = vcombine.high %v8837_v20, %v8841_v63  ;;  %v8701_v46 = vld [vmem:[#allocation10 + $0x1a18] sm:$0xff]  ;;  %v18093_v27 = vcombine.low %v8837_v20, %v8841_v63  ;;  %v18342_v63 = vld [vmem:[#allocation13 + $0x48] sm:$0xff]  }
 0x84c   :  { %15341 = vmatprep.subr.bf16.mxu1 %v18134_v47  ;;  %v8705_v56 = vld [vmem:[#allocation10 + $0x1a38] sm:$0xff]  ;;  %v18319_v47 = vld [vmem:[#allocation13 + $0xf8] sm:$0xff]  }
 0x84d   :  { %15301 = vmatpush2.bf16.msra.mxu0 %v18005_v33  ;;  %v8829_v58 = vld [vmem:[#allocation10 + $0x1e18] sm:$0xff]  ;;  %v17958_v55 = vcombine.high %v8701_v46, %v8705_v56  ;;  %v17957_v34 = vcombine.low %v8701_v46, %v8705_v56  ;;  %v18320_v33 = vld [vmem:[#allocation13 + $0x38] sm:$0xff]   ;;  %v18346_v46 = vld [vmem:[#allocation13 + $0x40] sm:$0xff]   ;;  %v15366_v56 = vmax.f32 %v19084_v32, 0.0 }
 0x84e   :  { %15302 = vmatprep.subr.bf16.mxu0 %v17998_v30  ;;  %v8833_v4 = vld [vmem:[#allocation10 + $0x1e38] sm:$0xff]  ;;  %v15381_v30 = vpack.c.bf16 %v15373_v52, %v15373_v52 }
 0x84f   :  { %15342 = vmatpush2.bf16.msra.mxu1 %v18133_v5  ;;  %v18086_v59 = vcombine.high %v8829_v58, %v8833_v4  ;;  %v18085_v41 = vcombine.low %v8829_v58, %v8833_v4  ;;  %v18322_v5 = vld [vmem:[#allocation13 + $0x70] sm:$0xff]   ;;  %v18347_v58 = vld [vmem:[#allocation13 + $0xc0] sm:$0xff]   ;;  %v15369_v4 = vmax.f32 %v19128_v40, 0.0  ;;  %v15374_v39 = vmin.f32 %v15366_v56, 6.0  ;;  %v18367_v40 = vld [vmem:[#allocation13 + $0x1b8] sm:$0xff]  }
 0x850   :  { %15343 = vmatprep.subr.bf16.mxu1 %v18126_v53  ;;  %v18323_v15 = vld [vmem:[#allocation13 + $0xf0] sm:$0xff]  }
 0x851   :  { %15303 = vmatpush2.bf16.msra.mxu0 %v17997_v36  ;;  %v18324_v48 = vld [vmem:[#allocation13 + $0x30] sm:$0xff]   ;;  %v15377_v45 = vmin.f32 %v15369_v4, 6.0 }
 0x852   :  { %15304 = vmatprep.subr.bf16.mxu0 %v17990_v31  ;;  %v18326_v31 = vld [vmem:[#allocation13 + $0x68] sm:$0xff]   ;;  %v18339_v28 = vld [vmem:[#allocation13 + $0xd0] sm:$0xff]  }
 0x853   :  { %15344 = vmatpush2.bf16.msra.mxu1 %v18125_v14  ;;  %v18325_v14 = vld [vmem:[#allocation13 + $0xb0] sm:$0xff]  }
 0x854   :  { %15345 = vmatprep.subr.bf16.mxu1 %v18118_v35  ;;  %v18340_v25 = vld [vmem:[#allocation13 + $0x10] sm:$0xff]  }
 0x855   :  { %15305 = vmatpush2.bf16.msra.mxu0 %v17989_v37  ;;  %v18341_v20 = vld [vmem:[#allocation13 + $0x90] sm:$0xff]  }
 0x856   :  { %15306 = vmatprep.subr.bf16.mxu0 %v17982_v22  ;;  %v18330_v22 = vld [vmem:[#allocation13 + $0x60] sm:$0xff]   ;;  %v18352_v32 = vld [vmem:[#allocation13 + $0x170] sm:$0xff]  }
 0x857   :  { %15346 = vmatpush2.bf16.msra.mxu1 %v18117_v49  ;;  %v18329_v49 = vld [vmem:[#allocation13 + $0xa8] sm:$0xff]   ;;  %v18368_v52 = vld [vmem:[#allocation13 + $0x1f0] sm:$0xff]  }
 0x858   :  { %15347 = vmatprep.subr.bf16.mxu1 %v18110_v7  ;;  %v18353_v62 = vld [vmem:[#allocation13 + $0x130] sm:$0xff]  }
 0x859   :  { %15307 = vmatpush2.bf16.msra.mxu0 %v17981_v18  ;;  %v18335_v18 = vld [vmem:[#allocation13 + $0xd8] sm:$0xff]  }
 0x85a   :  { %15308 = vmatprep.subr.bf16.mxu0 %v17974_v1  ;;  %v18337_v1 = vld [vmem:[#allocation13 + $0x98] sm:$0xff]  }
 0x85b   :  { %15348 = vmatpush2.bf16.msra.mxu1 %v18109_v44  ;;  %v18336_v44 = vld [vmem:[#allocation13 + $0x18] sm:$0xff]  }
 0x85c   :  { %15349 = vmatprep.subr.bf16.mxu1 %v18102_v51  ;;  %v18338_v51 = vld [vmem:[#allocation13 + $0x50] sm:$0xff]  }
 0x85d   :  { %15309 = vmatpush2.bf16.msra.mxu0 %v17973_v13  ;;  %v18343_v13 = vld [vmem:[#allocation13 + $0xc8] sm:$0xff]  }
 0x85e   :  { %15310 = vmatprep.subr.bf16.mxu0 %v17966_v57  ;;  %v15364_v57 = vmax.f32 %v19044_v54, 0.0  ;;  %v18366_v54 = vld [vmem:[#allocation13 + $0x1f8] sm:$0xff]  }
 0x85f   :  { %15350 = vmatpush2.bf16.msra.mxu1 %v18101_v26  ;;  %v18344_v26 = vld [vmem:[#allocation13 + $0x8] sm:$0xff]  }
 0x860   :  { %15351 = vmatprep.subr.bf16.mxu1 %v18094_v11  ;;  %v18345_v11 = vld [vmem:[#allocation13 + $0x88] sm:$0xff]  }
 0x861   :  { %15311 = vmatpush2.bf16.msra.mxu0 %v17965_v9  ;;  %v18348_v9 = vld [vmem:[#allocation13] sm:$0xff]  }
 0x862   :  { %15312 = vmatprep.subr.bf16.mxu0 %v17958_v55  ;;  %v18349_v55 = vld [vmem:[#allocation13 + $0x80] sm:$0xff]  }
 0x863   :  { %15352 = vmatpush2.bf16.msra.mxu1 %v18093_v27  ;;  %v15372_v27 = vmin.f32 %v15364_v57, 6.0 }
 0x864   :  { %15353 = vmatprep.subr.bf16.mxu1 %v18086_v59  ;;  %v18350_v59 = vld [vmem:[#allocation13 + $0x178] sm:$0xff]  }
 0x865   :  { %15313 = vmatpush2.bf16.msra.mxu0 %v17957_v34  ;;  %v18351_v34 = vld [vmem:[#allocation13 + $0x138] sm:$0xff]  }
 0x866   :  { %18208 = vmatprep.subr.bf16.mxu0 %v18318_v60  ;;  %v15382_v60 = vpack.c.bf16 %v15374_v39, %v15374_v39 }
 0x867   :  { %15354 = vmatpush2.bf16.msra.mxu1 %v18085_v41  ;;  %v15380_v41 = vpack.c.bf16 %v15372_v27, %v15372_v27 }
 0x868   :  { %18230 = vmatprep.subr.bf16.mxu1 %v18319_v47  ;;  %v15070_v53 = vpop.f32.mrf.mxu0  ;;  %15315 = vmatmul.mubr.bf16.vlgmr.msra.gmra.mxu0 %v19007_v42  ;;  %v18327_v42 = vld [vmem:[#allocation13 + $0xe8] sm:$0xff]   ;;  %v15385_v47 = vpack.c.bf16 %v15377_v45, %v15377_v45 }
 0x869   :  { %v15071_v23 = vadd.f32 %v15070_v53, %v8919_v43  ;;  %18209 = vmatpush3.bf16.msra.mxu0 %v18320_v33  ;;  %15939 = vmatprep.mubr.bf16.mxu0 %v15381_v30  ;;  %v18369_v43 = vld [vmem:[#allocation13 + $0x1b0] sm:$0xff]   ;;  %v18370_v33 = vld [vmem:[#allocation13 + $0x1e8] sm:$0xff]   ;;  %v18372_v30 = vld [vmem:[#allocation13 + $0x1e0] sm:$0xff]  }
 0x86a   :  { %v15111_v38 = vpop.f32.mrf.mxu1  ;;  %15356 = vmatmul.mubr.bf16.vlgmr.msra.gmra.mxu1 %v19009_v19  ;;  %v15072_v36 = vpop.f32.mrf.mxu0  ;;  %18210 = vmatprep.subr.bf16.mxu0 %v18322_v5  ;;  %v18328_v19 = vld [vmem:[#allocation13 + $0x28] sm:$0xff]   ;;  %v18357_v53 = vld [vmem:[#allocation13 + $0x120] sm:$0xff]  }
 0x86b   :  { %18231 = vmatpush3.bf16.msra.mxu1 %v18321_v3  ;;  %v19136_v35 = vadd.f32 %v15111_v38, %v15071_v23  ;;  %15979 = vmatprep.mubr.bf16.mxu1 %v15383_v6  ;;  %v15073_v61 = vadd.f32 %v15072_v36, %v8923_v2  ;;  %v18355_v3 = vld [vmem:[#allocation13 + $0x128] sm:$0xff]   ;;  %v18356_v2 = vld [vmem:[#allocation13 + $0x160] sm:$0xff]   ;;  %v18374_v23 = vld [vmem:[#allocation13 + $0x1d8] sm:$0xff]  }
 0x86c   :  { %v15113_v17 = vpop.f32.mrf.mxu1  ;;  %v15074_v8 = vpop.f32.mrf.mxu0  ;;  %18232 = vmatprep.subr.bf16.mxu1 %v18323_v15  ;;  %v18371_v5 = vld [vmem:[#allocation13 + $0x1a8] sm:$0xff]   ;;  %v18358_v15 = vld [vmem:[#allocation13 + $0x158] sm:$0xff]   ;;  %v18373_v6 = vld [vmem:[#allocation13 + $0x1a0] sm:$0xff]  }
 0x86d   :  { %v19138_v10 = vadd.f32 %v15113_v17, %v15073_v61  ;;  %18211 = vmatpush3.bf16.msra.mxu0 %v18324_v48  ;;  %v18359_v38 = vld [vmem:[#allocation13 + $0x118] sm:$0xff]   ;;  %v18360_v48 = vld [vmem:[#allocation13 + $0x150] sm:$0xff]   ;;  %v18363_v61 = vld [vmem:[#allocation13 + $0x108] sm:$0xff]   ;;  %v15368_v17 = vmax.f32 %v19124_v12, 0.0 }
 0x86e   :  { %v15115_v21 = vpop.f32.mrf.mxu1  ;;  %v15075_v37 = vpop.f32.mrf.mxu0  ;;  %18212 = vmatprep.subr.bf16.mxu0 %v18326_v31  ;;  %v18375_v36 = vld [vmem:[#allocation13 + $0x198] sm:$0xff]   ;;  %v18362_v31 = vld [vmem:[#allocation13 + $0x148] sm:$0xff]   ;;  %v18365_v8 = vld [vmem:[#allocation13 + $0x100] sm:$0xff]  }
 0x86f   :  { %18233 = vmatpush3.bf16.msra.mxu1 %v18325_v14  ;;  %v18361_v14 = vld [vmem:[#allocation13 + $0x110] sm:$0xff]   ;;  %v15376_v21 = vmin.f32 %v15368_v17, 6.0 }
 0x870   :  { %v15116_v7 = vpop.f32.mrf.mxu1  ;;  %18234 = vmatprep.subr.bf16.mxu1 %v18327_v42  ;;  %v18364_v42 = vld [vmem:[#allocation13 + $0x140] sm:$0xff]   ;;  %v18377_v12 = vld [vmem:[#allocation13 + $0x190] sm:$0xff]  }
 0x871   :  { %18213 = vmatpush3.bf16.msra.mxu0 %v18328_v19  ;;  %v15384_v19 = vpack.c.bf16 %v15376_v21, %v15376_v21 }
 0x872   :  { %18214 = vmatprep.subr.bf16.mxu0 %v18330_v22 }
 0x873   :  { %18235 = vmatpush3.bf16.msra.mxu1 %v18329_v49 }
 0x874   :  { %18236 = vmatprep.subr.bf16.mxu1 %v18331_v16  ;;  %v18376_v16 = vld [vmem:[#allocation13 + $0x1d0] sm:$0xff]  }
 0x875   :  { %18215 = vmatpush3.bf16.msra.mxu0 %v18332_v29 }
 0x876   :  { %18216 = vmatprep.subr.bf16.mxu0 %v18334_v24 }
 0x877   :  { %18237 = vmatpush3.bf16.msra.mxu1 %v18333_v50 }
 0x878   :  { %18238 = vmatprep.subr.bf16.mxu1 %v18335_v18 }
 0x879   :  { %18217 = vmatpush3.bf16.msra.mxu0 %v18336_v44 }
 0x87a   :  { %18218 = vmatprep.subr.bf16.mxu0 %v18338_v51 }
 0x87b   :  { %18239 = vmatpush3.bf16.msra.mxu1 %v18337_v1 }
 0x87c   :  { %18240 = vmatprep.subr.bf16.mxu1 %v18339_v28  ;;  %v18378_v28 = vld [vmem:[#allocation13 + $0x1c8] sm:$0xff]  }
 0x87d   :  { %18219 = vmatpush3.bf16.msra.mxu0 %v18340_v25 }
 0x87e   :  { %18220 = vmatprep.subr.bf16.mxu0 %v18342_v63  ;;  %v18381_v63 = vld [vmem:[#allocation13 + $0x180] sm:$0xff]  }
 0x87f   :  { %18241 = vmatpush3.bf16.msra.mxu1 %v18341_v20  ;;  %v18379_v20 = vld [vmem:[#allocation13 + $0x188] sm:$0xff]  }
 0x880   :  { %18242 = vmatprep.subr.bf16.mxu1 %v18343_v13 }
 0x881   :  { %18221 = vmatpush3.bf16.msra.mxu0 %v18344_v26 }
 0x882   :  { %18222 = vmatprep.subr.bf16.mxu0 %v18346_v46 }
 0x883   :  { %18243 = vmatpush3.bf16.msra.mxu1 %v18345_v11 }
 0x884   :  { %18244 = vmatprep.subr.bf16.mxu1 %v18347_v58 }
 0x885   :  { %18223 = vmatpush3.bf16.msra.mxu0 %v18348_v9 }
 0x886   :  { %18252 = vmatprep.subr.bf16.mxu0 %v18350_v59 }
 0x887   :  { %18245 = vmatpush3.bf16.msra.mxu1 %v18349_v55 }
 0x888   :  { %18274 = vmatprep.subr.bf16.mxu1 %v18366_v54  ;;  %15940 = vmatmul.mubr.bf16.vlgmr.msra.gmra.mxu0 %v15380_v41 }
 0x889   :  { %18253 = vmatpush3.bf16.msra.mxu0 %v18351_v34  ;;  %16019 = vmatprep.mubr.bf16.mxu0 %v15385_v47 }
 0x88a   :  { %15980 = vmatmul.mubr.bf16.vlgmr.msra.gmra.mxu1 %v15382_v60  ;;  %18254 = vmatprep.subr.bf16.mxu0 %v18352_v32 }
 0x88b   :  { %18275 = vmatpush3.bf16.msra.mxu1 %v18367_v40 }
 0x88c   :  { %18276 = vmatprep.subr.bf16.mxu1 %v18368_v52 }
 0x88d   :  { %18255 = vmatpush3.bf16.msra.mxu0 %v18353_v62 }
 0x88e   :  { %18256 = vmatprep.subr.bf16.mxu0 %v18354_v0 }
 0x88f   :  { %18277 = vmatpush3.bf16.msra.mxu1 %v18369_v43 }
 0x890   :  { %18278 = vmatprep.subr.bf16.mxu1 %v18370_v33 }
 0x891   :  { %18257 = vmatpush3.bf16.msra.mxu0 %v18355_v3 }
 0x892   :  { %18258 = vmatprep.subr.bf16.mxu0 %v18356_v2 }
 0x893   :  { %18279 = vmatpush3.bf16.msra.mxu1 %v18371_v5 }
 0x894   :  { %18280 = vmatprep.subr.bf16.mxu1 %v18372_v30 }
 0x895   :  { %18259 = vmatpush3.bf16.msra.mxu0 %v18357_v53 }
 0x896   :  { %18260 = vmatprep.subr.bf16.mxu0 %v18358_v15  ;;  %v18143_v15 = vld [vmem:[#allocation14] ss:$0 sm:$0xff] }
 0x897   :  { %18281 = vmatpush3.bf16.msra.mxu1 %v18373_v6 }
 0x898   :  { %18282 = vmatprep.subr.bf16.mxu1 %v18374_v23 }
 0x899   :  { %18261 = vmatpush3.bf16.msra.mxu0 %v18359_v38 }
 0x89a   :  { %18262 = vmatprep.subr.bf16.mxu0 %v18360_v48 }
 0x89b   :  { %18283 = vmatpush3.bf16.msra.mxu1 %v18375_v36 }
 0x89c   :  { %18284 = vmatprep.subr.bf16.mxu1 %v18376_v16 }
 0x89d   :  { %18263 = vmatpush3.bf16.msra.mxu0 %v18361_v14 }
 0x89e   :  { %18264 = vmatprep.subr.bf16.mxu0 %v18362_v31 }
 0x89f   :  { %18285 = vmatpush3.bf16.msra.mxu1 %v18377_v12 }
 0x8a0   :  { %18286 = vmatprep.subr.bf16.mxu1 %v18378_v28 }
 0x8a1   :  { %18265 = vmatpush3.bf16.msra.mxu0 %v18363_v61 }
 0x8a2   :  { %18266 = vmatprep.subr.bf16.mxu0 %v18364_v42 }
 0x8a3   :  { %18287 = vmatpush3.bf16.msra.mxu1 %v18379_v20 }
 0x8a5   :  { %18267 = vmatpush3.bf16.msra.mxu0 %v18365_v8 }
 0x8a8   :  { %v15152_v37 = vpop.f32.mrf.mxu0  ;;  %16020 = vmatmul.mubr.bf16.vlgmr.msra.gmra.mxu0 %v15384_v19 }
 0x8a9   :  { %v15153_v49 = vadd.f32 %v15152_v37, %v19136_v35  ;;  %v18380_v35 = vld [vmem:[#allocation13 + $0x1c0] sm:$0xff]  }
 0x8aa   :  { %v15193_v22 = vpop.f32.mrf.mxu1  ;;  %v15154_v7 = vpop.f32.mrf.mxu0  ;;  %18288 = vmatprep.subr.bf16.mxu1 %v18380_v35 }
 0x8ab   :  { %v15194_v29 = vadd.f32 %v15193_v22, %v15153_v49  ;;  %v15155_v50 = vadd.f32 %v15154_v7, %v19138_v10  ;;  %18289 = vmatpush3.bf16.msra.mxu1 %v18381_v63 }
 0x8ac   :  { %v15195_v24 = vpop.f32.mrf.mxu1  ;;  %v15156_v18 = vpop.f32.mrf.mxu0 }
 0x8ad   :  { %v15196_v44 = vadd.f32 %v15195_v24, %v15155_v50 }
 0x8ae   :  { %v15197_v1 = vpop.f32.mrf.mxu1  ;;  %v15157_v51 = vpop.f32.mrf.mxu0 }
 0x8b0   :  { %v15198_v25 = vpop.f32.mrf.mxu1 }
 0x8e8   :  { %v15234_v13 = vpop.f32.mrf.mxu0 }
 0x8e9   :  { %v15235_v26 = vadd.f32 %v15234_v13, %v15194_v29 }
 0x8ea   :  { %v15275_v10 = vpop.f32.mrf.mxu1  ;;  %v15236_v57 = vpop.f32.mrf.mxu0 }
 0x8eb   :  { %v15276_v11 = vadd.f32 %v15275_v10, %v15235_v26  ;;  %v15237_v27 = vadd.f32 %v15236_v57, %v15196_v44 }
 0x8ec   :  { %v15277_v46 = vpop.f32.mrf.mxu1  ;;  %v15238_v56 = vpop.f32.mrf.mxu0 }
 0x8ed   :  { %v15278_v59 = vadd.f32 %v15277_v46, %v15237_v27 }
 0x8ee   :  { %v15279_v58 = vpop.f32.mrf.mxu1  ;;  %v15239_v4 = vpop.f32.mrf.mxu0 }
 0x8f0   :  { %v15280_v9 = vpop.f32.mrf.mxu1 }
 0x928   :  { %v15316_v55 = vpop.f32.mrf.mxu0 }
 0x929   :  { %v15317_v39 = vadd.f32 %v15316_v55, %v15276_v11 }
 0x92a   :  { %v15357_v54 = vpop.f32.mrf.mxu1  ;;  %v15318_v45 = vpop.f32.mrf.mxu0 }
 0x92b   :  { %v15358_v34 = vadd.f32 %v15357_v54, %v15317_v39  ;;  %v15319_v41 = vadd.f32 %v15318_v45, %v15278_v59 }
 0x92c   :  { %v15359_v32 = vpop.f32.mrf.mxu1  ;;  %v15320_v60 = vpop.f32.mrf.mxu0 }
 0x92d   :  { %v15370_v40 = vmax.f32 %v15358_v34, 0.0  ;;  %v15360_v47 = vadd.f32 %v15359_v32, %v15319_v41 }
 0x92e   :  { %v15361_v52 = vpop.f32.mrf.mxu1  ;;  %v15321_v62 = vpop.f32.mrf.mxu0 }
 0x92f   :  { %v15371_v0 = vmax.f32 %v15360_v47, 0.0  ;;  %v15378_v33 = vmin.f32 %v15370_v40, 6.0 }
 0x930   :  { %v15362_v43 = vpop.f32.mrf.mxu1 }
 0x931   :  { %v15379_v3 = vmin.f32 %v15371_v0, 6.0  ;;  %v15386_v5 = vpack.c.bf16 %v15378_v33, %v15378_v33 }
 0x933   :  { %v15387_v2 = vpack.c.bf16 %v15379_v3, %v15379_v3 }
 0x935   :  { %16059 = vmatprep.mubr.bf16.mxu1 %v15387_v2 }
 0x936   :  { %16060 = vmatmul.mubr.bf16.vlgmr.msra.gmra.mxu1 %v15386_v5 }
 0x948   :  { %v18224_v30 = vpop.f32.mrf.mxu0 }
 0x94a   :  { %v18246_v53 = vpop.f32.mrf.mxu1  ;;  %v18225_v6 = vpop.f32.mrf.mxu0 }
 0x94b   :  { %v18226_v23 = vadd.f32 %v18225_v6, %v18224_v30 }
 0x94c   :  { %v18247_v38 = vpop.f32.mrf.mxu1  ;;  %v18227_v36 = vpop.f32.mrf.mxu0 }
 0x94d   :  { %v18248_v48 = vadd.f32 %v18247_v38, %v18246_v53  ;;  %v15942_v14 = vadd.f32 %v18226_v23, %v18143_v15 }
 0x94e   :  { %v18249_v31 = vpop.f32.mrf.mxu1  ;;  %v18228_v61 = vpop.f32.mrf.mxu0 }
 0x94f   :  { %v15982_v17 = vadd.f32 %v18248_v48, %v15942_v14 }
 0x950   :  { %v18250_v42 = vpop.f32.mrf.mxu1 }
 0x968   :  { %v18268_v8 = vpop.f32.mrf.mxu0 }
 0x96a   :  { %v18269_v21 = vpop.f32.mrf.mxu0 }
 0x96b   :  { %v18270_v19 = vadd.f32 %v18269_v21, %v18268_v8 }
 0x96c   :  { %v18271_v37 = vpop.f32.mrf.mxu0 }
 0x96d   :  { %v16022_v49 = vadd.f32 %v18270_v19, %v15982_v17 }
 0x96e   :  { %v18272_v22 = vpop.f32.mrf.mxu0 }
 0x9f6   :  { %v18290_v7 = vpop.f32.mrf.mxu1 }
 0x9f8   :  { %v18291_v16 = vpop.f32.mrf.mxu1 }
 0x9f9   :  { %v18292_v29 = vadd.f32 %v18291_v16, %v18290_v7 }
 0x9fa   :  { %v18293_v50 = vpop.f32.mrf.mxu1 }
 0x9fb   :  { %v16062_v24 = vadd.f32 %v18292_v29, %v16022_v49 }
 0x9fc   :  { %v18294_v12 = vpop.f32.mrf.mxu1 }
 0x9fd   :  { %16067 = vst [vmem:[#allocation16] sm:$0xff] %v16062_v24 }
 0x9fe   :  { %18556 = shalt.err (!%p18553_p2)
}
 0x9ff   :  { %16077 = dma.vmem_to_hbm [thread:$0]  %s16075_s7, 128, %s19157_s8, [#allocation4]  }
 0xa00   :  { %18575 = dma.done.wait [#allocation4], 128  }
 0xa01   :  { %18576 = vsyncadd [#allocation4], 4294967168 }
 0xa02   :  { %16081 = vsyncpa [#allocation3], 1 }
 0xa03   :  { %16082 = vsyncpa [#allocation6], 1 }
 0xa04   :  { %16083 = vsyncpa [#allocation9], 1 }
 0xa05   :  { %16084 = vsyncpa [#allocation12], 1 }
 0xa06   :  { %16085 = vsyncpa [#allocation15], 1 }
 0xa07   :  { %16086 = vsyncpa [#allocation4], 1 }

</bundles_post_ra>
